<compile_context>
chip_gen: v7x
topology: tpu7x:2x2x1
jax: 0.10.0
libtpu: 0.0.40
codegen_flags: <defaults>
</compile_context>

<pallas_src>
import numpy as np
import jax
import jax.numpy as jnp
from jax.experimental import pallas as pl
from jax.experimental.pallas import tpu as pltpu

EPS = 1e-5            # nn.BatchNorm2d default eps
NEG_SLOPE = 0.2       # LeakyReLU negative slope
CIN_PAD = 8           # pad the 3 RGB input channels to 8 (friendlier matmul K)
VMEM_LIMIT_BYTES = 32 * 1024 * 1024

# (c_in, c_out, use_batchnorm); the first conv has no BatchNorm (matches spec)
LAYER_CFG = [
    (3, 32, False),
    (32, 64, True),
    (64, 128, True),
    (128, 256, True),
]


def _conv_out(h):
    # 3x3 conv, stride 2, padding 1
    return (h - 1) // 2 + 1


def _gather_matrices(h, w):
    """0/1 gather matrices for a 3x3 / stride-2 / pad-1 conv on an (h, w) map.

    S[t, oh*Wo + ow, ih*w + iw] = 1 with (ih, iw) = (2*oh + di - 1, 2*ow + dj - 1)
    for tap t = 3*di + dj; out-of-bounds taps (zero padding) simply have no 1.
    Applied on the MXU these perform the im2col gather entirely on-chip.
    """
    ho, wo = _conv_out(h), _conv_out(w)
    s = np.zeros((9, ho * wo, h * w), np.float32)
    for di in range(3):
        for dj in range(3):
            t = 3 * di + dj
            for oh in range(ho):
                ih = 2 * oh + di - 1
                if ih < 0 or ih >= h:
                    continue
                for ow in range(wo):
                    iw = 2 * ow + dj - 1
                    if iw < 0 or iw >= w:
                        continue
                    s[t, oh * wo + ow, ih * w + iw] = 1.0
    return jnp.asarray(s, jnp.bfloat16)


# ---------------------------------------------------------------------------
# In-kernel helpers (operate on traced values / refs inside the fused kernel)
# ---------------------------------------------------------------------------
def _leaky_relu(a):
    return jnp.maximum(a, NEG_SLOPE * a)


def _conv_taps(x_img, s_ref, w_ref):
    """One image's 3x3/stride-2/pad-1 conv: 9 (gather-matmul, weight-matmul) pairs.

    x_img: (H*W, Cin) f32.  Returns the pre-activation (Ho*Wo, Cout) f32.
    bf16 MXU operands, f32 accumulation.
    """
    xb = x_img.astype(jnp.bfloat16)
    mo = s_ref.shape[1]
    cout = w_ref.shape[2]
    acc = jnp.zeros((mo, cout), jnp.float32)
    for t in range(9):
        g = jnp.dot(s_ref[t], xb, preferred_element_type=jnp.float32)   # on-chip im2col tap
        acc = acc + jnp.dot(g.astype(jnp.bfloat16), w_ref[t],
                            preferred_element_type=jnp.float32)
    return acc


def _conv_lrelu(xs, s_ref, w_ref, bias):
    # First layer: conv bias + LeakyReLU (no BatchNorm).
    return [_leaky_relu(_conv_taps(x, s_ref, w_ref) + bias) for x in xs]


def _conv_bn_lrelu(xs, s_ref, w_ref, gamma, beta):
    # Conv bias is exactly absorbed by training-mode BatchNorm -> skipped.
    ys = [_conv_taps(x, s_ref, w_ref) for x in xs]
    count = float(len(ys) * ys[0].shape[0])            # N * Ho * Wo
    cols = ys[0].shape[1]
    ssum = jnp.zeros((1, cols), jnp.float32)
    ssq = jnp.zeros((1, cols), jnp.float32)
    for y in ys:
        ssum = ssum + jnp.sum(y, axis=0, keepdims=True)
        ssq = ssq + jnp.sum(y * y, axis=0, keepdims=True)
    mean = ssum / count
    var = jnp.maximum(ssq / count - mean * mean, 0.0)  # biased var (PyTorch train mode)
    scale = gamma * jax.lax.rsqrt(var + EPS)
    shift = beta - mean * scale
    return [_leaky_relu(y * scale + shift) for y in ys]


def _discriminator_kernel(x_ref,
                          s1_ref, w1_ref, b1_ref,
                          s2_ref, w2_ref, g2_ref, be2_ref,
                          s3_ref, w3_ref, g3_ref, be3_ref,
                          s4_ref, w4_ref, g4_ref, be4_ref,
                          wl_ref, bl_ref,
                          out_ref):
    n_img = x_ref.shape[0]
    xs = [x_ref[n] for n in range(n_img)]              # per-image (H*W, Cin) f32

    xs = _conv_lrelu(xs, s1_ref, w1_ref, b1_ref[...])
    xs = _conv_bn_lrelu(xs, s2_ref, w2_ref, g2_ref[...], be2_ref[...])
    xs = _conv_bn_lrelu(xs, s3_ref, w3_ref, g3_ref[...], be3_ref[...])
    xs = _conv_bn_lrelu(xs, s4_ref, w4_ref, g4_ref[...], be4_ref[...])

    # Classifier: Flatten -> Linear(256*ds*ds, 1) -> Sigmoid.  The linear
    # weight was pre-permuted to (ds*ds, 256) (spatial-major, channel-minor,
    # matching the per-image feature layout), so the per-image logit is a
    # plain elementwise product + reduction (no 1-column MXU matmul).
    wl = wl_ref[...].astype(jnp.float32)
    row_ids = jax.lax.broadcasted_iota(jnp.int32, (n_img, 1), 0)
    logits = jnp.zeros((n_img, 1), jnp.float32)
    for n, feat in enumerate(xs):                      # feat: (ds*ds, 256) f32
        part = jnp.sum(feat * wl, axis=1, keepdims=True)    # (ds*ds, 1)
        logit_n = jnp.sum(part, axis=0, keepdims=True)      # (1, 1)
        logits = logits + jnp.where(row_ids == n, logit_n, 0.0)
    logits = logits + bl_ref[...]

    # Numerically stable sigmoid.
    z = jnp.exp(-jnp.abs(logits))
    p = 1.0 / (1.0 + z)
    out_ref[...] = jnp.where(logits >= 0.0, p, 1.0 - p)


# ---------------------------------------------------------------------------
# Parameter construction (deterministic, PyTorch-like fan-in uniform init)
# ---------------------------------------------------------------------------
def init_params(key, input_size):
    """Pre-arranged parameters.  To port real torch weights:
         conv:   w[t] = torch_w[:, :, t // 3, t % 3].transpose(0, 1)      # (Cin, Cout)
         linear: wlin[oh*ds + ow, c] = torch_lin_w[0, c*ds*ds + oh*ds + ow]
    """
    c = 3
    h = int((input_size // c) ** 0.5)
    assert h >= 16 and h % 16 == 0, "spatial size must be a multiple of 16"
    ds = h // 16

    convs = []
    cur_h = cur_w = h
    for (c_in, c_out, use_bn) in LAYER_CFG:
        key, kw, kb = jax.random.split(key, 3)
        fan_in = 9 * c_in
        lim = 1.0 / (fan_in ** 0.5)
        c_in_p = CIN_PAD if c_in == 3 else c_in
        w = jnp.zeros((9, c_in_p, c_out), jnp.float32)
        w = w.at[:, :c_in, :].set(
            jax.random.uniform(kw, (9, c_in, c_out), jnp.float32, -lim, lim))
        layer = {"s": _gather_matrices(cur_h, cur_w),
                 "w": w.astype(jnp.bfloat16)}
        if use_bn:
            layer["gamma"] = jnp.ones((1, c_out), jnp.float32)
            layer["beta"] = jnp.zeros((1, c_out), jnp.float32)
        else:
            layer["b"] = jax.random.uniform(kb, (1, c_out), jnp.float32, -lim, lim)
        convs.append(layer)
        cur_h, cur_w = _conv_out(cur_h), _conv_out(cur_w)

    key, kw, kb = jax.random.split(key, 3)
    lin_in = 256 * ds * ds
    lim = 1.0 / (lin_in ** 0.5)
    wlin = jax.random.uniform(kw, (ds * ds, 256), jnp.float32, -lim, lim)
    blin = jax.random.uniform(kb, (1, 1), jnp.float32, -lim, lim)
    return {"convs": convs, "wlin": wlin, "blin": blin}


# ---------------------------------------------------------------------------
# Forward pass: one fused pallas_call
# ---------------------------------------------------------------------------
def discriminator_forward(x_nchw, params):
    n, c, h, w = x_nchw.shape
    # NCHW -> NHWC -> (N, H*W, Cin_pad) rows in (h, w) raster order, matching
    # the gather matrices.  This reshape/pad is the only wrapper-side data
    # movement; everything else happens inside the single fused kernel.
    x = jnp.transpose(x_nchw, (0, 2, 3, 1)).reshape(n, h * w, c)
    x = jnp.pad(x, ((0, 0), (0, 0), (0, CIN_PAD - c))).astype(jnp.float32)

    c1, c2, c3, c4 = params["convs"]
    args = (
        x,
        c1["s"], c1["w"], c1["b"],
        c2["s"], c2["w"], c2["gamma"], c2["beta"],
        c3["s"], c3["w"], c3["gamma"], c3["beta"],
        c4["s"], c4["w"], c4["gamma"], c4["beta"],
        params["wlin"], params["blin"],
    )
    return pl.pallas_call(
        _discriminator_kernel,
        out_shape=jax.ShapeDtypeStruct((n, 1), jnp.float32),
        in_specs=[pl.BlockSpec(memory_space=pltpu.MemorySpace.VMEM)] * len(args),
        out_specs=pl.BlockSpec(memory_space=pltpu.MemorySpace.VMEM),
        compiler_params=pltpu.CompilerParams(vmem_limit_bytes=VMEM_LIMIT_BYTES),
    )(*args)


if __name__ == "__main__":
    key = jax.random.PRNGKey(0)
    N, C, H, W = 2, 3, 16, 16                  # input_size = 3*16*16 = 768
    input_size = C * H * W

    kp, kx = jax.random.split(key)
    params = init_params(kp, input_size)
    x = jax.random.normal(kx, (N, C, H, W), jnp.float32)

    fwd = jax.jit(discriminator_forward)
    out = jax.block_until_ready(fwd(x, params))
    assert out.shape == (N, 1)
    assert bool(jnp.all(jnp.isfinite(out)))
    assert bool(jnp.all((out >= 0.0) & (out <= 1.0)))
    print("KERNEL_OK")
</pallas_src>

<mosaic_0001>
module attributes {stable_mosaic.version = 11 : i64} {
  func.func @_discriminator_kernel(%arg0: memref<2x256x8xf32, #tpu.memory_space<vmem>>, %arg1: memref<9x64x256xbf16, #tpu.memory_space<vmem>>, %arg2: memref<9x8x32xbf16, #tpu.memory_space<vmem>>, %arg3: memref<1x32xf32, #tpu.memory_space<vmem>>, %arg4: memref<9x16x64xbf16, #tpu.memory_space<vmem>>, %arg5: memref<9x32x64xbf16, #tpu.memory_space<vmem>>, %arg6: memref<1x64xf32, #tpu.memory_space<vmem>>, %arg7: memref<1x64xf32, #tpu.memory_space<vmem>>, %arg8: memref<9x4x16xbf16, #tpu.memory_space<vmem>>, %arg9: memref<9x64x128xbf16, #tpu.memory_space<vmem>>, %arg10: memref<1x128xf32, #tpu.memory_space<vmem>>, %arg11: memref<1x128xf32, #tpu.memory_space<vmem>>, %arg12: memref<9x1x4xbf16, #tpu.memory_space<vmem>>, %arg13: memref<9x128x256xbf16, #tpu.memory_space<vmem>>, %arg14: memref<1x256xf32, #tpu.memory_space<vmem>>, %arg15: memref<1x256xf32, #tpu.memory_space<vmem>>, %arg16: memref<1x256xf32, #tpu.memory_space<vmem>>, %arg17: memref<1x1xf32, #tpu.memory_space<vmem>>, %arg18: memref<2x1xf32, #tpu.memory_space<vmem>>) attributes {dimension_semantics = [], scalar_prefetch = 0 : i64, scratch_operands = 0 : i64, tpu.core_type = #tpu.core_type<tc>} {
    %c0 = arith.constant 0 : index
    %c0_0 = arith.constant 0 : index
    %c0_1 = arith.constant 0 : index
    %0 = vector.load %arg0[%c0, %c0_0, %c0_1] : memref<2x256x8xf32, #tpu.memory_space<vmem>>, vector<1x256x8xf32>
    %1 = vector.shape_cast %0 : vector<1x256x8xf32> to vector<256x8xf32>
    %c1 = arith.constant 1 : index
    %c0_2 = arith.constant 0 : index
    %c0_3 = arith.constant 0 : index
    %2 = vector.load %arg0[%c1, %c0_2, %c0_3] : memref<2x256x8xf32, #tpu.memory_space<vmem>>, vector<1x256x8xf32>
    %3 = vector.shape_cast %2 : vector<1x256x8xf32> to vector<256x8xf32>
    %c0_4 = arith.constant 0 : index
    %c0_5 = arith.constant 0 : index
    %4 = vector.load %arg3[%c0_4, %c0_5] : memref<1x32xf32, #tpu.memory_space<vmem>>, vector<1x32xf32>
    %5 = arith.truncf %1 : vector<256x8xf32> to vector<256x8xbf16>
    %cst = arith.constant 0.000000e+00 : f32
    %6 = vector.broadcast %cst : f32 to vector<64x32xf32>
    %c0_6 = arith.constant 0 : index
    %c0_7 = arith.constant 0 : index
    %c0_8 = arith.constant 0 : index
    %7 = vector.load %arg1[%c0_6, %c0_7, %c0_8] : memref<9x64x256xbf16, #tpu.memory_space<vmem>>, vector<1x64x256xbf16>
    %8 = vector.shape_cast %7 : vector<1x64x256xbf16> to vector<64x256xbf16>
    %cst_9 = arith.constant dense<0.000000e+00> : vector<64x8xf32>
    %9 = tpu.matmul %8, %5, %cst_9 {dimension_numbers = #tpu.dot_dimension_numbers<[1], [0], [0], [1], [0, 0, 1, 1], [], []>} : vector<64x256xbf16>, vector<256x8xbf16>, vector<64x8xf32> -> vector<64x8xf32>
    %10 = arith.truncf %9 : vector<64x8xf32> to vector<64x8xbf16>
    %c0_10 = arith.constant 0 : index
    %c0_11 = arith.constant 0 : index
    %c0_12 = arith.constant 0 : index
    %11 = vector.load %arg2[%c0_10, %c0_11, %c0_12] : memref<9x8x32xbf16, #tpu.memory_space<vmem>>, vector<1x8x32xbf16>
    %12 = vector.shape_cast %11 : vector<1x8x32xbf16> to vector<8x32xbf16>
    %cst_13 = arith.constant dense<0.000000e+00> : vector<64x32xf32>
    %13 = tpu.matmul %10, %12, %cst_13 {dimension_numbers = #tpu.dot_dimension_numbers<[1], [0], [0], [1], [0, 0, 1, 1], [], []>} : vector<64x8xbf16>, vector<8x32xbf16>, vector<64x32xf32> -> vector<64x32xf32>
    %14 = arith.addf %6, %13 : vector<64x32xf32>
    %c1_14 = arith.constant 1 : index
    %c0_15 = arith.constant 0 : index
    %c0_16 = arith.constant 0 : index
    %15 = vector.load %arg1[%c1_14, %c0_15, %c0_16] : memref<9x64x256xbf16, #tpu.memory_space<vmem>>, vector<1x64x256xbf16>
    %16 = vector.shape_cast %15 : vector<1x64x256xbf16> to vector<64x256xbf16>
    %cst_17 = arith.constant dense<0.000000e+00> : vector<64x8xf32>
    %17 = tpu.matmul %16, %5, %cst_17 {dimension_numbers = #tpu.dot_dimension_numbers<[1], [0], [0], [1], [0, 0, 1, 1], [], []>} : vector<64x256xbf16>, vector<256x8xbf16>, vector<64x8xf32> -> vector<64x8xf32>
    %18 = arith.truncf %17 : vector<64x8xf32> to vector<64x8xbf16>
    %c1_18 = arith.constant 1 : index
    %c0_19 = arith.constant 0 : index
    %c0_20 = arith.constant 0 : index
    %19 = vector.load %arg2[%c1_18, %c0_19, %c0_20] : memref<9x8x32xbf16, #tpu.memory_space<vmem>>, vector<1x8x32xbf16>
    %20 = vector.shape_cast %19 : vector<1x8x32xbf16> to vector<8x32xbf16>
    %cst_21 = arith.constant dense<0.000000e+00> : vector<64x32xf32>
    %21 = tpu.matmul %18, %20, %cst_21 {dimension_numbers = #tpu.dot_dimension_numbers<[1], [0], [0], [1], [0, 0, 1, 1], [], []>} : vector<64x8xbf16>, vector<8x32xbf16>, vector<64x32xf32> -> vector<64x32xf32>
    %22 = arith.addf %14, %21 : vector<64x32xf32>
    %c2 = arith.constant 2 : index
    %c0_22 = arith.constant 0 : index
    %c0_23 = arith.constant 0 : index
    %23 = vector.load %arg1[%c2, %c0_22, %c0_23] : memref<9x64x256xbf16, #tpu.memory_space<vmem>>, vector<1x64x256xbf16>
    %24 = vector.shape_cast %23 : vector<1x64x256xbf16> to vector<64x256xbf16>
    %cst_24 = arith.constant dense<0.000000e+00> : vector<64x8xf32>
    %25 = tpu.matmul %24, %5, %cst_24 {dimension_numbers = #tpu.dot_dimension_numbers<[1], [0], [0], [1], [0, 0, 1, 1], [], []>} : vector<64x256xbf16>, vector<256x8xbf16>, vector<64x8xf32> -> vector<64x8xf32>
    %26 = arith.truncf %25 : vector<64x8xf32> to vector<64x8xbf16>
    %c2_25 = arith.constant 2 : index
    %c0_26 = arith.constant 0 : index
    %c0_27 = arith.constant 0 : index
    %27 = vector.load %arg2[%c2_25, %c0_26, %c0_27] : memref<9x8x32xbf16, #tpu.memory_space<vmem>>, vector<1x8x32xbf16>
    %28 = vector.shape_cast %27 : vector<1x8x32xbf16> to vector<8x32xbf16>
    %cst_28 = arith.constant dense<0.000000e+00> : vector<64x32xf32>
    %29 = tpu.matmul %26, %28, %cst_28 {dimension_numbers = #tpu.dot_dimension_numbers<[1], [0], [0], [1], [0, 0, 1, 1], [], []>} : vector<64x8xbf16>, vector<8x32xbf16>, vector<64x32xf32> -> vector<64x32xf32>
    %30 = arith.addf %22, %29 : vector<64x32xf32>
    %c3 = arith.constant 3 : index
    %c0_29 = arith.constant 0 : index
    %c0_30 = arith.constant 0 : index
    %31 = vector.load %arg1[%c3, %c0_29, %c0_30] : memref<9x64x256xbf16, #tpu.memory_space<vmem>>, vector<1x64x256xbf16>
    %32 = vector.shape_cast %31 : vector<1x64x256xbf16> to vector<64x256xbf16>
    %cst_31 = arith.constant dense<0.000000e+00> : vector<64x8xf32>
    %33 = tpu.matmul %32, %5, %cst_31 {dimension_numbers = #tpu.dot_dimension_numbers<[1], [0], [0], [1], [0, 0, 1, 1], [], []>} : vector<64x256xbf16>, vector<256x8xbf16>, vector<64x8xf32> -> vector<64x8xf32>
    %34 = arith.truncf %33 : vector<64x8xf32> to vector<64x8xbf16>
    %c3_32 = arith.constant 3 : index
    %c0_33 = arith.constant 0 : index
    %c0_34 = arith.constant 0 : index
    %35 = vector.load %arg2[%c3_32, %c0_33, %c0_34] : memref<9x8x32xbf16, #tpu.memory_space<vmem>>, vector<1x8x32xbf16>
    %36 = vector.shape_cast %35 : vector<1x8x32xbf16> to vector<8x32xbf16>
    %cst_35 = arith.constant dense<0.000000e+00> : vector<64x32xf32>
    %37 = tpu.matmul %34, %36, %cst_35 {dimension_numbers = #tpu.dot_dimension_numbers<[1], [0], [0], [1], [0, 0, 1, 1], [], []>} : vector<64x8xbf16>, vector<8x32xbf16>, vector<64x32xf32> -> vector<64x32xf32>
    %38 = arith.addf %30, %37 : vector<64x32xf32>
    %c4 = arith.constant 4 : index
    %c0_36 = arith.constant 0 : index
    %c0_37 = arith.constant 0 : index
    %39 = vector.load %arg1[%c4, %c0_36, %c0_37] : memref<9x64x256xbf16, #tpu.memory_space<vmem>>, vector<1x64x256xbf16>
    %40 = vector.shape_cast %39 : vector<1x64x256xbf16> to vector<64x256xbf16>
    %cst_38 = arith.constant dense<0.000000e+00> : vector<64x8xf32>
    %41 = tpu.matmul %40, %5, %cst_38 {dimension_numbers = #tpu.dot_dimension_numbers<[1], [0], [0], [1], [0, 0, 1, 1], [], []>} : vector<64x256xbf16>, vector<256x8xbf16>, vector<64x8xf32> -> vector<64x8xf32>
    %42 = arith.truncf %41 : vector<64x8xf32> to vector<64x8xbf16>
    %c4_39 = arith.constant 4 : index
    %c0_40 = arith.constant 0 : index
    %c0_41 = arith.constant 0 : index
    %43 = vector.load %arg2[%c4_39, %c0_40, %c0_41] : memref<9x8x32xbf16, #tpu.memory_space<vmem>>, vector<1x8x32xbf16>
    %44 = vector.shape_cast %43 : vector<1x8x32xbf16> to vector<8x32xbf16>
    %cst_42 = arith.constant dense<0.000000e+00> : vector<64x32xf32>
    %45 = tpu.matmul %42, %44, %cst_42 {dimension_numbers = #tpu.dot_dimension_numbers<[1], [0], [0], [1], [0, 0, 1, 1], [], []>} : vector<64x8xbf16>, vector<8x32xbf16>, vector<64x32xf32> -> vector<64x32xf32>
    %46 = arith.addf %38, %45 : vector<64x32xf32>
    %c5 = arith.constant 5 : index
    %c0_43 = arith.constant 0 : index
    %c0_44 = arith.constant 0 : index
    %47 = vector.load %arg1[%c5, %c0_43, %c0_44] : memref<9x64x256xbf16, #tpu.memory_space<vmem>>, vector<1x64x256xbf16>
    %48 = vector.shape_cast %47 : vector<1x64x256xbf16> to vector<64x256xbf16>
    %cst_45 = arith.constant dense<0.000000e+00> : vector<64x8xf32>
    %49 = tpu.matmul %48, %5, %cst_45 {dimension_numbers = #tpu.dot_dimension_numbers<[1], [0], [0], [1], [0, 0, 1, 1], [], []>} : vector<64x256xbf16>, vector<256x8xbf16>, vector<64x8xf32> -> vector<64x8xf32>
    %50 = arith.truncf %49 : vector<64x8xf32> to vector<64x8xbf16>
    %c5_46 = arith.constant 5 : index
    %c0_47 = arith.constant 0 : index
    %c0_48 = arith.constant 0 : index
    %51 = vector.load %arg2[%c5_46, %c0_47, %c0_48] : memref<9x8x32xbf16, #tpu.memory_space<vmem>>, vector<1x8x32xbf16>
    %52 = vector.shape_cast %51 : vector<1x8x32xbf16> to vector<8x32xbf16>
    %cst_49 = arith.constant dense<0.000000e+00> : vector<64x32xf32>
    %53 = tpu.matmul %50, %52, %cst_49 {dimension_numbers = #tpu.dot_dimension_numbers<[1], [0], [0], [1], [0, 0, 1, 1], [], []>} : vector<64x8xbf16>, vector<8x32xbf16>, vector<64x32xf32> -> vector<64x32xf32>
    %54 = arith.addf %46, %53 : vector<64x32xf32>
    %c6 = arith.constant 6 : index
    %c0_50 = arith.constant 0 : index
    %c0_51 = arith.constant 0 : index
    %55 = vector.load %arg1[%c6, %c0_50, %c0_51] : memref<9x64x256xbf16, #tpu.memory_space<vmem>>, vector<1x64x256xbf16>
    %56 = vector.shape_cast %55 : vector<1x64x256xbf16> to vector<64x256xbf16>
    %cst_52 = arith.constant dense<0.000000e+00> : vector<64x8xf32>
    %57 = tpu.matmul %56, %5, %cst_52 {dimension_numbers = #tpu.dot_dimension_numbers<[1], [0], [0], [1], [0, 0, 1, 1], [], []>} : vector<64x256xbf16>, vector<256x8xbf16>, vector<64x8xf32> -> vector<64x8xf32>
    %58 = arith.truncf %57 : vector<64x8xf32> to vector<64x8xbf16>
    %c6_53 = arith.constant 6 : index
    %c0_54 = arith.constant 0 : index
    %c0_55 = arith.constant 0 : index
    %59 = vector.load %arg2[%c6_53, %c0_54, %c0_55] : memref<9x8x32xbf16, #tpu.memory_space<vmem>>, vector<1x8x32xbf16>
    %60 = vector.shape_cast %59 : vector<1x8x32xbf16> to vector<8x32xbf16>
    %cst_56 = arith.constant dense<0.000000e+00> : vector<64x32xf32>
    %61 = tpu.matmul %58, %60, %cst_56 {dimension_numbers = #tpu.dot_dimension_numbers<[1], [0], [0], [1], [0, 0, 1, 1], [], []>} : vector<64x8xbf16>, vector<8x32xbf16>, vector<64x32xf32> -> vector<64x32xf32>
    %62 = arith.addf %54, %61 : vector<64x32xf32>
    %c7 = arith.constant 7 : index
    %c0_57 = arith.constant 0 : index
    %c0_58 = arith.constant 0 : index
    %63 = vector.load %arg1[%c7, %c0_57, %c0_58] : memref<9x64x256xbf16, #tpu.memory_space<vmem>>, vector<1x64x256xbf16>
    %64 = vector.shape_cast %63 : vector<1x64x256xbf16> to vector<64x256xbf16>
    %cst_59 = arith.constant dense<0.000000e+00> : vector<64x8xf32>
    %65 = tpu.matmul %64, %5, %cst_59 {dimension_numbers = #tpu.dot_dimension_numbers<[1], [0], [0], [1], [0, 0, 1, 1], [], []>} : vector<64x256xbf16>, vector<256x8xbf16>, vector<64x8xf32> -> vector<64x8xf32>
    %66 = arith.truncf %65 : vector<64x8xf32> to vector<64x8xbf16>
    %c7_60 = arith.constant 7 : index
    %c0_61 = arith.constant 0 : index
    %c0_62 = arith.constant 0 : index
    %67 = vector.load %arg2[%c7_60, %c0_61, %c0_62] : memref<9x8x32xbf16, #tpu.memory_space<vmem>>, vector<1x8x32xbf16>
    %68 = vector.shape_cast %67 : vector<1x8x32xbf16> to vector<8x32xbf16>
    %cst_63 = arith.constant dense<0.000000e+00> : vector<64x32xf32>
    %69 = tpu.matmul %66, %68, %cst_63 {dimension_numbers = #tpu.dot_dimension_numbers<[1], [0], [0], [1], [0, 0, 1, 1], [], []>} : vector<64x8xbf16>, vector<8x32xbf16>, vector<64x32xf32> -> vector<64x32xf32>
    %70 = arith.addf %62, %69 : vector<64x32xf32>
    %c8 = arith.constant 8 : index
    %c0_64 = arith.constant 0 : index
    %c0_65 = arith.constant 0 : index
    %71 = vector.load %arg1[%c8, %c0_64, %c0_65] : memref<9x64x256xbf16, #tpu.memory_space<vmem>>, vector<1x64x256xbf16>
    %72 = vector.shape_cast %71 : vector<1x64x256xbf16> to vector<64x256xbf16>
    %cst_66 = arith.constant dense<0.000000e+00> : vector<64x8xf32>
    %73 = tpu.matmul %72, %5, %cst_66 {dimension_numbers = #tpu.dot_dimension_numbers<[1], [0], [0], [1], [0, 0, 1, 1], [], []>} : vector<64x256xbf16>, vector<256x8xbf16>, vector<64x8xf32> -> vector<64x8xf32>
    %74 = arith.truncf %73 : vector<64x8xf32> to vector<64x8xbf16>
    %c8_67 = arith.constant 8 : index
    %c0_68 = arith.constant 0 : index
    %c0_69 = arith.constant 0 : index
    %75 = vector.load %arg2[%c8_67, %c0_68, %c0_69] : memref<9x8x32xbf16, #tpu.memory_space<vmem>>, vector<1x8x32xbf16>
    %76 = vector.shape_cast %75 : vector<1x8x32xbf16> to vector<8x32xbf16>
    %cst_70 = arith.constant dense<0.000000e+00> : vector<64x32xf32>
    %77 = tpu.matmul %74, %76, %cst_70 {dimension_numbers = #tpu.dot_dimension_numbers<[1], [0], [0], [1], [0, 0, 1, 1], [], []>} : vector<64x8xbf16>, vector<8x32xbf16>, vector<64x32xf32> -> vector<64x32xf32>
    %78 = arith.addf %70, %77 : vector<64x32xf32>
    %79 = vector.broadcast %4 : vector<1x32xf32> to vector<64x32xf32>
    %80 = arith.addf %78, %79 : vector<64x32xf32>
    %cst_71 = arith.constant 2.000000e-01 : f32
    %81 = vector.broadcast %cst_71 : f32 to vector<64x32xf32>
    %82 = arith.mulf %81, %80 : vector<64x32xf32>
    %83 = arith.maximumf %80, %82 : vector<64x32xf32>
    %84 = arith.truncf %3 : vector<256x8xf32> to vector<256x8xbf16>
    %cst_72 = arith.constant 0.000000e+00 : f32
    %85 = vector.broadcast %cst_72 : f32 to vector<64x32xf32>
    %c0_73 = arith.constant 0 : index
    %c0_74 = arith.constant 0 : index
    %c0_75 = arith.constant 0 : index
    %86 = vector.load %arg1[%c0_73, %c0_74, %c0_75] : memref<9x64x256xbf16, #tpu.memory_space<vmem>>, vector<1x64x256xbf16>
    %87 = vector.shape_cast %86 : vector<1x64x256xbf16> to vector<64x256xbf16>
    %cst_76 = arith.constant dense<0.000000e+00> : vector<64x8xf32>
    %88 = tpu.matmul %87, %84, %cst_76 {dimension_numbers = #tpu.dot_dimension_numbers<[1], [0], [0], [1], [0, 0, 1, 1], [], []>} : vector<64x256xbf16>, vector<256x8xbf16>, vector<64x8xf32> -> vector<64x8xf32>
    %89 = arith.truncf %88 : vector<64x8xf32> to vector<64x8xbf16>
    %c0_77 = arith.constant 0 : index
    %c0_78 = arith.constant 0 : index
    %c0_79 = arith.constant 0 : index
    %90 = vector.load %arg2[%c0_77, %c0_78, %c0_79] : memref<9x8x32xbf16, #tpu.memory_space<vmem>>, vector<1x8x32xbf16>
    %91 = vector.shape_cast %90 : vector<1x8x32xbf16> to vector<8x32xbf16>
    %cst_80 = arith.constant dense<0.000000e+00> : vector<64x32xf32>
    %92 = tpu.matmul %89, %91, %cst_80 {dimension_numbers = #tpu.dot_dimension_numbers<[1], [0], [0], [1], [0, 0, 1, 1], [], []>} : vector<64x8xbf16>, vector<8x32xbf16>, vector<64x32xf32> -> vector<64x32xf32>
    %93 = arith.addf %85, %92 : vector<64x32xf32>
    %c1_81 = arith.constant 1 : index
    %c0_82 = arith.constant 0 : index
    %c0_83 = arith.constant 0 : index
    %94 = vector.load %arg1[%c1_81, %c0_82, %c0_83] : memref<9x64x256xbf16, #tpu.memory_space<vmem>>, vector<1x64x256xbf16>
    %95 = vector.shape_cast %94 : vector<1x64x256xbf16> to vector<64x256xbf16>
    %cst_84 = arith.constant dense<0.000000e+00> : vector<64x8xf32>
    %96 = tpu.matmul %95, %84, %cst_84 {dimension_numbers = #tpu.dot_dimension_numbers<[1], [0], [0], [1], [0, 0, 1, 1], [], []>} : vector<64x256xbf16>, vector<256x8xbf16>, vector<64x8xf32> -> vector<64x8xf32>
    %97 = arith.truncf %96 : vector<64x8xf32> to vector<64x8xbf16>
    %c1_85 = arith.constant 1 : index
    %c0_86 = arith.constant 0 : index
    %c0_87 = arith.constant 0 : index
    %98 = vector.load %arg2[%c1_85, %c0_86, %c0_87] : memref<9x8x32xbf16, #tpu.memory_space<vmem>>, vector<1x8x32xbf16>
    %99 = vector.shape_cast %98 : vector<1x8x32xbf16> to vector<8x32xbf16>
    %cst_88 = arith.constant dense<0.000000e+00> : vector<64x32xf32>
    %100 = tpu.matmul %97, %99, %cst_88 {dimension_numbers = #tpu.dot_dimension_numbers<[1], [0], [0], [1], [0, 0, 1, 1], [], []>} : vector<64x8xbf16>, vector<8x32xbf16>, vector<64x32xf32> -> vector<64x32xf32>
    %101 = arith.addf %93, %100 : vector<64x32xf32>
    %c2_89 = arith.constant 2 : index
    %c0_90 = arith.constant 0 : index
    %c0_91 = arith.constant 0 : index
    %102 = vector.load %arg1[%c2_89, %c0_90, %c0_91] : memref<9x64x256xbf16, #tpu.memory_space<vmem>>, vector<1x64x256xbf16>
    %103 = vector.shape_cast %102 : vector<1x64x256xbf16> to vector<64x256xbf16>
    %cst_92 = arith.constant dense<0.000000e+00> : vector<64x8xf32>
    %104 = tpu.matmul %103, %84, %cst_92 {dimension_numbers = #tpu.dot_dimension_numbers<[1], [0], [0], [1], [0, 0, 1, 1], [], []>} : vector<64x256xbf16>, vector<256x8xbf16>, vector<64x8xf32> -> vector<64x8xf32>
    %105 = arith.truncf %104 : vector<64x8xf32> to vector<64x8xbf16>
    %c2_93 = arith.constant 2 : index
    %c0_94 = arith.constant 0 : index
    %c0_95 = arith.constant 0 : index
    %106 = vector.load %arg2[%c2_93, %c0_94, %c0_95] : memref<9x8x32xbf16, #tpu.memory_space<vmem>>, vector<1x8x32xbf16>
    %107 = vector.shape_cast %106 : vector<1x8x32xbf16> to vector<8x32xbf16>
    %cst_96 = arith.constant dense<0.000000e+00> : vector<64x32xf32>
    %108 = tpu.matmul %105, %107, %cst_96 {dimension_numbers = #tpu.dot_dimension_numbers<[1], [0], [0], [1], [0, 0, 1, 1], [], []>} : vector<64x8xbf16>, vector<8x32xbf16>, vector<64x32xf32> -> vector<64x32xf32>
    %109 = arith.addf %101, %108 : vector<64x32xf32>
    %c3_97 = arith.constant 3 : index
    %c0_98 = arith.constant 0 : index
    %c0_99 = arith.constant 0 : index
    %110 = vector.load %arg1[%c3_97, %c0_98, %c0_99] : memref<9x64x256xbf16, #tpu.memory_space<vmem>>, vector<1x64x256xbf16>
    %111 = vector.shape_cast %110 : vector<1x64x256xbf16> to vector<64x256xbf16>
    %cst_100 = arith.constant dense<0.000000e+00> : vector<64x8xf32>
    %112 = tpu.matmul %111, %84, %cst_100 {dimension_numbers = #tpu.dot_dimension_numbers<[1], [0], [0], [1], [0, 0, 1, 1], [], []>} : vector<64x256xbf16>, vector<256x8xbf16>, vector<64x8xf32> -> vector<64x8xf32>
    %113 = arith.truncf %112 : vector<64x8xf32> to vector<64x8xbf16>
    %c3_101 = arith.constant 3 : index
    %c0_102 = arith.constant 0 : index
    %c0_103 = arith.constant 0 : index
    %114 = vector.load %arg2[%c3_101, %c0_102, %c0_103] : memref<9x8x32xbf16, #tpu.memory_space<vmem>>, vector<1x8x32xbf16>
    %115 = vector.shape_cast %114 : vector<1x8x32xbf16> to vector<8x32xbf16>
    %cst_104 = arith.constant dense<0.000000e+00> : vector<64x32xf32>
    %116 = tpu.matmul %113, %115, %cst_104 {dimension_numbers = #tpu.dot_dimension_numbers<[1], [0], [0], [1], [0, 0, 1, 1], [], []>} : vector<64x8xbf16>, vector<8x32xbf16>, vector<64x32xf32> -> vector<64x32xf32>
    %117 = arith.addf %109, %116 : vector<64x32xf32>
    %c4_105 = arith.constant 4 : index
    %c0_106 = arith.constant 0 : index
    %c0_107 = arith.constant 0 : index
    %118 = vector.load %arg1[%c4_105, %c0_106, %c0_107] : memref<9x64x256xbf16, #tpu.memory_space<vmem>>, vector<1x64x256xbf16>
    %119 = vector.shape_cast %118 : vector<1x64x256xbf16> to vector<64x256xbf16>
    %cst_108 = arith.constant dense<0.000000e+00> : vector<64x8xf32>
    %120 = tpu.matmul %119, %84, %cst_108 {dimension_numbers = #tpu.dot_dimension_numbers<[1], [0], [0], [1], [0, 0, 1, 1], [], []>} : vector<64x256xbf16>, vector<256x8xbf16>, vector<64x8xf32> -> vector<64x8xf32>
    %121 = arith.truncf %120 : vector<64x8xf32> to vector<64x8xbf16>
    %c4_109 = arith.constant 4 : index
    %c0_110 = arith.constant 0 : index
    %c0_111 = arith.constant 0 : index
    %122 = vector.load %arg2[%c4_109, %c0_110, %c0_111] : memref<9x8x32xbf16, #tpu.memory_space<vmem>>, vector<1x8x32xbf16>
    %123 = vector.shape_cast %122 : vector<1x8x32xbf16> to vector<8x32xbf16>
    %cst_112 = arith.constant dense<0.000000e+00> : vector<64x32xf32>
    %124 = tpu.matmul %121, %123, %cst_112 {dimension_numbers = #tpu.dot_dimension_numbers<[1], [0], [0], [1], [0, 0, 1, 1], [], []>} : vector<64x8xbf16>, vector<8x32xbf16>, vector<64x32xf32> -> vector<64x32xf32>
    %125 = arith.addf %117, %124 : vector<64x32xf32>
    %c5_113 = arith.constant 5 : index
    %c0_114 = arith.constant 0 : index
    %c0_115 = arith.constant 0 : index
    %126 = vector.load %arg1[%c5_113, %c0_114, %c0_115] : memref<9x64x256xbf16, #tpu.memory_space<vmem>>, vector<1x64x256xbf16>
    %127 = vector.shape_cast %126 : vector<1x64x256xbf16> to vector<64x256xbf16>
    %cst_116 = arith.constant dense<0.000000e+00> : vector<64x8xf32>
    %128 = tpu.matmul %127, %84, %cst_116 {dimension_numbers = #tpu.dot_dimension_numbers<[1], [0], [0], [1], [0, 0, 1, 1], [], []>} : vector<64x256xbf16>, vector<256x8xbf16>, vector<64x8xf32> -> vector<64x8xf32>
    %129 = arith.truncf %128 : vector<64x8xf32> to vector<64x8xbf16>
    %c5_117 = arith.constant 5 : index
    %c0_118 = arith.constant 0 : index
    %c0_119 = arith.constant 0 : index
    %130 = vector.load %arg2[%c5_117, %c0_118, %c0_119] : memref<9x8x32xbf16, #tpu.memory_space<vmem>>, vector<1x8x32xbf16>
    %131 = vector.shape_cast %130 : vector<1x8x32xbf16> to vector<8x32xbf16>
    %cst_120 = arith.constant dense<0.000000e+00> : vector<64x32xf32>
    %132 = tpu.matmul %129, %131, %cst_120 {dimension_numbers = #tpu.dot_dimension_numbers<[1], [0], [0], [1], [0, 0, 1, 1], [], []>} : vector<64x8xbf16>, vector<8x32xbf16>, vector<64x32xf32> -> vector<64x32xf32>
    %133 = arith.addf %125, %132 : vector<64x32xf32>
    %c6_121 = arith.constant 6 : index
    %c0_122 = arith.constant 0 : index
    %c0_123 = arith.constant 0 : index
    %134 = vector.load %arg1[%c6_121, %c0_122, %c0_123] : memref<9x64x256xbf16, #tpu.memory_space<vmem>>, vector<1x64x256xbf16>
    %135 = vector.shape_cast %134 : vector<1x64x256xbf16> to vector<64x256xbf16>
    %cst_124 = arith.constant dense<0.000000e+00> : vector<64x8xf32>
    %136 = tpu.matmul %135, %84, %cst_124 {dimension_numbers = #tpu.dot_dimension_numbers<[1], [0], [0], [1], [0, 0, 1, 1], [], []>} : vector<64x256xbf16>, vector<256x8xbf16>, vector<64x8xf32> -> vector<64x8xf32>
    %137 = arith.truncf %136 : vector<64x8xf32> to vector<64x8xbf16>
    %c6_125 = arith.constant 6 : index
    %c0_126 = arith.constant 0 : index
    %c0_127 = arith.constant 0 : index
    %138 = vector.load %arg2[%c6_125, %c0_126, %c0_127] : memref<9x8x32xbf16, #tpu.memory_space<vmem>>, vector<1x8x32xbf16>
    %139 = vector.shape_cast %138 : vector<1x8x32xbf16> to vector<8x32xbf16>
    %cst_128 = arith.constant dense<0.000000e+00> : vector<64x32xf32>
    %140 = tpu.matmul %137, %139, %cst_128 {dimension_numbers = #tpu.dot_dimension_numbers<[1], [0], [0], [1], [0, 0, 1, 1], [], []>} : vector<64x8xbf16>, vector<8x32xbf16>, vector<64x32xf32> -> vector<64x32xf32>
    %141 = arith.addf %133, %140 : vector<64x32xf32>
    %c7_129 = arith.constant 7 : index
    %c0_130 = arith.constant 0 : index
    %c0_131 = arith.constant 0 : index
    %142 = vector.load %arg1[%c7_129, %c0_130, %c0_131] : memref<9x64x256xbf16, #tpu.memory_space<vmem>>, vector<1x64x256xbf16>
    %143 = vector.shape_cast %142 : vector<1x64x256xbf16> to vector<64x256xbf16>
    %cst_132 = arith.constant dense<0.000000e+00> : vector<64x8xf32>
    %144 = tpu.matmul %143, %84, %cst_132 {dimension_numbers = #tpu.dot_dimension_numbers<[1], [0], [0], [1], [0, 0, 1, 1], [], []>} : vector<64x256xbf16>, vector<256x8xbf16>, vector<64x8xf32> -> vector<64x8xf32>
    %145 = arith.truncf %144 : vector<64x8xf32> to vector<64x8xbf16>
    %c7_133 = arith.constant 7 : index
    %c0_134 = arith.constant 0 : index
    %c0_135 = arith.constant 0 : index
    %146 = vector.load %arg2[%c7_133, %c0_134, %c0_135] : memref<9x8x32xbf16, #tpu.memory_space<vmem>>, vector<1x8x32xbf16>
    %147 = vector.shape_cast %146 : vector<1x8x32xbf16> to vector<8x32xbf16>
    %cst_136 = arith.constant dense<0.000000e+00> : vector<64x32xf32>
    %148 = tpu.matmul %145, %147, %cst_136 {dimension_numbers = #tpu.dot_dimension_numbers<[1], [0], [0], [1], [0, 0, 1, 1], [], []>} : vector<64x8xbf16>, vector<8x32xbf16>, vector<64x32xf32> -> vector<64x32xf32>
    %149 = arith.addf %141, %148 : vector<64x32xf32>
    %c8_137 = arith.constant 8 : index
    %c0_138 = arith.constant 0 : index
    %c0_139 = arith.constant 0 : index
    %150 = vector.load %arg1[%c8_137, %c0_138, %c0_139] : memref<9x64x256xbf16, #tpu.memory_space<vmem>>, vector<1x64x256xbf16>
    %151 = vector.shape_cast %150 : vector<1x64x256xbf16> to vector<64x256xbf16>
    %cst_140 = arith.constant dense<0.000000e+00> : vector<64x8xf32>
    %152 = tpu.matmul %151, %84, %cst_140 {dimension_numbers = #tpu.dot_dimension_numbers<[1], [0], [0], [1], [0, 0, 1, 1], [], []>} : vector<64x256xbf16>, vector<256x8xbf16>, vector<64x8xf32> -> vector<64x8xf32>
    %153 = arith.truncf %152 : vector<64x8xf32> to vector<64x8xbf16>
    %c8_141 = arith.constant 8 : index
    %c0_142 = arith.constant 0 : index
    %c0_143 = arith.constant 0 : index
    %154 = vector.load %arg2[%c8_141, %c0_142, %c0_143] : memref<9x8x32xbf16, #tpu.memory_space<vmem>>, vector<1x8x32xbf16>
    %155 = vector.shape_cast %154 : vector<1x8x32xbf16> to vector<8x32xbf16>
    %cst_144 = arith.constant dense<0.000000e+00> : vector<64x32xf32>
    %156 = tpu.matmul %153, %155, %cst_144 {dimension_numbers = #tpu.dot_dimension_numbers<[1], [0], [0], [1], [0, 0, 1, 1], [], []>} : vector<64x8xbf16>, vector<8x32xbf16>, vector<64x32xf32> -> vector<64x32xf32>
    %157 = arith.addf %149, %156 : vector<64x32xf32>
    %158 = vector.broadcast %4 : vector<1x32xf32> to vector<64x32xf32>
    %159 = arith.addf %157, %158 : vector<64x32xf32>
    %cst_145 = arith.constant 2.000000e-01 : f32
    %160 = vector.broadcast %cst_145 : f32 to vector<64x32xf32>
    %161 = arith.mulf %160, %159 : vector<64x32xf32>
    %162 = arith.maximumf %159, %161 : vector<64x32xf32>
    %c0_146 = arith.constant 0 : index
    %c0_147 = arith.constant 0 : index
    %163 = vector.load %arg6[%c0_146, %c0_147] : memref<1x64xf32, #tpu.memory_space<vmem>>, vector<1x64xf32>
    %c0_148 = arith.constant 0 : index
    %c0_149 = arith.constant 0 : index
    %164 = vector.load %arg7[%c0_148, %c0_149] : memref<1x64xf32, #tpu.memory_space<vmem>>, vector<1x64xf32>
    %165 = arith.truncf %83 : vector<64x32xf32> to vector<64x32xbf16>
    %cst_150 = arith.constant 0.000000e+00 : f32
    %166 = vector.broadcast %cst_150 : f32 to vector<16x64xf32>
    %c0_151 = arith.constant 0 : index
    %c0_152 = arith.constant 0 : index
    %c0_153 = arith.constant 0 : index
    %167 = vector.load %arg4[%c0_151, %c0_152, %c0_153] : memref<9x16x64xbf16, #tpu.memory_space<vmem>>, vector<1x16x64xbf16>
    %168 = vector.shape_cast %167 : vector<1x16x64xbf16> to vector<16x64xbf16>
    %cst_154 = arith.constant dense<0.000000e+00> : vector<16x32xf32>
    %169 = tpu.matmul %168, %165, %cst_154 {dimension_numbers = #tpu.dot_dimension_numbers<[1], [0], [0], [1], [0, 0, 1, 1], [], []>} : vector<16x64xbf16>, vector<64x32xbf16>, vector<16x32xf32> -> vector<16x32xf32>
    %170 = arith.truncf %169 : vector<16x32xf32> to vector<16x32xbf16>
    %c0_155 = arith.constant 0 : index
    %c0_156 = arith.constant 0 : index
    %c0_157 = arith.constant 0 : index
    %171 = vector.load %arg5[%c0_155, %c0_156, %c0_157] : memref<9x32x64xbf16, #tpu.memory_space<vmem>>, vector<1x32x64xbf16>
    %172 = vector.shape_cast %171 : vector<1x32x64xbf16> to vector<32x64xbf16>
    %cst_158 = arith.constant dense<0.000000e+00> : vector<16x64xf32>
    %173 = tpu.matmul %170, %172, %cst_158 {dimension_numbers = #tpu.dot_dimension_numbers<[1], [0], [0], [1], [0, 0, 1, 1], [], []>} : vector<16x32xbf16>, vector<32x64xbf16>, vector<16x64xf32> -> vector<16x64xf32>
    %174 = arith.addf %166, %173 : vector<16x64xf32>
    %c1_159 = arith.constant 1 : index
    %c0_160 = arith.constant 0 : index
    %c0_161 = arith.constant 0 : index
    %175 = vector.load %arg4[%c1_159, %c0_160, %c0_161] : memref<9x16x64xbf16, #tpu.memory_space<vmem>>, vector<1x16x64xbf16>
    %176 = vector.shape_cast %175 : vector<1x16x64xbf16> to vector<16x64xbf16>
    %cst_162 = arith.constant dense<0.000000e+00> : vector<16x32xf32>
    %177 = tpu.matmul %176, %165, %cst_162 {dimension_numbers = #tpu.dot_dimension_numbers<[1], [0], [0], [1], [0, 0, 1, 1], [], []>} : vector<16x64xbf16>, vector<64x32xbf16>, vector<16x32xf32> -> vector<16x32xf32>
    %178 = arith.truncf %177 : vector<16x32xf32> to vector<16x32xbf16>
    %c1_163 = arith.constant 1 : index
    %c0_164 = arith.constant 0 : index
    %c0_165 = arith.constant 0 : index
    %179 = vector.load %arg5[%c1_163, %c0_164, %c0_165] : memref<9x32x64xbf16, #tpu.memory_space<vmem>>, vector<1x32x64xbf16>
    %180 = vector.shape_cast %179 : vector<1x32x64xbf16> to vector<32x64xbf16>
    %cst_166 = arith.constant dense<0.000000e+00> : vector<16x64xf32>
    %181 = tpu.matmul %178, %180, %cst_166 {dimension_numbers = #tpu.dot_dimension_numbers<[1], [0], [0], [1], [0, 0, 1, 1], [], []>} : vector<16x32xbf16>, vector<32x64xbf16>, vector<16x64xf32> -> vector<16x64xf32>
    %182 = arith.addf %174, %181 : vector<16x64xf32>
    %c2_167 = arith.constant 2 : index
    %c0_168 = arith.constant 0 : index
    %c0_169 = arith.constant 0 : index
    %183 = vector.load %arg4[%c2_167, %c0_168, %c0_169] : memref<9x16x64xbf16, #tpu.memory_space<vmem>>, vector<1x16x64xbf16>
    %184 = vector.shape_cast %183 : vector<1x16x64xbf16> to vector<16x64xbf16>
    %cst_170 = arith.constant dense<0.000000e+00> : vector<16x32xf32>
    %185 = tpu.matmul %184, %165, %cst_170 {dimension_numbers = #tpu.dot_dimension_numbers<[1], [0], [0], [1], [0, 0, 1, 1], [], []>} : vector<16x64xbf16>, vector<64x32xbf16>, vector<16x32xf32> -> vector<16x32xf32>
    %186 = arith.truncf %185 : vector<16x32xf32> to vector<16x32xbf16>
    %c2_171 = arith.constant 2 : index
    %c0_172 = arith.constant 0 : index
    %c0_173 = arith.constant 0 : index
    %187 = vector.load %arg5[%c2_171, %c0_172, %c0_173] : memref<9x32x64xbf16, #tpu.memory_space<vmem>>, vector<1x32x64xbf16>
    %188 = vector.shape_cast %187 : vector<1x32x64xbf16> to vector<32x64xbf16>
    %cst_174 = arith.constant dense<0.000000e+00> : vector<16x64xf32>
    %189 = tpu.matmul %186, %188, %cst_174 {dimension_numbers = #tpu.dot_dimension_numbers<[1], [0], [0], [1], [0, 0, 1, 1], [], []>} : vector<16x32xbf16>, vector<32x64xbf16>, vector<16x64xf32> -> vector<16x64xf32>
    %190 = arith.addf %182, %189 : vector<16x64xf32>
    %c3_175 = arith.constant 3 : index
    %c0_176 = arith.constant 0 : index
    %c0_177 = arith.constant 0 : index
    %191 = vector.load %arg4[%c3_175, %c0_176, %c0_177] : memref<9x16x64xbf16, #tpu.memory_space<vmem>>, vector<1x16x64xbf16>
    %192 = vector.shape_cast %191 : vector<1x16x64xbf16> to vector<16x64xbf16>
    %cst_178 = arith.constant dense<0.000000e+00> : vector<16x32xf32>
    %193 = tpu.matmul %192, %165, %cst_178 {dimension_numbers = #tpu.dot_dimension_numbers<[1], [0], [0], [1], [0, 0, 1, 1], [], []>} : vector<16x64xbf16>, vector<64x32xbf16>, vector<16x32xf32> -> vector<16x32xf32>
    %194 = arith.truncf %193 : vector<16x32xf32> to vector<16x32xbf16>
    %c3_179 = arith.constant 3 : index
    %c0_180 = arith.constant 0 : index
    %c0_181 = arith.constant 0 : index
    %195 = vector.load %arg5[%c3_179, %c0_180, %c0_181] : memref<9x32x64xbf16, #tpu.memory_space<vmem>>, vector<1x32x64xbf16>
    %196 = vector.shape_cast %195 : vector<1x32x64xbf16> to vector<32x64xbf16>
    %cst_182 = arith.constant dense<0.000000e+00> : vector<16x64xf32>
    %197 = tpu.matmul %194, %196, %cst_182 {dimension_numbers = #tpu.dot_dimension_numbers<[1], [0], [0], [1], [0, 0, 1, 1], [], []>} : vector<16x32xbf16>, vector<32x64xbf16>, vector<16x64xf32> -> vector<16x64xf32>
    %198 = arith.addf %190, %197 : vector<16x64xf32>
    %c4_183 = arith.constant 4 : index
    %c0_184 = arith.constant 0 : index
    %c0_185 = arith.constant 0 : index
    %199 = vector.load %arg4[%c4_183, %c0_184, %c0_185] : memref<9x16x64xbf16, #tpu.memory_space<vmem>>, vector<1x16x64xbf16>
    %200 = vector.shape_cast %199 : vector<1x16x64xbf16> to vector<16x64xbf16>
    %cst_186 = arith.constant dense<0.000000e+00> : vector<16x32xf32>
    %201 = tpu.matmul %200, %165, %cst_186 {dimension_numbers = #tpu.dot_dimension_numbers<[1], [0], [0], [1], [0, 0, 1, 1], [], []>} : vector<16x64xbf16>, vector<64x32xbf16>, vector<16x32xf32> -> vector<16x32xf32>
    %202 = arith.truncf %201 : vector<16x32xf32> to vector<16x32xbf16>
    %c4_187 = arith.constant 4 : index
    %c0_188 = arith.constant 0 : index
    %c0_189 = arith.constant 0 : index
    %203 = vector.load %arg5[%c4_187, %c0_188, %c0_189] : memref<9x32x64xbf16, #tpu.memory_space<vmem>>, vector<1x32x64xbf16>
    %204 = vector.shape_cast %203 : vector<1x32x64xbf16> to vector<32x64xbf16>
    %cst_190 = arith.constant dense<0.000000e+00> : vector<16x64xf32>
    %205 = tpu.matmul %202, %204, %cst_190 {dimension_numbers = #tpu.dot_dimension_numbers<[1], [0], [0], [1], [0, 0, 1, 1], [], []>} : vector<16x32xbf16>, vector<32x64xbf16>, vector<16x64xf32> -> vector<16x64xf32>
    %206 = arith.addf %198, %205 : vector<16x64xf32>
    %c5_191 = arith.constant 5 : index
    %c0_192 = arith.constant 0 : index
    %c0_193 = arith.constant 0 : index
    %207 = vector.load %arg4[%c5_191, %c0_192, %c0_193] : memref<9x16x64xbf16, #tpu.memory_space<vmem>>, vector<1x16x64xbf16>
    %208 = vector.shape_cast %207 : vector<1x16x64xbf16> to vector<16x64xbf16>
    %cst_194 = arith.constant dense<0.000000e+00> : vector<16x32xf32>
    %209 = tpu.matmul %208, %165, %cst_194 {dimension_numbers = #tpu.dot_dimension_numbers<[1], [0], [0], [1], [0, 0, 1, 1], [], []>} : vector<16x64xbf16>, vector<64x32xbf16>, vector<16x32xf32> -> vector<16x32xf32>
    %210 = arith.truncf %209 : vector<16x32xf32> to vector<16x32xbf16>
    %c5_195 = arith.constant 5 : index
    %c0_196 = arith.constant 0 : index
    %c0_197 = arith.constant 0 : index
    %211 = vector.load %arg5[%c5_195, %c0_196, %c0_197] : memref<9x32x64xbf16, #tpu.memory_space<vmem>>, vector<1x32x64xbf16>
    %212 = vector.shape_cast %211 : vector<1x32x64xbf16> to vector<32x64xbf16>
    %cst_198 = arith.constant dense<0.000000e+00> : vector<16x64xf32>
    %213 = tpu.matmul %210, %212, %cst_198 {dimension_numbers = #tpu.dot_dimension_numbers<[1], [0], [0], [1], [0, 0, 1, 1], [], []>} : vector<16x32xbf16>, vector<32x64xbf16>, vector<16x64xf32> -> vector<16x64xf32>
    %214 = arith.addf %206, %213 : vector<16x64xf32>
    %c6_199 = arith.constant 6 : index
    %c0_200 = arith.constant 0 : index
    %c0_201 = arith.constant 0 : index
    %215 = vector.load %arg4[%c6_199, %c0_200, %c0_201] : memref<9x16x64xbf16, #tpu.memory_space<vmem>>, vector<1x16x64xbf16>
    %216 = vector.shape_cast %215 : vector<1x16x64xbf16> to vector<16x64xbf16>
    %cst_202 = arith.constant dense<0.000000e+00> : vector<16x32xf32>
    %217 = tpu.matmul %216, %165, %cst_202 {dimension_numbers = #tpu.dot_dimension_numbers<[1], [0], [0], [1], [0, 0, 1, 1], [], []>} : vector<16x64xbf16>, vector<64x32xbf16>, vector<16x32xf32> -> vector<16x32xf32>
    %218 = arith.truncf %217 : vector<16x32xf32> to vector<16x32xbf16>
    %c6_203 = arith.constant 6 : index
    %c0_204 = arith.constant 0 : index
    %c0_205 = arith.constant 0 : index
    %219 = vector.load %arg5[%c6_203, %c0_204, %c0_205] : memref<9x32x64xbf16, #tpu.memory_space<vmem>>, vector<1x32x64xbf16>
    %220 = vector.shape_cast %219 : vector<1x32x64xbf16> to vector<32x64xbf16>
    %cst_206 = arith.constant dense<0.000000e+00> : vector<16x64xf32>
    %221 = tpu.matmul %218, %220, %cst_206 {dimension_numbers = #tpu.dot_dimension_numbers<[1], [0], [0], [1], [0, 0, 1, 1], [], []>} : vector<16x32xbf16>, vector<32x64xbf16>, vector<16x64xf32> -> vector<16x64xf32>
    %222 = arith.addf %214, %221 : vector<16x64xf32>
    %c7_207 = arith.constant 7 : index
    %c0_208 = arith.constant 0 : index
    %c0_209 = arith.constant 0 : index
    %223 = vector.load %arg4[%c7_207, %c0_208, %c0_209] : memref<9x16x64xbf16, #tpu.memory_space<vmem>>, vector<1x16x64xbf16>
    %224 = vector.shape_cast %223 : vector<1x16x64xbf16> to vector<16x64xbf16>
    %cst_210 = arith.constant dense<0.000000e+00> : vector<16x32xf32>
    %225 = tpu.matmul %224, %165, %cst_210 {dimension_numbers = #tpu.dot_dimension_numbers<[1], [0], [0], [1], [0, 0, 1, 1], [], []>} : vector<16x64xbf16>, vector<64x32xbf16>, vector<16x32xf32> -> vector<16x32xf32>
    %226 = arith.truncf %225 : vector<16x32xf32> to vector<16x32xbf16>
    %c7_211 = arith.constant 7 : index
    %c0_212 = arith.constant 0 : index
    %c0_213 = arith.constant 0 : index
    %227 = vector.load %arg5[%c7_211, %c0_212, %c0_213] : memref<9x32x64xbf16, #tpu.memory_space<vmem>>, vector<1x32x64xbf16>
    %228 = vector.shape_cast %227 : vector<1x32x64xbf16> to vector<32x64xbf16>
    %cst_214 = arith.constant dense<0.000000e+00> : vector<16x64xf32>
    %229 = tpu.matmul %226, %228, %cst_214 {dimension_numbers = #tpu.dot_dimension_numbers<[1], [0], [0], [1], [0, 0, 1, 1], [], []>} : vector<16x32xbf16>, vector<32x64xbf16>, vector<16x64xf32> -> vector<16x64xf32>
    %230 = arith.addf %222, %229 : vector<16x64xf32>
    %c8_215 = arith.constant 8 : index
    %c0_216 = arith.constant 0 : index
    %c0_217 = arith.constant 0 : index
    %231 = vector.load %arg4[%c8_215, %c0_216, %c0_217] : memref<9x16x64xbf16, #tpu.memory_space<vmem>>, vector<1x16x64xbf16>
    %232 = vector.shape_cast %231 : vector<1x16x64xbf16> to vector<16x64xbf16>
    %cst_218 = arith.constant dense<0.000000e+00> : vector<16x32xf32>
    %233 = tpu.matmul %232, %165, %cst_218 {dimension_numbers = #tpu.dot_dimension_numbers<[1], [0], [0], [1], [0, 0, 1, 1], [], []>} : vector<16x64xbf16>, vector<64x32xbf16>, vector<16x32xf32> -> vector<16x32xf32>
    %234 = arith.truncf %233 : vector<16x32xf32> to vector<16x32xbf16>
    %c8_219 = arith.constant 8 : index
    %c0_220 = arith.constant 0 : index
    %c0_221 = arith.constant 0 : index
    %235 = vector.load %arg5[%c8_219, %c0_220, %c0_221] : memref<9x32x64xbf16, #tpu.memory_space<vmem>>, vector<1x32x64xbf16>
    %236 = vector.shape_cast %235 : vector<1x32x64xbf16> to vector<32x64xbf16>
    %cst_222 = arith.constant dense<0.000000e+00> : vector<16x64xf32>
    %237 = tpu.matmul %234, %236, %cst_222 {dimension_numbers = #tpu.dot_dimension_numbers<[1], [0], [0], [1], [0, 0, 1, 1], [], []>} : vector<16x32xbf16>, vector<32x64xbf16>, vector<16x64xf32> -> vector<16x64xf32>
    %238 = arith.addf %230, %237 : vector<16x64xf32>
    %239 = arith.truncf %162 : vector<64x32xf32> to vector<64x32xbf16>
    %cst_223 = arith.constant 0.000000e+00 : f32
    %240 = vector.broadcast %cst_223 : f32 to vector<16x64xf32>
    %c0_224 = arith.constant 0 : index
    %c0_225 = arith.constant 0 : index
    %c0_226 = arith.constant 0 : index
    %241 = vector.load %arg4[%c0_224, %c0_225, %c0_226] : memref<9x16x64xbf16, #tpu.memory_space<vmem>>, vector<1x16x64xbf16>
    %242 = vector.shape_cast %241 : vector<1x16x64xbf16> to vector<16x64xbf16>
    %cst_227 = arith.constant dense<0.000000e+00> : vector<16x32xf32>
    %243 = tpu.matmul %242, %239, %cst_227 {dimension_numbers = #tpu.dot_dimension_numbers<[1], [0], [0], [1], [0, 0, 1, 1], [], []>} : vector<16x64xbf16>, vector<64x32xbf16>, vector<16x32xf32> -> vector<16x32xf32>
    %244 = arith.truncf %243 : vector<16x32xf32> to vector<16x32xbf16>
    %c0_228 = arith.constant 0 : index
    %c0_229 = arith.constant 0 : index
    %c0_230 = arith.constant 0 : index
    %245 = vector.load %arg5[%c0_228, %c0_229, %c0_230] : memref<9x32x64xbf16, #tpu.memory_space<vmem>>, vector<1x32x64xbf16>
    %246 = vector.shape_cast %245 : vector<1x32x64xbf16> to vector<32x64xbf16>
    %cst_231 = arith.constant dense<0.000000e+00> : vector<16x64xf32>
    %247 = tpu.matmul %244, %246, %cst_231 {dimension_numbers = #tpu.dot_dimension_numbers<[1], [0], [0], [1], [0, 0, 1, 1], [], []>} : vector<16x32xbf16>, vector<32x64xbf16>, vector<16x64xf32> -> vector<16x64xf32>
    %248 = arith.addf %240, %247 : vector<16x64xf32>
    %c1_232 = arith.constant 1 : index
    %c0_233 = arith.constant 0 : index
    %c0_234 = arith.constant 0 : index
    %249 = vector.load %arg4[%c1_232, %c0_233, %c0_234] : memref<9x16x64xbf16, #tpu.memory_space<vmem>>, vector<1x16x64xbf16>
    %250 = vector.shape_cast %249 : vector<1x16x64xbf16> to vector<16x64xbf16>
    %cst_235 = arith.constant dense<0.000000e+00> : vector<16x32xf32>
    %251 = tpu.matmul %250, %239, %cst_235 {dimension_numbers = #tpu.dot_dimension_numbers<[1], [0], [0], [1], [0, 0, 1, 1], [], []>} : vector<16x64xbf16>, vector<64x32xbf16>, vector<16x32xf32> -> vector<16x32xf32>
    %252 = arith.truncf %251 : vector<16x32xf32> to vector<16x32xbf16>
    %c1_236 = arith.constant 1 : index
    %c0_237 = arith.constant 0 : index
    %c0_238 = arith.constant 0 : index
    %253 = vector.load %arg5[%c1_236, %c0_237, %c0_238] : memref<9x32x64xbf16, #tpu.memory_space<vmem>>, vector<1x32x64xbf16>
    %254 = vector.shape_cast %253 : vector<1x32x64xbf16> to vector<32x64xbf16>
    %cst_239 = arith.constant dense<0.000000e+00> : vector<16x64xf32>
    %255 = tpu.matmul %252, %254, %cst_239 {dimension_numbers = #tpu.dot_dimension_numbers<[1], [0], [0], [1], [0, 0, 1, 1], [], []>} : vector<16x32xbf16>, vector<32x64xbf16>, vector<16x64xf32> -> vector<16x64xf32>
    %256 = arith.addf %248, %255 : vector<16x64xf32>
    %c2_240 = arith.constant 2 : index
    %c0_241 = arith.constant 0 : index
    %c0_242 = arith.constant 0 : index
    %257 = vector.load %arg4[%c2_240, %c0_241, %c0_242] : memref<9x16x64xbf16, #tpu.memory_space<vmem>>, vector<1x16x64xbf16>
    %258 = vector.shape_cast %257 : vector<1x16x64xbf16> to vector<16x64xbf16>
    %cst_243 = arith.constant dense<0.000000e+00> : vector<16x32xf32>
    %259 = tpu.matmul %258, %239, %cst_243 {dimension_numbers = #tpu.dot_dimension_numbers<[1], [0], [0], [1], [0, 0, 1, 1], [], []>} : vector<16x64xbf16>, vector<64x32xbf16>, vector<16x32xf32> -> vector<16x32xf32>
    %260 = arith.truncf %259 : vector<16x32xf32> to vector<16x32xbf16>
    %c2_244 = arith.constant 2 : index
    %c0_245 = arith.constant 0 : index
    %c0_246 = arith.constant 0 : index
    %261 = vector.load %arg5[%c2_244, %c0_245, %c0_246] : memref<9x32x64xbf16, #tpu.memory_space<vmem>>, vector<1x32x64xbf16>
    %262 = vector.shape_cast %261 : vector<1x32x64xbf16> to vector<32x64xbf16>
    %cst_247 = arith.constant dense<0.000000e+00> : vector<16x64xf32>
    %263 = tpu.matmul %260, %262, %cst_247 {dimension_numbers = #tpu.dot_dimension_numbers<[1], [0], [0], [1], [0, 0, 1, 1], [], []>} : vector<16x32xbf16>, vector<32x64xbf16>, vector<16x64xf32> -> vector<16x64xf32>
    %264 = arith.addf %256, %263 : vector<16x64xf32>
    %c3_248 = arith.constant 3 : index
    %c0_249 = arith.constant 0 : index
    %c0_250 = arith.constant 0 : index
    %265 = vector.load %arg4[%c3_248, %c0_249, %c0_250] : memref<9x16x64xbf16, #tpu.memory_space<vmem>>, vector<1x16x64xbf16>
    %266 = vector.shape_cast %265 : vector<1x16x64xbf16> to vector<16x64xbf16>
    %cst_251 = arith.constant dense<0.000000e+00> : vector<16x32xf32>
    %267 = tpu.matmul %266, %239, %cst_251 {dimension_numbers = #tpu.dot_dimension_numbers<[1], [0], [0], [1], [0, 0, 1, 1], [], []>} : vector<16x64xbf16>, vector<64x32xbf16>, vector<16x32xf32> -> vector<16x32xf32>
    %268 = arith.truncf %267 : vector<16x32xf32> to vector<16x32xbf16>
    %c3_252 = arith.constant 3 : index
    %c0_253 = arith.constant 0 : index
    %c0_254 = arith.constant 0 : index
    %269 = vector.load %arg5[%c3_252, %c0_253, %c0_254] : memref<9x32x64xbf16, #tpu.memory_space<vmem>>, vector<1x32x64xbf16>
    %270 = vector.shape_cast %269 : vector<1x32x64xbf16> to vector<32x64xbf16>
    %cst_255 = arith.constant dense<0.000000e+00> : vector<16x64xf32>
    %271 = tpu.matmul %268, %270, %cst_255 {dimension_numbers = #tpu.dot_dimension_numbers<[1], [0], [0], [1], [0, 0, 1, 1], [], []>} : vector<16x32xbf16>, vector<32x64xbf16>, vector<16x64xf32> -> vector<16x64xf32>
    %272 = arith.addf %264, %271 : vector<16x64xf32>
    %c4_256 = arith.constant 4 : index
    %c0_257 = arith.constant 0 : index
    %c0_258 = arith.constant 0 : index
    %273 = vector.load %arg4[%c4_256, %c0_257, %c0_258] : memref<9x16x64xbf16, #tpu.memory_space<vmem>>, vector<1x16x64xbf16>
    %274 = vector.shape_cast %273 : vector<1x16x64xbf16> to vector<16x64xbf16>
    %cst_259 = arith.constant dense<0.000000e+00> : vector<16x32xf32>
    %275 = tpu.matmul %274, %239, %cst_259 {dimension_numbers = #tpu.dot_dimension_numbers<[1], [0], [0], [1], [0, 0, 1, 1], [], []>} : vector<16x64xbf16>, vector<64x32xbf16>, vector<16x32xf32> -> vector<16x32xf32>
    %276 = arith.truncf %275 : vector<16x32xf32> to vector<16x32xbf16>
    %c4_260 = arith.constant 4 : index
    %c0_261 = arith.constant 0 : index
    %c0_262 = arith.constant 0 : index
    %277 = vector.load %arg5[%c4_260, %c0_261, %c0_262] : memref<9x32x64xbf16, #tpu.memory_space<vmem>>, vector<1x32x64xbf16>
    %278 = vector.shape_cast %277 : vector<1x32x64xbf16> to vector<32x64xbf16>
    %cst_263 = arith.constant dense<0.000000e+00> : vector<16x64xf32>
    %279 = tpu.matmul %276, %278, %cst_263 {dimension_numbers = #tpu.dot_dimension_numbers<[1], [0], [0], [1], [0, 0, 1, 1], [], []>} : vector<16x32xbf16>, vector<32x64xbf16>, vector<16x64xf32> -> vector<16x64xf32>
    %280 = arith.addf %272, %279 : vector<16x64xf32>
    %c5_264 = arith.constant 5 : index
    %c0_265 = arith.constant 0 : index
    %c0_266 = arith.constant 0 : index
    %281 = vector.load %arg4[%c5_264, %c0_265, %c0_266] : memref<9x16x64xbf16, #tpu.memory_space<vmem>>, vector<1x16x64xbf16>
    %282 = vector.shape_cast %281 : vector<1x16x64xbf16> to vector<16x64xbf16>
    %cst_267 = arith.constant dense<0.000000e+00> : vector<16x32xf32>
    %283 = tpu.matmul %282, %239, %cst_267 {dimension_numbers = #tpu.dot_dimension_numbers<[1], [0], [0], [1], [0, 0, 1, 1], [], []>} : vector<16x64xbf16>, vector<64x32xbf16>, vector<16x32xf32> -> vector<16x32xf32>
    %284 = arith.truncf %283 : vector<16x32xf32> to vector<16x32xbf16>
    %c5_268 = arith.constant 5 : index
    %c0_269 = arith.constant 0 : index
    %c0_270 = arith.constant 0 : index
    %285 = vector.load %arg5[%c5_268, %c0_269, %c0_270] : memref<9x32x64xbf16, #tpu.memory_space<vmem>>, vector<1x32x64xbf16>
    %286 = vector.shape_cast %285 : vector<1x32x64xbf16> to vector<32x64xbf16>
    %cst_271 = arith.constant dense<0.000000e+00> : vector<16x64xf32>
    %287 = tpu.matmul %284, %286, %cst_271 {dimension_numbers = #tpu.dot_dimension_numbers<[1], [0], [0], [1], [0, 0, 1, 1], [], []>} : vector<16x32xbf16>, vector<32x64xbf16>, vector<16x64xf32> -> vector<16x64xf32>
    %288 = arith.addf %280, %287 : vector<16x64xf32>
    %c6_272 = arith.constant 6 : index
    %c0_273 = arith.constant 0 : index
    %c0_274 = arith.constant 0 : index
    %289 = vector.load %arg4[%c6_272, %c0_273, %c0_274] : memref<9x16x64xbf16, #tpu.memory_space<vmem>>, vector<1x16x64xbf16>
    %290 = vector.shape_cast %289 : vector<1x16x64xbf16> to vector<16x64xbf16>
    %cst_275 = arith.constant dense<0.000000e+00> : vector<16x32xf32>
    %291 = tpu.matmul %290, %239, %cst_275 {dimension_numbers = #tpu.dot_dimension_numbers<[1], [0], [0], [1], [0, 0, 1, 1], [], []>} : vector<16x64xbf16>, vector<64x32xbf16>, vector<16x32xf32> -> vector<16x32xf32>
    %292 = arith.truncf %291 : vector<16x32xf32> to vector<16x32xbf16>
    %c6_276 = arith.constant 6 : index
    %c0_277 = arith.constant 0 : index
    %c0_278 = arith.constant 0 : index
    %293 = vector.load %arg5[%c6_276, %c0_277, %c0_278] : memref<9x32x64xbf16, #tpu.memory_space<vmem>>, vector<1x32x64xbf16>
    %294 = vector.shape_cast %293 : vector<1x32x64xbf16> to vector<32x64xbf16>
    %cst_279 = arith.constant dense<0.000000e+00> : vector<16x64xf32>
    %295 = tpu.matmul %292, %294, %cst_279 {dimension_numbers = #tpu.dot_dimension_numbers<[1], [0], [0], [1], [0, 0, 1, 1], [], []>} : vector<16x32xbf16>, vector<32x64xbf16>, vector<16x64xf32> -> vector<16x64xf32>
    %296 = arith.addf %288, %295 : vector<16x64xf32>
    %c7_280 = arith.constant 7 : index
    %c0_281 = arith.constant 0 : index
    %c0_282 = arith.constant 0 : index
    %297 = vector.load %arg4[%c7_280, %c0_281, %c0_282] : memref<9x16x64xbf16, #tpu.memory_space<vmem>>, vector<1x16x64xbf16>
    %298 = vector.shape_cast %297 : vector<1x16x64xbf16> to vector<16x64xbf16>
    %cst_283 = arith.constant dense<0.000000e+00> : vector<16x32xf32>
    %299 = tpu.matmul %298, %239, %cst_283 {dimension_numbers = #tpu.dot_dimension_numbers<[1], [0], [0], [1], [0, 0, 1, 1], [], []>} : vector<16x64xbf16>, vector<64x32xbf16>, vector<16x32xf32> -> vector<16x32xf32>
    %300 = arith.truncf %299 : vector<16x32xf32> to vector<16x32xbf16>
    %c7_284 = arith.constant 7 : index
    %c0_285 = arith.constant 0 : index
    %c0_286 = arith.constant 0 : index
    %301 = vector.load %arg5[%c7_284, %c0_285, %c0_286] : memref<9x32x64xbf16, #tpu.memory_space<vmem>>, vector<1x32x64xbf16>
    %302 = vector.shape_cast %301 : vector<1x32x64xbf16> to vector<32x64xbf16>
    %cst_287 = arith.constant dense<0.000000e+00> : vector<16x64xf32>
    %303 = tpu.matmul %300, %302, %cst_287 {dimension_numbers = #tpu.dot_dimension_numbers<[1], [0], [0], [1], [0, 0, 1, 1], [], []>} : vector<16x32xbf16>, vector<32x64xbf16>, vector<16x64xf32> -> vector<16x64xf32>
    %304 = arith.addf %296, %303 : vector<16x64xf32>
    %c8_288 = arith.constant 8 : index
    %c0_289 = arith.constant 0 : index
    %c0_290 = arith.constant 0 : index
    %305 = vector.load %arg4[%c8_288, %c0_289, %c0_290] : memref<9x16x64xbf16, #tpu.memory_space<vmem>>, vector<1x16x64xbf16>
    %306 = vector.shape_cast %305 : vector<1x16x64xbf16> to vector<16x64xbf16>
    %cst_291 = arith.constant dense<0.000000e+00> : vector<16x32xf32>
    %307 = tpu.matmul %306, %239, %cst_291 {dimension_numbers = #tpu.dot_dimension_numbers<[1], [0], [0], [1], [0, 0, 1, 1], [], []>} : vector<16x64xbf16>, vector<64x32xbf16>, vector<16x32xf32> -> vector<16x32xf32>
    %308 = arith.truncf %307 : vector<16x32xf32> to vector<16x32xbf16>
    %c8_292 = arith.constant 8 : index
    %c0_293 = arith.constant 0 : index
    %c0_294 = arith.constant 0 : index
    %309 = vector.load %arg5[%c8_292, %c0_293, %c0_294] : memref<9x32x64xbf16, #tpu.memory_space<vmem>>, vector<1x32x64xbf16>
    %310 = vector.shape_cast %309 : vector<1x32x64xbf16> to vector<32x64xbf16>
    %cst_295 = arith.constant dense<0.000000e+00> : vector<16x64xf32>
    %311 = tpu.matmul %308, %310, %cst_295 {dimension_numbers = #tpu.dot_dimension_numbers<[1], [0], [0], [1], [0, 0, 1, 1], [], []>} : vector<16x32xbf16>, vector<32x64xbf16>, vector<16x64xf32> -> vector<16x64xf32>
    %312 = arith.addf %304, %311 : vector<16x64xf32>
    %cst_296 = arith.constant 0.000000e+00 : f32
    %313 = vector.broadcast %cst_296 : f32 to vector<1x64xf32>
    %cst_297 = arith.constant 0.000000e+00 : f32
    %314 = vector.broadcast %cst_297 : f32 to vector<1x64xf32>
    %cst_298 = arith.constant dense<0.000000e+00> : vector<64xf32>
    %315 = vector.multi_reduction <add>, %238, %cst_298 [0] : vector<16x64xf32> to vector<64xf32>
    %316 = vector.shape_cast %315 : vector<64xf32> to vector<1x64xf32>
    %317 = arith.addf %313, %316 : vector<1x64xf32>
    %318 = arith.mulf %238, %238 : vector<16x64xf32>
    %cst_299 = arith.constant dense<0.000000e+00> : vector<64xf32>
    %319 = vector.multi_reduction <add>, %318, %cst_299 [0] : vector<16x64xf32> to vector<64xf32>
    %320 = vector.shape_cast %319 : vector<64xf32> to vector<1x64xf32>
    %321 = arith.addf %314, %320 : vector<1x64xf32>
    %cst_300 = arith.constant dense<0.000000e+00> : vector<64xf32>
    %322 = vector.multi_reduction <add>, %312, %cst_300 [0] : vector<16x64xf32> to vector<64xf32>
    %323 = vector.shape_cast %322 : vector<64xf32> to vector<1x64xf32>
    %324 = arith.addf %317, %323 : vector<1x64xf32>
    %325 = arith.mulf %312, %312 : vector<16x64xf32>
    %cst_301 = arith.constant dense<0.000000e+00> : vector<64xf32>
    %326 = vector.multi_reduction <add>, %325, %cst_301 [0] : vector<16x64xf32> to vector<64xf32>
    %327 = vector.shape_cast %326 : vector<64xf32> to vector<1x64xf32>
    %328 = arith.addf %321, %327 : vector<1x64xf32>
    %cst_302 = arith.constant 3.200000e+01 : f32
    %329 = vector.broadcast %cst_302 : f32 to vector<1x64xf32>
    %330 = arith.divf %324, %329 : vector<1x64xf32>
    %cst_303 = arith.constant 3.200000e+01 : f32
    %331 = vector.broadcast %cst_303 : f32 to vector<1x64xf32>
    %332 = arith.divf %328, %331 : vector<1x64xf32>
    %333 = arith.mulf %330, %330 : vector<1x64xf32>
    %334 = arith.subf %332, %333 : vector<1x64xf32>
    %cst_304 = arith.constant 0.000000e+00 : f32
    %335 = vector.broadcast %cst_304 : f32 to vector<1x64xf32>
    %336 = arith.maximumf %334, %335 : vector<1x64xf32>
    %cst_305 = arith.constant 9.99999974E-6 : f32
    %337 = vector.broadcast %cst_305 : f32 to vector<1x64xf32>
    %338 = arith.addf %336, %337 : vector<1x64xf32>
    %339 = math.rsqrt %338 : vector<1x64xf32>
    %340 = arith.mulf %163, %339 : vector<1x64xf32>
    %341 = arith.mulf %330, %340 : vector<1x64xf32>
    %342 = arith.subf %164, %341 : vector<1x64xf32>
    %343 = vector.broadcast %340 : vector<1x64xf32> to vector<16x64xf32>
    %344 = arith.mulf %238, %343 : vector<16x64xf32>
    %345 = vector.broadcast %342 : vector<1x64xf32> to vector<16x64xf32>
    %346 = arith.addf %344, %345 : vector<16x64xf32>
    %cst_306 = arith.constant 2.000000e-01 : f32
    %347 = vector.broadcast %cst_306 : f32 to vector<16x64xf32>
    %348 = arith.mulf %347, %346 : vector<16x64xf32>
    %349 = arith.maximumf %346, %348 : vector<16x64xf32>
    %350 = vector.broadcast %340 : vector<1x64xf32> to vector<16x64xf32>
    %351 = arith.mulf %312, %350 : vector<16x64xf32>
    %352 = vector.broadcast %342 : vector<1x64xf32> to vector<16x64xf32>
    %353 = arith.addf %351, %352 : vector<16x64xf32>
    %cst_307 = arith.constant 2.000000e-01 : f32
    %354 = vector.broadcast %cst_307 : f32 to vector<16x64xf32>
    %355 = arith.mulf %354, %353 : vector<16x64xf32>
    %356 = arith.maximumf %353, %355 : vector<16x64xf32>
    %c0_308 = arith.constant 0 : index
    %c0_309 = arith.constant 0 : index
    %357 = vector.load %arg10[%c0_308, %c0_309] : memref<1x128xf32, #tpu.memory_space<vmem>>, vector<1x128xf32>
    %c0_310 = arith.constant 0 : index
    %c0_311 = arith.constant 0 : index
    %358 = vector.load %arg11[%c0_310, %c0_311] : memref<1x128xf32, #tpu.memory_space<vmem>>, vector<1x128xf32>
    %359 = arith.truncf %349 : vector<16x64xf32> to vector<16x64xbf16>
    %cst_312 = arith.constant 0.000000e+00 : f32
    %360 = vector.broadcast %cst_312 : f32 to vector<4x128xf32>
    %c0_313 = arith.constant 0 : index
    %c0_314 = arith.constant 0 : index
    %c0_315 = arith.constant 0 : index
    %361 = vector.load %arg8[%c0_313, %c0_314, %c0_315] : memref<9x4x16xbf16, #tpu.memory_space<vmem>>, vector<1x4x16xbf16>
    %362 = vector.shape_cast %361 : vector<1x4x16xbf16> to vector<4x16xbf16>
    %cst_316 = arith.constant dense<0.000000e+00> : vector<4x64xf32>
    %363 = tpu.matmul %362, %359, %cst_316 {dimension_numbers = #tpu.dot_dimension_numbers<[1], [0], [0], [1], [0, 0, 1, 1], [], []>} : vector<4x16xbf16>, vector<16x64xbf16>, vector<4x64xf32> -> vector<4x64xf32>
    %364 = arith.truncf %363 : vector<4x64xf32> to vector<4x64xbf16>
    %c0_317 = arith.constant 0 : index
    %c0_318 = arith.constant 0 : index
    %c0_319 = arith.constant 0 : index
    %365 = vector.load %arg9[%c0_317, %c0_318, %c0_319] : memref<9x64x128xbf16, #tpu.memory_space<vmem>>, vector<1x64x128xbf16>
    %366 = vector.shape_cast %365 : vector<1x64x128xbf16> to vector<64x128xbf16>
    %cst_320 = arith.constant dense<0.000000e+00> : vector<4x128xf32>
    %367 = tpu.matmul %364, %366, %cst_320 {dimension_numbers = #tpu.dot_dimension_numbers<[1], [0], [0], [1], [0, 0, 1, 1], [], []>} : vector<4x64xbf16>, vector<64x128xbf16>, vector<4x128xf32> -> vector<4x128xf32>
    %368 = arith.addf %360, %367 : vector<4x128xf32>
    %c1_321 = arith.constant 1 : index
    %c0_322 = arith.constant 0 : index
    %c0_323 = arith.constant 0 : index
    %369 = vector.load %arg8[%c1_321, %c0_322, %c0_323] : memref<9x4x16xbf16, #tpu.memory_space<vmem>>, vector<1x4x16xbf16>
    %370 = vector.shape_cast %369 : vector<1x4x16xbf16> to vector<4x16xbf16>
    %cst_324 = arith.constant dense<0.000000e+00> : vector<4x64xf32>
    %371 = tpu.matmul %370, %359, %cst_324 {dimension_numbers = #tpu.dot_dimension_numbers<[1], [0], [0], [1], [0, 0, 1, 1], [], []>} : vector<4x16xbf16>, vector<16x64xbf16>, vector<4x64xf32> -> vector<4x64xf32>
    %372 = arith.truncf %371 : vector<4x64xf32> to vector<4x64xbf16>
    %c1_325 = arith.constant 1 : index
    %c0_326 = arith.constant 0 : index
    %c0_327 = arith.constant 0 : index
    %373 = vector.load %arg9[%c1_325, %c0_326, %c0_327] : memref<9x64x128xbf16, #tpu.memory_space<vmem>>, vector<1x64x128xbf16>
    %374 = vector.shape_cast %373 : vector<1x64x128xbf16> to vector<64x128xbf16>
    %cst_328 = arith.constant dense<0.000000e+00> : vector<4x128xf32>
    %375 = tpu.matmul %372, %374, %cst_328 {dimension_numbers = #tpu.dot_dimension_numbers<[1], [0], [0], [1], [0, 0, 1, 1], [], []>} : vector<4x64xbf16>, vector<64x128xbf16>, vector<4x128xf32> -> vector<4x128xf32>
    %376 = arith.addf %368, %375 : vector<4x128xf32>
    %c2_329 = arith.constant 2 : index
    %c0_330 = arith.constant 0 : index
    %c0_331 = arith.constant 0 : index
    %377 = vector.load %arg8[%c2_329, %c0_330, %c0_331] : memref<9x4x16xbf16, #tpu.memory_space<vmem>>, vector<1x4x16xbf16>
    %378 = vector.shape_cast %377 : vector<1x4x16xbf16> to vector<4x16xbf16>
    %cst_332 = arith.constant dense<0.000000e+00> : vector<4x64xf32>
    %379 = tpu.matmul %378, %359, %cst_332 {dimension_numbers = #tpu.dot_dimension_numbers<[1], [0], [0], [1], [0, 0, 1, 1], [], []>} : vector<4x16xbf16>, vector<16x64xbf16>, vector<4x64xf32> -> vector<4x64xf32>
    %380 = arith.truncf %379 : vector<4x64xf32> to vector<4x64xbf16>
    %c2_333 = arith.constant 2 : index
    %c0_334 = arith.constant 0 : index
    %c0_335 = arith.constant 0 : index
    %381 = vector.load %arg9[%c2_333, %c0_334, %c0_335] : memref<9x64x128xbf16, #tpu.memory_space<vmem>>, vector<1x64x128xbf16>
    %382 = vector.shape_cast %381 : vector<1x64x128xbf16> to vector<64x128xbf16>
    %cst_336 = arith.constant dense<0.000000e+00> : vector<4x128xf32>
    %383 = tpu.matmul %380, %382, %cst_336 {dimension_numbers = #tpu.dot_dimension_numbers<[1], [0], [0], [1], [0, 0, 1, 1], [], []>} : vector<4x64xbf16>, vector<64x128xbf16>, vector<4x128xf32> -> vector<4x128xf32>
    %384 = arith.addf %376, %383 : vector<4x128xf32>
    %c3_337 = arith.constant 3 : index
    %c0_338 = arith.constant 0 : index
    %c0_339 = arith.constant 0 : index
    %385 = vector.load %arg8[%c3_337, %c0_338, %c0_339] : memref<9x4x16xbf16, #tpu.memory_space<vmem>>, vector<1x4x16xbf16>
    %386 = vector.shape_cast %385 : vector<1x4x16xbf16> to vector<4x16xbf16>
    %cst_340 = arith.constant dense<0.000000e+00> : vector<4x64xf32>
    %387 = tpu.matmul %386, %359, %cst_340 {dimension_numbers = #tpu.dot_dimension_numbers<[1], [0], [0], [1], [0, 0, 1, 1], [], []>} : vector<4x16xbf16>, vector<16x64xbf16>, vector<4x64xf32> -> vector<4x64xf32>
    %388 = arith.truncf %387 : vector<4x64xf32> to vector<4x64xbf16>
    %c3_341 = arith.constant 3 : index
    %c0_342 = arith.constant 0 : index
    %c0_343 = arith.constant 0 : index
    %389 = vector.load %arg9[%c3_341, %c0_342, %c0_343] : memref<9x64x128xbf16, #tpu.memory_space<vmem>>, vector<1x64x128xbf16>
    %390 = vector.shape_cast %389 : vector<1x64x128xbf16> to vector<64x128xbf16>
    %cst_344 = arith.constant dense<0.000000e+00> : vector<4x128xf32>
    %391 = tpu.matmul %388, %390, %cst_344 {dimension_numbers = #tpu.dot_dimension_numbers<[1], [0], [0], [1], [0, 0, 1, 1], [], []>} : vector<4x64xbf16>, vector<64x128xbf16>, vector<4x128xf32> -> vector<4x128xf32>
    %392 = arith.addf %384, %391 : vector<4x128xf32>
    %c4_345 = arith.constant 4 : index
    %c0_346 = arith.constant 0 : index
    %c0_347 = arith.constant 0 : index
    %393 = vector.load %arg8[%c4_345, %c0_346, %c0_347] : memref<9x4x16xbf16, #tpu.memory_space<vmem>>, vector<1x4x16xbf16>
    %394 = vector.shape_cast %393 : vector<1x4x16xbf16> to vector<4x16xbf16>
    %cst_348 = arith.constant dense<0.000000e+00> : vector<4x64xf32>
    %395 = tpu.matmul %394, %359, %cst_348 {dimension_numbers = #tpu.dot_dimension_numbers<[1], [0], [0], [1], [0, 0, 1, 1], [], []>} : vector<4x16xbf16>, vector<16x64xbf16>, vector<4x64xf32> -> vector<4x64xf32>
    %396 = arith.truncf %395 : vector<4x64xf32> to vector<4x64xbf16>
    %c4_349 = arith.constant 4 : index
    %c0_350 = arith.constant 0 : index
    %c0_351 = arith.constant 0 : index
    %397 = vector.load %arg9[%c4_349, %c0_350, %c0_351] : memref<9x64x128xbf16, #tpu.memory_space<vmem>>, vector<1x64x128xbf16>
    %398 = vector.shape_cast %397 : vector<1x64x128xbf16> to vector<64x128xbf16>
    %cst_352 = arith.constant dense<0.000000e+00> : vector<4x128xf32>
    %399 = tpu.matmul %396, %398, %cst_352 {dimension_numbers = #tpu.dot_dimension_numbers<[1], [0], [0], [1], [0, 0, 1, 1], [], []>} : vector<4x64xbf16>, vector<64x128xbf16>, vector<4x128xf32> -> vector<4x128xf32>
    %400 = arith.addf %392, %399 : vector<4x128xf32>
    %c5_353 = arith.constant 5 : index
    %c0_354 = arith.constant 0 : index
    %c0_355 = arith.constant 0 : index
    %401 = vector.load %arg8[%c5_353, %c0_354, %c0_355] : memref<9x4x16xbf16, #tpu.memory_space<vmem>>, vector<1x4x16xbf16>
    %402 = vector.shape_cast %401 : vector<1x4x16xbf16> to vector<4x16xbf16>
    %cst_356 = arith.constant dense<0.000000e+00> : vector<4x64xf32>
    %403 = tpu.matmul %402, %359, %cst_356 {dimension_numbers = #tpu.dot_dimension_numbers<[1], [0], [0], [1], [0, 0, 1, 1], [], []>} : vector<4x16xbf16>, vector<16x64xbf16>, vector<4x64xf32> -> vector<4x64xf32>
    %404 = arith.truncf %403 : vector<4x64xf32> to vector<4x64xbf16>
    %c5_357 = arith.constant 5 : index
    %c0_358 = arith.constant 0 : index
    %c0_359 = arith.constant 0 : index
    %405 = vector.load %arg9[%c5_357, %c0_358, %c0_359] : memref<9x64x128xbf16, #tpu.memory_space<vmem>>, vector<1x64x128xbf16>
    %406 = vector.shape_cast %405 : vector<1x64x128xbf16> to vector<64x128xbf16>
    %cst_360 = arith.constant dense<0.000000e+00> : vector<4x128xf32>
    %407 = tpu.matmul %404, %406, %cst_360 {dimension_numbers = #tpu.dot_dimension_numbers<[1], [0], [0], [1], [0, 0, 1, 1], [], []>} : vector<4x64xbf16>, vector<64x128xbf16>, vector<4x128xf32> -> vector<4x128xf32>
    %408 = arith.addf %400, %407 : vector<4x128xf32>
    %c6_361 = arith.constant 6 : index
    %c0_362 = arith.constant 0 : index
    %c0_363 = arith.constant 0 : index
    %409 = vector.load %arg8[%c6_361, %c0_362, %c0_363] : memref<9x4x16xbf16, #tpu.memory_space<vmem>>, vector<1x4x16xbf16>
    %410 = vector.shape_cast %409 : vector<1x4x16xbf16> to vector<4x16xbf16>
    %cst_364 = arith.constant dense<0.000000e+00> : vector<4x64xf32>
    %411 = tpu.matmul %410, %359, %cst_364 {dimension_numbers = #tpu.dot_dimension_numbers<[1], [0], [0], [1], [0, 0, 1, 1], [], []>} : vector<4x16xbf16>, vector<16x64xbf16>, vector<4x64xf32> -> vector<4x64xf32>
    %412 = arith.truncf %411 : vector<4x64xf32> to vector<4x64xbf16>
    %c6_365 = arith.constant 6 : index
    %c0_366 = arith.constant 0 : index
    %c0_367 = arith.constant 0 : index
    %413 = vector.load %arg9[%c6_365, %c0_366, %c0_367] : memref<9x64x128xbf16, #tpu.memory_space<vmem>>, vector<1x64x128xbf16>
    %414 = vector.shape_cast %413 : vector<1x64x128xbf16> to vector<64x128xbf16>
    %cst_368 = arith.constant dense<0.000000e+00> : vector<4x128xf32>
    %415 = tpu.matmul %412, %414, %cst_368 {dimension_numbers = #tpu.dot_dimension_numbers<[1], [0], [0], [1], [0, 0, 1, 1], [], []>} : vector<4x64xbf16>, vector<64x128xbf16>, vector<4x128xf32> -> vector<4x128xf32>
    %416 = arith.addf %408, %415 : vector<4x128xf32>
    %c7_369 = arith.constant 7 : index
    %c0_370 = arith.constant 0 : index
    %c0_371 = arith.constant 0 : index
    %417 = vector.load %arg8[%c7_369, %c0_370, %c0_371] : memref<9x4x16xbf16, #tpu.memory_space<vmem>>, vector<1x4x16xbf16>
    %418 = vector.shape_cast %417 : vector<1x4x16xbf16> to vector<4x16xbf16>
    %cst_372 = arith.constant dense<0.000000e+00> : vector<4x64xf32>
    %419 = tpu.matmul %418, %359, %cst_372 {dimension_numbers = #tpu.dot_dimension_numbers<[1], [0], [0], [1], [0, 0, 1, 1], [], []>} : vector<4x16xbf16>, vector<16x64xbf16>, vector<4x64xf32> -> vector<4x64xf32>
    %420 = arith.truncf %419 : vector<4x64xf32> to vector<4x64xbf16>
    %c7_373 = arith.constant 7 : index
    %c0_374 = arith.constant 0 : index
    %c0_375 = arith.constant 0 : index
    %421 = vector.load %arg9[%c7_373, %c0_374, %c0_375] : memref<9x64x128xbf16, #tpu.memory_space<vmem>>, vector<1x64x128xbf16>
    %422 = vector.shape_cast %421 : vector<1x64x128xbf16> to vector<64x128xbf16>
    %cst_376 = arith.constant dense<0.000000e+00> : vector<4x128xf32>
    %423 = tpu.matmul %420, %422, %cst_376 {dimension_numbers = #tpu.dot_dimension_numbers<[1], [0], [0], [1], [0, 0, 1, 1], [], []>} : vector<4x64xbf16>, vector<64x128xbf16>, vector<4x128xf32> -> vector<4x128xf32>
    %424 = arith.addf %416, %423 : vector<4x128xf32>
    %c8_377 = arith.constant 8 : index
    %c0_378 = arith.constant 0 : index
    %c0_379 = arith.constant 0 : index
    %425 = vector.load %arg8[%c8_377, %c0_378, %c0_379] : memref<9x4x16xbf16, #tpu.memory_space<vmem>>, vector<1x4x16xbf16>
    %426 = vector.shape_cast %425 : vector<1x4x16xbf16> to vector<4x16xbf16>
    %cst_380 = arith.constant dense<0.000000e+00> : vector<4x64xf32>
    %427 = tpu.matmul %426, %359, %cst_380 {dimension_numbers = #tpu.dot_dimension_numbers<[1], [0], [0], [1], [0, 0, 1, 1], [], []>} : vector<4x16xbf16>, vector<16x64xbf16>, vector<4x64xf32> -> vector<4x64xf32>
    %428 = arith.truncf %427 : vector<4x64xf32> to vector<4x64xbf16>
    %c8_381 = arith.constant 8 : index
    %c0_382 = arith.constant 0 : index
    %c0_383 = arith.constant 0 : index
    %429 = vector.load %arg9[%c8_381, %c0_382, %c0_383] : memref<9x64x128xbf16, #tpu.memory_space<vmem>>, vector<1x64x128xbf16>
    %430 = vector.shape_cast %429 : vector<1x64x128xbf16> to vector<64x128xbf16>
    %cst_384 = arith.constant dense<0.000000e+00> : vector<4x128xf32>
    %431 = tpu.matmul %428, %430, %cst_384 {dimension_numbers = #tpu.dot_dimension_numbers<[1], [0], [0], [1], [0, 0, 1, 1], [], []>} : vector<4x64xbf16>, vector<64x128xbf16>, vector<4x128xf32> -> vector<4x128xf32>
    %432 = arith.addf %424, %431 : vector<4x128xf32>
    %433 = arith.truncf %356 : vector<16x64xf32> to vector<16x64xbf16>
    %cst_385 = arith.constant 0.000000e+00 : f32
    %434 = vector.broadcast %cst_385 : f32 to vector<4x128xf32>
    %c0_386 = arith.constant 0 : index
    %c0_387 = arith.constant 0 : index
    %c0_388 = arith.constant 0 : index
    %435 = vector.load %arg8[%c0_386, %c0_387, %c0_388] : memref<9x4x16xbf16, #tpu.memory_space<vmem>>, vector<1x4x16xbf16>
    %436 = vector.shape_cast %435 : vector<1x4x16xbf16> to vector<4x16xbf16>
    %cst_389 = arith.constant dense<0.000000e+00> : vector<4x64xf32>
    %437 = tpu.matmul %436, %433, %cst_389 {dimension_numbers = #tpu.dot_dimension_numbers<[1], [0], [0], [1], [0, 0, 1, 1], [], []>} : vector<4x16xbf16>, vector<16x64xbf16>, vector<4x64xf32> -> vector<4x64xf32>
    %438 = arith.truncf %437 : vector<4x64xf32> to vector<4x64xbf16>
    %c0_390 = arith.constant 0 : index
    %c0_391 = arith.constant 0 : index
    %c0_392 = arith.constant 0 : index
    %439 = vector.load %arg9[%c0_390, %c0_391, %c0_392] : memref<9x64x128xbf16, #tpu.memory_space<vmem>>, vector<1x64x128xbf16>
    %440 = vector.shape_cast %439 : vector<1x64x128xbf16> to vector<64x128xbf16>
    %cst_393 = arith.constant dense<0.000000e+00> : vector<4x128xf32>
    %441 = tpu.matmul %438, %440, %cst_393 {dimension_numbers = #tpu.dot_dimension_numbers<[1], [0], [0], [1], [0, 0, 1, 1], [], []>} : vector<4x64xbf16>, vector<64x128xbf16>, vector<4x128xf32> -> vector<4x128xf32>
    %442 = arith.addf %434, %441 : vector<4x128xf32>
    %c1_394 = arith.constant 1 : index
    %c0_395 = arith.constant 0 : index
    %c0_396 = arith.constant 0 : index
    %443 = vector.load %arg8[%c1_394, %c0_395, %c0_396] : memref<9x4x16xbf16, #tpu.memory_space<vmem>>, vector<1x4x16xbf16>
    %444 = vector.shape_cast %443 : vector<1x4x16xbf16> to vector<4x16xbf16>
    %cst_397 = arith.constant dense<0.000000e+00> : vector<4x64xf32>
    %445 = tpu.matmul %444, %433, %cst_397 {dimension_numbers = #tpu.dot_dimension_numbers<[1], [0], [0], [1], [0, 0, 1, 1], [], []>} : vector<4x16xbf16>, vector<16x64xbf16>, vector<4x64xf32> -> vector<4x64xf32>
    %446 = arith.truncf %445 : vector<4x64xf32> to vector<4x64xbf16>
    %c1_398 = arith.constant 1 : index
    %c0_399 = arith.constant 0 : index
    %c0_400 = arith.constant 0 : index
    %447 = vector.load %arg9[%c1_398, %c0_399, %c0_400] : memref<9x64x128xbf16, #tpu.memory_space<vmem>>, vector<1x64x128xbf16>
    %448 = vector.shape_cast %447 : vector<1x64x128xbf16> to vector<64x128xbf16>
    %cst_401 = arith.constant dense<0.000000e+00> : vector<4x128xf32>
    %449 = tpu.matmul %446, %448, %cst_401 {dimension_numbers = #tpu.dot_dimension_numbers<[1], [0], [0], [1], [0, 0, 1, 1], [], []>} : vector<4x64xbf16>, vector<64x128xbf16>, vector<4x128xf32> -> vector<4x128xf32>
    %450 = arith.addf %442, %449 : vector<4x128xf32>
    %c2_402 = arith.constant 2 : index
    %c0_403 = arith.constant 0 : index
    %c0_404 = arith.constant 0 : index
    %451 = vector.load %arg8[%c2_402, %c0_403, %c0_404] : memref<9x4x16xbf16, #tpu.memory_space<vmem>>, vector<1x4x16xbf16>
    %452 = vector.shape_cast %451 : vector<1x4x16xbf16> to vector<4x16xbf16>
    %cst_405 = arith.constant dense<0.000000e+00> : vector<4x64xf32>
    %453 = tpu.matmul %452, %433, %cst_405 {dimension_numbers = #tpu.dot_dimension_numbers<[1], [0], [0], [1], [0, 0, 1, 1], [], []>} : vector<4x16xbf16>, vector<16x64xbf16>, vector<4x64xf32> -> vector<4x64xf32>
    %454 = arith.truncf %453 : vector<4x64xf32> to vector<4x64xbf16>
    %c2_406 = arith.constant 2 : index
    %c0_407 = arith.constant 0 : index
    %c0_408 = arith.constant 0 : index
    %455 = vector.load %arg9[%c2_406, %c0_407, %c0_408] : memref<9x64x128xbf16, #tpu.memory_space<vmem>>, vector<1x64x128xbf16>
    %456 = vector.shape_cast %455 : vector<1x64x128xbf16> to vector<64x128xbf16>
    %cst_409 = arith.constant dense<0.000000e+00> : vector<4x128xf32>
    %457 = tpu.matmul %454, %456, %cst_409 {dimension_numbers = #tpu.dot_dimension_numbers<[1], [0], [0], [1], [0, 0, 1, 1], [], []>} : vector<4x64xbf16>, vector<64x128xbf16>, vector<4x128xf32> -> vector<4x128xf32>
    %458 = arith.addf %450, %457 : vector<4x128xf32>
    %c3_410 = arith.constant 3 : index
    %c0_411 = arith.constant 0 : index
    %c0_412 = arith.constant 0 : index
    %459 = vector.load %arg8[%c3_410, %c0_411, %c0_412] : memref<9x4x16xbf16, #tpu.memory_space<vmem>>, vector<1x4x16xbf16>
    %460 = vector.shape_cast %459 : vector<1x4x16xbf16> to vector<4x16xbf16>
    %cst_413 = arith.constant dense<0.000000e+00> : vector<4x64xf32>
    %461 = tpu.matmul %460, %433, %cst_413 {dimension_numbers = #tpu.dot_dimension_numbers<[1], [0], [0], [1], [0, 0, 1, 1], [], []>} : vector<4x16xbf16>, vector<16x64xbf16>, vector<4x64xf32> -> vector<4x64xf32>
    %462 = arith.truncf %461 : vector<4x64xf32> to vector<4x64xbf16>
    %c3_414 = arith.constant 3 : index
    %c0_415 = arith.constant 0 : index
    %c0_416 = arith.constant 0 : index
    %463 = vector.load %arg9[%c3_414, %c0_415, %c0_416] : memref<9x64x128xbf16, #tpu.memory_space<vmem>>, vector<1x64x128xbf16>
    %464 = vector.shape_cast %463 : vector<1x64x128xbf16> to vector<64x128xbf16>
    %cst_417 = arith.constant dense<0.000000e+00> : vector<4x128xf32>
    %465 = tpu.matmul %462, %464, %cst_417 {dimension_numbers = #tpu.dot_dimension_numbers<[1], [0], [0], [1], [0, 0, 1, 1], [], []>} : vector<4x64xbf16>, vector<64x128xbf16>, vector<4x128xf32> -> vector<4x128xf32>
    %466 = arith.addf %458, %465 : vector<4x128xf32>
    %c4_418 = arith.constant 4 : index
    %c0_419 = arith.constant 0 : index
    %c0_420 = arith.constant 0 : index
    %467 = vector.load %arg8[%c4_418, %c0_419, %c0_420] : memref<9x4x16xbf16, #tpu.memory_space<vmem>>, vector<1x4x16xbf16>
    %468 = vector.shape_cast %467 : vector<1x4x16xbf16> to vector<4x16xbf16>
    %cst_421 = arith.constant dense<0.000000e+00> : vector<4x64xf32>
    %469 = tpu.matmul %468, %433, %cst_421 {dimension_numbers = #tpu.dot_dimension_numbers<[1], [0], [0], [1], [0, 0, 1, 1], [], []>} : vector<4x16xbf16>, vector<16x64xbf16>, vector<4x64xf32> -> vector<4x64xf32>
    %470 = arith.truncf %469 : vector<4x64xf32> to vector<4x64xbf16>
    %c4_422 = arith.constant 4 : index
    %c0_423 = arith.constant 0 : index
    %c0_424 = arith.constant 0 : index
    %471 = vector.load %arg9[%c4_422, %c0_423, %c0_424] : memref<9x64x128xbf16, #tpu.memory_space<vmem>>, vector<1x64x128xbf16>
    %472 = vector.shape_cast %471 : vector<1x64x128xbf16> to vector<64x128xbf16>
    %cst_425 = arith.constant dense<0.000000e+00> : vector<4x128xf32>
    %473 = tpu.matmul %470, %472, %cst_425 {dimension_numbers = #tpu.dot_dimension_numbers<[1], [0], [0], [1], [0, 0, 1, 1], [], []>} : vector<4x64xbf16>, vector<64x128xbf16>, vector<4x128xf32> -> vector<4x128xf32>
    %474 = arith.addf %466, %473 : vector<4x128xf32>
    %c5_426 = arith.constant 5 : index
    %c0_427 = arith.constant 0 : index
    %c0_428 = arith.constant 0 : index
    %475 = vector.load %arg8[%c5_426, %c0_427, %c0_428] : memref<9x4x16xbf16, #tpu.memory_space<vmem>>, vector<1x4x16xbf16>
    %476 = vector.shape_cast %475 : vector<1x4x16xbf16> to vector<4x16xbf16>
    %cst_429 = arith.constant dense<0.000000e+00> : vector<4x64xf32>
    %477 = tpu.matmul %476, %433, %cst_429 {dimension_numbers = #tpu.dot_dimension_numbers<[1], [0], [0], [1], [0, 0, 1, 1], [], []>} : vector<4x16xbf16>, vector<16x64xbf16>, vector<4x64xf32> -> vector<4x64xf32>
    %478 = arith.truncf %477 : vector<4x64xf32> to vector<4x64xbf16>
    %c5_430 = arith.constant 5 : index
    %c0_431 = arith.constant 0 : index
    %c0_432 = arith.constant 0 : index
    %479 = vector.load %arg9[%c5_430, %c0_431, %c0_432] : memref<9x64x128xbf16, #tpu.memory_space<vmem>>, vector<1x64x128xbf16>
    %480 = vector.shape_cast %479 : vector<1x64x128xbf16> to vector<64x128xbf16>
    %cst_433 = arith.constant dense<0.000000e+00> : vector<4x128xf32>
    %481 = tpu.matmul %478, %480, %cst_433 {dimension_numbers = #tpu.dot_dimension_numbers<[1], [0], [0], [1], [0, 0, 1, 1], [], []>} : vector<4x64xbf16>, vector<64x128xbf16>, vector<4x128xf32> -> vector<4x128xf32>
    %482 = arith.addf %474, %481 : vector<4x128xf32>
    %c6_434 = arith.constant 6 : index
    %c0_435 = arith.constant 0 : index
    %c0_436 = arith.constant 0 : index
    %483 = vector.load %arg8[%c6_434, %c0_435, %c0_436] : memref<9x4x16xbf16, #tpu.memory_space<vmem>>, vector<1x4x16xbf16>
    %484 = vector.shape_cast %483 : vector<1x4x16xbf16> to vector<4x16xbf16>
    %cst_437 = arith.constant dense<0.000000e+00> : vector<4x64xf32>
    %485 = tpu.matmul %484, %433, %cst_437 {dimension_numbers = #tpu.dot_dimension_numbers<[1], [0], [0], [1], [0, 0, 1, 1], [], []>} : vector<4x16xbf16>, vector<16x64xbf16>, vector<4x64xf32> -> vector<4x64xf32>
    %486 = arith.truncf %485 : vector<4x64xf32> to vector<4x64xbf16>
    %c6_438 = arith.constant 6 : index
    %c0_439 = arith.constant 0 : index
    %c0_440 = arith.constant 0 : index
    %487 = vector.load %arg9[%c6_438, %c0_439, %c0_440] : memref<9x64x128xbf16, #tpu.memory_space<vmem>>, vector<1x64x128xbf16>
    %488 = vector.shape_cast %487 : vector<1x64x128xbf16> to vector<64x128xbf16>
    %cst_441 = arith.constant dense<0.000000e+00> : vector<4x128xf32>
    %489 = tpu.matmul %486, %488, %cst_441 {dimension_numbers = #tpu.dot_dimension_numbers<[1], [0], [0], [1], [0, 0, 1, 1], [], []>} : vector<4x64xbf16>, vector<64x128xbf16>, vector<4x128xf32> -> vector<4x128xf32>
    %490 = arith.addf %482, %489 : vector<4x128xf32>
    %c7_442 = arith.constant 7 : index
    %c0_443 = arith.constant 0 : index
    %c0_444 = arith.constant 0 : index
    %491 = vector.load %arg8[%c7_442, %c0_443, %c0_444] : memref<9x4x16xbf16, #tpu.memory_space<vmem>>, vector<1x4x16xbf16>
    %492 = vector.shape_cast %491 : vector<1x4x16xbf16> to vector<4x16xbf16>
    %cst_445 = arith.constant dense<0.000000e+00> : vector<4x64xf32>
    %493 = tpu.matmul %492, %433, %cst_445 {dimension_numbers = #tpu.dot_dimension_numbers<[1], [0], [0], [1], [0, 0, 1, 1], [], []>} : vector<4x16xbf16>, vector<16x64xbf16>, vector<4x64xf32> -> vector<4x64xf32>
    %494 = arith.truncf %493 : vector<4x64xf32> to vector<4x64xbf16>
    %c7_446 = arith.constant 7 : index
    %c0_447 = arith.constant 0 : index
    %c0_448 = arith.constant 0 : index
    %495 = vector.load %arg9[%c7_446, %c0_447, %c0_448] : memref<9x64x128xbf16, #tpu.memory_space<vmem>>, vector<1x64x128xbf16>
    %496 = vector.shape_cast %495 : vector<1x64x128xbf16> to vector<64x128xbf16>
    %cst_449 = arith.constant dense<0.000000e+00> : vector<4x128xf32>
    %497 = tpu.matmul %494, %496, %cst_449 {dimension_numbers = #tpu.dot_dimension_numbers<[1], [0], [0], [1], [0, 0, 1, 1], [], []>} : vector<4x64xbf16>, vector<64x128xbf16>, vector<4x128xf32> -> vector<4x128xf32>
    %498 = arith.addf %490, %497 : vector<4x128xf32>
    %c8_450 = arith.constant 8 : index
    %c0_451 = arith.constant 0 : index
    %c0_452 = arith.constant 0 : index
    %499 = vector.load %arg8[%c8_450, %c0_451, %c0_452] : memref<9x4x16xbf16, #tpu.memory_space<vmem>>, vector<1x4x16xbf16>
    %500 = vector.shape_cast %499 : vector<1x4x16xbf16> to vector<4x16xbf16>
    %cst_453 = arith.constant dense<0.000000e+00> : vector<4x64xf32>
    %501 = tpu.matmul %500, %433, %cst_453 {dimension_numbers = #tpu.dot_dimension_numbers<[1], [0], [0], [1], [0, 0, 1, 1], [], []>} : vector<4x16xbf16>, vector<16x64xbf16>, vector<4x64xf32> -> vector<4x64xf32>
    %502 = arith.truncf %501 : vector<4x64xf32> to vector<4x64xbf16>
    %c8_454 = arith.constant 8 : index
    %c0_455 = arith.constant 0 : index
    %c0_456 = arith.constant 0 : index
    %503 = vector.load %arg9[%c8_454, %c0_455, %c0_456] : memref<9x64x128xbf16, #tpu.memory_space<vmem>>, vector<1x64x128xbf16>
    %504 = vector.shape_cast %503 : vector<1x64x128xbf16> to vector<64x128xbf16>
    %cst_457 = arith.constant dense<0.000000e+00> : vector<4x128xf32>
    %505 = tpu.matmul %502, %504, %cst_457 {dimension_numbers = #tpu.dot_dimension_numbers<[1], [0], [0], [1], [0, 0, 1, 1], [], []>} : vector<4x64xbf16>, vector<64x128xbf16>, vector<4x128xf32> -> vector<4x128xf32>
    %506 = arith.addf %498, %505 : vector<4x128xf32>
    %cst_458 = arith.constant 0.000000e+00 : f32
    %507 = vector.broadcast %cst_458 : f32 to vector<1x128xf32>
    %cst_459 = arith.constant 0.000000e+00 : f32
    %508 = vector.broadcast %cst_459 : f32 to vector<1x128xf32>
    %cst_460 = arith.constant dense<0.000000e+00> : vector<128xf32>
    %509 = vector.multi_reduction <add>, %432, %cst_460 [0] : vector<4x128xf32> to vector<128xf32>
    %510 = vector.shape_cast %509 : vector<128xf32> to vector<1x128xf32>
    %511 = arith.addf %507, %510 : vector<1x128xf32>
    %512 = arith.mulf %432, %432 : vector<4x128xf32>
    %cst_461 = arith.constant dense<0.000000e+00> : vector<128xf32>
    %513 = vector.multi_reduction <add>, %512, %cst_461 [0] : vector<4x128xf32> to vector<128xf32>
    %514 = vector.shape_cast %513 : vector<128xf32> to vector<1x128xf32>
    %515 = arith.addf %508, %514 : vector<1x128xf32>
    %cst_462 = arith.constant dense<0.000000e+00> : vector<128xf32>
    %516 = vector.multi_reduction <add>, %506, %cst_462 [0] : vector<4x128xf32> to vector<128xf32>
    %517 = vector.shape_cast %516 : vector<128xf32> to vector<1x128xf32>
    %518 = arith.addf %511, %517 : vector<1x128xf32>
    %519 = arith.mulf %506, %506 : vector<4x128xf32>
    %cst_463 = arith.constant dense<0.000000e+00> : vector<128xf32>
    %520 = vector.multi_reduction <add>, %519, %cst_463 [0] : vector<4x128xf32> to vector<128xf32>
    %521 = vector.shape_cast %520 : vector<128xf32> to vector<1x128xf32>
    %522 = arith.addf %515, %521 : vector<1x128xf32>
    %cst_464 = arith.constant 8.000000e+00 : f32
    %523 = vector.broadcast %cst_464 : f32 to vector<1x128xf32>
    %524 = arith.divf %518, %523 : vector<1x128xf32>
    %cst_465 = arith.constant 8.000000e+00 : f32
    %525 = vector.broadcast %cst_465 : f32 to vector<1x128xf32>
    %526 = arith.divf %522, %525 : vector<1x128xf32>
    %527 = arith.mulf %524, %524 : vector<1x128xf32>
    %528 = arith.subf %526, %527 : vector<1x128xf32>
    %cst_466 = arith.constant 0.000000e+00 : f32
    %529 = vector.broadcast %cst_466 : f32 to vector<1x128xf32>
    %530 = arith.maximumf %528, %529 : vector<1x128xf32>
    %cst_467 = arith.constant 9.99999974E-6 : f32
    %531 = vector.broadcast %cst_467 : f32 to vector<1x128xf32>
    %532 = arith.addf %530, %531 : vector<1x128xf32>
    %533 = math.rsqrt %532 : vector<1x128xf32>
    %534 = arith.mulf %357, %533 : vector<1x128xf32>
    %535 = arith.mulf %524, %534 : vector<1x128xf32>
    %536 = arith.subf %358, %535 : vector<1x128xf32>
    %537 = vector.broadcast %534 : vector<1x128xf32> to vector<4x128xf32>
    %538 = arith.mulf %432, %537 : vector<4x128xf32>
    %539 = vector.broadcast %536 : vector<1x128xf32> to vector<4x128xf32>
    %540 = arith.addf %538, %539 : vector<4x128xf32>
    %cst_468 = arith.constant 2.000000e-01 : f32
    %541 = vector.broadcast %cst_468 : f32 to vector<4x128xf32>
    %542 = arith.mulf %541, %540 : vector<4x128xf32>
    %543 = arith.maximumf %540, %542 : vector<4x128xf32>
    %544 = vector.broadcast %534 : vector<1x128xf32> to vector<4x128xf32>
    %545 = arith.mulf %506, %544 : vector<4x128xf32>
    %546 = vector.broadcast %536 : vector<1x128xf32> to vector<4x128xf32>
    %547 = arith.addf %545, %546 : vector<4x128xf32>
    %cst_469 = arith.constant 2.000000e-01 : f32
    %548 = vector.broadcast %cst_469 : f32 to vector<4x128xf32>
    %549 = arith.mulf %548, %547 : vector<4x128xf32>
    %550 = arith.maximumf %547, %549 : vector<4x128xf32>
    %c0_470 = arith.constant 0 : index
    %c0_471 = arith.constant 0 : index
    %551 = vector.load %arg14[%c0_470, %c0_471] : memref<1x256xf32, #tpu.memory_space<vmem>>, vector<1x256xf32>
    %c0_472 = arith.constant 0 : index
    %c0_473 = arith.constant 0 : index
    %552 = vector.load %arg15[%c0_472, %c0_473] : memref<1x256xf32, #tpu.memory_space<vmem>>, vector<1x256xf32>
    %553 = arith.truncf %543 : vector<4x128xf32> to vector<4x128xbf16>
    %cst_474 = arith.constant 0.000000e+00 : f32
    %554 = vector.broadcast %cst_474 : f32 to vector<1x256xf32>
    %c0_475 = arith.constant 0 : index
    %c0_476 = arith.constant 0 : index
    %c0_477 = arith.constant 0 : index
    %555 = vector.load %arg12[%c0_475, %c0_476, %c0_477] : memref<9x1x4xbf16, #tpu.memory_space<vmem>>, vector<1x1x4xbf16>
    %556 = vector.shape_cast %555 : vector<1x1x4xbf16> to vector<1x4xbf16>
    %cst_478 = arith.constant dense<0.000000e+00> : vector<1x128xf32>
    %557 = tpu.matmul %556, %553, %cst_478 {dimension_numbers = #tpu.dot_dimension_numbers<[1], [0], [0], [1], [0, 0, 1, 1], [], []>} : vector<1x4xbf16>, vector<4x128xbf16>, vector<1x128xf32> -> vector<1x128xf32>
    %558 = arith.truncf %557 : vector<1x128xf32> to vector<1x128xbf16>
    %c0_479 = arith.constant 0 : index
    %c0_480 = arith.constant 0 : index
    %c0_481 = arith.constant 0 : index
    %559 = vector.load %arg13[%c0_479, %c0_480, %c0_481] : memref<9x128x256xbf16, #tpu.memory_space<vmem>>, vector<1x128x256xbf16>
    %560 = vector.shape_cast %559 : vector<1x128x256xbf16> to vector<128x256xbf16>
    %cst_482 = arith.constant dense<0.000000e+00> : vector<1x256xf32>
    %561 = tpu.matmul %558, %560, %cst_482 {dimension_numbers = #tpu.dot_dimension_numbers<[1], [0], [0], [1], [0, 0, 1, 1], [], []>} : vector<1x128xbf16>, vector<128x256xbf16>, vector<1x256xf32> -> vector<1x256xf32>
    %562 = arith.addf %554, %561 : vector<1x256xf32>
    %c1_483 = arith.constant 1 : index
    %c0_484 = arith.constant 0 : index
    %c0_485 = arith.constant 0 : index
    %563 = vector.load %arg12[%c1_483, %c0_484, %c0_485] : memref<9x1x4xbf16, #tpu.memory_space<vmem>>, vector<1x1x4xbf16>
    %564 = vector.shape_cast %563 : vector<1x1x4xbf16> to vector<1x4xbf16>
    %cst_486 = arith.constant dense<0.000000e+00> : vector<1x128xf32>
    %565 = tpu.matmul %564, %553, %cst_486 {dimension_numbers = #tpu.dot_dimension_numbers<[1], [0], [0], [1], [0, 0, 1, 1], [], []>} : vector<1x4xbf16>, vector<4x128xbf16>, vector<1x128xf32> -> vector<1x128xf32>
    %566 = arith.truncf %565 : vector<1x128xf32> to vector<1x128xbf16>
    %c1_487 = arith.constant 1 : index
    %c0_488 = arith.constant 0 : index
    %c0_489 = arith.constant 0 : index
    %567 = vector.load %arg13[%c1_487, %c0_488, %c0_489] : memref<9x128x256xbf16, #tpu.memory_space<vmem>>, vector<1x128x256xbf16>
    %568 = vector.shape_cast %567 : vector<1x128x256xbf16> to vector<128x256xbf16>
    %cst_490 = arith.constant dense<0.000000e+00> : vector<1x256xf32>
    %569 = tpu.matmul %566, %568, %cst_490 {dimension_numbers = #tpu.dot_dimension_numbers<[1], [0], [0], [1], [0, 0, 1, 1], [], []>} : vector<1x128xbf16>, vector<128x256xbf16>, vector<1x256xf32> -> vector<1x256xf32>
    %570 = arith.addf %562, %569 : vector<1x256xf32>
    %c2_491 = arith.constant 2 : index
    %c0_492 = arith.constant 0 : index
    %c0_493 = arith.constant 0 : index
    %571 = vector.load %arg12[%c2_491, %c0_492, %c0_493] : memref<9x1x4xbf16, #tpu.memory_space<vmem>>, vector<1x1x4xbf16>
    %572 = vector.shape_cast %571 : vector<1x1x4xbf16> to vector<1x4xbf16>
    %cst_494 = arith.constant dense<0.000000e+00> : vector<1x128xf32>
    %573 = tpu.matmul %572, %553, %cst_494 {dimension_numbers = #tpu.dot_dimension_numbers<[1], [0], [0], [1], [0, 0, 1, 1], [], []>} : vector<1x4xbf16>, vector<4x128xbf16>, vector<1x128xf32> -> vector<1x128xf32>
    %574 = arith.truncf %573 : vector<1x128xf32> to vector<1x128xbf16>
    %c2_495 = arith.constant 2 : index
    %c0_496 = arith.constant 0 : index
    %c0_497 = arith.constant 0 : index
    %575 = vector.load %arg13[%c2_495, %c0_496, %c0_497] : memref<9x128x256xbf16, #tpu.memory_space<vmem>>, vector<1x128x256xbf16>
    %576 = vector.shape_cast %575 : vector<1x128x256xbf16> to vector<128x256xbf16>
    %cst_498 = arith.constant dense<0.000000e+00> : vector<1x256xf32>
    %577 = tpu.matmul %574, %576, %cst_498 {dimension_numbers = #tpu.dot_dimension_numbers<[1], [0], [0], [1], [0, 0, 1, 1], [], []>} : vector<1x128xbf16>, vector<128x256xbf16>, vector<1x256xf32> -> vector<1x256xf32>
    %578 = arith.addf %570, %577 : vector<1x256xf32>
    %c3_499 = arith.constant 3 : index
    %c0_500 = arith.constant 0 : index
    %c0_501 = arith.constant 0 : index
    %579 = vector.load %arg12[%c3_499, %c0_500, %c0_501] : memref<9x1x4xbf16, #tpu.memory_space<vmem>>, vector<1x1x4xbf16>
    %580 = vector.shape_cast %579 : vector<1x1x4xbf16> to vector<1x4xbf16>
    %cst_502 = arith.constant dense<0.000000e+00> : vector<1x128xf32>
    %581 = tpu.matmul %580, %553, %cst_502 {dimension_numbers = #tpu.dot_dimension_numbers<[1], [0], [0], [1], [0, 0, 1, 1], [], []>} : vector<1x4xbf16>, vector<4x128xbf16>, vector<1x128xf32> -> vector<1x128xf32>
    %582 = arith.truncf %581 : vector<1x128xf32> to vector<1x128xbf16>
    %c3_503 = arith.constant 3 : index
    %c0_504 = arith.constant 0 : index
    %c0_505 = arith.constant 0 : index
    %583 = vector.load %arg13[%c3_503, %c0_504, %c0_505] : memref<9x128x256xbf16, #tpu.memory_space<vmem>>, vector<1x128x256xbf16>
    %584 = vector.shape_cast %583 : vector<1x128x256xbf16> to vector<128x256xbf16>
    %cst_506 = arith.constant dense<0.000000e+00> : vector<1x256xf32>
    %585 = tpu.matmul %582, %584, %cst_506 {dimension_numbers = #tpu.dot_dimension_numbers<[1], [0], [0], [1], [0, 0, 1, 1], [], []>} : vector<1x128xbf16>, vector<128x256xbf16>, vector<1x256xf32> -> vector<1x256xf32>
    %586 = arith.addf %578, %585 : vector<1x256xf32>
    %c4_507 = arith.constant 4 : index
    %c0_508 = arith.constant 0 : index
    %c0_509 = arith.constant 0 : index
    %587 = vector.load %arg12[%c4_507, %c0_508, %c0_509] : memref<9x1x4xbf16, #tpu.memory_space<vmem>>, vector<1x1x4xbf16>
    %588 = vector.shape_cast %587 : vector<1x1x4xbf16> to vector<1x4xbf16>
    %cst_510 = arith.constant dense<0.000000e+00> : vector<1x128xf32>
    %589 = tpu.matmul %588, %553, %cst_510 {dimension_numbers = #tpu.dot_dimension_numbers<[1], [0], [0], [1], [0, 0, 1, 1], [], []>} : vector<1x4xbf16>, vector<4x128xbf16>, vector<1x128xf32> -> vector<1x128xf32>
    %590 = arith.truncf %589 : vector<1x128xf32> to vector<1x128xbf16>
    %c4_511 = arith.constant 4 : index
    %c0_512 = arith.constant 0 : index
    %c0_513 = arith.constant 0 : index
    %591 = vector.load %arg13[%c4_511, %c0_512, %c0_513] : memref<9x128x256xbf16, #tpu.memory_space<vmem>>, vector<1x128x256xbf16>
    %592 = vector.shape_cast %591 : vector<1x128x256xbf16> to vector<128x256xbf16>
    %cst_514 = arith.constant dense<0.000000e+00> : vector<1x256xf32>
    %593 = tpu.matmul %590, %592, %cst_514 {dimension_numbers = #tpu.dot_dimension_numbers<[1], [0], [0], [1], [0, 0, 1, 1], [], []>} : vector<1x128xbf16>, vector<128x256xbf16>, vector<1x256xf32> -> vector<1x256xf32>
    %594 = arith.addf %586, %593 : vector<1x256xf32>
    %c5_515 = arith.constant 5 : index
    %c0_516 = arith.constant 0 : index
    %c0_517 = arith.constant 0 : index
    %595 = vector.load %arg12[%c5_515, %c0_516, %c0_517] : memref<9x1x4xbf16, #tpu.memory_space<vmem>>, vector<1x1x4xbf16>
    %596 = vector.shape_cast %595 : vector<1x1x4xbf16> to vector<1x4xbf16>
    %cst_518 = arith.constant dense<0.000000e+00> : vector<1x128xf32>
    %597 = tpu.matmul %596, %553, %cst_518 {dimension_numbers = #tpu.dot_dimension_numbers<[1], [0], [0], [1], [0, 0, 1, 1], [], []>} : vector<1x4xbf16>, vector<4x128xbf16>, vector<1x128xf32> -> vector<1x128xf32>
    %598 = arith.truncf %597 : vector<1x128xf32> to vector<1x128xbf16>
    %c5_519 = arith.constant 5 : index
    %c0_520 = arith.constant 0 : index
    %c0_521 = arith.constant 0 : index
    %599 = vector.load %arg13[%c5_519, %c0_520, %c0_521] : memref<9x128x256xbf16, #tpu.memory_space<vmem>>, vector<1x128x256xbf16>
    %600 = vector.shape_cast %599 : vector<1x128x256xbf16> to vector<128x256xbf16>
    %cst_522 = arith.constant dense<0.000000e+00> : vector<1x256xf32>
    %601 = tpu.matmul %598, %600, %cst_522 {dimension_numbers = #tpu.dot_dimension_numbers<[1], [0], [0], [1], [0, 0, 1, 1], [], []>} : vector<1x128xbf16>, vector<128x256xbf16>, vector<1x256xf32> -> vector<1x256xf32>
    %602 = arith.addf %594, %601 : vector<1x256xf32>
    %c6_523 = arith.constant 6 : index
    %c0_524 = arith.constant 0 : index
    %c0_525 = arith.constant 0 : index
    %603 = vector.load %arg12[%c6_523, %c0_524, %c0_525] : memref<9x1x4xbf16, #tpu.memory_space<vmem>>, vector<1x1x4xbf16>
    %604 = vector.shape_cast %603 : vector<1x1x4xbf16> to vector<1x4xbf16>
    %cst_526 = arith.constant dense<0.000000e+00> : vector<1x128xf32>
    %605 = tpu.matmul %604, %553, %cst_526 {dimension_numbers = #tpu.dot_dimension_numbers<[1], [0], [0], [1], [0, 0, 1, 1], [], []>} : vector<1x4xbf16>, vector<4x128xbf16>, vector<1x128xf32> -> vector<1x128xf32>
    %606 = arith.truncf %605 : vector<1x128xf32> to vector<1x128xbf16>
    %c6_527 = arith.constant 6 : index
    %c0_528 = arith.constant 0 : index
    %c0_529 = arith.constant 0 : index
    %607 = vector.load %arg13[%c6_527, %c0_528, %c0_529] : memref<9x128x256xbf16, #tpu.memory_space<vmem>>, vector<1x128x256xbf16>
    %608 = vector.shape_cast %607 : vector<1x128x256xbf16> to vector<128x256xbf16>
    %cst_530 = arith.constant dense<0.000000e+00> : vector<1x256xf32>
    %609 = tpu.matmul %606, %608, %cst_530 {dimension_numbers = #tpu.dot_dimension_numbers<[1], [0], [0], [1], [0, 0, 1, 1], [], []>} : vector<1x128xbf16>, vector<128x256xbf16>, vector<1x256xf32> -> vector<1x256xf32>
    %610 = arith.addf %602, %609 : vector<1x256xf32>
    %c7_531 = arith.constant 7 : index
    %c0_532 = arith.constant 0 : index
    %c0_533 = arith.constant 0 : index
    %611 = vector.load %arg12[%c7_531, %c0_532, %c0_533] : memref<9x1x4xbf16, #tpu.memory_space<vmem>>, vector<1x1x4xbf16>
    %612 = vector.shape_cast %611 : vector<1x1x4xbf16> to vector<1x4xbf16>
    %cst_534 = arith.constant dense<0.000000e+00> : vector<1x128xf32>
    %613 = tpu.matmul %612, %553, %cst_534 {dimension_numbers = #tpu.dot_dimension_numbers<[1], [0], [0], [1], [0, 0, 1, 1], [], []>} : vector<1x4xbf16>, vector<4x128xbf16>, vector<1x128xf32> -> vector<1x128xf32>
    %614 = arith.truncf %613 : vector<1x128xf32> to vector<1x128xbf16>
    %c7_535 = arith.constant 7 : index
    %c0_536 = arith.constant 0 : index
    %c0_537 = arith.constant 0 : index
    %615 = vector.load %arg13[%c7_535, %c0_536, %c0_537] : memref<9x128x256xbf16, #tpu.memory_space<vmem>>, vector<1x128x256xbf16>
    %616 = vector.shape_cast %615 : vector<1x128x256xbf16> to vector<128x256xbf16>
    %cst_538 = arith.constant dense<0.000000e+00> : vector<1x256xf32>
    %617 = tpu.matmul %614, %616, %cst_538 {dimension_numbers = #tpu.dot_dimension_numbers<[1], [0], [0], [1], [0, 0, 1, 1], [], []>} : vector<1x128xbf16>, vector<128x256xbf16>, vector<1x256xf32> -> vector<1x256xf32>
    %618 = arith.addf %610, %617 : vector<1x256xf32>
    %c8_539 = arith.constant 8 : index
    %c0_540 = arith.constant 0 : index
    %c0_541 = arith.constant 0 : index
    %619 = vector.load %arg12[%c8_539, %c0_540, %c0_541] : memref<9x1x4xbf16, #tpu.memory_space<vmem>>, vector<1x1x4xbf16>
    %620 = vector.shape_cast %619 : vector<1x1x4xbf16> to vector<1x4xbf16>
    %cst_542 = arith.constant dense<0.000000e+00> : vector<1x128xf32>
    %621 = tpu.matmul %620, %553, %cst_542 {dimension_numbers = #tpu.dot_dimension_numbers<[1], [0], [0], [1], [0, 0, 1, 1], [], []>} : vector<1x4xbf16>, vector<4x128xbf16>, vector<1x128xf32> -> vector<1x128xf32>
    %622 = arith.truncf %621 : vector<1x128xf32> to vector<1x128xbf16>
    %c8_543 = arith.constant 8 : index
    %c0_544 = arith.constant 0 : index
    %c0_545 = arith.constant 0 : index
    %623 = vector.load %arg13[%c8_543, %c0_544, %c0_545] : memref<9x128x256xbf16, #tpu.memory_space<vmem>>, vector<1x128x256xbf16>
    %624 = vector.shape_cast %623 : vector<1x128x256xbf16> to vector<128x256xbf16>
    %cst_546 = arith.constant dense<0.000000e+00> : vector<1x256xf32>
    %625 = tpu.matmul %622, %624, %cst_546 {dimension_numbers = #tpu.dot_dimension_numbers<[1], [0], [0], [1], [0, 0, 1, 1], [], []>} : vector<1x128xbf16>, vector<128x256xbf16>, vector<1x256xf32> -> vector<1x256xf32>
    %626 = arith.addf %618, %625 : vector<1x256xf32>
    %627 = arith.truncf %550 : vector<4x128xf32> to vector<4x128xbf16>
    %cst_547 = arith.constant 0.000000e+00 : f32
    %628 = vector.broadcast %cst_547 : f32 to vector<1x256xf32>
    %c0_548 = arith.constant 0 : index
    %c0_549 = arith.constant 0 : index
    %c0_550 = arith.constant 0 : index
    %629 = vector.load %arg12[%c0_548, %c0_549, %c0_550] : memref<9x1x4xbf16, #tpu.memory_space<vmem>>, vector<1x1x4xbf16>
    %630 = vector.shape_cast %629 : vector<1x1x4xbf16> to vector<1x4xbf16>
    %cst_551 = arith.constant dense<0.000000e+00> : vector<1x128xf32>
    %631 = tpu.matmul %630, %627, %cst_551 {dimension_numbers = #tpu.dot_dimension_numbers<[1], [0], [0], [1], [0, 0, 1, 1], [], []>} : vector<1x4xbf16>, vector<4x128xbf16>, vector<1x128xf32> -> vector<1x128xf32>
    %632 = arith.truncf %631 : vector<1x128xf32> to vector<1x128xbf16>
    %c0_552 = arith.constant 0 : index
    %c0_553 = arith.constant 0 : index
    %c0_554 = arith.constant 0 : index
    %633 = vector.load %arg13[%c0_552, %c0_553, %c0_554] : memref<9x128x256xbf16, #tpu.memory_space<vmem>>, vector<1x128x256xbf16>
    %634 = vector.shape_cast %633 : vector<1x128x256xbf16> to vector<128x256xbf16>
    %cst_555 = arith.constant dense<0.000000e+00> : vector<1x256xf32>
    %635 = tpu.matmul %632, %634, %cst_555 {dimension_numbers = #tpu.dot_dimension_numbers<[1], [0], [0], [1], [0, 0, 1, 1], [], []>} : vector<1x128xbf16>, vector<128x256xbf16>, vector<1x256xf32> -> vector<1x256xf32>
    %636 = arith.addf %628, %635 : vector<1x256xf32>
    %c1_556 = arith.constant 1 : index
    %c0_557 = arith.constant 0 : index
    %c0_558 = arith.constant 0 : index
    %637 = vector.load %arg12[%c1_556, %c0_557, %c0_558] : memref<9x1x4xbf16, #tpu.memory_space<vmem>>, vector<1x1x4xbf16>
    %638 = vector.shape_cast %637 : vector<1x1x4xbf16> to vector<1x4xbf16>
    %cst_559 = arith.constant dense<0.000000e+00> : vector<1x128xf32>
    %639 = tpu.matmul %638, %627, %cst_559 {dimension_numbers = #tpu.dot_dimension_numbers<[1], [0], [0], [1], [0, 0, 1, 1], [], []>} : vector<1x4xbf16>, vector<4x128xbf16>, vector<1x128xf32> -> vector<1x128xf32>
    %640 = arith.truncf %639 : vector<1x128xf32> to vector<1x128xbf16>
    %c1_560 = arith.constant 1 : index
    %c0_561 = arith.constant 0 : index
    %c0_562 = arith.constant 0 : index
    %641 = vector.load %arg13[%c1_560, %c0_561, %c0_562] : memref<9x128x256xbf16, #tpu.memory_space<vmem>>, vector<1x128x256xbf16>
    %642 = vector.shape_cast %641 : vector<1x128x256xbf16> to vector<128x256xbf16>
    %cst_563 = arith.constant dense<0.000000e+00> : vector<1x256xf32>
    %643 = tpu.matmul %640, %642, %cst_563 {dimension_numbers = #tpu.dot_dimension_numbers<[1], [0], [0], [1], [0, 0, 1, 1], [], []>} : vector<1x128xbf16>, vector<128x256xbf16>, vector<1x256xf32> -> vector<1x256xf32>
    %644 = arith.addf %636, %643 : vector<1x256xf32>
    %c2_564 = arith.constant 2 : index
    %c0_565 = arith.constant 0 : index
    %c0_566 = arith.constant 0 : index
    %645 = vector.load %arg12[%c2_564, %c0_565, %c0_566] : memref<9x1x4xbf16, #tpu.memory_space<vmem>>, vector<1x1x4xbf16>
    %646 = vector.shape_cast %645 : vector<1x1x4xbf16> to vector<1x4xbf16>
    %cst_567 = arith.constant dense<0.000000e+00> : vector<1x128xf32>
    %647 = tpu.matmul %646, %627, %cst_567 {dimension_numbers = #tpu.dot_dimension_numbers<[1], [0], [0], [1], [0, 0, 1, 1], [], []>} : vector<1x4xbf16>, vector<4x128xbf16>, vector<1x128xf32> -> vector<1x128xf32>
    %648 = arith.truncf %647 : vector<1x128xf32> to vector<1x128xbf16>
    %c2_568 = arith.constant 2 : index
    %c0_569 = arith.constant 0 : index
    %c0_570 = arith.constant 0 : index
    %649 = vector.load %arg13[%c2_568, %c0_569, %c0_570] : memref<9x128x256xbf16, #tpu.memory_space<vmem>>, vector<1x128x256xbf16>
    %650 = vector.shape_cast %649 : vector<1x128x256xbf16> to vector<128x256xbf16>
    %cst_571 = arith.constant dense<0.000000e+00> : vector<1x256xf32>
    %651 = tpu.matmul %648, %650, %cst_571 {dimension_numbers = #tpu.dot_dimension_numbers<[1], [0], [0], [1], [0, 0, 1, 1], [], []>} : vector<1x128xbf16>, vector<128x256xbf16>, vector<1x256xf32> -> vector<1x256xf32>
    %652 = arith.addf %644, %651 : vector<1x256xf32>
    %c3_572 = arith.constant 3 : index
    %c0_573 = arith.constant 0 : index
    %c0_574 = arith.constant 0 : index
    %653 = vector.load %arg12[%c3_572, %c0_573, %c0_574] : memref<9x1x4xbf16, #tpu.memory_space<vmem>>, vector<1x1x4xbf16>
    %654 = vector.shape_cast %653 : vector<1x1x4xbf16> to vector<1x4xbf16>
    %cst_575 = arith.constant dense<0.000000e+00> : vector<1x128xf32>
    %655 = tpu.matmul %654, %627, %cst_575 {dimension_numbers = #tpu.dot_dimension_numbers<[1], [0], [0], [1], [0, 0, 1, 1], [], []>} : vector<1x4xbf16>, vector<4x128xbf16>, vector<1x128xf32> -> vector<1x128xf32>
    %656 = arith.truncf %655 : vector<1x128xf32> to vector<1x128xbf16>
    %c3_576 = arith.constant 3 : index
    %c0_577 = arith.constant 0 : index
    %c0_578 = arith.constant 0 : index
    %657 = vector.load %arg13[%c3_576, %c0_577, %c0_578] : memref<9x128x256xbf16, #tpu.memory_space<vmem>>, vector<1x128x256xbf16>
    %658 = vector.shape_cast %657 : vector<1x128x256xbf16> to vector<128x256xbf16>
    %cst_579 = arith.constant dense<0.000000e+00> : vector<1x256xf32>
    %659 = tpu.matmul %656, %658, %cst_579 {dimension_numbers = #tpu.dot_dimension_numbers<[1], [0], [0], [1], [0, 0, 1, 1], [], []>} : vector<1x128xbf16>, vector<128x256xbf16>, vector<1x256xf32> -> vector<1x256xf32>
    %660 = arith.addf %652, %659 : vector<1x256xf32>
    %c4_580 = arith.constant 4 : index
    %c0_581 = arith.constant 0 : index
    %c0_582 = arith.constant 0 : index
    %661 = vector.load %arg12[%c4_580, %c0_581, %c0_582] : memref<9x1x4xbf16, #tpu.memory_space<vmem>>, vector<1x1x4xbf16>
    %662 = vector.shape_cast %661 : vector<1x1x4xbf16> to vector<1x4xbf16>
    %cst_583 = arith.constant dense<0.000000e+00> : vector<1x128xf32>
    %663 = tpu.matmul %662, %627, %cst_583 {dimension_numbers = #tpu.dot_dimension_numbers<[1], [0], [0], [1], [0, 0, 1, 1], [], []>} : vector<1x4xbf16>, vector<4x128xbf16>, vector<1x128xf32> -> vector<1x128xf32>
    %664 = arith.truncf %663 : vector<1x128xf32> to vector<1x128xbf16>
    %c4_584 = arith.constant 4 : index
    %c0_585 = arith.constant 0 : index
    %c0_586 = arith.constant 0 : index
    %665 = vector.load %arg13[%c4_584, %c0_585, %c0_586] : memref<9x128x256xbf16, #tpu.memory_space<vmem>>, vector<1x128x256xbf16>
    %666 = vector.shape_cast %665 : vector<1x128x256xbf16> to vector<128x256xbf16>
    %cst_587 = arith.constant dense<0.000000e+00> : vector<1x256xf32>
    %667 = tpu.matmul %664, %666, %cst_587 {dimension_numbers = #tpu.dot_dimension_numbers<[1], [0], [0], [1], [0, 0, 1, 1], [], []>} : vector<1x128xbf16>, vector<128x256xbf16>, vector<1x256xf32> -> vector<1x256xf32>
    %668 = arith.addf %660, %667 : vector<1x256xf32>
    %c5_588 = arith.constant 5 : index
    %c0_589 = arith.constant 0 : index
    %c0_590 = arith.constant 0 : index
    %669 = vector.load %arg12[%c5_588, %c0_589, %c0_590] : memref<9x1x4xbf16, #tpu.memory_space<vmem>>, vector<1x1x4xbf16>
    %670 = vector.shape_cast %669 : vector<1x1x4xbf16> to vector<1x4xbf16>
    %cst_591 = arith.constant dense<0.000000e+00> : vector<1x128xf32>
    %671 = tpu.matmul %670, %627, %cst_591 {dimension_numbers = #tpu.dot_dimension_numbers<[1], [0], [0], [1], [0, 0, 1, 1], [], []>} : vector<1x4xbf16>, vector<4x128xbf16>, vector<1x128xf32> -> vector<1x128xf32>
    %672 = arith.truncf %671 : vector<1x128xf32> to vector<1x128xbf16>
    %c5_592 = arith.constant 5 : index
    %c0_593 = arith.constant 0 : index
    %c0_594 = arith.constant 0 : index
    %673 = vector.load %arg13[%c5_592, %c0_593, %c0_594] : memref<9x128x256xbf16, #tpu.memory_space<vmem>>, vector<1x128x256xbf16>
    %674 = vector.shape_cast %673 : vector<1x128x256xbf16> to vector<128x256xbf16>
    %cst_595 = arith.constant dense<0.000000e+00> : vector<1x256xf32>
    %675 = tpu.matmul %672, %674, %cst_595 {dimension_numbers = #tpu.dot_dimension_numbers<[1], [0], [0], [1], [0, 0, 1, 1], [], []>} : vector<1x128xbf16>, vector<128x256xbf16>, vector<1x256xf32> -> vector<1x256xf32>
    %676 = arith.addf %668, %675 : vector<1x256xf32>
    %c6_596 = arith.constant 6 : index
    %c0_597 = arith.constant 0 : index
    %c0_598 = arith.constant 0 : index
    %677 = vector.load %arg12[%c6_596, %c0_597, %c0_598] : memref<9x1x4xbf16, #tpu.memory_space<vmem>>, vector<1x1x4xbf16>
    %678 = vector.shape_cast %677 : vector<1x1x4xbf16> to vector<1x4xbf16>
    %cst_599 = arith.constant dense<0.000000e+00> : vector<1x128xf32>
    %679 = tpu.matmul %678, %627, %cst_599 {dimension_numbers = #tpu.dot_dimension_numbers<[1], [0], [0], [1], [0, 0, 1, 1], [], []>} : vector<1x4xbf16>, vector<4x128xbf16>, vector<1x128xf32> -> vector<1x128xf32>
    %680 = arith.truncf %679 : vector<1x128xf32> to vector<1x128xbf16>
    %c6_600 = arith.constant 6 : index
    %c0_601 = arith.constant 0 : index
    %c0_602 = arith.constant 0 : index
    %681 = vector.load %arg13[%c6_600, %c0_601, %c0_602] : memref<9x128x256xbf16, #tpu.memory_space<vmem>>, vector<1x128x256xbf16>
    %682 = vector.shape_cast %681 : vector<1x128x256xbf16> to vector<128x256xbf16>
    %cst_603 = arith.constant dense<0.000000e+00> : vector<1x256xf32>
    %683 = tpu.matmul %680, %682, %cst_603 {dimension_numbers = #tpu.dot_dimension_numbers<[1], [0], [0], [1], [0, 0, 1, 1], [], []>} : vector<1x128xbf16>, vector<128x256xbf16>, vector<1x256xf32> -> vector<1x256xf32>
    %684 = arith.addf %676, %683 : vector<1x256xf32>
    %c7_604 = arith.constant 7 : index
    %c0_605 = arith.constant 0 : index
    %c0_606 = arith.constant 0 : index
    %685 = vector.load %arg12[%c7_604, %c0_605, %c0_606] : memref<9x1x4xbf16, #tpu.memory_space<vmem>>, vector<1x1x4xbf16>
    %686 = vector.shape_cast %685 : vector<1x1x4xbf16> to vector<1x4xbf16>
    %cst_607 = arith.constant dense<0.000000e+00> : vector<1x128xf32>
    %687 = tpu.matmul %686, %627, %cst_607 {dimension_numbers = #tpu.dot_dimension_numbers<[1], [0], [0], [1], [0, 0, 1, 1], [], []>} : vector<1x4xbf16>, vector<4x128xbf16>, vector<1x128xf32> -> vector<1x128xf32>
    %688 = arith.truncf %687 : vector<1x128xf32> to vector<1x128xbf16>
    %c7_608 = arith.constant 7 : index
    %c0_609 = arith.constant 0 : index
    %c0_610 = arith.constant 0 : index
    %689 = vector.load %arg13[%c7_608, %c0_609, %c0_610] : memref<9x128x256xbf16, #tpu.memory_space<vmem>>, vector<1x128x256xbf16>
    %690 = vector.shape_cast %689 : vector<1x128x256xbf16> to vector<128x256xbf16>
    %cst_611 = arith.constant dense<0.000000e+00> : vector<1x256xf32>
    %691 = tpu.matmul %688, %690, %cst_611 {dimension_numbers = #tpu.dot_dimension_numbers<[1], [0], [0], [1], [0, 0, 1, 1], [], []>} : vector<1x128xbf16>, vector<128x256xbf16>, vector<1x256xf32> -> vector<1x256xf32>
    %692 = arith.addf %684, %691 : vector<1x256xf32>
    %c8_612 = arith.constant 8 : index
    %c0_613 = arith.constant 0 : index
    %c0_614 = arith.constant 0 : index
    %693 = vector.load %arg12[%c8_612, %c0_613, %c0_614] : memref<9x1x4xbf16, #tpu.memory_space<vmem>>, vector<1x1x4xbf16>
    %694 = vector.shape_cast %693 : vector<1x1x4xbf16> to vector<1x4xbf16>
    %cst_615 = arith.constant dense<0.000000e+00> : vector<1x128xf32>
    %695 = tpu.matmul %694, %627, %cst_615 {dimension_numbers = #tpu.dot_dimension_numbers<[1], [0], [0], [1], [0, 0, 1, 1], [], []>} : vector<1x4xbf16>, vector<4x128xbf16>, vector<1x128xf32> -> vector<1x128xf32>
    %696 = arith.truncf %695 : vector<1x128xf32> to vector<1x128xbf16>
    %c8_616 = arith.constant 8 : index
    %c0_617 = arith.constant 0 : index
    %c0_618 = arith.constant 0 : index
    %697 = vector.load %arg13[%c8_616, %c0_617, %c0_618] : memref<9x128x256xbf16, #tpu.memory_space<vmem>>, vector<1x128x256xbf16>
    %698 = vector.shape_cast %697 : vector<1x128x256xbf16> to vector<128x256xbf16>
    %cst_619 = arith.constant dense<0.000000e+00> : vector<1x256xf32>
    %699 = tpu.matmul %696, %698, %cst_619 {dimension_numbers = #tpu.dot_dimension_numbers<[1], [0], [0], [1], [0, 0, 1, 1], [], []>} : vector<1x128xbf16>, vector<128x256xbf16>, vector<1x256xf32> -> vector<1x256xf32>
    %700 = arith.addf %692, %699 : vector<1x256xf32>
    %cst_620 = arith.constant 0.000000e+00 : f32
    %701 = vector.broadcast %cst_620 : f32 to vector<1x256xf32>
    %cst_621 = arith.constant 0.000000e+00 : f32
    %702 = vector.broadcast %cst_621 : f32 to vector<1x256xf32>
    %cst_622 = arith.constant dense<0.000000e+00> : vector<256xf32>
    %703 = vector.multi_reduction <add>, %626, %cst_622 [0] : vector<1x256xf32> to vector<256xf32>
    %704 = vector.shape_cast %703 : vector<256xf32> to vector<1x256xf32>
    %705 = arith.addf %701, %704 : vector<1x256xf32>
    %706 = arith.mulf %626, %626 : vector<1x256xf32>
    %cst_623 = arith.constant dense<0.000000e+00> : vector<256xf32>
    %707 = vector.multi_reduction <add>, %706, %cst_623 [0] : vector<1x256xf32> to vector<256xf32>
    %708 = vector.shape_cast %707 : vector<256xf32> to vector<1x256xf32>
    %709 = arith.addf %702, %708 : vector<1x256xf32>
    %cst_624 = arith.constant dense<0.000000e+00> : vector<256xf32>
    %710 = vector.multi_reduction <add>, %700, %cst_624 [0] : vector<1x256xf32> to vector<256xf32>
    %711 = vector.shape_cast %710 : vector<256xf32> to vector<1x256xf32>
    %712 = arith.addf %705, %711 : vector<1x256xf32>
    %713 = arith.mulf %700, %700 : vector<1x256xf32>
    %cst_625 = arith.constant dense<0.000000e+00> : vector<256xf32>
    %714 = vector.multi_reduction <add>, %713, %cst_625 [0] : vector<1x256xf32> to vector<256xf32>
    %715 = vector.shape_cast %714 : vector<256xf32> to vector<1x256xf32>
    %716 = arith.addf %709, %715 : vector<1x256xf32>
    %cst_626 = arith.constant 2.000000e+00 : f32
    %717 = vector.broadcast %cst_626 : f32 to vector<1x256xf32>
    %718 = arith.divf %712, %717 : vector<1x256xf32>
    %cst_627 = arith.constant 2.000000e+00 : f32
    %719 = vector.broadcast %cst_627 : f32 to vector<1x256xf32>
    %720 = arith.divf %716, %719 : vector<1x256xf32>
    %721 = arith.mulf %718, %718 : vector<1x256xf32>
    %722 = arith.subf %720, %721 : vector<1x256xf32>
    %cst_628 = arith.constant 0.000000e+00 : f32
    %723 = vector.broadcast %cst_628 : f32 to vector<1x256xf32>
    %724 = arith.maximumf %722, %723 : vector<1x256xf32>
    %cst_629 = arith.constant 9.99999974E-6 : f32
    %725 = vector.broadcast %cst_629 : f32 to vector<1x256xf32>
    %726 = arith.addf %724, %725 : vector<1x256xf32>
    %727 = math.rsqrt %726 : vector<1x256xf32>
    %728 = arith.mulf %551, %727 : vector<1x256xf32>
    %729 = arith.mulf %718, %728 : vector<1x256xf32>
    %730 = arith.subf %552, %729 : vector<1x256xf32>
    %731 = arith.mulf %626, %728 : vector<1x256xf32>
    %732 = arith.addf %731, %730 : vector<1x256xf32>
    %cst_630 = arith.constant 2.000000e-01 : f32
    %733 = vector.broadcast %cst_630 : f32 to vector<1x256xf32>
    %734 = arith.mulf %733, %732 : vector<1x256xf32>
    %735 = arith.maximumf %732, %734 : vector<1x256xf32>
    %736 = arith.mulf %700, %728 : vector<1x256xf32>
    %737 = arith.addf %736, %730 : vector<1x256xf32>
    %cst_631 = arith.constant 2.000000e-01 : f32
    %738 = vector.broadcast %cst_631 : f32 to vector<1x256xf32>
    %739 = arith.mulf %738, %737 : vector<1x256xf32>
    %740 = arith.maximumf %737, %739 : vector<1x256xf32>
    %c0_632 = arith.constant 0 : index
    %c0_633 = arith.constant 0 : index
    %741 = vector.load %arg16[%c0_632, %c0_633] : memref<1x256xf32, #tpu.memory_space<vmem>>, vector<1x256xf32>
    %742 = tpu.iota {dimensions = array<i32: 0>} : vector<2x1xi32>
    %cst_634 = arith.constant 0.000000e+00 : f32
    %743 = vector.broadcast %cst_634 : f32 to vector<2x1xf32>
    %744 = arith.mulf %735, %741 : vector<1x256xf32>
    %cst_635 = arith.constant dense<0.000000e+00> : vector<1xf32>
    %745 = vector.multi_reduction <add>, %744, %cst_635 [1] : vector<1x256xf32> to vector<1xf32>
    %746 = vector.shape_cast %745 : vector<1xf32> to vector<1x1xf32>
    %cst_636 = arith.constant dense<0.000000e+00> : vector<1xf32>
    %747 = vector.multi_reduction <add>, %746, %cst_636 [0] : vector<1x1xf32> to vector<1xf32>
    %748 = vector.shape_cast %747 : vector<1xf32> to vector<1x1xf32>
    %c0_i32 = arith.constant 0 : i32
    %749 = vector.broadcast %c0_i32 : i32 to vector<2x1xi32>
    %750 = arith.cmpi eq, %742, %749 : vector<2x1xi32>
    %cst_637 = arith.constant 0.000000e+00 : f32
    %751 = vector.shape_cast %748 : vector<1x1xf32> to vector<1x1xf32>
    %752 = vector.broadcast %751 : vector<1x1xf32> to vector<2x1xf32>
    %753 = vector.broadcast %cst_637 : f32 to vector<2x1xf32>
    %754 = arith.select %750, %752, %753 : vector<2x1xi1>, vector<2x1xf32>
    %755 = arith.addf %743, %754 : vector<2x1xf32>
    %756 = arith.mulf %740, %741 : vector<1x256xf32>
    %cst_638 = arith.constant dense<0.000000e+00> : vector<1xf32>
    %757 = vector.multi_reduction <add>, %756, %cst_638 [1] : vector<1x256xf32> to vector<1xf32>
    %758 = vector.shape_cast %757 : vector<1xf32> to vector<1x1xf32>
    %cst_639 = arith.constant dense<0.000000e+00> : vector<1xf32>
    %759 = vector.multi_reduction <add>, %758, %cst_639 [0] : vector<1x1xf32> to vector<1xf32>
    %760 = vector.shape_cast %759 : vector<1xf32> to vector<1x1xf32>
    %c1_i32 = arith.constant 1 : i32
    %761 = vector.broadcast %c1_i32 : i32 to vector<2x1xi32>
    %762 = arith.cmpi eq, %742, %761 : vector<2x1xi32>
    %cst_640 = arith.constant 0.000000e+00 : f32
    %763 = vector.shape_cast %760 : vector<1x1xf32> to vector<1x1xf32>
    %764 = vector.broadcast %763 : vector<1x1xf32> to vector<2x1xf32>
    %765 = vector.broadcast %cst_640 : f32 to vector<2x1xf32>
    %766 = arith.select %762, %764, %765 : vector<2x1xi1>, vector<2x1xf32>
    %767 = arith.addf %755, %766 : vector<2x1xf32>
    %c0_641 = arith.constant 0 : index
    %c0_642 = arith.constant 0 : index
    %768 = vector.load %arg17[%c0_641, %c0_642] : memref<1x1xf32, #tpu.memory_space<vmem>>, vector<1x1xf32>
    %769 = vector.broadcast %768 : vector<1x1xf32> to vector<2x1xf32>
    %770 = arith.addf %767, %769 : vector<2x1xf32>
    %771 = math.absf %770 : vector<2x1xf32>
    %cst_643 = arith.constant 0.000000e+00 : f32
    %772 = vector.broadcast %cst_643 : f32 to vector<2x1xf32>
    %773 = arith.subf %772, %771 : vector<2x1xf32>
    %774 = math.exp %773 : vector<2x1xf32>
    %cst_644 = arith.constant 1.000000e+00 : f32
    %775 = vector.broadcast %cst_644 : f32 to vector<2x1xf32>
    %776 = arith.addf %775, %774 : vector<2x1xf32>
    %cst_645 = arith.constant 1.000000e+00 : f32
    %777 = vector.broadcast %cst_645 : f32 to vector<2x1xf32>
    %778 = arith.divf %777, %776 : vector<2x1xf32>
    %cst_646 = arith.constant 0.000000e+00 : f32
    %779 = vector.broadcast %cst_646 : f32 to vector<2x1xf32>
    %780 = arith.cmpf oge, %770, %779 : vector<2x1xf32>
    %cst_647 = arith.constant 1.000000e+00 : f32
    %781 = vector.broadcast %cst_647 : f32 to vector<2x1xf32>
    %782 = arith.subf %781, %778 : vector<2x1xf32>
    %783 = arith.select %780, %778, %782 : vector<2x1xi1>, vector<2x1xf32>
    %c0_648 = arith.constant 0 : index
    %c0_649 = arith.constant 0 : index
    %784 = vector.load %arg18[%c0_648, %c0_649] : memref<2x1xf32, #tpu.memory_space<vmem>>, vector<2x1xf32>
    tpu.vector_store %arg18[%c0_648, %c0_649], %783 {strides = array<i32>} : memref<2x1xf32, #tpu.memory_space<vmem>>, vector<2x1xf32>,
    return
  }
}

</mosaic_0001>

<bundles_post_ra>
// kernel: discriminator_forward.1
= control target key start
LH: loop header
LB: loop body
LE: loop exit
PB: predicated region body
PF: predicated region fallthrough
CT: control target
= control target key end

     0   :  { %s17122_s0 = inlined_call_operand.vmem [shape: f32[2,256,8], index: 0, kind: input, shape index: {}]   ;;  %s17123_s1 = inlined_call_operand.hbm [shape: bf16[9,64,256], index: 1, kind: input, shape index: {}]   ;;  %s17124_s2 = inlined_call_operand.hbm [shape: bf16[9,8,32], index: 2, kind: input, shape index: {}]   ;;  %s17125_s3 = inlined_call_operand.vmem [shape: f32[1,32], index: 3, kind: input, shape index: {}]   ;;  %s17126_s4 = inlined_call_operand.vmem [shape: bf16[9,16,64], index: 4, kind: input, shape index: {}]   ;;  %s17127_s5 = inlined_call_operand.vmem [shape: bf16[9,32,64], index: 5, kind: input, shape index: {}]   ;;  %s17128_s6 = inlined_call_operand.vmem [shape: f32[1,64], index: 6, kind: input, shape index: {}]   ;;  %s17129_s7 = inlined_call_operand.vmem [shape: f32[1,64], index: 7, kind: input, shape index: {}]   ;;  %s17130_s8 = inlined_call_operand.hbm [shape: bf16[9,4,16], index: 8, kind: input, shape index: {}]   ;;  %s17131_s9 = inlined_call_operand.vmem [shape: bf16[9,64,128], index: 9, kind: input, shape index: {}]   ;;  %s17132_s10 = inlined_call_operand.vmem [shape: f32[1,128], index: 10, kind: input, shape index: {}]   ;;  %s17133_s11 = inlined_call_operand.vmem [shape: f32[1,128], index: 11, kind: input, shape index: {}]   ;;  %s17134_s12 = inlined_call_operand.vmem [shape: bf16[9,1,4], index: 12, kind: input, shape index: {}]   ;;  %s17135_s13 = inlined_call_operand.vmem [shape: bf16[9,128,256], index: 13, kind: input, shape index: {}]   ;;  %s17136_s14 = inlined_call_operand.hbm [shape: f32[1,256], index: 14, kind: input, shape index: {}]   ;;  %s17137_s15 = inlined_call_operand.hbm [shape: f32[1,256], index: 15, kind: input, shape index: {}]   ;;  %s17138_s16 = inlined_call_operand.hbm [shape: f32[1,256], index: 16, kind: input, shape index: {}]   ;;  %s17139_s17 = inlined_call_operand.<no memory space> [shape: f32[1,1], index: 17, kind: input, shape index: {}]   ;;  %s17140_s18 = inlined_call_operand.vmem [shape: f32[2,1], index: 18, kind: output, shape index: {}]  }
   0x1   :  { %17202 = sst [smem:[#allocation63_spill]] %s17122_s0  ;;  %v23_v0 = vstv %s17139_s17 }
   0x2   :  { %17203 = sst [smem:[#allocation64_spill]] %s17123_s1  ;;  %24 = vst [vmem:[#allocation2] sm:$0x1] %v23_v0 }
   0x3   :  { %17204 = sst [smem:[#allocation65_spill]] %s17124_s2 }
   0x4   :  { %17205 = sst [smem:[#allocation66_spill]] %s17140_s18 }
   0x5   :  { %25 = vsyncpa [#allocation4], 0 }
   0x6   :  { %26 = vsyncpa [#allocation6], 0 }
   0x7   :  { %27 = vsyncpa [#allocation9], 0 }
   0x8   :  { %28 = vsyncpa [#allocation12], 0  ;;  %s13762_s29 = smov [#allocation5]   ;;  %s17206_s1 = sld [smem:[#allocation65_spill]] }
   0x9   :  { %s48_s30 = sshll.u32 %s13762_s29, 4  ;;  %s49_s30 = int_to_ptr.vmem [resolvable:$true] %s48_s30 }
   0xe   :  { %s13622_s20 = scalar_lea.hbm %s17206_s1, 576 }
   0xf   :  { %p13623_p0 = scmp.ne.s32.totalorder %s17206_s1, %s13622_s20  ;;  %p13626_p1 = scmp.lt.u32.totalorder %s13622_s20, %s17206_s1 }
  0x11   :  { %p13628_p2 = pnand %p13626_p1, %p13623_p0 }
  0x13   :  { %13631 = shalt.err (!%p13628_p2)
}
  0x14   :  { %s13632_s17 = scalar_lea.vmem %s49_s30, 576  ;;  %p13637_p4 = scmp.lt.s32.totalorder %s49_s30, %s49_s30 }
  0x15   :  { %p13633_p3 = scmp.ne.s32.totalorder %s49_s30, %s13632_s17  ;;  %p13638_p5 = scmp.lt.s32.totalorder %s13632_s17, %s13632_s17 }
  0x17   :  { %p13639_p6 = por %p13638_p5, %p13637_p4 }
  0x19   :  { %p13640_p7 = pnand %p13639_p6, %p13633_p3 }
  0x1b   :  { %13643 = shalt.err (!%p13640_p7)
}
  0x1c   :  { %s13763_s24 = smov 64   ;;  %s13764_s25 = smov 4  }
  0x1d   :  { %54 = dma.hbm_to_vmem [thread:$0]  %s17206_s1, 576, %s49_s30, [#allocation6], %s13763_s24, %s13763_s24, %s13764_s25  }
  0x1e   :  { %s13765_s28 = smov [#allocation8]   ;;  %s13766_s0 = smov [#allocation3]  }
  0x1f   :  { %s93_s29 = sshll.u32 %s13765_s28, 4  ;;  %s36_s19 = sshll.u32 %s13766_s0, 4  ;;  %s94_s29 = int_to_ptr.vmem [resolvable:$true] %s93_s29  ;;  %s37_s19 = int_to_ptr.vmem [resolvable:$true] %s36_s19 }
  0x20   :  { %s13644_s22 = scalar_lea.hbm %s17136_s14, 32 }
  0x21   :  { %p13645_p8 = scmp.ne.s32.totalorder %s17136_s14, %s13644_s22  ;;  %p13648_p9 = scmp.lt.u32.totalorder %s13644_s22, %s17136_s14 }
  0x23   :  { %p13650_p10 = pnand %p13648_p9, %p13645_p8 }
  0x25   :  { %13653 = shalt.err (!%p13650_p10)
}
  0x26   :  { %s13654_s30 = scalar_lea.vmem %s94_s29, 32  ;;  %p13659_p12 = scmp.lt.s32.totalorder %s94_s29, %s94_s29 }
  0x27   :  { %p13655_p11 = scmp.ne.s32.totalorder %s94_s29, %s13654_s30  ;;  %p13660_p13 = scmp.lt.s32.totalorder %s13654_s30, %s13654_s30 }
  0x29   :  { %p13661_p0 = por %p13660_p13, %p13659_p12 }
  0x2b   :  { %p13662_p1 = pnand %p13661_p0, %p13655_p11 }
  0x2d   :  { %13665 = shalt.err (!%p13662_p1)
}
  0x2e   :  { %96 = dma.hbm_to_vmem [thread:$0]  %s17136_s14, 32, %s94_s29, [#allocation9]  }
  0x2f   :  { %s17207_s27 = sld [smem:[#allocation64_spill]] }
  0x35   :  { %s13666_s28 = scalar_lea.hbm %s17207_s27, 9216 }
  0x36   :  { %p13667_p2 = scmp.ne.s32.totalorder %s17207_s27, %s13666_s28  ;;  %p13670_p3 = scmp.lt.u32.totalorder %s13666_s28, %s17207_s27 }
  0x38   :  { %p13672_p4 = pnand %p13670_p3, %p13667_p2 }
  0x3a   :  { %13675 = shalt.err (!%p13672_p4)
}
  0x3b   :  { %s13676_s22 = scalar_lea.vmem %s37_s19, 9216  ;;  %p13681_p6 = scmp.lt.s32.totalorder %s37_s19, %s37_s19 }
  0x3c   :  { %p13677_p5 = scmp.ne.s32.totalorder %s37_s19, %s13676_s22  ;;  %p13682_p7 = scmp.lt.s32.totalorder %s13676_s22, %s13676_s22 }
  0x3e   :  { %p13683_p8 = por %p13682_p7, %p13681_p6 }
  0x40   :  { %p13684_p9 = pnand %p13683_p8, %p13677_p5 }
  0x42   :  { %13687 = shalt.err (!%p13684_p9)
}
  0x43   :  { %s13767_s14 = smov 128   ;;  %s13768_s29 = smov 8  }
  0x44   :  { %42 = dma.hbm_to_vmem [thread:$0]  %s17207_s27, 9216, %s37_s19, [#allocation4], %s13767_s14, %s13767_s14, %s13768_s29  }
  0x45   :  { %s13769_s17 = smov [#allocation7]   ;;  %s13688_s25 = scalar_lea.hbm %s17130_s8, 288 }
  0x46   :  { %s70_s30 = sshll.u32 %s13769_s17, 4  ;;  %p13689_p10 = scmp.ne.s32.totalorder %s17130_s8, %s13688_s25  ;;  %s71_s30 = int_to_ptr.vmem [resolvable:$true] %s70_s30 }
  0x47   :  { %p13692_p11 = scmp.lt.u32.totalorder %s13688_s25, %s17130_s8 }
  0x49   :  { %p13694_p12 = pnand %p13692_p11, %p13689_p10 }
  0x4b   :  { %13697 = shalt.err (!%p13694_p12)
}
  0x4c   :  { %s13698_s20 = scalar_lea.vmem %s71_s30, 288  ;;  %p13703_p0 = scmp.lt.s32.totalorder %s71_s30, %s71_s30 }
  0x4d   :  { %p13699_p13 = scmp.ne.s32.totalorder %s71_s30, %s13698_s20  ;;  %p13704_p1 = scmp.lt.s32.totalorder %s13698_s20, %s13698_s20 }
  0x4f   :  { %p13705_p2 = por %p13704_p1, %p13703_p0 }
  0x51   :  { %p13706_p3 = pnand %p13705_p2, %p13699_p13 }
  0x53   :  { %13709 = shalt.err (!%p13706_p3)
}
  0x54   :  { %s13770_s19 = smov 32   ;;  %s13771_s27 = smov 2  }
  0x55   :  { %76 = dma.hbm_to_vmem [thread:$0]  %s17130_s8, 288, %s71_s30, [#allocation6], %s13770_s19, %s13770_s19, %s13771_s27  }
  0x56   :  { %s13772_s14 = smov [#allocation10]   ;;  %s13773_s2 = smov [#allocation11]  }
  0x57   :  { %s103_s29 = sshll.u32 %s13772_s14, 4  ;;  %s113_s23 = sshll.u32 %s13773_s2, 4  ;;  %s104_s29 = int_to_ptr.vmem [resolvable:$true] %s103_s29  ;;  %s114_s23 = int_to_ptr.vmem [resolvable:$true] %s113_s23 }
  0x58   :  { %s13710_s24 = scalar_lea.hbm %s17137_s15, 32 }
  0x59   :  { %p13711_p4 = scmp.ne.s32.totalorder %s17137_s15, %s13710_s24  ;;  %p13714_p5 = scmp.lt.u32.totalorder %s13710_s24, %s17137_s15 }
  0x5b   :  { %p13716_p6 = pnand %p13714_p5, %p13711_p4 }
  0x5d   :  { %13719 = shalt.err (!%p13716_p6)
}
  0x5e   :  { %s13720_s8 = scalar_lea.vmem %s104_s29, 32  ;;  %p13725_p8 = scmp.lt.s32.totalorder %s104_s29, %s104_s29 }
  0x5f   :  { %p13721_p7 = scmp.ne.s32.totalorder %s104_s29, %s13720_s8  ;;  %p13726_p9 = scmp.lt.s32.totalorder %s13720_s8, %s13720_s8 }
  0x61   :  { %p13727_p10 = por %p13726_p9, %p13725_p8 }
  0x63   :  { %p13728_p11 = pnand %p13727_p10, %p13721_p7 }
  0x65   :  { %13731 = shalt.err (!%p13728_p11)
}
  0x66   :  { %106 = dma.hbm_to_vmem [thread:$0]  %s17137_s15, 32, %s104_s29, [#allocation9]  }
  0x67   :  { %s13732_s27 = scalar_lea.hbm %s17138_s16, 32 }
  0x68   :  { %p13733_p12 = scmp.ne.s32.totalorder %s17138_s16, %s13732_s27  ;;  %p13736_p13 = scmp.lt.u32.totalorder %s13732_s27, %s17138_s16 }
  0x6a   :  { %p13738_p0 = pnand %p13736_p13, %p13733_p12 }
  0x6c   :  { %13741 = shalt.err (!%p13738_p0)
}
  0x6d   :  { %s13742_s17 = scalar_lea.vmem %s114_s23, 32  ;;  %p13747_p2 = scmp.lt.s32.totalorder %s114_s23, %s114_s23 }
  0x6e   :  { %p13743_p1 = scmp.ne.s32.totalorder %s114_s23, %s13742_s17  ;;  %p13748_p3 = scmp.lt.s32.totalorder %s13742_s17, %s13742_s17 }
  0x70   :  { %p13749_p4 = por %p13748_p3, %p13747_p2 }
  0x72   :  { %p13750_p5 = pnand %p13749_p4, %p13743_p1 }
  0x74   :  { %13753 = shalt.err (!%p13750_p5)
}
  0x75   :  { %116 = dma.hbm_to_vmem [thread:$0]  %s17138_s16, 32, %s114_s23, [#allocation12]  }
  0x76   :  { %13754 = dma.done.wait [#allocation4], 9216  }
  0x77   :  { %13755 = vsyncadd [#allocation4], 4294958080 }
  0x78   :  { %13756 = dma.done.wait [#allocation6], 864  }
  0x79   :  { %13757 = vsyncadd [#allocation6], 4294966432 }
  0x7a   :  { %13758 = dma.done.wait [#allocation9], 64  }
  0x7b   :  { %13759 = vsyncadd [#allocation9], 4294967232 }
  0x7c   :  { %13760 = dma.done.wait [#allocation12], 32  }
  0x7d   :  { %13761 = vsyncadd [#allocation12], 4294967264  ;;  %s17208_s25 = sld [smem:[#allocation63_spill]]  ;;  %v13156_v27 = vld [vmem:[#allocation3 + $0x44] ss:$8 sps:$4 sm:$0xff]   ;;  %vm471_vm0 = vcmask 1043456  }
  0x7e   :  { %419 = vmatprep.mubr.bf16.mxu1 %v13156_v27  ;;  %v13162_v33 = vld [vmem:[#allocation3 + $0x4] ss:$8 sps:$4 sm:$0xff]   ;;  %v13154_v51 = vld [vmem:[#allocation3 + $0x40] ss:$8 sps:$4 sm:$0xff]   ;;  %v13157_v53 = vld [vmem:[#allocation3 + $0x54] ss:$8 sps:$4 sm:$0xff]  }
  0x7f   :  { %300 = vmatprep.mubr.bf16.mxu0 %v13162_v33  ;;  %v13160_v52 = vld [vmem:[#allocation3] ss:$8 sps:$4 sm:$0xff]   ;;  %v13166_v54 = vld [vmem:[#allocation3 + $0x14] ss:$8 sps:$4 sm:$0xff]   ;;  %v13159_v55 = vld [vmem:[#allocation3 + $0x50] ss:$8 sps:$4 sm:$0xff]  }
  0x80   :  { %v13170_v56 = vld [vmem:[#allocation3 + $0x10] ss:$8 sps:$4 sm:$0xff]   ;;  %v13163_v57 = vld [vmem:[#allocation3 + $0x64] ss:$8 sps:$4 sm:$0xff]   ;;  %v13165_v59 = vld [vmem:[#allocation3 + $0x60] ss:$8 sps:$4 sm:$0xff]  }
  0x81   :  { %v13172_v58 = vld [vmem:[#allocation3 + $0x24] ss:$8 sps:$4 sm:$0xff]   ;;  %v13177_v60 = vld [vmem:[#allocation3 + $0x20] ss:$8 sps:$4 sm:$0xff]   ;;  %v13168_v61 = vld [vmem:[#allocation3 + $0x74] ss:$8 sps:$4 sm:$0xff]  }
  0x82   :  { %v13178_v62 = vld [vmem:[#allocation3 + $0x34] ss:$8 sps:$4 sm:$0xff]   ;;  %v13171_v63 = vld [vmem:[#allocation3 + $0x70] ss:$8 sps:$4 sm:$0xff]   ;;  %v14156_v27 = vld [vmem:[#allocation5 + $0x4] sm:$0xf] }
  0x83   :  { %v154_v1 = vld [vmem:[%s17208_s25 + $0x80] sm:$0xff]  ;;  %v155_v2 = vld [vmem:[%s17208_s25 + $0x88] sm:$0xff]  ;;  %v156_v6 = vld [vmem:[%s17208_s25 + $0x90] sm:$0xff]  ;;  %vm458_vm1 = vcmask 64512   ;;  %vm13775_vm2 = vmmov 0   ;;  %vm3529_vm3 = vcmask 523264  }
  0x84   :  { %v138_v3 = vld [vmem:[%s17208_s25] sm:$0xff]  ;;  %v13957_v4 = vpack.c.bf16 %v155_v2, %v154_v1  ;;  %v139_v5 = vld [vmem:[%s17208_s25 + $0x8] sm:$0xff]  ;;  %v157_v7 = vld [vmem:[%s17208_s25 + $0x98] sm:$0xff]  ;;  %vm3649_vm4 = vcmask 261120   ;;  %vm5441_vm5 = vcmask 130048   ;;  %vm7381_vm6 = vcmask 1041408  }
  0x85   :  { %v13968_v8 = vpack.c.bf16 %v139_v5, %v138_v3  ;;  %v13970_v9 = vpack.c.bf16 %v157_v7, %v156_v6  ;;  %v140_v10 = vld [vmem:[%s17208_s25 + $0x10] sm:$0xff]  ;;  %v141_v11 = vld [vmem:[%s17208_s25 + $0x18] sm:$0xff]  ;;  %v158_v12 = vld [vmem:[%s17208_s25 + $0xa0] sm:$0xff]  ;;  %vm7377_vm7 = vcmask 31744   ;;  %vm9934_vm8 = vcmask 1040384   ;;  %s17327_s28 = sld [smem:[#allocation66_spill]] }
  0x86   :  { %10754 = vmatprep.subr.bf16.mxu1 %v13957_v4  ;;  %v159_v13 = vld [vmem:[%s17208_s25 + $0xa8] sm:$0xff]  ;;  %10714 = vmatprep.subr.bf16.mxu0 %v13957_v4  ;;  %v13987_v14 = vpack.c.bf16 %v141_v11, %v140_v10  ;;  %v142_v16 = vld [vmem:[%s17208_s25 + $0x20] sm:$0xff]  ;;  %v160_v18 = vld [vmem:[%s17208_s25 + $0xb0] sm:$0xff]  ;;  %vm9981_vm11 = vcmask 1024  }
  0x87   :  { %10755 = vmatpush3.bf16.msra.mxu1 %v13968_v8  ;;  %10715 = vmatpush3.bf16.msra.mxu0 %v13968_v8  ;;  %v13991_v15 = vpack.c.bf16 %v159_v13, %v158_v12  ;;  %v143_v17 = vld [vmem:[%s17208_s25 + $0x28] sm:$0xff]  ;;  %v161_v19 = vld [vmem:[%s17208_s25 + $0xb8] sm:$0xff]  ;;  %v144_v22 = vld [vmem:[%s17208_s25 + $0x30] sm:$0xff] }
  0x88   :  { %10756 = vmatprep.subr.bf16.mxu1 %v13970_v9  ;;  %10716 = vmatprep.subr.bf16.mxu0 %v13970_v9  ;;  %v14007_v20 = vpack.c.bf16 %v143_v17, %v142_v16  ;;  %v14011_v21 = vpack.c.bf16 %v161_v19, %v160_v18  ;;  %v145_v23 = vld [vmem:[%s17208_s25 + $0x38] sm:$0xff]  ;;  %v162_v24 = vld [vmem:[%s17208_s25 + $0xc0] sm:$0xff]  ;;  %v163_v25 = vld [vmem:[%s17208_s25 + $0xc8] sm:$0xff] }
  0x89   :  { %v146_v26 = vld [vmem:[%s17208_s25 + $0x40] sm:$0xff]  ;;  %v14030_v28 = vpack.c.bf16 %v145_v23, %v144_v22  ;;  %v147_v29 = vld [vmem:[%s17208_s25 + $0x48] sm:$0xff]  ;;  %v14037_v30 = vpack.c.bf16 %v163_v25, %v162_v24  ;;  %v164_v31 = vld [vmem:[%s17208_s25 + $0xd0] sm:$0xff] }
  0x8a   :  { %v165_v32 = vld [vmem:[%s17208_s25 + $0xd8] sm:$0xff]  ;;  %v14047_v34 = vpack.c.bf16 %v147_v29, %v146_v26  ;;  %v148_v35 = vld [vmem:[%s17208_s25 + $0x50] sm:$0xff]  ;;  %v166_v38 = vld [vmem:[%s17208_s25 + $0xe0] sm:$0xff]  ;;  %v14163_v29 = vsel %vm471_vm0, %v14156_v27, 0 }
  0x8b   :  { %10757 = vmatpush3.bf16.msra.mxu1 %v13987_v14  ;;  %10717 = vmatpush3.bf16.msra.mxu0 %v13987_v14  ;;  %v14054_v36 = vpack.c.bf16 %v165_v32, %v164_v31  ;;  %v149_v37 = vld [vmem:[%s17208_s25 + $0x58] sm:$0xff]  ;;  %v167_v39 = vld [vmem:[%s17208_s25 + $0xe8] sm:$0xff]  ;;  %v150_v41 = vld [vmem:[%s17208_s25 + $0x60] sm:$0xff] }
  0x8c   :  { %10758 = vmatprep.subr.bf16.mxu1 %v13991_v15  ;;  %10718 = vmatprep.subr.bf16.mxu0 %v13991_v15  ;;  %v14067_v40 = vpack.c.bf16 %v149_v37, %v148_v35  ;;  %v151_v42 = vld [vmem:[%s17208_s25 + $0x68] sm:$0xff]  ;;  %v14077_v43 = vpack.c.bf16 %v167_v39, %v166_v38  ;;  %v168_v44 = vld [vmem:[%s17208_s25 + $0xf0] sm:$0xff]  ;;  %v169_v45 = vld [vmem:[%s17208_s25 + $0xf8] sm:$0xff] }
  0x8d   :  { %v14087_v46 = vpack.c.bf16 %v151_v42, %v150_v41  ;;  %v152_v47 = vld [vmem:[%s17208_s25 + $0x70] sm:$0xff]  ;;  %v14094_v48 = vpack.c.bf16 %v169_v45, %v168_v44  ;;  %v153_v49 = vld [vmem:[%s17208_s25 + $0x78] sm:$0xff]  ;;  %v13174_v2 = vld [vmem:[#allocation3 + $0x80] ss:$8 sps:$4 sm:$0xff]  }
  0x8e   :  { %v14101_v50 = vpack.c.bf16 %v153_v49, %v152_v47  ;;  %v13182_v0 = vld [vmem:[#allocation3 + $0x30] ss:$8 sps:$4 sm:$0xff]   ;;  %v13176_v1 = vld [vmem:[#allocation3 + $0x84] ss:$8 sps:$4 sm:$0xff]   ;;  %v13180_v3 = vld [vmem:[#allocation3 + $0x94] ss:$8 sps:$4 sm:$0xff]  }
  0x8f   :  { %10759 = vmatpush3.bf16.msra.mxu1 %v14007_v20  ;;  %10719 = vmatpush3.bf16.msra.mxu0 %v14007_v20  ;;  %v13183_v5 = vld [vmem:[#allocation3 + $0x90] ss:$8 sps:$4 sm:$0xff]   ;;  %v13184_v6 = vld [vmem:[#allocation3 + $0xa4] ss:$8 sps:$4 sm:$0xff]   ;;  %v13186_v7 = vld [vmem:[#allocation3 + $0xa0] ss:$8 sps:$4 sm:$0xff]  }
  0x90   :  { %10760 = vmatprep.subr.bf16.mxu1 %v14011_v21  ;;  %10720 = vmatprep.subr.bf16.mxu0 %v14011_v21  ;;  %v13187_v10 = vld [vmem:[#allocation3 + $0xb4] ss:$8 sps:$4 sm:$0xff]   ;;  %v13189_v11 = vld [vmem:[#allocation3 + $0xb0] ss:$8 sps:$4 sm:$0xff]   ;;  %v13192_v12 = vld [vmem:[#allocation3 + $0xc4] ss:$8 sps:$4 sm:$0xff]  }
  0x91   :  { %v13190_v13 = vld [vmem:[#allocation3 + $0xc0] ss:$8 sps:$4 sm:$0xff]   ;;  %v13193_v16 = vld [vmem:[#allocation3 + $0xd4] ss:$8 sps:$4 sm:$0xff]   ;;  %v13195_v17 = vld [vmem:[#allocation3 + $0xd0] ss:$8 sps:$4 sm:$0xff]  }
  0x92   :  { %v13196_v18 = vld [vmem:[#allocation3 + $0xe4] ss:$8 sps:$4 sm:$0xff]   ;;  %v13198_v19 = vld [vmem:[#allocation3 + $0xe0] ss:$8 sps:$4 sm:$0xff]   ;;  %v13199_v22 = vld [vmem:[#allocation3 + $0xf4] ss:$8 sps:$4 sm:$0xff]  }
  0x93   :  { %10761 = vmatpush3.bf16.msra.mxu1 %v14030_v28  ;;  %10721 = vmatpush3.bf16.msra.mxu0 %v14030_v28  ;;  %v13201_v23 = vld [vmem:[#allocation3 + $0xf0] ss:$8 sps:$4 sm:$0xff]   ;;  %v13204_v24 = vld [vmem:[#allocation3 + $0x104] ss:$8 sps:$4 sm:$0xff]   ;;  %v13202_v25 = vld [vmem:[#allocation3 + $0x100] ss:$8 sps:$4 sm:$0xff]  }
  0x94   :  { %10762 = vmatprep.subr.bf16.mxu1 %v14037_v30  ;;  %10722 = vmatprep.subr.bf16.mxu0 %v14037_v30  ;;  %v13205_v26 = vld [vmem:[#allocation3 + $0x114] ss:$8 sps:$4 sm:$0xff]   ;;  %v13207_v31 = vld [vmem:[#allocation3 + $0x110] ss:$8 sps:$4 sm:$0xff]   ;;  %v13208_v32 = vld [vmem:[#allocation3 + $0x124] ss:$8 sps:$4 sm:$0xff]  }
  0x95   :  { %v13210_v33 = vld [vmem:[#allocation3 + $0x120] ss:$8 sps:$4 sm:$0xff]   ;;  %v13211_v35 = vld [vmem:[#allocation3 + $0x134] ss:$8 sps:$4 sm:$0xff]   ;;  %v13213_v37 = vld [vmem:[#allocation3 + $0x130] ss:$8 sps:$4 sm:$0xff]  }
  0x96   :  { %v14177_v38 = vld [vmem:[#allocation5] sm:$0xf]  ;;  %v13216_v41 = vld [vmem:[#allocation3 + $0x184] ss:$8 sps:$4 sm:$0xff]  }
  0x97   :  { %10763 = vmatpush3.bf16.msra.mxu1 %v14047_v34  ;;  %10723 = vmatpush3.bf16.msra.mxu0 %v14047_v34  ;;  %v13214_v39 = vld [vmem:[#allocation3 + $0x180] ss:$8 sps:$4 sm:$0xff]  }
  0x98   :  { %10764 = vmatprep.subr.bf16.mxu1 %v14054_v36  ;;  %10724 = vmatprep.subr.bf16.mxu0 %v14054_v36 }
  0x9b   :  { %10765 = vmatpush3.bf16.msra.mxu1 %v14067_v40  ;;  %10725 = vmatpush3.bf16.msra.mxu0 %v14067_v40 }
  0x9c   :  { %10766 = vmatprep.subr.bf16.mxu1 %v14077_v43  ;;  %10726 = vmatprep.subr.bf16.mxu0 %v14077_v43 }
  0x9f   :  { %10767 = vmatpush3.bf16.msra.mxu1 %v14087_v46  ;;  %10727 = vmatpush3.bf16.msra.mxu0 %v14087_v46 }
  0xa0   :  { %10768 = vmatprep.subr.bf16.mxu1 %v14094_v48  ;;  %10728 = vmatprep.subr.bf16.mxu0 %v14094_v48 }
  0xa3   :  { %10769 = vmatpush3.bf16.msra.mxu1 %v14101_v50  ;;  %10729 = vmatpush3.bf16.msra.mxu0 %v14101_v50 }
  0xa4   :  { %10804 = vmatprep.subr.bf16.mxu1 %v13957_v4  ;;  %13120 = vmatprep.subr.msk.bf16.mxu0 %vm471_vm0, %v14156_v27 }
  0xa6   :  { %420 = vmatmul.mubr.bf16.vlgmr.msra.gmra.mrb[0].mxu1 %v13154_v51  ;;  %301 = vmatmul.mubr.bf16.vlgmr.msra.gmra.mrb[0].mxu0 %v13160_v52 }
  0xa7   :  { %10805 = vmatpush3.bf16.msra.mxu1 %v13968_v8  ;;  %427 = vmatprep.mubr.bf16.mxu1 %v13157_v53 }
  0xa8   :  { %10806 = vmatprep.subr.bf16.mxu1 %v13970_v9  ;;  %308 = vmatprep.mubr.bf16.mxu0 %v13166_v54 }
  0xa9   :  { %11831 = vmatpush3.bf16.msra.mxu0 %v14163_v29 }
  0xaa   :  { %13121 = vmatprep.subr.msk.bf16.mxu0 %vm471_vm0, %v14177_v38 }
  0xab   :  { %10807 = vmatpush3.bf16.msra.mxu1 %v13987_v14 }
  0xac   :  { %10808 = vmatprep.subr.bf16.mxu1 %v13991_v15 }
  0xae   :  { %428 = vmatmul.mubr.bf16.gmra.mrb[4].mxu1 %v13159_v55  ;;  %309 = vmatmul.mubr.bf16.gmra.mrb[4].mxu0 %v13170_v56 }
  0xaf   :  { %10809 = vmatpush3.bf16.msra.mxu1 %v14007_v20  ;;  %435 = vmatprep.mubr.bf16.mxu1 %v13163_v57 }
  0xb0   :  { %10810 = vmatprep.subr.bf16.mxu1 %v14011_v21  ;;  %316 = vmatprep.mubr.bf16.mxu0 %v13172_v58  ;;  %v13217_v58 = vld [vmem:[#allocation3 + $0x194] ss:$8 sps:$4 sm:$0xff]  }
  0xb3   :  { %10811 = vmatpush3.bf16.msra.mxu1 %v14030_v28 }
  0xb4   :  { %10812 = vmatprep.subr.bf16.mxu1 %v14037_v30 }
  0xb6   :  { %436 = vmatmul.mubr.bf16.gmra.mrb[8].mxu1 %v13165_v59  ;;  %317 = vmatmul.mubr.bf16.gmra.mrb[8].mxu0 %v13177_v60 }
  0xb7   :  { %10813 = vmatpush3.bf16.msra.mxu1 %v14047_v34  ;;  %443 = vmatprep.mubr.bf16.mxu1 %v13168_v61  ;;  %v13219_v61 = vld [vmem:[#allocation3 + $0x190] ss:$8 sps:$4 sm:$0xff]  }
  0xb8   :  { %10814 = vmatprep.subr.bf16.mxu1 %v14054_v36  ;;  %324 = vmatprep.mubr.bf16.mxu0 %v13178_v62 }
  0xbb   :  { %10815 = vmatpush3.bf16.msra.mxu1 %v14067_v40 }
  0xbc   :  { %10816 = vmatprep.subr.bf16.mxu1 %v14077_v43 }
  0xbe   :  { %444 = vmatmul.mubr.bf16.gmra.mrb[12].mxu1 %v13171_v63  ;;  %325 = vmatmul.mubr.bf16.gmra.mrb[12].mxu0 %v13182_v0 }
  0xbf   :  { %10817 = vmatpush3.bf16.msra.mxu1 %v14087_v46  ;;  %701 = vmatprep.mubr.bf16.mxu1 %v13176_v1 }
  0xc0   :  { %10818 = vmatprep.subr.bf16.mxu1 %v14094_v48 }
  0xc3   :  { %10819 = vmatpush3.bf16.msra.mxu1 %v14101_v50 }
  0xc4   :  { %10849 = vmatprep.subr.bf16.mxu1 %v13957_v4 }
  0xc6   :  { %702 = vmatmul.mubr.bf16.vlgmr.msra.gmra.mrb[16].mxu1 %v13174_v2 }
  0xc7   :  { %10850 = vmatpush3.bf16.msra.mxu1 %v13968_v8  ;;  %709 = vmatprep.mubr.bf16.mxu1 %v13180_v3 }
  0xc8   :  { %10851 = vmatprep.subr.bf16.mxu1 %v13970_v9 }
  0xcb   :  { %10852 = vmatpush3.bf16.msra.mxu1 %v13987_v14 }
  0xcc   :  { %10853 = vmatprep.subr.bf16.mxu1 %v13991_v15 }
  0xce   :  { %710 = vmatmul.mubr.bf16.gmra.mrb[20].mxu1 %v13183_v5 }
  0xcf   :  { %10854 = vmatpush3.bf16.msra.mxu1 %v14007_v20  ;;  %717 = vmatprep.mubr.bf16.mxu1 %v13184_v6 }
  0xd0   :  { %10855 = vmatprep.subr.bf16.mxu1 %v14011_v21 }
  0xd3   :  { %10856 = vmatpush3.bf16.msra.mxu1 %v14030_v28 }
  0xd4   :  { %10857 = vmatprep.subr.bf16.mxu1 %v14037_v30 }
  0xd6   :  { %718 = vmatmul.mubr.bf16.gmra.mrb[24].mxu1 %v13186_v7 }
  0xd7   :  { %10858 = vmatpush3.bf16.msra.mxu1 %v14047_v34  ;;  %725 = vmatprep.mubr.bf16.mxu1 %v13187_v10 }
  0xd8   :  { %10859 = vmatprep.subr.bf16.mxu1 %v14054_v36 }
  0xdb   :  { %10860 = vmatpush3.bf16.msra.mxu1 %v14067_v40 }
  0xdc   :  { %10861 = vmatprep.subr.bf16.mxu1 %v14077_v43 }
  0xde   :  { %726 = vmatmul.mubr.bf16.gmra.mrb[28].mxu1 %v13189_v11 }
  0xdf   :  { %10862 = vmatpush3.bf16.msra.mxu1 %v14087_v46  ;;  %909 = vmatprep.mubr.bf16.mxu1 %v13192_v12 }
  0xe0   :  { %10863 = vmatprep.subr.bf16.mxu1 %v14094_v48 }
  0xe3   :  { %10864 = vmatpush3.bf16.msra.mxu1 %v14101_v50 }
  0xe4   :  { %10894 = vmatprep.subr.bf16.mxu1 %v13957_v4 }
  0xe6   :  { %910 = vmatmul.mubr.bf16.vlgmr.msra.gmra.mrb[32].mxu1 %v13190_v13  ;;  %v13223_v13 = vld [vmem:[#allocation3 + $0x1a4] ss:$8 sps:$4 sm:$0xff]  }
  0xe7   :  { %10895 = vmatpush3.bf16.msra.mxu1 %v13968_v8  ;;  %917 = vmatprep.mubr.bf16.mxu1 %v13193_v16 }
  0xe8   :  { %10896 = vmatprep.subr.bf16.mxu1 %v13970_v9 }
  0xeb   :  { %10897 = vmatpush3.bf16.msra.mxu1 %v13987_v14 }
  0xec   :  { %10898 = vmatprep.subr.bf16.mxu1 %v13991_v15 }
  0xee   :  { %918 = vmatmul.mubr.bf16.gmra.mrb[36].mxu1 %v13195_v17 }
  0xef   :  { %10899 = vmatpush3.bf16.msra.mxu1 %v14007_v20  ;;  %925 = vmatprep.mubr.bf16.mxu1 %v13196_v18  ;;  %v14208_v18 = vsel %vm471_vm0, %v14177_v38, 0 }
  0xf0   :  { %10900 = vmatprep.subr.bf16.mxu1 %v14011_v21  ;;  %17209 = vst [vmem:[#allocation17_spill] sm:$0xff] %v14208_v18 }
  0xf3   :  { %10901 = vmatpush3.bf16.msra.mxu1 %v14030_v28 }
  0xf4   :  { %10902 = vmatprep.subr.bf16.mxu1 %v14037_v30 }
  0xf6   :  { %926 = vmatmul.mubr.bf16.gmra.mrb[40].mxu1 %v13198_v19  ;;  %v13225_v19 = vld [vmem:[#allocation3 + $0x1a0] ss:$8 sps:$4 sm:$0xff]  }
  0xf7   :  { %10903 = vmatpush3.bf16.msra.mxu1 %v14047_v34  ;;  %933 = vmatprep.mubr.bf16.mxu1 %v13199_v22  ;;  %v14211_v22 = vld [vmem:[#allocation5 + $0x8] sm:$0xf] }
  0xf8   :  { %10904 = vmatprep.subr.bf16.mxu1 %v14054_v36 }
  0xfb   :  { %10905 = vmatpush3.bf16.msra.mxu1 %v14067_v40 }
  0xfc   :  { %10906 = vmatprep.subr.bf16.mxu1 %v14077_v43 }
  0xfe   :  { %934 = vmatmul.mubr.bf16.gmra.mrb[44].mxu1 %v13201_v23 }
  0xff   :  { %10907 = vmatpush3.bf16.msra.mxu1 %v14087_v46  ;;  %1117 = vmatprep.mubr.bf16.mxu1 %v13204_v24 }
 0x100   :  { %10908 = vmatprep.subr.bf16.mxu1 %v14094_v48 }
 0x103   :  { %10909 = vmatpush3.bf16.msra.mxu1 %v14101_v50 }
 0x104   :  { %10984 = vmatprep.subr.bf16.mxu1 %v13957_v4 }
 0x106   :  { %1118 = vmatmul.mubr.bf16.vlgmr.msra.gmra.mrb[48].mxu1 %v13202_v25 }
 0x107   :  { %1125 = vmatprep.mubr.bf16.mxu1 %v13205_v26  ;;  %10985 = vmatpush3.bf16.msra.mxu1 %v13968_v8 }
 0x108   :  { %10986 = vmatprep.subr.bf16.mxu1 %v13970_v9 }
 0x10b   :  { %10987 = vmatpush3.bf16.msra.mxu1 %v13987_v14 }
 0x10c   :  { %10988 = vmatprep.subr.bf16.mxu1 %v13991_v15 }
 0x10e   :  { %1126 = vmatmul.mubr.bf16.gmra.mrb[52].mxu1 %v13207_v31  ;;  %v13228_v31 = vld [vmem:[#allocation3 + $0x1b4] ss:$8 sps:$4 sm:$0xff]  }
 0x10f   :  { %1133 = vmatprep.mubr.bf16.mxu1 %v13208_v32  ;;  %10989 = vmatpush3.bf16.msra.mxu1 %v14007_v20 }
 0x110   :  { %10990 = vmatprep.subr.bf16.mxu1 %v14011_v21 }
 0x113   :  { %10991 = vmatpush3.bf16.msra.mxu1 %v14030_v28 }
 0x114   :  { %10992 = vmatprep.subr.bf16.mxu1 %v14037_v30 }
 0x116   :  { %1134 = vmatmul.mubr.bf16.gmra.mrb[56].mxu1 %v13210_v33 }
 0x117   :  { %1141 = vmatprep.mubr.bf16.mxu1 %v13211_v35  ;;  %10993 = vmatpush3.bf16.msra.mxu1 %v14047_v34 }
 0x118   :  { %10994 = vmatprep.subr.bf16.mxu1 %v14054_v36 }
 0x11b   :  { %10995 = vmatpush3.bf16.msra.mxu1 %v14067_v40 }
 0x11c   :  { %10996 = vmatprep.subr.bf16.mxu1 %v14077_v43 }
 0x11e   :  { %1142 = vmatmul.mubr.bf16.gmra.mrb[60].mxu1 %v13213_v37 }
 0x11f   :  { %10997 = vmatpush3.bf16.msra.mxu1 %v14087_v46  ;;  %1533 = vmatprep.mubr.bf16.mxu1 %v13216_v41 }
 0x120   :  { %10998 = vmatprep.subr.bf16.mxu1 %v14094_v48 }
 0x123   :  { %10999 = vmatpush3.bf16.msra.mxu1 %v14101_v50 }
 0x124   :  { %11029 = vmatprep.subr.bf16.mxu1 %v13957_v4 }
 0x126   :  { %1534 = vmatmul.mubr.bf16.vlgmr.msra.gmra.mrb[64].mxu1 %v13214_v39 }
 0x127   :  { %11030 = vmatpush3.bf16.msra.mxu1 %v13968_v8  ;;  %1541 = vmatprep.mubr.bf16.mxu1 %v13217_v58 }
 0x128   :  { %11031 = vmatprep.subr.bf16.mxu1 %v13970_v9 }
 0x12b   :  { %11032 = vmatpush3.bf16.msra.mxu1 %v13987_v14 }
 0x12c   :  { %11033 = vmatprep.subr.bf16.mxu1 %v13991_v15 }
 0x12e   :  { %1542 = vmatmul.mubr.bf16.gmra.mrb[68].mxu1 %v13219_v61 }
 0x12f   :  { %11034 = vmatpush3.bf16.msra.mxu1 %v14007_v20  ;;  %1549 = vmatprep.mubr.bf16.mxu1 %v13223_v13  ;;  %v13240_v13 = vld [vmem:[#allocation3 + $0x1d4] ss:$8 sps:$4 sm:$0xff]  }
 0x130   :  { %11035 = vmatprep.subr.bf16.mxu1 %v14011_v21 }
 0x133   :  { %11036 = vmatpush3.bf16.msra.mxu1 %v14030_v28 }
 0x134   :  { %11037 = vmatprep.subr.bf16.mxu1 %v14037_v30 }
 0x136   :  { %1550 = vmatmul.mubr.bf16.gmra.mrb[72].mxu1 %v13225_v19 }
 0x137   :  { %11038 = vmatpush3.bf16.msra.mxu1 %v14047_v34  ;;  %1557 = vmatprep.mubr.bf16.mxu1 %v13228_v31  ;;  %v13244_v31 = vld [vmem:[#allocation3 + $0x1e4] ss:$8 sps:$4 sm:$0xff]  }
 0x138   :  { %11039 = vmatprep.subr.bf16.mxu1 %v14054_v36 }
 0x13b   :  { %11040 = vmatpush3.bf16.msra.mxu1 %v14067_v40 }
 0x13c   :  { %11041 = vmatprep.subr.bf16.mxu1 %v14077_v43 }
 0x13f   :  { %11042 = vmatpush3.bf16.msra.mxu1 %v14087_v46 }
 0x140   :  { %11043 = vmatprep.subr.bf16.mxu1 %v14094_v48 }
 0x143   :  { %11044 = vmatpush3.bf16.msra.mxu1 %v14101_v50 }
 0x144   :  { %11074 = vmatprep.subr.bf16.mxu1 %v13957_v4 }
 0x179   :  { %v10770_v42 = vpop.f32.mrb[0].mxu1  ;;  %v10730_v44 = vpop.f32.mrb[0].mxu0 }
 0x17a   :  { %v10771_v45 = vpop.f32.mrb[1].mxu1  ;;  %v10731_v47 = vpop.f32.mrb[1].mxu0 }
 0x17b   :  { %v10772_v49 = vadd.f32 %v10771_v45, %v10770_v42  ;;  %v10773_v51 = vpop.f32.mrb[2].mxu1  ;;  %v14187_v52 = vadd.f32 %v10731_v47, %v10730_v44  ;;  %v10733_v53 = vpop.f32.mrb[2].mxu0 }
 0x17c   :  { %v10774_v54 = vpop.f32.mrb[3].mxu1  ;;  %v10734_v55 = vpop.f32.mrb[3].mxu0 }
 0x17d   :  { %v10775_v56 = vadd.f32 %v10774_v54, %v10773_v51  ;;  %v14190_v57 = vadd.f32 %v10734_v55, %v10733_v53 }
 0x17f   :  { %v452_v59 = vpack.c.bf16 %v10775_v56, %v10772_v49  ;;  %v333_v60 = vpack.c.bf16 %v14190_v57, %v14187_v52  ;;  %v13231_v49 = vld [vmem:[#allocation3 + $0x1b0] ss:$8 sps:$4 sm:$0xff]   ;;  %v13236_v56 = vld [vmem:[#allocation3 + $0x1c4] ss:$8 sps:$4 sm:$0xff]  }
 0x180   :  { %1558 = vmatmul.mubr.bf16.gmra.mrb[76].mxu1 %v13231_v49  ;;  %v13243_v52 = vld [vmem:[#allocation3 + $0x1d0] ss:$8 sps:$4 sm:$0xff]   ;;  %v947_v57 = vld [vmem:[#allocation5 + $0xc] sm:$0xf] }
 0x181   :  { %v10776_v62 = vpop.f32.mrb[4].mxu1  ;;  %11832 = vmatprep.mubr.msk.bf16.mxu0 %vm458_vm1, %v452_v59  ;;  %v10736_v63 = vpop.f32.mrb[4].mxu0  ;;  %1741 = vmatprep.mubr.bf16.mxu1 %v13236_v56  ;;  %v13249_v49 = vld [vmem:[#allocation3 + $0x1f0] ss:$8 sps:$4 sm:$0xff]  }
 0x182   :  { %v10777_v0 = vpop.f32.mrb[5].mxu1  ;;  %v10737_v1 = vpop.f32.mrb[5].mxu0 }
 0x183   :  { %v10778_v2 = vadd.f32 %v10777_v0, %v10776_v62  ;;  %v10779_v3 = vpop.f32.mrb[6].mxu1  ;;  %v14198_v5 = vadd.f32 %v10737_v1, %v10736_v63  ;;  %v10739_v6 = vpop.f32.mrb[6].mxu0 }
 0x184   :  { %v10780_v7 = vpop.f32.mrb[7].mxu1  ;;  %v10740_v10 = vpop.f32.mrb[7].mxu0 }
 0x185   :  { %v10781_v11 = vadd.f32 %v10780_v7, %v10779_v3  ;;  %v14201_v12 = vadd.f32 %v10740_v10, %v10739_v6  ;;  %v13234_v3 = vld [vmem:[#allocation3 + $0x1c0] ss:$8 sps:$4 sm:$0xff]  }
 0x187   :  { %v453_v16 = vpack.c.bf16 %v10781_v11, %v10778_v2  ;;  %v334_v17 = vpack.c.bf16 %v14201_v12, %v14198_v5  ;;  %v13246_v12 = vld [vmem:[#allocation3 + $0x1e0] ss:$8 sps:$4 sm:$0xff]  }
 0x188   :  { %1742 = vmatmul.mubr.bf16.vlgmr.msra.gmra.mrb[80].mxu1 %v13234_v3 }
 0x189   :  { %v10782_v23 = vpop.f32.mrb[8].mxu1  ;;  %11833 = vmatmul.mubr.msk.bf16.vlgmr.msra.gmra.mrb[16].mxu0 %vm458_vm1, %v453_v16  ;;  %v10742_v24 = vpop.f32.mrb[8].mxu0  ;;  %11075 = vmatpush3.bf16.msra.mxu1 %v13968_v8 }
 0x18a   :  { %v10783_v25 = vpop.f32.mrb[9].mxu1  ;;  %v10743_v26 = vpop.f32.mrb[9].mxu0  ;;  %11841 = vmatpush3.bf16.msra.mxu0 %v14208_v18  ;;  %11076 = vmatprep.subr.bf16.mxu1 %v13970_v9 }
 0x18b   :  { %v10784_v32 = vadd.f32 %v10783_v25, %v10782_v23  ;;  %v10785_v33 = vpop.f32.mrb[10].mxu1  ;;  %v10744_v35 = vadd.f32 %v10743_v26, %v10742_v24  ;;  %v10745_v37 = vpop.f32.mrb[10].mxu0  ;;  %13122 = vmatprep.subr.msk.bf16.mxu0 %vm471_vm0, %v14211_v22  ;;  %1749 = vmatprep.mubr.bf16.mxu1 %v13240_v13  ;;  %v14236_v26 = vsel %vm471_vm0, %v14211_v22, 0 }
 0x18c   :  { %v10786_v39 = vpop.f32.mrb[11].mxu1  ;;  %v10746_v41 = vpop.f32.mrb[11].mxu0  ;;  %17210 = vst [vmem:[#allocation18_spill] sm:$0xff] %v14236_v26 }
 0x18d   :  { %v10787_v42 = vadd.f32 %v10786_v39, %v10785_v33  ;;  %v10747_v44 = vadd.f32 %v10746_v41, %v10745_v37  ;;  %11077 = vmatpush3.bf16.msra.mxu1 %v13987_v14 }
 0x18e   :  { %11078 = vmatprep.subr.bf16.mxu1 %v13991_v15 }
 0x18f   :  { %v454_v45 = vpack.c.bf16 %v10787_v42, %v10784_v32  ;;  %v335_v47 = vpack.c.bf16 %v10747_v44, %v10744_v35 }
 0x190   :  { %1750 = vmatmul.mubr.bf16.gmra.mrb[84].mxu1 %v13243_v52 }
 0x191   :  { %v10788_v51 = vpop.f32.mrb[12].mxu1  ;;  %11836 = vmatprep.mubr.msk.bf16.mxu0 %vm458_vm1, %v454_v45  ;;  %v10748_v53 = vpop.f32.mrb[12].mxu0  ;;  %11079 = vmatpush3.bf16.msra.mxu1 %v14007_v20 }
 0x192   :  { %v10789_v54 = vpop.f32.mrb[13].mxu1  ;;  %v10749_v55 = vpop.f32.mrb[13].mxu0  ;;  %11080 = vmatprep.subr.bf16.mxu1 %v14011_v21  ;;  %1757 = vmatprep.mubr.bf16.mxu1 %v13244_v31 }
 0x193   :  { %v10791_v58 = vpop.f32.mrb[14].mxu1  ;;  %v10790_v59 = vadd.f32 %v10789_v54, %v10788_v51  ;;  %v10750_v61 = vadd.f32 %v10749_v55, %v10748_v53  ;;  %v10751_v62 = vpop.f32.mrb[14].mxu0  ;;  %v14255_v53 = vsel %vm471_vm0, %v947_v57, 0  ;;  %v1155_v54 = vld [vmem:[#allocation5 + $0x10] sm:$0xf] }
 0x194   :  { %v10792_v63 = vpop.f32.mrb[15].mxu1  ;;  %v10752_v0 = vpop.f32.mrb[15].mxu0  ;;  %17211 = vst [vmem:[#allocation19_spill] sm:$0xff] %v14255_v53  ;;  %v13252_v55 = vld [vmem:[#allocation3 + $0x204] ss:$8 sps:$4 sm:$0xff]  }
 0x195   :  { %v10793_v1 = vadd.f32 %v10792_v63, %v10791_v58  ;;  %v10753_v2 = vadd.f32 %v10752_v0, %v10751_v62  ;;  %11081 = vmatpush3.bf16.msra.mxu1 %v14030_v28  ;;  %v13250_v0 = vld [vmem:[#allocation3 + $0x200] ss:$8 sps:$4 sm:$0xff]  }
 0x196   :  { %11082 = vmatprep.subr.bf16.mxu1 %v14037_v30 }
 0x197   :  { %v455_v6 = vpack.c.bf16 %v10793_v1, %v10790_v59  ;;  %v336_v7 = vpack.c.bf16 %v10753_v2, %v10750_v61  ;;  %v13253_v2 = vld [vmem:[#allocation3 + $0x214] ss:$8 sps:$4 sm:$0xff]  }
 0x198   :  { %1758 = vmatmul.mubr.bf16.gmra.mrb[88].mxu1 %v13246_v12 }
 0x199   :  { %11837 = vmatmul.mubr.msk.bf16.gmra.mrb[20].mxu0 %vm458_vm1, %v455_v6  ;;  %v10820_v10 = vpop.f32.mrb[16].mxu1  ;;  %11083 = vmatpush3.bf16.msra.mxu1 %v14047_v34 }
 0x19a   :  { %v10821_v11 = vpop.f32.mrb[17].mxu1  ;;  %11842 = vmatprep.mubr.msk.bf16.mxu0 %vm458_vm1, %v333_v60  ;;  %11084 = vmatprep.subr.bf16.mxu1 %v14054_v36 }
 0x19b   :  { %v10822_v16 = vadd.f32 %v10821_v11, %v10820_v10  ;;  %v10823_v19 = vpop.f32.mrb[18].mxu1 }
 0x19c   :  { %v10824_v23 = vpop.f32.mrb[19].mxu1 }
 0x19d   :  { %v10825_v24 = vadd.f32 %v10824_v23, %v10823_v19  ;;  %11085 = vmatpush3.bf16.msra.mxu1 %v14067_v40  ;;  %v13256_v23 = vld [vmem:[#allocation3 + $0x224] ss:$8 sps:$4 sm:$0xff]  }
 0x19e   :  { %11086 = vmatprep.subr.bf16.mxu1 %v14077_v43 }
 0x19f   :  { %v734_v25 = vpack.c.bf16 %v10825_v24, %v10822_v16  ;;  %v13255_v16 = vld [vmem:[#allocation3 + $0x210] ss:$8 sps:$4 sm:$0xff]  }
 0x1a1   :  { %11843 = vmatmul.mubr.msk.bf16.vlgmr.msra.gmra.mrb[16].mxu0 %vm458_vm1, %v334_v17  ;;  %v10826_v60 = vpop.f32.mrb[20].mxu1  ;;  %v13247_v17 = vld [vmem:[#allocation3 + $0x1f4] ss:$8 sps:$4 sm:$0xff]   ;;  %11087 = vmatpush3.bf16.msra.mxu1 %v14087_v46 }
 0x1a2   :  { %v10827_v32 = vpop.f32.mrb[21].mxu1  ;;  %11846 = vmatprep.mubr.msk.bf16.mxu0 %vm458_vm1, %v335_v47  ;;  %11851 = vmatpush3.bf16.msra.mxu0 %v14236_v26 }
 0x1a3   :  { %v10828_v33 = vadd.f32 %v10827_v32, %v10826_v60  ;;  %v10829_v22 = vpop.f32.mrb[22].mxu1  ;;  %13123 = vmatprep.subr.msk.bf16.mxu0 %vm471_vm0, %v947_v57  ;;  %1765 = vmatprep.mubr.bf16.mxu1 %v13247_v17  ;;  %v13258_v32 = vld [vmem:[#allocation3 + $0x220] ss:$8 sps:$4 sm:$0xff]  }
 0x1a4   :  { %v10830_v35 = vpop.f32.mrb[23].mxu1  ;;  %1766 = vmatmul.mubr.bf16.gmra.mrb[92].mxu1 %v13249_v49  ;;  %11088 = vmatprep.subr.bf16.mxu1 %v14094_v48 }
 0x1a5   :  { %v10831_v5 = vadd.f32 %v10830_v35, %v10829_v22  ;;  %1949 = vmatprep.mubr.bf16.mxu1 %v13252_v55  ;;  %11089 = vmatpush3.bf16.msra.mxu1 %v14101_v50  ;;  %v14269_v22 = vsel %vm471_vm0, %v1155_v54, 0  ;;  %v13259_v35 = vld [vmem:[#allocation3 + $0x234] ss:$8 sps:$4 sm:$0xff]  }
 0x1a6   :  { %17212 = vst [vmem:[#allocation20_spill] sm:$0xff] %v14269_v22 }
 0x1a7   :  { %v735_v37 = vpack.c.bf16 %v10831_v5, %v10828_v33 }
 0x1a9   :  { %11847 = vmatmul.mubr.msk.bf16.gmra.mrb[20].mxu0 %vm458_vm1, %v336_v7  ;;  %v10832_v39 = vpop.f32.mrb[24].mxu1 }
 0x1aa   :  { %v10833_v41 = vpop.f32.mrb[25].mxu1  ;;  %11852 = vmatprep.mubr.msk.bf16.mxu0 %vm458_vm1, %v734_v25 }
 0x1ab   :  { %v10834_v42 = vadd.f32 %v10833_v41, %v10832_v39  ;;  %v10835_v44 = vpop.f32.mrb[26].mxu1 }
 0x1ac   :  { %v10836_v45 = vpop.f32.mrb[27].mxu1  ;;  %1950 = vmatmul.mubr.bf16.vlgmr.msra.gmra.mrb[96].mxu1 %v13250_v0 }
 0x1ad   :  { %v10837_v47 = vadd.f32 %v10836_v45, %v10835_v44  ;;  %1957 = vmatprep.mubr.bf16.mxu1 %v13253_v2 }
 0x1af   :  { %v736_v51 = vpack.c.bf16 %v10837_v47, %v10834_v42  ;;  %v13261_v42 = vld [vmem:[#allocation3 + $0x230] ss:$8 sps:$4 sm:$0xff]  }
 0x1b1   :  { %v10838_v56 = vpop.f32.mrb[28].mxu1  ;;  %11853 = vmatmul.mubr.msk.bf16.vlgmr.msra.gmra.mrb[16].mxu0 %vm458_vm1, %v735_v37 }
 0x1b2   :  { %v10839_v58 = vpop.f32.mrb[29].mxu1  ;;  %11856 = vmatprep.mubr.msk.bf16.mxu0 %vm458_vm1, %v736_v51  ;;  %11861 = vmatpush3.bf16.msra.mxu0 %v14255_v53 }
 0x1b3   :  { %v10840_v59 = vadd.f32 %v10839_v58, %v10838_v56  ;;  %v10841_v61 = vpop.f32.mrb[30].mxu1  ;;  %13124 = vmatprep.subr.msk.bf16.mxu0 %vm471_vm0, %v1155_v54  ;;  %v13553_v54 = vld [vmem:[#allocation3 + $0x4] ss:$8 sps:$4 sm:$0xff]  }
 0x1b4   :  { %v10842_v62 = vpop.f32.mrb[31].mxu1  ;;  %1958 = vmatmul.mubr.bf16.gmra.mrb[100].mxu1 %v13255_v16 }
 0x1b5   :  { %v10843_v63 = vadd.f32 %v10842_v62, %v10841_v61  ;;  %1965 = vmatprep.mubr.bf16.mxu1 %v13256_v23 }
 0x1b7   :  { %v737_v1 = vpack.c.bf16 %v10843_v63, %v10840_v59 }
 0x1b9   :  { %11857 = vmatmul.mubr.msk.bf16.gmra.mrb[20].mxu0 %vm458_vm1, %v737_v1  ;;  %v10865_v3 = vpop.f32.mrb[32].mxu1 }
 0x1ba   :  { %v10866_v6 = vpop.f32.mrb[33].mxu1 }
 0x1bb   :  { %v10867_v7 = vadd.f32 %v10866_v6, %v10865_v3  ;;  %v10868_v10 = vpop.f32.mrb[34].mxu1 }
 0x1bc   :  { %v10869_v11 = vpop.f32.mrb[35].mxu1  ;;  %1966 = vmatmul.mubr.bf16.gmra.mrb[104].mxu1 %v13258_v32 }
 0x1bd   :  { %v10870_v13 = vadd.f32 %v10869_v11, %v10868_v10  ;;  %1973 = vmatprep.mubr.bf16.mxu1 %v13259_v35  ;;  %v14286_v35 = vld [vmem:[#allocation3 + $0x144] ss:$8 sps:$4 sm:$0xff]  }
 0x1bf   :  { %v942_v19 = vpack.c.bf16 %v10870_v13, %v10867_v7 }
 0x1c1   :  { %v10871_v24 = vpop.f32.mrb[36].mxu1  ;;  %11862 = vmatprep.mubr.msk.bf16.mxu0 %vm458_vm1, %v942_v19 }
 0x1c2   :  { %v10872_v25 = vpop.f32.mrb[37].mxu1 }
 0x1c3   :  { %v10873_v52 = vadd.f32 %v10872_v25, %v10871_v24  ;;  %v10874_v57 = vpop.f32.mrb[38].mxu1 }
 0x1c4   :  { %v10875_v60 = vpop.f32.mrb[39].mxu1  ;;  %1974 = vmatmul.mubr.bf16.gmra.mrb[108].mxu1 %v13261_v42 }
 0x1c5   :  { %v10876_v31 = vadd.f32 %v10875_v60, %v10874_v57  ;;  %2154 = vmatprep.mubr.bf16.mxu1 %v13553_v54 }
 0x1c7   :  { %v943_v33 = vpack.c.bf16 %v10876_v31, %v10873_v52 }
 0x1c9   :  { %v10877_v5 = vpop.f32.mrb[40].mxu1  ;;  %11863 = vmatmul.mubr.msk.bf16.vlgmr.msra.gmra.mrb[16].mxu0 %vm458_vm1, %v943_v33 }
 0x1ca   :  { %v10878_v12 = vpop.f32.mrb[41].mxu1  ;;  %11871 = vmatpush3.bf16.msra.mxu0 %v14269_v22 }
 0x1cb   :  { %v10879_v17 = vadd.f32 %v10878_v12, %v10877_v5  ;;  %v10880_v37 = vpop.f32.mrb[42].mxu1  ;;  %10939 = vmatprep.subr.bf16.mxu0 %v13957_v4 }
 0x1cc   :  { %v10881_v39 = vpop.f32.mrb[43].mxu1 }
 0x1cd   :  { %v10882_v41 = vadd.f32 %v10881_v39, %v10880_v37 }
 0x1cf   :  { %v944_v44 = vpack.c.bf16 %v10882_v41, %v10879_v17 }
 0x1d1   :  { %v10883_v45 = vpop.f32.mrb[44].mxu1  ;;  %11866 = vmatprep.mubr.msk.bf16.mxu0 %vm458_vm1, %v944_v44 }
 0x1d2   :  { %v10884_v47 = vpop.f32.mrb[45].mxu1 }
 0x1d3   :  { %v10885_v49 = vadd.f32 %v10884_v47, %v10883_v45  ;;  %v10886_v51 = vpop.f32.mrb[46].mxu1 }
 0x1d4   :  { %v10887_v55 = vpop.f32.mrb[47].mxu1 }
 0x1d5   :  { %v10888_v56 = vadd.f32 %v10887_v55, %v10886_v51 }
 0x1d7   :  { %v945_v58 = vpack.c.bf16 %v10888_v56, %v10885_v49  ;;  %v13559_v49 = vld [vmem:[#allocation3 + $0x34] ss:$8 sps:$4 sm:$0xff]  }
 0x1d9   :  { %11867 = vmatmul.mubr.msk.bf16.gmra.mrb[20].mxu0 %vm458_vm1, %v945_v58  ;;  %v10910_v4 = vpop.f32.mrb[48].mxu1 }
 0x1da   :  { %v10911_v59 = vpop.f32.mrb[49].mxu1 }
 0x1db   :  { %v10912_v61 = vadd.f32 %v10911_v59, %v10910_v4  ;;  %v10913_v62 = vpop.f32.mrb[50].mxu1  ;;  %v13554_v59 = vld [vmem:[#allocation3] ss:$8 sps:$4 sm:$0xff]  }
 0x1dc   :  { %v10914_v63 = vpop.f32.mrb[51].mxu1 }
 0x1dd   :  { %v10915_v0 = vadd.f32 %v10914_v63, %v10913_v62 }
 0x1df   :  { %v1150_v1 = vpack.c.bf16 %v10915_v0, %v10912_v61 }
 0x1e1   :  { %v10916_v2 = vpop.f32.mrb[52].mxu1  ;;  %11872 = vmatprep.mubr.msk.bf16.mxu0 %vm458_vm1, %v1150_v1 }
 0x1e2   :  { %v10917_v3 = vpop.f32.mrb[53].mxu1 }
 0x1e3   :  { %v10918_v6 = vadd.f32 %v10917_v3, %v10916_v2  ;;  %v10919_v7 = vpop.f32.mrb[54].mxu1  ;;  %v10005_v3 = vld [vmem:[%s17208_s25 + $0x170] sm:$0xff] }
 0x1e4   :  { %v10920_v10 = vpop.f32.mrb[55].mxu1 }
 0x1e5   :  { %v10921_v11 = vadd.f32 %v10920_v10, %v10919_v7 }
 0x1e7   :  { %v1151_v13 = vpack.c.bf16 %v10921_v11, %v10918_v6 }
 0x1e9   :  { %11873 = vmatmul.mubr.msk.bf16.vlgmr.msra.gmra.mrb[16].mxu0 %vm458_vm1, %v1151_v13  ;;  %v10922_v16 = vpop.f32.mrb[56].mxu1 }
 0x1ea   :  { %10940 = vmatpush3.bf16.msra.mxu0 %v13968_v8  ;;  %v10923_v19 = vpop.f32.mrb[57].mxu1 }
 0x1eb   :  { %10941 = vmatprep.subr.bf16.mxu0 %v13970_v9  ;;  %v10924_v23 = vadd.f32 %v10923_v19, %v10922_v16  ;;  %v10925_v24 = vpop.f32.mrb[58].mxu1  ;;  %v10021_v19 = vld [vmem:[%s17208_s25 + $0x1f0] sm:$0xff] }
 0x1ec   :  { %v10926_v25 = vpop.f32.mrb[59].mxu1 }
 0x1ed   :  { %v10927_v52 = vadd.f32 %v10926_v25, %v10925_v24  ;;  %v14354_v24 = vld [vmem:[#allocation5 + $0x18] sm:$0xf] }
 0x1ee   :  { %10942 = vmatpush3.bf16.msra.mxu0 %v13987_v14 }
 0x1ef   :  { %v1152_v57 = vpack.c.bf16 %v10927_v52, %v10924_v23  ;;  %10943 = vmatprep.subr.bf16.mxu0 %v13991_v15  ;;  %v1363_v15 = vld [vmem:[#allocation5 + $0x14] sm:$0xf] }
 0x1f1   :  { %v10928_v60 = vpop.f32.mrb[60].mxu1  ;;  %11876 = vmatprep.mubr.msk.bf16.mxu0 %vm458_vm1, %v1152_v57 }
 0x1f2   :  { %10944 = vmatpush3.bf16.msra.mxu0 %v14007_v20  ;;  %v10929_v31 = vpop.f32.mrb[61].mxu1  ;;  %v14297_v20 = vld [vmem:[#allocation3 + $0x140] ss:$8 sps:$4 sm:$0xff]  }
 0x1f3   :  { %10945 = vmatprep.subr.bf16.mxu0 %v14011_v21  ;;  %v10930_v8 = vadd.f32 %v10929_v31, %v10928_v60  ;;  %v10931_v32 = vpop.f32.mrb[62].mxu1  ;;  %v14300_v21 = vld [vmem:[#allocation3 + $0x154] ss:$8 sps:$4 sm:$0xff]  }
 0x1f4   :  { %v10932_v9 = vpop.f32.mrb[63].mxu1 }
 0x1f5   :  { %v10933_v33 = vadd.f32 %v10932_v9, %v10931_v32  ;;  %v10003_v9 = vld [vmem:[%s17208_s25 + $0x160] sm:$0xff] }
 0x1f6   :  { %10946 = vmatpush3.bf16.msra.mxu0 %v14030_v28  ;;  %v14304_v28 = vsel %vm471_vm0, %v1363_v15, 0 }
 0x1f7   :  { %v1153_v14 = vpack.c.bf16 %v10933_v33, %v10930_v8  ;;  %10947 = vmatprep.subr.bf16.mxu0 %v14037_v30  ;;  %17213 = vst [vmem:[#allocation21_spill] sm:$0xff] %v14304_v28  ;;  %v14309_v30 = vld [vmem:[#allocation3 + $0x150] ss:$8 sps:$4 sm:$0xff]  }
 0x1f9   :  { %11877 = vmatmul.mubr.msk.bf16.gmra.mrb[20].mxu0 %vm458_vm1, %v1153_v14 }
 0x1fa   :  { %10948 = vmatpush3.bf16.msra.mxu0 %v14047_v34  ;;  %1325 = vmatprep.mubr.bf16.mxu0 %v14286_v35  ;;  %v14311_v34 = vld [vmem:[#allocation3 + $0x164] ss:$8 sps:$4 sm:$0xff]  }
 0x1fb   :  { %10949 = vmatprep.subr.bf16.mxu0 %v14054_v36  ;;  %v14315_v36 = vld [vmem:[#allocation3 + $0x160] ss:$8 sps:$4 sm:$0xff]  }
 0x1fe   :  { %10950 = vmatpush3.bf16.msra.mxu0 %v14067_v40  ;;  %v14317_v40 = vld [vmem:[#allocation3 + $0x174] ss:$8 sps:$4 sm:$0xff]  }
 0x1ff   :  { %10951 = vmatprep.subr.bf16.mxu0 %v14077_v43  ;;  %v14321_v43 = vld [vmem:[#allocation3 + $0x170] ss:$8 sps:$4 sm:$0xff]  }
 0x200   :  { %17214 = vst [vmem:[#allocation22_spill] sm:$0xff] %v14321_v43 }
 0x202   :  { %10952 = vmatpush3.bf16.msra.mxu0 %v14087_v46  ;;  %v11000_v46 = vpop.f32.mrb[64].mxu1 }
 0x203   :  { %10953 = vmatprep.subr.bf16.mxu0 %v14094_v48  ;;  %v11001_v48 = vpop.f32.mrb[65].mxu1 }
 0x204   :  { %v11003_v5 = vpop.f32.mrb[66].mxu1 }
 0x205   :  { %v11004_v12 = vpop.f32.mrb[67].mxu1 }
 0x206   :  { %10954 = vmatpush3.bf16.msra.mxu0 %v14101_v50  ;;  %v14324_v50 = vadd.f32 %v11001_v48, %v11000_v46  ;;  %v14326_v17 = vadd.f32 %v11004_v12, %v11003_v5  ;;  %v11006_v39 = vpop.f32.mrb[68].mxu1  ;;  %v10019_v12 = vld [vmem:[%s17208_s25 + $0x1e0] sm:$0xff] }
 0x207   :  { %13125 = vmatprep.subr.msk.bf16.mxu0 %vm471_vm0, %v1363_v15  ;;  %v11007_v41 = vpop.f32.mrb[69].mxu1 }
 0x208   :  { %v14330_v42 = vadd.f32 %v11007_v41, %v11006_v39  ;;  %v11009_v44 = vpop.f32.mrb[70].mxu1 }
 0x209   :  { %1326 = vmatmul.mubr.bf16.vlgmr.msra.gmra.mrb[24].mxu0 %v14297_v20  ;;  %v11010_v45 = vpop.f32.mrb[71].mxu1 }
 0x20a   :  { %1333 = vmatprep.mubr.bf16.mxu0 %v14300_v21  ;;  %11881 = vmatpush3.bf16.msra.mxu0 %v14304_v28  ;;  %v14332_v47 = vadd.f32 %v11010_v45, %v11009_v44  ;;  %v11012_v51 = vpop.f32.mrb[72].mxu1  ;;  %v13560_v28 = vld [vmem:[#allocation3 + $0x30] ss:$8 sps:$4 sm:$0xff]  }
 0x20b   :  { %v11013_v54 = vpop.f32.mrb[73].mxu1  ;;  %13126 = vmatprep.subr.msk.bf16.mxu0 %vm471_vm0, %v14354_v24 }
 0x20c   :  { %v14336_v55 = vadd.f32 %v11013_v54, %v11012_v51  ;;  %v11015_v56 = vpop.f32.mrb[74].mxu1 }
 0x20d   :  { %v11016_v58 = vpop.f32.mrb[75].mxu1 }
 0x20e   :  { %v14338_v4 = vadd.f32 %v11016_v58, %v11015_v56  ;;  %v10001_v56 = vld [vmem:[%s17208_s25 + $0x150] sm:$0xff] }
 0x211   :  { %1334 = vmatmul.mubr.bf16.gmra.mrb[28].mxu0 %v14309_v30 }
 0x212   :  { %1341 = vmatprep.mubr.bf16.mxu0 %v14311_v34 }
 0x219   :  { %1342 = vmatmul.mubr.bf16.gmra.mrb[32].mxu0 %v14315_v36 }
 0x21a   :  { %1349 = vmatprep.mubr.bf16.mxu0 %v14317_v40 }
 0x221   :  { %1350 = vmatmul.mubr.bf16.gmra.mrb[36].mxu0 %v14321_v43 }
 0x253   :  { %v11018_v61 = vpop.f32.mrb[76].mxu1 }
 0x254   :  { %v11019_v62 = vpop.f32.mrb[77].mxu1 }
 0x255   :  { %v14342_v63 = vadd.f32 %v11019_v62, %v11018_v61  ;;  %v11021_v0 = vpop.f32.mrb[78].mxu1 }
 0x256   :  { %v11022_v1 = vpop.f32.mrb[79].mxu1 }
 0x257   :  { %v14344_v2 = vadd.f32 %v11022_v1, %v11021_v0 }
 0x25b   :  { %v11045_v6 = vpop.f32.mrb[80].mxu1 }
 0x25c   :  { %v11046_v7 = vpop.f32.mrb[81].mxu1 }
 0x25d   :  { %v14348_v10 = vadd.f32 %v11046_v7, %v11045_v6  ;;  %v11048_v11 = vpop.f32.mrb[82].mxu1  ;;  %v10017_v7 = vld [vmem:[%s17208_s25 + $0x1d0] sm:$0xff] }
 0x25e   :  { %v11049_v13 = vpop.f32.mrb[83].mxu1 }
 0x25f   :  { %v14350_v16 = vadd.f32 %v11049_v13, %v11048_v11 }
 0x263   :  { %v11051_v23 = vpop.f32.mrb[84].mxu1 }
 0x264   :  { %v11052_v25 = vpop.f32.mrb[85].mxu1 }
 0x265   :  { %v14358_v52 = vadd.f32 %v11052_v25, %v11051_v23  ;;  %v11054_v57 = vpop.f32.mrb[86].mxu1 }
 0x266   :  { %v11055_v60 = vpop.f32.mrb[87].mxu1 }
 0x267   :  { %v14360_v31 = vadd.f32 %v11055_v60, %v11054_v57  ;;  %v10007_v60 = vld [vmem:[%s17208_s25 + $0x180] sm:$0xff] }
 0x26b   :  { %v11057_v8 = vpop.f32.mrb[88].mxu1 }
 0x26c   :  { %v11058_v32 = vpop.f32.mrb[89].mxu1 }
 0x26d   :  { %v14364_v33 = vadd.f32 %v11058_v32, %v11057_v8  ;;  %v11060_v14 = vpop.f32.mrb[90].mxu1  ;;  %v10008_v8 = vld [vmem:[%s17208_s25 + $0x188] sm:$0xff] }
 0x26e   :  { %v11061_v15 = vpop.f32.mrb[91].mxu1 }
 0x26f   :  { %v14366_v46 = vadd.f32 %v11061_v15, %v11060_v14  ;;  %v14392_v14 = vpack.c.bf16 %v10008_v8, %v10007_v60  ;;  %v9993_v60 = vld [vmem:[%s17208_s25 + $0x110] sm:$0xff]  ;;  %v9994_v8 = vld [vmem:[%s17208_s25 + $0x118] sm:$0xff]  ;;  %v9999_v15 = vld [vmem:[%s17208_s25 + $0x140] sm:$0xff] }
 0x271   :  { %11119 = vmatprep.subr.bf16.mxu1 %v14392_v14 }
 0x277   :  { %v11063_v48 = vpop.f32.mrb[92].mxu1 }
 0x278   :  { %v11064_v5 = vpop.f32.mrb[93].mxu1 }
 0x279   :  { %v14370_v39 = vadd.f32 %v11064_v5, %v11063_v48  ;;  %v11066_v41 = vpop.f32.mrb[94].mxu1 }
 0x27a   :  { %v11067_v44 = vpop.f32.mrb[95].mxu1 }
 0x27b   :  { %v14372_v45 = vadd.f32 %v11067_v44, %v11066_v41 }
 0x27f   :  { %v11090_v51 = vpop.f32.mrb[96].mxu1 }
 0x280   :  { %v11091_v54 = vpop.f32.mrb[97].mxu1 }
 0x281   :  { %v14376_v58 = vadd.f32 %v11091_v54, %v11090_v51  ;;  %v11093_v61 = vpop.f32.mrb[98].mxu1  ;;  %v9991_v51 = vld [vmem:[%s17208_s25 + $0x100] sm:$0xff]  ;;  %v9992_v54 = vld [vmem:[%s17208_s25 + $0x108] sm:$0xff] }
 0x282   :  { %v11094_v62 = vpop.f32.mrb[99].mxu1 }
 0x283   :  { %v14378_v0 = vadd.f32 %v11094_v62, %v11093_v61  ;;  %v14407_v61 = vpack.c.bf16 %v9992_v54, %v9991_v51  ;;  %v10015_v62 = vld [vmem:[%s17208_s25 + $0x1c0] sm:$0xff] }
 0x285   :  { %11120 = vmatpush3.bf16.msra.mxu1 %v14407_v61 }
 0x287   :  { %v11096_v1 = vpop.f32.mrb[100].mxu1 }
 0x288   :  { %v11097_v6 = vpop.f32.mrb[101].mxu1 }
 0x289   :  { %v14382_v11 = vadd.f32 %v11097_v6, %v11096_v1  ;;  %v11099_v13 = vpop.f32.mrb[102].mxu1  ;;  %v10009_v6 = vld [vmem:[%s17208_s25 + $0x190] sm:$0xff] }
 0x28a   :  { %v11100_v23 = vpop.f32.mrb[103].mxu1 }
 0x28b   :  { %v14384_v25 = vadd.f32 %v11100_v23, %v11099_v13  ;;  %v10010_v13 = vld [vmem:[%s17208_s25 + $0x198] sm:$0xff] }
 0x28f   :  { %v11102_v57 = vpop.f32.mrb[104].mxu1 }
 0x290   :  { %v11103_v32 = vpop.f32.mrb[105].mxu1 }
 0x291   :  { %v14396_v48 = vadd.f32 %v11103_v32, %v11102_v57  ;;  %v11105_v5 = vpop.f32.mrb[106].mxu1  ;;  %v14418_v57 = vpack.c.bf16 %v10010_v13, %v10009_v6  ;;  %v10011_v6 = vld [vmem:[%s17208_s25 + $0x1a0] sm:$0xff]  ;;  %v10012_v13 = vld [vmem:[%s17208_s25 + $0x1a8] sm:$0xff] }
 0x292   :  { %v11106_v41 = vpop.f32.mrb[107].mxu1 }
 0x293   :  { %v14399_v44 = vadd.f32 %v11106_v41, %v11105_v5  ;;  %v14428_v41 = vpack.c.bf16 %v9994_v8, %v9993_v60  ;;  %11121 = vmatprep.subr.bf16.mxu1 %v14418_v57  ;;  %v9996_v60 = vld [vmem:[%s17208_s25 + $0x128] sm:$0xff]  ;;  %v9997_v8 = vld [vmem:[%s17208_s25 + $0x130] sm:$0xff] }
 0x295   :  { %11122 = vmatpush3.bf16.msra.mxu1 %v14428_v41 }
 0x297   :  { %v11108_v1 = vpop.f32.mrb[108].mxu1 }
 0x298   :  { %v11109_v23 = vpop.f32.mrb[109].mxu1 }
 0x299   :  { %v14426_v32 = vadd.f32 %v11109_v23, %v11108_v1  ;;  %v11111_v5 = vpop.f32.mrb[110].mxu1  ;;  %v14440_v1 = vpack.c.bf16 %v10012_v13, %v10011_v6  ;;  %v9995_v23 = vld [vmem:[%s17208_s25 + $0x120] sm:$0xff]  ;;  %v10014_v6 = vld [vmem:[%s17208_s25 + $0x1b8] sm:$0xff] }
 0x29a   :  { %v11112_v51 = vpop.f32.mrb[111].mxu1 }
 0x29b   :  { %v14431_v54 = vadd.f32 %v11112_v51, %v11111_v5  ;;  %v14450_v5 = vpack.c.bf16 %v9996_v60, %v9995_v23  ;;  %11123 = vmatprep.subr.bf16.mxu1 %v14440_v1  ;;  %v10013_v51 = vld [vmem:[%s17208_s25 + $0x1b0] sm:$0xff]  ;;  %v9998_v23 = vld [vmem:[%s17208_s25 + $0x138] sm:$0xff] }
 0x29c   :  { %v14460_v13 = vpack.c.bf16 %v10014_v6, %v10013_v51  ;;  %v14468_v60 = vpack.c.bf16 %v9998_v23, %v9997_v8  ;;  %v10016_v51 = vld [vmem:[%s17208_s25 + $0x1c8] sm:$0xff] }
 0x29d   :  { %11124 = vmatpush3.bf16.msra.mxu1 %v14450_v5  ;;  %v14478_v6 = vpack.c.bf16 %v10016_v51, %v10015_v62  ;;  %v10000_v8 = vld [vmem:[%s17208_s25 + $0x148] sm:$0xff]  ;;  %v10018_v62 = vld [vmem:[%s17208_s25 + $0x1d8] sm:$0xff] }
 0x29e   :  { %11125 = vmatprep.subr.bf16.mxu1 %v14460_v13  ;;  %v14486_v23 = vpack.c.bf16 %v10000_v8, %v9999_v15  ;;  %v14496_v51 = vpack.c.bf16 %v10018_v62, %v10017_v7  ;;  %v10002_v15 = vld [vmem:[%s17208_s25 + $0x158] sm:$0xff]  ;;  %v10020_v7 = vld [vmem:[%s17208_s25 + $0x1e8] sm:$0xff] }
 0x29f   :  { %v14504_v8 = vpack.c.bf16 %v10002_v15, %v10001_v56  ;;  %v14514_v62 = vpack.c.bf16 %v10020_v7, %v10019_v12  ;;  %v10004_v56 = vld [vmem:[%s17208_s25 + $0x168] sm:$0xff]  ;;  %v10022_v12 = vld [vmem:[%s17208_s25 + $0x1f8] sm:$0xff] }
 0x2a0   :  { %v14522_v15 = vpack.c.bf16 %v10004_v56, %v10003_v9  ;;  %v14532_v7 = vpack.c.bf16 %v10022_v12, %v10021_v19  ;;  %v10006_v9 = vld [vmem:[%s17208_s25 + $0x178] sm:$0xff] }
 0x2a1   :  { %11126 = vmatpush3.bf16.msra.mxu1 %v14468_v60  ;;  %v14540_v56 = vpack.c.bf16 %v10006_v9, %v10005_v3  ;;  %v13555_v19 = vld [vmem:[#allocation3 + $0x14] ss:$8 sps:$4 sm:$0xff]   ;;  %v13556_v12 = vld [vmem:[#allocation3 + $0x10] ss:$8 sps:$4 sm:$0xff]   ;;  %v13557_v3 = vld [vmem:[#allocation3 + $0x24] ss:$8 sps:$4 sm:$0xff]  }
 0x2a2   :  { %11127 = vmatprep.subr.bf16.mxu1 %v14478_v6  ;;  %v13558_v9 = vld [vmem:[#allocation3 + $0x20] ss:$8 sps:$4 sm:$0xff]  }
 0x2a5   :  { %11128 = vmatpush3.bf16.msra.mxu1 %v14486_v23 }
 0x2a6   :  { %11129 = vmatprep.subr.bf16.mxu1 %v14496_v51 }
 0x2a9   :  { %11130 = vmatpush3.bf16.msra.mxu1 %v14504_v8 }
 0x2aa   :  { %11131 = vmatprep.subr.bf16.mxu1 %v14514_v62 }
 0x2ad   :  { %11132 = vmatpush3.bf16.msra.mxu1 %v14522_v15 }
 0x2ae   :  { %11133 = vmatprep.subr.bf16.mxu1 %v14532_v7 }
 0x2b1   :  { %11134 = vmatpush3.bf16.msra.mxu1 %v14540_v56 }
 0x2b2   :  { %13129 = vmatprep.subr.msk.bf16.mxu1 %vm471_vm0, %v14156_v27 }
 0x2b4   :  { %2155 = vmatmul.mubr.bf16.vlgmr.msra.gmra.mrb[112].mxu1 %v13554_v59 }
 0x2b5   :  { %2162 = vmatprep.mubr.bf16.mxu1 %v13555_v19  ;;  %11921 = vmatpush3.bf16.msra.mxu1 %v14163_v29 }
 0x2b6   :  { %13130 = vmatprep.subr.msk.bf16.mxu1 %vm471_vm0, %v14177_v38 }
 0x2bc   :  { %2163 = vmatmul.mubr.bf16.gmra.mrb[116].mxu1 %v13556_v12 }
 0x2bd   :  { %2170 = vmatprep.mubr.bf16.mxu1 %v13557_v3 }
 0x2c4   :  { %2171 = vmatmul.mubr.bf16.gmra.mrb[120].mxu1 %v13558_v9 }
 0x2c5   :  { %2178 = vmatprep.mubr.bf16.mxu1 %v13559_v49  ;;  %v14552_v49 = vsel %vm471_vm0, %v14354_v24, 0 }
 0x2cc   :  { %2179 = vmatmul.mubr.bf16.gmra.mrb[124].mxu1 %v13560_v28  ;;  %v14554_v28 = vld [vmem:[#allocation5 + $0x1c] sm:$0xf] }
 0x2dc   :  { %v10955_v37 = vpop.f32.mrb[24].mxu0 }
 0x2dd   :  { %v10956_v27 = vpop.f32.mrb[25].mxu0 }
 0x2de   :  { %v10957_v59 = vadd.f32 %v10956_v27, %v10955_v37  ;;  %v10958_v22 = vpop.f32.mrb[26].mxu0 }
 0x2df   :  { %v10959_v19 = vpop.f32.mrb[27].mxu0 }
 0x2e0   :  { %v10960_v53 = vadd.f32 %v10959_v19, %v10958_v22 }
 0x2e2   :  { %v1358_v29 = vpack.c.bf16 %v10960_v53, %v10957_v59 }
 0x2e4   :  { %v10961_v26 = vpop.f32.mrb[28].mxu0  ;;  %11882 = vmatprep.mubr.msk.bf16.mxu0 %vm458_vm1, %v1358_v29 }
 0x2e5   :  { %v10962_v38 = vpop.f32.mrb[29].mxu0 }
 0x2e6   :  { %v10963_v12 = vadd.f32 %v10962_v38, %v10961_v26  ;;  %v10964_v18 = vpop.f32.mrb[30].mxu0 }
 0x2e7   :  { %v10965_v3 = vpop.f32.mrb[31].mxu0 }
 0x2e8   :  { %v10966_v43 = vadd.f32 %v10965_v3, %v10964_v18 }
 0x2ea   :  { %v1359_v9 = vpack.c.bf16 %v10966_v43, %v10963_v12 }
 0x2ec   :  { %v10967_v37 = vpop.f32.mrb[32].mxu0  ;;  %11883 = vmatmul.mubr.msk.bf16.vlgmr.msra.gmra.mrb[16].mxu0 %vm458_vm1, %v1359_v9  ;;  %v17215_v9 = vpack.c.bf16 %v14326_v17, %v14324_v50  ;;  %v17218_v50 = vpack.c.bf16 %v14344_v2, %v14342_v63  ;;  %v17219_v17 = vpack.c.bf16 %v14350_v16, %v14348_v10  ;;  %v17223_v63 = vpack.c.bf16 %v14378_v0, %v14376_v58  ;;  %v13567_v58 = vld [vmem:[#allocation3 + $0x74] ss:$8 sps:$4 sm:$0xff]   ;;  %v13568_v0 = vld [vmem:[#allocation3 + $0x70] ss:$8 sps:$4 sm:$0xff]  }
 0x2ed   :  { %v10968_v22 = vpop.f32.mrb[33].mxu0  ;;  %11891 = vmatpush3.bf16.msra.mxu0 %v14552_v49  ;;  %v17224_v2 = vpack.c.bf16 %v14384_v25, %v14382_v11  ;;  %v17225_v10 = vpack.c.bf16 %v14399_v44, %v14396_v48  ;;  %v17226_v16 = vpack.c.bf16 %v14431_v54, %v14426_v32  ;;  %v13569_v11 = vld [vmem:[#allocation3 + $0x84] ss:$8 sps:$4 sm:$0xff]   ;;  %v13570_v25 = vld [vmem:[#allocation3 + $0x80] ss:$8 sps:$4 sm:$0xff]  }
 0x2ee   :  { %v10969_v53 = vadd.f32 %v10968_v22, %v10967_v37  ;;  %v10970_v27 = vpop.f32.mrb[34].mxu0  ;;  %13127 = vmatprep.subr.msk.bf16.mxu0 %vm471_vm0, %v14554_v28  ;;  %v14568_v37 = vsel %vm471_vm0, %v14554_v28, 0  ;;  %v14570_v22 = vld [vmem:[#allocation5 + $0x20] sm:$0xf]  ;;  %v13571_v48 = vld [vmem:[#allocation3 + $0x94] ss:$8 sps:$4 sm:$0xff]  }
 0x2ef   :  { %v10971_v26 = vpop.f32.mrb[35].mxu0  ;;  %v13572_v44 = vld [vmem:[#allocation3 + $0x90] ss:$8 sps:$4 sm:$0xff]   ;;  %v13573_v32 = vld [vmem:[#allocation3 + $0xa4] ss:$8 sps:$4 sm:$0xff]  }
 0x2f0   :  { %v10972_v18 = vadd.f32 %v10971_v26, %v10970_v27  ;;  %v17217_v27 = vpack.c.bf16 %v14338_v4, %v14336_v55  ;;  %v17221_v55 = vpack.c.bf16 %v14366_v46, %v14364_v33  ;;  %v17222_v4 = vpack.c.bf16 %v14372_v45, %v14370_v39  ;;  %v13563_v33 = vld [vmem:[#allocation3 + $0x54] ss:$8 sps:$4 sm:$0xff]   ;;  %v13564_v46 = vld [vmem:[#allocation3 + $0x50] ss:$8 sps:$4 sm:$0xff]   ;;  %v13565_v39 = vld [vmem:[#allocation3 + $0x64] ss:$8 sps:$4 sm:$0xff]  }
 0x2f1   :  { %v13566_v45 = vld [vmem:[#allocation3 + $0x60] ss:$8 sps:$4 sm:$0xff]   ;;  %v13575_v26 = vld [vmem:[#allocation3 + $0xb4] ss:$8 sps:$4 sm:$0xff]  }
 0x2f2   :  { %v1360_v43 = vpack.c.bf16 %v10972_v18, %v10969_v53  ;;  %v17216_v53 = vpack.c.bf16 %v14332_v47, %v14330_v42  ;;  %v14593_v42 = vsel %vm471_vm0, %v14570_v22, 0  ;;  %v17220_v47 = vpack.c.bf16 %v14360_v31, %v14358_v52  ;;  %v13561_v52 = vld [vmem:[#allocation3 + $0x44] ss:$8 sps:$4 sm:$0xff]   ;;  %v13562_v31 = vld [vmem:[#allocation3 + $0x40] ss:$8 sps:$4 sm:$0xff]  }
 0x2f3   :  { %v13574_v54 = vld [vmem:[#allocation3 + $0xa0] ss:$8 sps:$4 sm:$0xff]   ;;  %v13576_v18 = vld [vmem:[#allocation3 + $0xb0] ss:$8 sps:$4 sm:$0xff]  }
 0x2f4   :  { %v10973_v59 = vpop.f32.mrb[36].mxu0  ;;  %11886 = vmatprep.mubr.msk.bf16.mxu0 %vm458_vm1, %v1360_v43  ;;  %v13577_v43 = vld [vmem:[#allocation3 + $0xc4] ss:$8 sps:$4 sm:$0xff]  }
 0x2f5   :  { %v10974_v24 = vpop.f32.mrb[37].mxu0 }
 0x2f6   :  { %v10975_v19 = vadd.f32 %v10974_v24, %v10973_v59  ;;  %v10976_v29 = vpop.f32.mrb[38].mxu0  ;;  %v13578_v59 = vld [vmem:[#allocation3 + $0xc0] ss:$8 sps:$4 sm:$0xff]   ;;  %v13579_v24 = vld [vmem:[#allocation3 + $0xd4] ss:$8 sps:$4 sm:$0xff]  }
 0x2f7   :  { %v10977_v38 = vpop.f32.mrb[39].mxu0 }
 0x2f8   :  { %v10978_v12 = vadd.f32 %v10977_v38, %v10976_v29  ;;  %v13581_v29 = vld [vmem:[#allocation3 + $0xe4] ss:$8 sps:$4 sm:$0xff]   ;;  %v13582_v38 = vld [vmem:[#allocation3 + $0xe0] ss:$8 sps:$4 sm:$0xff]  }
 0x2fa   :  { %v1361_v3 = vpack.c.bf16 %v10978_v12, %v10975_v19  ;;  %v13580_v19 = vld [vmem:[#allocation3 + $0xd0] ss:$8 sps:$4 sm:$0xff]   ;;  %v13583_v12 = vld [vmem:[#allocation3 + $0xf4] ss:$8 sps:$4 sm:$0xff]  }
 0x2fc   :  { %11887 = vmatmul.mubr.msk.bf16.gmra.mrb[20].mxu0 %vm458_vm1, %v1361_v3  ;;  %v13584_v3 = vld [vmem:[#allocation3 + $0xf0] ss:$8 sps:$4 sm:$0xff]  }
 0x2fd   :  { %11892 = vmatprep.mubr.msk.bf16.mxu0 %vm458_vm1, %v17215_v9  ;;  %v13585_v9 = vld [vmem:[#allocation3 + $0x104] ss:$8 sps:$4 sm:$0xff]  }
 0x304   :  { %11893 = vmatmul.mubr.msk.bf16.vlgmr.msra.gmra.mrb[16].mxu0 %vm458_vm1, %v17216_v53  ;;  %v13586_v53 = vld [vmem:[#allocation3 + $0x100] ss:$8 sps:$4 sm:$0xff]  }
 0x305   :  { %11896 = vmatprep.mubr.msk.bf16.mxu0 %vm458_vm1, %v17217_v27  ;;  %11901 = vmatpush3.bf16.msra.mxu0 %v14568_v37  ;;  %v13587_v27 = vld [vmem:[#allocation3 + $0x114] ss:$8 sps:$4 sm:$0xff]  }
 0x306   :  { %13128 = vmatprep.subr.msk.bf16.mxu0 %vm471_vm0, %v14570_v22 }
 0x30c   :  { %11897 = vmatmul.mubr.msk.bf16.gmra.mrb[20].mxu0 %vm458_vm1, %v17218_v50  ;;  %v13588_v50 = vld [vmem:[#allocation3 + $0x110] ss:$8 sps:$4 sm:$0xff]  }
 0x30d   :  { %11902 = vmatprep.mubr.msk.bf16.mxu0 %vm458_vm1, %v17219_v17  ;;  %v13589_v17 = vld [vmem:[#allocation3 + $0x124] ss:$8 sps:$4 sm:$0xff]  }
 0x314   :  { %11903 = vmatmul.mubr.msk.bf16.vlgmr.msra.gmra.mrb[16].mxu0 %vm458_vm1, %v17220_v47 }
 0x315   :  { %11906 = vmatprep.mubr.msk.bf16.mxu0 %vm458_vm1, %v17221_v55  ;;  %11911 = vmatpush3.bf16.msra.mxu0 %v14593_v42  ;;  %v13590_v55 = vld [vmem:[#allocation3 + $0x120] ss:$8 sps:$4 sm:$0xff]  }
 0x316   :  { %11159 = vmatprep.subr.bf16.mxu0 %v14392_v14 }
 0x31c   :  { %11907 = vmatmul.mubr.msk.bf16.gmra.mrb[20].mxu0 %vm458_vm1, %v17222_v4 }
 0x31d   :  { %11912 = vmatprep.mubr.msk.bf16.mxu0 %vm458_vm1, %v17223_v63  ;;  %v13591_v63 = vld [vmem:[#allocation3 + $0x134] ss:$8 sps:$4 sm:$0xff]  }
 0x324   :  { %11913 = vmatmul.mubr.msk.bf16.vlgmr.msra.gmra.mrb[16].mxu0 %vm458_vm1, %v17224_v2 }
 0x325   :  { %11160 = vmatpush3.bf16.msra.mxu0 %v14407_v61  ;;  %11916 = vmatprep.mubr.msk.bf16.mxu0 %vm458_vm1, %v17225_v10 }
 0x326   :  { %11161 = vmatprep.subr.bf16.mxu0 %v14418_v57 }
 0x329   :  { %11162 = vmatpush3.bf16.msra.mxu0 %v14428_v41 }
 0x32a   :  { %11163 = vmatprep.subr.bf16.mxu0 %v14440_v1 }
 0x32c   :  { %11917 = vmatmul.mubr.msk.bf16.gmra.mrb[20].mxu0 %vm458_vm1, %v17226_v16 }
 0x32d   :  { %11164 = vmatpush3.bf16.msra.mxu0 %v14450_v5  ;;  %2223 = vmatprep.mubr.bf16.mxu0 %v13561_v52 }
 0x32e   :  { %11165 = vmatprep.subr.bf16.mxu0 %v14460_v13 }
 0x331   :  { %11166 = vmatpush3.bf16.msra.mxu0 %v14468_v60 }
 0x332   :  { %11167 = vmatprep.subr.bf16.mxu0 %v14478_v6 }
 0x335   :  { %11168 = vmatpush3.bf16.msra.mxu0 %v14486_v23 }
 0x336   :  { %11169 = vmatprep.subr.bf16.mxu0 %v14496_v51 }
 0x339   :  { %11170 = vmatpush3.bf16.msra.mxu0 %v14504_v8 }
 0x33a   :  { %11171 = vmatprep.subr.bf16.mxu0 %v14514_v62 }
 0x33d   :  { %11172 = vmatpush3.bf16.msra.mxu0 %v14522_v15 }
 0x33e   :  { %11173 = vmatprep.subr.bf16.mxu0 %v14532_v7 }
 0x341   :  { %11174 = vmatpush3.bf16.msra.mxu0 %v14540_v56 }
 0x342   :  { %11209 = vmatprep.subr.bf16.mxu0 %v14392_v14 }
 0x344   :  { %2224 = vmatmul.mubr.bf16.vlgmr.msra.gmra.mrb[40].mxu0 %v13562_v31 }
 0x345   :  { %11210 = vmatpush3.bf16.msra.mxu0 %v14407_v61  ;;  %2231 = vmatprep.mubr.bf16.mxu0 %v13563_v33 }
 0x346   :  { %11211 = vmatprep.subr.bf16.mxu0 %v14418_v57 }
 0x349   :  { %11212 = vmatpush3.bf16.msra.mxu0 %v14428_v41 }
 0x34a   :  { %11213 = vmatprep.subr.bf16.mxu0 %v14440_v1 }
 0x34c   :  { %2232 = vmatmul.mubr.bf16.gmra.mrb[44].mxu0 %v13564_v46 }
 0x34d   :  { %11214 = vmatpush3.bf16.msra.mxu0 %v14450_v5  ;;  %2239 = vmatprep.mubr.bf16.mxu0 %v13565_v39 }
 0x34e   :  { %11215 = vmatprep.subr.bf16.mxu0 %v14460_v13 }
 0x351   :  { %11216 = vmatpush3.bf16.msra.mxu0 %v14468_v60 }
 0x352   :  { %11217 = vmatprep.subr.bf16.mxu0 %v14478_v6 }
 0x354   :  { %2240 = vmatmul.mubr.bf16.gmra.mrb[48].mxu0 %v13566_v45 }
 0x355   :  { %11218 = vmatpush3.bf16.msra.mxu0 %v14486_v23  ;;  %2247 = vmatprep.mubr.bf16.mxu0 %v13567_v58 }
 0x356   :  { %11219 = vmatprep.subr.bf16.mxu0 %v14496_v51 }
 0x359   :  { %11220 = vmatpush3.bf16.msra.mxu0 %v14504_v8 }
 0x35a   :  { %11221 = vmatprep.subr.bf16.mxu0 %v14514_v62 }
 0x35c   :  { %2248 = vmatmul.mubr.bf16.gmra.mrb[52].mxu0 %v13568_v0 }
 0x35d   :  { %11222 = vmatpush3.bf16.msra.mxu0 %v14522_v15  ;;  %2446 = vmatprep.mubr.bf16.mxu0 %v13569_v11 }
 0x35e   :  { %11223 = vmatprep.subr.bf16.mxu0 %v14532_v7 }
 0x361   :  { %11224 = vmatpush3.bf16.msra.mxu0 %v14540_v56 }
 0x362   :  { %11254 = vmatprep.subr.bf16.mxu0 %v14392_v14 }
 0x364   :  { %2447 = vmatmul.mubr.bf16.vlgmr.msra.gmra.mrb[56].mxu0 %v13570_v25  ;;  %v13592_v25 = vld [vmem:[#allocation3 + $0x130] ss:$8 sps:$4 sm:$0xff]  }
 0x365   :  { %11255 = vmatpush3.bf16.msra.mxu0 %v14407_v61  ;;  %2454 = vmatprep.mubr.bf16.mxu0 %v13571_v48 }
 0x366   :  { %11256 = vmatprep.subr.bf16.mxu0 %v14418_v57 }
 0x369   :  { %11257 = vmatpush3.bf16.msra.mxu0 %v14428_v41 }
 0x36a   :  { %11258 = vmatprep.subr.bf16.mxu0 %v14440_v1 }
 0x36c   :  { %2455 = vmatmul.mubr.bf16.gmra.mrb[60].mxu0 %v13572_v44 }
 0x36d   :  { %11259 = vmatpush3.bf16.msra.mxu0 %v14450_v5  ;;  %2462 = vmatprep.mubr.bf16.mxu0 %v13573_v32 }
 0x36e   :  { %11260 = vmatprep.subr.bf16.mxu0 %v14460_v13 }
 0x371   :  { %11261 = vmatpush3.bf16.msra.mxu0 %v14468_v60 }
 0x372   :  { %11262 = vmatprep.subr.bf16.mxu0 %v14478_v6 }
 0x374   :  { %2463 = vmatmul.mubr.bf16.gmra.mrb[64].mxu0 %v13574_v54 }
 0x375   :  { %11263 = vmatpush3.bf16.msra.mxu0 %v14486_v23  ;;  %2470 = vmatprep.mubr.bf16.mxu0 %v13575_v26 }
 0x376   :  { %11264 = vmatprep.subr.bf16.mxu0 %v14496_v51 }
 0x379   :  { %11265 = vmatpush3.bf16.msra.mxu0 %v14504_v8 }
 0x37a   :  { %11266 = vmatprep.subr.bf16.mxu0 %v14514_v62 }
 0x37c   :  { %2471 = vmatmul.mubr.bf16.gmra.mrb[68].mxu0 %v13576_v18 }
 0x37d   :  { %11267 = vmatpush3.bf16.msra.mxu0 %v14522_v15  ;;  %2600 = vmatprep.mubr.bf16.mxu0 %v13577_v43 }
 0x37e   :  { %11268 = vmatprep.subr.bf16.mxu0 %v14532_v7 }
 0x381   :  { %11269 = vmatpush3.bf16.msra.mxu0 %v14540_v56 }
 0x382   :  { %11299 = vmatprep.subr.bf16.mxu0 %v14392_v14 }
 0x384   :  { %2601 = vmatmul.mubr.bf16.vlgmr.msra.gmra.mrb[72].mxu0 %v13578_v59 }
 0x385   :  { %11300 = vmatpush3.bf16.msra.mxu0 %v14407_v61  ;;  %2608 = vmatprep.mubr.bf16.mxu0 %v13579_v24 }
 0x386   :  { %11301 = vmatprep.subr.bf16.mxu0 %v14418_v57 }
 0x387   :  { %v11135_v47 = vpop.f32.mrb[112].mxu1 }
 0x388   :  { %v11136_v4 = vpop.f32.mrb[113].mxu1 }
 0x389   :  { %11302 = vmatpush3.bf16.msra.mxu0 %v14428_v41  ;;  %v14698_v2 = vadd.f32 %v11136_v4, %v11135_v47  ;;  %v11138_v10 = vpop.f32.mrb[114].mxu1 }
 0x38a   :  { %11303 = vmatprep.subr.bf16.mxu0 %v14440_v1  ;;  %v11139_v16 = vpop.f32.mrb[115].mxu1 }
 0x38b   :  { %v14701_v52 = vadd.f32 %v11139_v16, %v11138_v10 }
 0x38c   :  { %2609 = vmatmul.mubr.bf16.gmra.mrb[76].mxu0 %v13580_v19 }
 0x38d   :  { %11304 = vmatpush3.bf16.msra.mxu0 %v14450_v5  ;;  %2616 = vmatprep.mubr.bf16.mxu0 %v13581_v29  ;;  %v2187_v46 = vpack.c.bf16 %v14701_v52, %v14698_v2  ;;  %v14833_v52 = vld [vmem:[%s17126_s4 + $0x8] sm:$0xff]  }
 0x38e   :  { %11305 = vmatprep.subr.bf16.mxu0 %v14460_v13 }
 0x38f   :  { %v11141_v31 = vpop.f32.mrb[116].mxu1 }
 0x390   :  { %v11142_v33 = vpop.f32.mrb[117].mxu1 }
 0x391   :  { %11306 = vmatpush3.bf16.msra.mxu0 %v14468_v60  ;;  %v14706_v39 = vadd.f32 %v11142_v33, %v11141_v31  ;;  %v11144_v45 = vpop.f32.mrb[118].mxu1 }
 0x392   :  { %11307 = vmatprep.subr.bf16.mxu0 %v14478_v6  ;;  %v11145_v58 = vpop.f32.mrb[119].mxu1 }
 0x393   :  { %v14709_v0 = vadd.f32 %v11145_v58, %v11144_v45  ;;  %v13600_v45 = vld [vmem:[#allocation3 + $0x1b0] ss:$8 sps:$4 sm:$0xff]  }
 0x394   :  { %2617 = vmatmul.mubr.bf16.gmra.mrb[80].mxu0 %v13582_v38 }
 0x395   :  { %11308 = vmatpush3.bf16.msra.mxu0 %v14486_v23  ;;  %2624 = vmatprep.mubr.bf16.mxu0 %v13583_v12  ;;  %v2188_v44 = vpack.c.bf16 %v14709_v0, %v14706_v39  ;;  %v13618_v39 = vld [vmem:[#allocation5 + $0xc] sm:$0xf] }
 0x396   :  { %11309 = vmatprep.subr.bf16.mxu0 %v14496_v51 }
 0x397   :  { %v11147_v11 = vpop.f32.mrb[120].mxu1 }
 0x398   :  { %v11148_v48 = vpop.f32.mrb[121].mxu1 }
 0x399   :  { %11310 = vmatpush3.bf16.msra.mxu0 %v14504_v8  ;;  %v14715_v32 = vadd.f32 %v11148_v48, %v11147_v11  ;;  %v11150_v54 = vpop.f32.mrb[122].mxu1  ;;  %v13601_v11 = vld [vmem:[#allocation3 + $0x1c4] ss:$8 sps:$4 sm:$0xff]  }
 0x39a   :  { %11311 = vmatprep.subr.bf16.mxu0 %v14514_v62  ;;  %v11151_v26 = vpop.f32.mrb[123].mxu1 }
 0x39b   :  { %v14718_v18 = vadd.f32 %v11151_v26, %v11150_v54 }
 0x39c   :  { %2625 = vmatmul.mubr.bf16.gmra.mrb[84].mxu0 %v13584_v3  ;;  %v13598_v3 = vld [vmem:[#allocation3 + $0x1a0] ss:$8 sps:$4 sm:$0xff]  }
 0x39d   :  { %11312 = vmatpush3.bf16.msra.mxu0 %v14522_v15  ;;  %2754 = vmatprep.mubr.bf16.mxu0 %v13585_v9  ;;  %v2189_v24 = vpack.c.bf16 %v14718_v18, %v14715_v32  ;;  %v14765_v9 = vld [vmem:[%s17125_s3] ss:$0 sm:$0xff] }
 0x39e   :  { %11313 = vmatprep.subr.bf16.mxu0 %v14532_v7 }
 0x39f   :  { %v11153_v43 = vpop.f32.mrb[124].mxu1 }
 0x3a0   :  { %v11154_v59 = vpop.f32.mrb[125].mxu1 }
 0x3a1   :  { %11314 = vmatpush3.bf16.msra.mxu0 %v14540_v56  ;;  %v14723_v19 = vadd.f32 %v11154_v59, %v11153_v43 }
 0x3a2   :  { %11344 = vmatprep.subr.bf16.mxu0 %v14392_v14 }
 0x3a4   :  { %2755 = vmatmul.mubr.bf16.vlgmr.msra.gmra.mrb[88].mxu0 %v13586_v53  ;;  %v13599_v53 = vld [vmem:[#allocation3 + $0x1b4] ss:$8 sps:$4 sm:$0xff]  }
 0x3a5   :  { %11345 = vmatpush3.bf16.msra.mxu0 %v14407_v61  ;;  %2762 = vmatprep.mubr.bf16.mxu0 %v13587_v27 }
 0x3a6   :  { %11346 = vmatprep.subr.bf16.mxu0 %v14418_v57 }
 0x3a9   :  { %11347 = vmatpush3.bf16.msra.mxu0 %v14428_v41 }
 0x3aa   :  { %11348 = vmatprep.subr.bf16.mxu0 %v14440_v1 }
 0x3ac   :  { %2763 = vmatmul.mubr.bf16.gmra.mrb[92].mxu0 %v13588_v50 }
 0x3ad   :  { %11349 = vmatpush3.bf16.msra.mxu0 %v14450_v5  ;;  %2770 = vmatprep.mubr.bf16.mxu0 %v13589_v17 }
 0x3ae   :  { %11350 = vmatprep.subr.bf16.mxu0 %v14460_v13 }
 0x3b1   :  { %11351 = vmatpush3.bf16.msra.mxu0 %v14468_v60 }
 0x3b2   :  { %11352 = vmatprep.subr.bf16.mxu0 %v14478_v6 }
 0x3b4   :  { %2771 = vmatmul.mubr.bf16.gmra.mrb[96].mxu0 %v13590_v55 }
 0x3b5   :  { %11353 = vmatpush3.bf16.msra.mxu0 %v14486_v23  ;;  %2778 = vmatprep.mubr.bf16.mxu0 %v13591_v63 }
 0x3b6   :  { %11354 = vmatprep.subr.bf16.mxu0 %v14496_v51 }
 0x3b9   :  { %11355 = vmatpush3.bf16.msra.mxu0 %v14504_v8 }
 0x3ba   :  { %11356 = vmatprep.subr.bf16.mxu0 %v14514_v62 }
 0x3bc   :  { %2779 = vmatmul.mubr.bf16.gmra.mrb[100].mxu0 %v13592_v25 }
 0x3bd   :  { %11357 = vmatpush3.bf16.msra.mxu0 %v14522_v15  ;;  %2908 = vmatprep.mubr.bf16.mxu0 %v14286_v35  ;;  %v11156_v35 = vpop.f32.mrb[126].mxu1 }
 0x3be   :  { %11358 = vmatprep.subr.bf16.mxu0 %v14532_v7  ;;  %v11157_v29 = vpop.f32.mrb[127].mxu1 }
 0x3bf   :  { %v14726_v38 = vadd.f32 %v11157_v29, %v11156_v35 }
 0x3c1   :  { %11359 = vmatpush3.bf16.msra.mxu0 %v14540_v56  ;;  %v2190_v12 = vpack.c.bf16 %v14726_v38, %v14723_v19 }
 0x3c2   :  { %11389 = vmatprep.subr.bf16.mxu0 %v14392_v14 }
 0x3c4   :  { %2909 = vmatmul.mubr.bf16.vlgmr.msra.gmra.mrb[104].mxu0 %v14297_v20  ;;  %v17227_v20 = vld [vmem:[#allocation22_spill] sm:$0xff] }
 0x3c5   :  { %11390 = vmatpush3.bf16.msra.mxu0 %v14407_v61  ;;  %2916 = vmatprep.mubr.bf16.mxu0 %v14300_v21  ;;  %v13593_v21 = vld [vmem:[#allocation3 + $0x184] ss:$8 sps:$4 sm:$0xff]  }
 0x3c6   :  { %11391 = vmatprep.subr.bf16.mxu0 %v14418_v57 }
 0x3c9   :  { %11392 = vmatpush3.bf16.msra.mxu0 %v14428_v41 }
 0x3ca   :  { %11393 = vmatprep.subr.bf16.mxu0 %v14440_v1 }
 0x3cc   :  { %2917 = vmatmul.mubr.bf16.gmra.mrb[108].mxu0 %v14309_v30  ;;  %v13594_v30 = vld [vmem:[#allocation3 + $0x180] ss:$8 sps:$4 sm:$0xff]  }
 0x3cd   :  { %11394 = vmatpush3.bf16.msra.mxu0 %v14450_v5  ;;  %2924 = vmatprep.mubr.bf16.mxu0 %v14311_v34  ;;  %v13595_v34 = vld [vmem:[#allocation3 + $0x194] ss:$8 sps:$4 sm:$0xff]  }
 0x3ce   :  { %11395 = vmatprep.subr.bf16.mxu0 %v14460_v13 }
 0x3d1   :  { %11396 = vmatpush3.bf16.msra.mxu0 %v14468_v60 }
 0x3d2   :  { %11397 = vmatprep.subr.bf16.mxu0 %v14478_v6 }
 0x3d4   :  { %2925 = vmatmul.mubr.bf16.gmra.mrb[112].mxu0 %v14315_v36  ;;  %v13596_v36 = vld [vmem:[#allocation3 + $0x190] ss:$8 sps:$4 sm:$0xff]  }
 0x3d5   :  { %11398 = vmatpush3.bf16.msra.mxu0 %v14486_v23  ;;  %2932 = vmatprep.mubr.bf16.mxu0 %v14317_v40  ;;  %v13597_v40 = vld [vmem:[#allocation3 + $0x1a4] ss:$8 sps:$4 sm:$0xff]  }
 0x3d6   :  { %11399 = vmatprep.subr.bf16.mxu0 %v14496_v51 }
 0x3d9   :  { %11400 = vmatpush3.bf16.msra.mxu0 %v14504_v8 }
 0x3da   :  { %11401 = vmatprep.subr.bf16.mxu0 %v14514_v62 }
 0x3dc   :  { %2933 = vmatmul.mubr.bf16.gmra.mrb[116].mxu0 %v17227_v20 }
 0x3dd   :  { %11402 = vmatpush3.bf16.msra.mxu0 %v14522_v15  ;;  %3062 = vmatprep.mubr.bf16.mxu0 %v13593_v21 }
 0x3de   :  { %11403 = vmatprep.subr.bf16.mxu0 %v14532_v7 }
 0x3e1   :  { %11404 = vmatpush3.bf16.msra.mxu0 %v14540_v56 }
 0x3e2   :  { %11434 = vmatprep.subr.bf16.mxu0 %v14392_v14 }
 0x3e4   :  { %3063 = vmatmul.mubr.bf16.vlgmr.msra.gmra.mrb[120].mxu0 %v13594_v30 }
 0x3e5   :  { %11435 = vmatpush3.bf16.msra.mxu0 %v14407_v61  ;;  %3070 = vmatprep.mubr.bf16.mxu0 %v13595_v34 }
 0x3e6   :  { %11436 = vmatprep.subr.bf16.mxu0 %v14418_v57 }
 0x3e9   :  { %11437 = vmatpush3.bf16.msra.mxu0 %v14428_v41 }
 0x3ea   :  { %11438 = vmatprep.subr.bf16.mxu0 %v14440_v1 }
 0x3ec   :  { %3071 = vmatmul.mubr.bf16.gmra.mrb[124].mxu0 %v13596_v36 }
 0x3ed   :  { %11439 = vmatpush3.bf16.msra.mxu0 %v14450_v5  ;;  %3078 = vmatprep.mubr.bf16.mxu0 %v13597_v40 }
 0x3ee   :  { %11440 = vmatprep.subr.bf16.mxu0 %v14460_v13 }
 0x3f1   :  { %11441 = vmatpush3.bf16.msra.mxu0 %v14468_v60 }
 0x3f2   :  { %11442 = vmatprep.subr.bf16.mxu0 %v14478_v6 }
 0x3f4   :  { %3079 = vmatmul.mubr.bf16.gmra.mrb[128].mxu0 %v13598_v3 }
 0x3f5   :  { %11443 = vmatpush3.bf16.msra.mxu0 %v14486_v23  ;;  %3086 = vmatprep.mubr.bf16.mxu0 %v13599_v53 }
 0x3f6   :  { %11444 = vmatprep.subr.bf16.mxu0 %v14496_v51 }
 0x3f7   :  { %v11914_v27 = vpop.f32.mrb[16].mxu0 }
 0x3f8   :  { %v2084_v50 = vadd.f32 %v11914_v27, %v14765_v9  ;;  %v2037_v17 = vpop.f32.mrb[17].mxu0 }
 0x3f9   :  { %v2082_v47 = vadd.f32 %v14765_v9, %v2037_v17  ;;  %11445 = vmatpush3.bf16.msra.mxu0 %v14504_v8  ;;  %v11915_v55 = vpop.f32.mrb[18].mxu0 }
 0x3fa   :  { %v2092_v4 = vmul.f32 0.2, %v2084_v50  ;;  %v2085_v63 = vadd.f32 %v11915_v55, %v14765_v9  ;;  %v2040_v10 = vpop.f32.mrb[19].mxu0  ;;  %11446 = vmatprep.subr.bf16.mxu0 %v14514_v62 }
 0x3fb   :  { %v2090_v16 = vmul.f32 0.2, %v2082_v47  ;;  %v2083_v31 = vadd.f32 %v14765_v9, %v2040_v10 }
 0x3fc   :  { %v2093_v33 = vmul.f32 0.2, %v2085_v63  ;;  %3087 = vmatmul.mubr.bf16.gmra.mrb[132].mxu0 %v13600_v45  ;;  %v2100_v25 = vmax.f32 %v2084_v50, %v2092_v4  ;;  %v13602_v50 = vld [vmem:[#allocation3 + $0x1c0] ss:$8 sps:$4 sm:$0xff]  }
 0x3fd   :  { %v2091_v58 = vmul.f32 0.2, %v2083_v31  ;;  %11447 = vmatpush3.bf16.msra.mxu0 %v14522_v15  ;;  %3216 = vmatprep.mubr.bf16.mxu0 %v13601_v11  ;;  %v2098_v54 = vmax.f32 %v2082_v47, %v2090_v16  ;;  %v13603_v47 = vld [vmem:[#allocation3 + $0x1d4] ss:$8 sps:$4 sm:$0xff]  }
 0x3fe   :  { %v2101_v48 = vmax.f32 %v2085_v63, %v2093_v33  ;;  %11448 = vmatprep.subr.bf16.mxu0 %v14532_v7  ;;  %v13607_v33 = vld [vmem:[#allocation3 + $0x1f4] ss:$8 sps:$4 sm:$0xff]  }
 0x3ff   :  { %v2099_v26 = vmax.f32 %v2083_v31, %v2091_v58  ;;  %v11918_v43 = vpop.f32.mrb[20].mxu0  ;;  %v13604_v31 = vld [vmem:[#allocation3 + $0x1d0] ss:$8 sps:$4 sm:$0xff]  }
 0x400   :  { %v14776_v59 = vpack.c.bf16 %v2101_v48, %v2100_v25  ;;  %v2088_v35 = vadd.f32 %v11918_v43, %v14765_v9  ;;  %v2053_v29 = vpop.f32.mrb[21].mxu0  ;;  %v13611_v43 = vld [vmem:[#allocation3 + $0x214] ss:$8 sps:$4 sm:$0xff]  }
 0x401   :  { %v14779_v20 = vpack.c.bf16 %v2099_v26, %v2098_v54  ;;  %v2086_v21 = vadd.f32 %v14765_v9, %v2053_v29  ;;  %11449 = vmatpush3.bf16.msra.mxu0 %v14540_v56  ;;  %v11919_v30 = vpop.f32.mrb[22].mxu0  ;;  %v13610_v26 = vld [vmem:[#allocation3 + $0x200] ss:$8 sps:$4 sm:$0xff]  }
 0x402   :  { %v2096_v34 = vmul.f32 0.2, %v2088_v35  ;;  %v2089_v36 = vadd.f32 %v11919_v30, %v14765_v9  ;;  %v2056_v40 = vpop.f32.mrb[23].mxu0  ;;  %11479 = vmatprep.subr.bf16.mxu0 %v14392_v14  ;;  %v17228_v29 = vld [vmem:[#allocation17_spill] sm:$0xff]  ;;  %v13612_v30 = vld [vmem:[#allocation5 + $0x8] sm:$0xf] }
 0x403   :  { %v2094_v3 = vmul.f32 0.2, %v2086_v21  ;;  %v2087_v53 = vadd.f32 %v14765_v9, %v2056_v40  ;;  %v13613_v40 = vld [vmem:[#allocation3 + $0x210] ss:$8 sps:$4 sm:$0xff]  }
 0x404   :  { %v2097_v27 = vmul.f32 0.2, %v2089_v36  ;;  %3217 = vmatmul.mubr.bf16.vlgmr.msra.gmra.mrb[136].mxu0 %v13602_v50  ;;  %v2104_v55 = vmax.f32 %v2088_v35, %v2096_v34 }
 0x405   :  { %v2095_v17 = vmul.f32 0.2, %v2087_v53  ;;  %11480 = vmatpush3.bf16.msra.mxu0 %v14407_v61  ;;  %3224 = vmatprep.mubr.bf16.mxu0 %v13603_v47  ;;  %v2102_v63 = vmax.f32 %v2086_v21, %v2094_v3  ;;  %v13605_v61 = vld [vmem:[#allocation3 + $0x1e4] ss:$8 sps:$4 sm:$0xff]  }
 0x406   :  { %v2105_v4 = vmax.f32 %v2089_v36, %v2097_v27  ;;  %11481 = vmatprep.subr.bf16.mxu0 %v14418_v57  ;;  %v13606_v57 = vld [vmem:[#allocation3 + $0x1e0] ss:$8 sps:$4 sm:$0xff]  }
 0x407   :  { %v2103_v10 = vmax.f32 %v2087_v53, %v2095_v17  ;;  %v13614_v53 = vld [vmem:[#allocation3 + $0x224] ss:$8 sps:$4 sm:$0xff]  }
 0x408   :  { %v14788_v16 = vpack.c.bf16 %v2105_v4, %v2104_v55 }
 0x409   :  { %v14790_v14 = vpack.c.bf16 %v2103_v10, %v2102_v63  ;;  %11482 = vmatpush3.bf16.msra.mxu0 %v14428_v41  ;;  %v13615_v63 = vld [vmem:[#allocation3 + $0x220] ss:$8 sps:$4 sm:$0xff]  }
 0x40a   :  { %11483 = vmatprep.subr.bf16.mxu0 %v14440_v1 }
 0x40c   :  { %3225 = vmatmul.mubr.bf16.gmra.mrb[140].mxu0 %v13604_v31  ;;  %v13616_v31 = vld [vmem:[#allocation3 + $0x234] ss:$8 sps:$4 sm:$0xff]  }
 0x40d   :  { %11484 = vmatpush3.bf16.msra.mxu0 %v14450_v5  ;;  %3232 = vmatprep.mubr.bf16.mxu0 %v13605_v61 }
 0x40e   :  { %11485 = vmatprep.subr.bf16.mxu0 %v14460_v13 }
 0x411   :  { %11486 = vmatpush3.bf16.msra.mxu0 %v14468_v60  ;;  %v13608_v60 = vld [vmem:[#allocation3 + $0x1f0] ss:$8 sps:$4 sm:$0xff]  }
 0x412   :  { %11487 = vmatprep.subr.bf16.mxu0 %v14478_v6 }
 0x414   :  { %3233 = vmatmul.mubr.bf16.gmra.mrb[144].mxu0 %v13606_v57 }
 0x415   :  { %11488 = vmatpush3.bf16.msra.mxu0 %v14486_v23  ;;  %3240 = vmatprep.mubr.bf16.mxu0 %v13607_v33  ;;  %v13609_v23 = vld [vmem:[#allocation3 + $0x204] ss:$8 sps:$4 sm:$0xff]  }
 0x416   :  { %11489 = vmatprep.subr.bf16.mxu0 %v14496_v51 }
 0x417   :  { %v11175_v41 = vpop.f32.mrb[40].mxu0 }
 0x418   :  { %v11176_v1 = vpop.f32.mrb[41].mxu0 }
 0x419   :  { %v11177_v45 = vadd.f32 %v11176_v1, %v11175_v41  ;;  %v11178_v5 = vpop.f32.mrb[42].mxu0  ;;  %11490 = vmatpush3.bf16.msra.mxu0 %v14504_v8 }
 0x41a   :  { %v11179_v58 = vpop.f32.mrb[43].mxu0  ;;  %11491 = vmatprep.subr.bf16.mxu0 %v14514_v62  ;;  %v17150_v62 = vmov 0.0  }
 0x41b   :  { %v11180_v13 = vadd.f32 %v11179_v58, %v11178_v5  ;;  %v13617_v5 = vld [vmem:[#allocation3 + $0x230] ss:$8 sps:$4 sm:$0xff]  }
 0x41c   :  { %3241 = vmatmul.mubr.bf16.gmra.mrb[148].mxu0 %v13608_v60 }
 0x41d   :  { %v2256_v6 = vpack.c.bf16 %v11180_v13, %v11177_v45  ;;  %11492 = vmatpush3.bf16.msra.mxu0 %v14522_v15  ;;  %3370 = vmatprep.mubr.bf16.mxu0 %v13609_v23 }
 0x41e   :  { %11493 = vmatprep.subr.bf16.mxu0 %v14532_v7 }
 0x41f   :  { %v11181_v51 = vpop.f32.mrb[44].mxu0  ;;  %11922 = vmatprep.mubr.msk.bf16.mxu1 %vm458_vm1, %v2256_v6 }
 0x420   :  { %v11182_v11 = vpop.f32.mrb[45].mxu0 }
 0x421   :  { %v11183_v25 = vadd.f32 %v11182_v11, %v11181_v51  ;;  %v11184_v48 = vpop.f32.mrb[46].mxu0  ;;  %11494 = vmatpush3.bf16.msra.mxu0 %v14540_v56 }
 0x422   :  { %v11185_v8 = vpop.f32.mrb[47].mxu0  ;;  %12022 = vmatprep.subr.bf16.mxu0 %v17150_v62 }
 0x423   :  { %v11186_v54 = vadd.f32 %v11185_v8, %v11184_v48 }
 0x424   :  { %3371 = vmatmul.mubr.bf16.vlgmr.msra.gmra.mrb[152].mxu0 %v13610_v26  ;;  %v17230_v26 = vld [vmem:[#allocation19_spill] sm:$0xff] }
 0x425   :  { %v2257_v15 = vpack.c.bf16 %v11186_v54, %v11183_v25  ;;  %12023 = vmatpush3.bf16.msra.mxu0 %v14779_v20  ;;  %3378 = vmatprep.mubr.bf16.mxu0 %v13611_v43 }
 0x426   :  { %12024 = vmatprep.subr.bf16.mxu0 %v17150_v62 }
 0x427   :  { %v11187_v7 = vpop.f32.mrb[48].mxu0  ;;  %11923 = vmatmul.mubr.msk.bf16.vlgmr.msra.gmra.mrb[128].mxu1 %vm458_vm1, %v2257_v15 }
 0x428   :  { %v11188_v35 = vpop.f32.mrb[49].mxu0  ;;  %11931 = vmatpush3.bf16.msra.mxu1 %v17228_v29 }
 0x429   :  { %v11189_v56 = vadd.f32 %v11188_v35, %v11187_v7  ;;  %v11190_v21 = vpop.f32.mrb[50].mxu0  ;;  %12025 = vmatpush3.bf16.msra.mxu0 %v14776_v59  ;;  %13131 = vmatprep.subr.msk.bf16.mxu1 %vm471_vm0, %v13612_v30 }
 0x42a   :  { %v11191_v34 = vpop.f32.mrb[51].mxu0  ;;  %12026 = vmatprep.subr.bf16.mxu0 %v17150_v62 }
 0x42b   :  { %v11192_v36 = vadd.f32 %v11191_v34, %v11190_v21 }
 0x42c   :  { %3379 = vmatmul.mubr.bf16.gmra.mrb[156].mxu0 %v13613_v40 }
 0x42d   :  { %v2258_v3 = vpack.c.bf16 %v11192_v36, %v11189_v56  ;;  %12027 = vmatpush3.bf16.msra.mxu0 %v14790_v14  ;;  %3386 = vmatprep.mubr.bf16.mxu0 %v13614_v53 }
 0x42e   :  { %12028 = vmatprep.subr.bf16.mxu0 %v17150_v62 }
 0x42f   :  { %v11193_v27 = vpop.f32.mrb[52].mxu0  ;;  %11926 = vmatprep.mubr.msk.bf16.mxu1 %vm458_vm1, %v2258_v3 }
 0x430   :  { %v11194_v50 = vpop.f32.mrb[53].mxu0 }
 0x431   :  { %v11195_v17 = vadd.f32 %v11194_v50, %v11193_v27  ;;  %v11196_v47 = vpop.f32.mrb[54].mxu0  ;;  %12029 = vmatpush3.bf16.msra.mxu0 %v14788_v16 }
 0x432   :  { %v11197_v55 = vpop.f32.mrb[55].mxu0  ;;  %12034 = vmatprep.subr.bf16.mxu0 %v17150_v62 }
 0x433   :  { %v11198_v4 = vadd.f32 %v11197_v55, %v11196_v47 }
 0x434   :  { %3387 = vmatmul.mubr.bf16.gmra.mrb[160].mxu0 %v13615_v63  ;;  %v17231_v63 = vld [vmem:[#allocation20_spill] sm:$0xff] }
 0x435   :  { %v2259_v10 = vpack.c.bf16 %v11198_v4, %v11195_v17  ;;  %3394 = vmatprep.mubr.bf16.mxu0 %v13616_v31 }
 0x437   :  { %11927 = vmatmul.mubr.msk.bf16.gmra.mrb[132].mxu1 %vm458_vm1, %v2259_v10  ;;  %v11225_v61 = vpop.f32.mrb[56].mxu0 }
 0x438   :  { %v11226_v57 = vpop.f32.mrb[57].mxu0  ;;  %11932 = vmatprep.mubr.msk.bf16.mxu1 %vm458_vm1, %v2187_v46  ;;  %v17229_v46 = vld [vmem:[#allocation18_spill] sm:$0xff] }
 0x439   :  { %v11227_v33 = vadd.f32 %v11226_v57, %v11225_v61  ;;  %v11228_v41 = vpop.f32.mrb[58].mxu0  ;;  %v13620_v61 = vld [vmem:[#allocation5 + $0x14] sm:$0xf] }
 0x43a   :  { %v11229_v1 = vpop.f32.mrb[59].mxu0 }
 0x43b   :  { %v11230_v45 = vadd.f32 %v11229_v1, %v11228_v41 }
 0x43c   :  { %3395 = vmatmul.mubr.bf16.gmra.mrb[164].mxu0 %v13617_v5 }
 0x43d   :  { %v2479_v58 = vpack.c.bf16 %v11230_v45, %v11227_v33  ;;  %12030 = vmatprep.mubr.msk.bf16.mxu0 %vm13775_vm2, %v17150_v62 }
 0x43f   :  { %11933 = vmatmul.mubr.msk.bf16.vlgmr.msra.gmra.mrb[128].mxu1 %vm458_vm1, %v2188_v44  ;;  %v11231_v13 = vpop.f32.mrb[60].mxu0 }
 0x440   :  { %v11232_v2 = vpop.f32.mrb[61].mxu0  ;;  %11936 = vmatprep.mubr.msk.bf16.mxu1 %vm458_vm1, %v2189_v24  ;;  %11941 = vmatpush3.bf16.msra.mxu1 %v17229_v46 }
 0x441   :  { %v11233_v60 = vadd.f32 %v11232_v2, %v11231_v13  ;;  %v11234_v6 = vpop.f32.mrb[62].mxu0  ;;  %13132 = vmatprep.subr.msk.bf16.mxu1 %vm471_vm0, %v13618_v39 }
 0x442   :  { %v11235_v0 = vpop.f32.mrb[63].mxu0 }
 0x443   :  { %v11236_v44 = vadd.f32 %v11235_v0, %v11234_v6 }
 0x444   :  { %12031 = vmatmul.mubr.msk.bf16.vlgmr.msra.gmra.mrb[168].mxu0 %vm3529_vm3, %v14833_v52 }
 0x445   :  { %v2480_v23 = vpack.c.bf16 %v11236_v44, %v11233_v60  ;;  %12038 = vmatprep.mubr.msk.bf16.mxu0 %vm13775_vm2, %v17150_v62 }
 0x447   :  { %11937 = vmatmul.mubr.msk.bf16.gmra.mrb[132].mxu1 %vm458_vm1, %v2190_v12  ;;  %v11237_v32 = vpop.f32.mrb[64].mxu0  ;;  %v13619_v12 = vld [vmem:[#allocation5 + $0x10] sm:$0xf] }
 0x448   :  { %v11238_v18 = vpop.f32.mrb[65].mxu0  ;;  %11942 = vmatprep.mubr.msk.bf16.mxu1 %vm458_vm1, %v2479_v58 }
 0x449   :  { %v11239_v24 = vadd.f32 %v11238_v18, %v11237_v32  ;;  %v11240_v51 = vpop.f32.mrb[66].mxu0 }
 0x44a   :  { %v11241_v11 = vpop.f32.mrb[67].mxu0 }
 0x44b   :  { %v11242_v25 = vadd.f32 %v11241_v11, %v11240_v51 }
 0x44d   :  { %v2481_v48 = vpack.c.bf16 %v11242_v25, %v11239_v24 }
 0x44f   :  { %v11243_v8 = vpop.f32.mrb[68].mxu0  ;;  %11943 = vmatmul.mubr.msk.bf16.vlgmr.msra.gmra.mrb[128].mxu1 %vm458_vm1, %v2480_v23 }
 0x450   :  { %v11244_v54 = vpop.f32.mrb[69].mxu0  ;;  %11946 = vmatprep.mubr.msk.bf16.mxu1 %vm458_vm1, %v2481_v48  ;;  %11951 = vmatpush3.bf16.msra.mxu1 %v17230_v26 }
 0x451   :  { %v11245_v19 = vadd.f32 %v11244_v54, %v11243_v8  ;;  %v11246_v38 = vpop.f32.mrb[70].mxu0  ;;  %13133 = vmatprep.subr.msk.bf16.mxu1 %vm471_vm0, %v13619_v12 }
 0x452   :  { %v11247_v15 = vpop.f32.mrb[71].mxu0 }
 0x453   :  { %v11248_v43 = vadd.f32 %v11247_v15, %v11246_v38  ;;  %v13621_v15 = vld [vmem:[#allocation5 + $0x18] sm:$0xf] }
 0x455   :  { %v2482_v7 = vpack.c.bf16 %v11248_v43, %v11245_v19  ;;  %v17232_v19 = vld [vmem:[#allocation21_spill] sm:$0xff] }
 0x457   :  { %11947 = vmatmul.mubr.msk.bf16.gmra.mrb[132].mxu1 %vm458_vm1, %v2482_v7  ;;  %v11270_v35 = vpop.f32.mrb[72].mxu0 }
 0x458   :  { %v11271_v29 = vpop.f32.mrb[73].mxu0 }
 0x459   :  { %v11272_v56 = vadd.f32 %v11271_v29, %v11270_v35  ;;  %v11273_v21 = vpop.f32.mrb[74].mxu0 }
 0x45a   :  { %v11274_v30 = vpop.f32.mrb[75].mxu0 }
 0x45b   :  { %v11275_v34 = vadd.f32 %v11274_v30, %v11273_v21 }
 0x45d   :  { %v2633_v36 = vpack.c.bf16 %v11275_v34, %v11272_v56 }
 0x45f   :  { %v11276_v40 = vpop.f32.mrb[76].mxu0  ;;  %11952 = vmatprep.mubr.msk.bf16.mxu1 %vm458_vm1, %v2633_v36 }
 0x460   :  { %v11277_v3 = vpop.f32.mrb[77].mxu0 }
 0x461   :  { %v11278_v53 = vadd.f32 %v11277_v3, %v11276_v40  ;;  %v11279_v27 = vpop.f32.mrb[78].mxu0  ;;  %v14869_v40 = vld [vmem:[%s17127_s5 + $0x10] sm:$0xff]  }
 0x462   :  { %v11280_v50 = vpop.f32.mrb[79].mxu0  ;;  %12035 = vmatpush3.bf16.msra.mxu0 %v14869_v40 }
 0x463   :  { %v11281_v17 = vadd.f32 %v11280_v50, %v11279_v27  ;;  %12036 = vmatprep.subr.bf16.mxu0 %v17150_v62  ;;  %v14877_v27 = vld [vmem:[%s17127_s5 + $0x18] sm:$0xff]  }
 0x465   :  { %v2634_v47 = vpack.c.bf16 %v11281_v17, %v11278_v53 }
 0x466   :  { %12037 = vmatpush3.bf16.msra.mxu0 %v14877_v27 }
 0x467   :  { %v11282_v55 = vpop.f32.mrb[80].mxu0  ;;  %11953 = vmatmul.mubr.msk.bf16.vlgmr.msra.gmra.mrb[128].mxu1 %vm458_vm1, %v2634_v47  ;;  %12050 = vmatprep.subr.bf16.mxu0 %v17150_v62 }
 0x468   :  { %v11283_v4 = vpop.f32.mrb[81].mxu0  ;;  %11961 = vmatpush3.bf16.msra.mxu1 %v17231_v63 }
 0x469   :  { %v11284_v10 = vadd.f32 %v11283_v4, %v11282_v55  ;;  %v11285_v31 = vpop.f32.mrb[82].mxu0  ;;  %13134 = vmatprep.subr.msk.bf16.mxu1 %vm471_vm0, %v13620_v61 }
 0x46a   :  { %v11286_v57 = vpop.f32.mrb[83].mxu0 }
 0x46b   :  { %v11287_v33 = vadd.f32 %v11286_v57, %v11285_v31 }
 0x46d   :  { %v2635_v41 = vpack.c.bf16 %v11287_v33, %v11284_v10 }
 0x46f   :  { %v11288_v1 = vpop.f32.mrb[84].mxu0  ;;  %11956 = vmatprep.mubr.msk.bf16.mxu1 %vm458_vm1, %v2635_v41 }
 0x470   :  { %v11289_v45 = vpop.f32.mrb[85].mxu0 }
 0x471   :  { %v11290_v5 = vadd.f32 %v11289_v45, %v11288_v1  ;;  %v11291_v58 = vpop.f32.mrb[86].mxu0 }
 0x472   :  { %v11292_v13 = vpop.f32.mrb[87].mxu0 }
 0x473   :  { %v11293_v2 = vadd.f32 %v11292_v13, %v11291_v58 }
 0x475   :  { %v2636_v46 = vpack.c.bf16 %v11293_v2, %v11290_v5 }
 0x477   :  { %11957 = vmatmul.mubr.msk.bf16.gmra.mrb[132].mxu1 %vm458_vm1, %v2636_v46  ;;  %v11315_v60 = vpop.f32.mrb[88].mxu0 }
 0x478   :  { %v11316_v6 = vpop.f32.mrb[89].mxu0 }
 0x479   :  { %v11317_v39 = vadd.f32 %v11316_v6, %v11315_v60  ;;  %v11318_v0 = vpop.f32.mrb[90].mxu0 }
 0x47a   :  { %v11319_v44 = vpop.f32.mrb[91].mxu0 }
 0x47b   :  { %v11320_v23 = vadd.f32 %v11319_v44, %v11318_v0 }
 0x47d   :  { %v2787_v32 = vpack.c.bf16 %v11320_v23, %v11317_v39 }
 0x47f   :  { %v11321_v18 = vpop.f32.mrb[92].mxu0  ;;  %11962 = vmatprep.mubr.msk.bf16.mxu1 %vm458_vm1, %v2787_v32 }
 0x480   :  { %v11322_v24 = vpop.f32.mrb[93].mxu0 }
 0x481   :  { %v11323_v51 = vadd.f32 %v11322_v24, %v11321_v18  ;;  %v11324_v11 = vpop.f32.mrb[94].mxu0 }
 0x482   :  { %v11325_v25 = vpop.f32.mrb[95].mxu0 }
 0x483   :  { %v11326_v48 = vadd.f32 %v11325_v25, %v11324_v11 }
 0x485   :  { %v2788_v8 = vpack.c.bf16 %v11326_v48, %v11323_v51 }
 0x487   :  { %v11327_v54 = vpop.f32.mrb[96].mxu0  ;;  %11963 = vmatmul.mubr.msk.bf16.vlgmr.msra.gmra.mrb[128].mxu1 %vm458_vm1, %v2788_v8 }
 0x488   :  { %v11328_v26 = vpop.f32.mrb[97].mxu0  ;;  %11971 = vmatpush3.bf16.msra.mxu1 %v17232_v19 }
 0x489   :  { %v11329_v38 = vadd.f32 %v11328_v26, %v11327_v54  ;;  %v11330_v12 = vpop.f32.mrb[98].mxu0  ;;  %13135 = vmatprep.subr.msk.bf16.mxu1 %vm471_vm0, %v13621_v15 }
 0x48a   :  { %v11331_v43 = vpop.f32.mrb[99].mxu0 }
 0x48b   :  { %v11332_v7 = vadd.f32 %v11331_v43, %v11330_v12 }
 0x48d   :  { %v2789_v35 = vpack.c.bf16 %v11332_v7, %v11329_v38 }
 0x48f   :  { %v11333_v29 = vpop.f32.mrb[100].mxu0  ;;  %11966 = vmatprep.mubr.msk.bf16.mxu1 %vm458_vm1, %v2789_v35 }
 0x490   :  { %v11334_v56 = vpop.f32.mrb[101].mxu0 }
 0x491   :  { %v11335_v21 = vadd.f32 %v11334_v56, %v11333_v29  ;;  %v11336_v30 = vpop.f32.mrb[102].mxu0 }
 0x492   :  { %v11337_v34 = vpop.f32.mrb[103].mxu0 }
 0x493   :  { %v11338_v36 = vadd.f32 %v11337_v34, %v11336_v30 }
 0x495   :  { %v2790_v3 = vpack.c.bf16 %v11338_v36, %v11335_v21 }
 0x497   :  { %11967 = vmatmul.mubr.msk.bf16.gmra.mrb[132].mxu1 %vm458_vm1, %v2790_v3  ;;  %v11360_v53 = vpop.f32.mrb[104].mxu0 }
 0x498   :  { %v11361_v50 = vpop.f32.mrb[105].mxu0 }
 0x499   :  { %v11362_v17 = vadd.f32 %v11361_v50, %v11360_v53  ;;  %v11363_v47 = vpop.f32.mrb[106].mxu0 }
 0x49a   :  { %v11364_v55 = vpop.f32.mrb[107].mxu0 }
 0x49b   :  { %v11365_v4 = vadd.f32 %v11364_v55, %v11363_v47 }
 0x49d   :  { %v2941_v63 = vpack.c.bf16 %v11365_v4, %v11362_v17 }
 0x49f   :  { %v11366_v10 = vpop.f32.mrb[108].mxu0  ;;  %11972 = vmatprep.mubr.msk.bf16.mxu1 %vm458_vm1, %v2941_v63 }
 0x4a0   :  { %v11367_v31 = vpop.f32.mrb[109].mxu0 }
 0x4a1   :  { %v11368_v61 = vadd.f32 %v11367_v31, %v11366_v10  ;;  %v11369_v57 = vpop.f32.mrb[110].mxu0 }
 0x4a2   :  { %v11370_v33 = vpop.f32.mrb[111].mxu0 }
 0x4a3   :  { %v11371_v41 = vadd.f32 %v11370_v33, %v11369_v57 }
 0x4a5   :  { %v2942_v1 = vpack.c.bf16 %v11371_v41, %v11368_v61 }
 0x4a7   :  { %v11372_v45 = vpop.f32.mrb[112].mxu0  ;;  %11973 = vmatmul.mubr.msk.bf16.vlgmr.msra.gmra.mrb[128].mxu1 %vm458_vm1, %v2942_v1 }
 0x4a8   :  { %v11373_v5 = vpop.f32.mrb[113].mxu0  ;;  %11981 = vmatpush3.bf16.msra.mxu1 %v14552_v49 }
 0x4a9   :  { %v11374_v58 = vadd.f32 %v11373_v5, %v11372_v45  ;;  %v11375_v13 = vpop.f32.mrb[114].mxu0  ;;  %13136 = vmatprep.subr.msk.bf16.mxu1 %vm471_vm0, %v14554_v28 }
 0x4aa   :  { %v11376_v2 = vpop.f32.mrb[115].mxu0 }
 0x4ab   :  { %v11377_v46 = vadd.f32 %v11376_v2, %v11375_v13 }
 0x4ad   :  { %v2943_v60 = vpack.c.bf16 %v11377_v46, %v11374_v58 }
 0x4af   :  { %v11378_v6 = vpop.f32.mrb[116].mxu0  ;;  %11976 = vmatprep.mubr.msk.bf16.mxu1 %vm458_vm1, %v2943_v60 }
 0x4b0   :  { %v11379_v39 = vpop.f32.mrb[117].mxu0 }
 0x4b1   :  { %v11380_v0 = vadd.f32 %v11379_v39, %v11378_v6  ;;  %v11381_v44 = vpop.f32.mrb[118].mxu0 }
 0x4b2   :  { %v11382_v23 = vpop.f32.mrb[119].mxu0 }
 0x4b3   :  { %v11383_v32 = vadd.f32 %v11382_v23, %v11381_v44 }
 0x4b5   :  { %v2944_v18 = vpack.c.bf16 %v11383_v32, %v11380_v0 }
 0x4b7   :  { %11977 = vmatmul.mubr.msk.bf16.gmra.mrb[132].mxu1 %vm458_vm1, %v2944_v18  ;;  %v11405_v49 = vpop.f32.mrb[120].mxu0 }
 0x4b8   :  { %v11406_v24 = vpop.f32.mrb[121].mxu0 }
 0x4b9   :  { %v11407_v51 = vadd.f32 %v11406_v24, %v11405_v49  ;;  %v11408_v11 = vpop.f32.mrb[122].mxu0 }
 0x4ba   :  { %v11409_v25 = vpop.f32.mrb[123].mxu0 }
 0x4bb   :  { %v11410_v28 = vadd.f32 %v11409_v25, %v11408_v11 }
 0x4bd   :  { %v3095_v48 = vpack.c.bf16 %v11410_v28, %v11407_v51 }
 0x4bf   :  { %v11411_v8 = vpop.f32.mrb[124].mxu0  ;;  %11982 = vmatprep.mubr.msk.bf16.mxu1 %vm458_vm1, %v3095_v48 }
 0x4c0   :  { %v11412_v54 = vpop.f32.mrb[125].mxu0 }
 0x4c1   :  { %v11413_v26 = vadd.f32 %v11412_v54, %v11411_v8  ;;  %v11414_v19 = vpop.f32.mrb[126].mxu0 }
 0x4c2   :  { %v11415_v38 = vpop.f32.mrb[127].mxu0 }
 0x4c3   :  { %v11416_v12 = vadd.f32 %v11415_v38, %v11414_v19 }
 0x4c5   :  { %v3096_v15 = vpack.c.bf16 %v11416_v12, %v11413_v26 }
 0x4c7   :  { %v11417_v43 = vpop.f32.mrb[128].mxu0  ;;  %11983 = vmatmul.mubr.msk.bf16.vlgmr.msra.gmra.mrb[128].mxu1 %vm458_vm1, %v3096_v15 }
 0x4c8   :  { %v11418_v7 = vpop.f32.mrb[129].mxu0  ;;  %11991 = vmatpush3.bf16.msra.mxu1 %v14568_v37 }
 0x4c9   :  { %v11419_v35 = vadd.f32 %v11418_v7, %v11417_v43  ;;  %v11420_v29 = vpop.f32.mrb[130].mxu0  ;;  %13137 = vmatprep.subr.msk.bf16.mxu1 %vm471_vm0, %v14570_v22 }
 0x4ca   :  { %v11421_v56 = vpop.f32.mrb[131].mxu0 }
 0x4cb   :  { %v11422_v21 = vadd.f32 %v11421_v56, %v11420_v29 }
 0x4cd   :  { %v3097_v30 = vpack.c.bf16 %v11422_v21, %v11419_v35 }
 0x4cf   :  { %v11423_v34 = vpop.f32.mrb[132].mxu0  ;;  %11986 = vmatprep.mubr.msk.bf16.mxu1 %vm458_vm1, %v3097_v30 }
 0x4d0   :  { %v11424_v36 = vpop.f32.mrb[133].mxu0 }
 0x4d1   :  { %v11425_v3 = vadd.f32 %v11424_v36, %v11423_v34  ;;  %v11426_v53 = vpop.f32.mrb[134].mxu0 }
 0x4d2   :  { %v11427_v50 = vpop.f32.mrb[135].mxu0 }
 0x4d3   :  { %v11428_v17 = vadd.f32 %v11427_v50, %v11426_v53 }
 0x4d5   :  { %v3098_v47 = vpack.c.bf16 %v11428_v17, %v11425_v3 }
 0x4d7   :  { %11987 = vmatmul.mubr.msk.bf16.gmra.mrb[132].mxu1 %vm458_vm1, %v3098_v47  ;;  %v11450_v37 = vpop.f32.mrb[136].mxu0 }
 0x4d8   :  { %v11451_v55 = vpop.f32.mrb[137].mxu0 }
 0x4d9   :  { %v11452_v4 = vadd.f32 %v11451_v55, %v11450_v37  ;;  %v11453_v63 = vpop.f32.mrb[138].mxu0 }
 0x4da   :  { %v11454_v10 = vpop.f32.mrb[139].mxu0 }
 0x4db   :  { %v11455_v22 = vadd.f32 %v11454_v10, %v11453_v63 }
 0x4dd   :  { %v3249_v31 = vpack.c.bf16 %v11455_v22, %v11452_v4 }
 0x4df   :  { %v11456_v61 = vpop.f32.mrb[140].mxu0  ;;  %11992 = vmatprep.mubr.msk.bf16.mxu1 %vm458_vm1, %v3249_v31  ;;  %v14918_v31 = vld [vmem:[%s17126_s4] sm:$0xff]  }
 0x4e0   :  { %v11457_v57 = vpop.f32.mrb[141].mxu0 }
 0x4e1   :  { %v11458_v33 = vadd.f32 %v11457_v57, %v11456_v61  ;;  %v11459_v41 = vpop.f32.mrb[142].mxu0  ;;  %v14936_v61 = vld [vmem:[%s17126_s4 + $0x10] sm:$0xff]   ;;  %v14953_v57 = vld [vmem:[%s17126_s4 + $0x20] sm:$0xff]  }
 0x4e2   :  { %v11460_v1 = vpop.f32.mrb[143].mxu0 }
 0x4e3   :  { %v11461_v45 = vadd.f32 %v11460_v1, %v11459_v41  ;;  %v14987_v41 = vld [vmem:[%s17126_s4 + $0x30] sm:$0xff]   ;;  %v15004_v1 = vld [vmem:[%s17126_s4 + $0x40] sm:$0xff]  }
 0x4e5   :  { %v3250_v5 = vpack.c.bf16 %v11461_v45, %v11458_v33  ;;  %v14970_v33 = vld [vmem:[%s17126_s4 + $0x28] sm:$0xff]   ;;  %v15015_v45 = vld [vmem:[%s17127_s5] sm:$0xff]  }
 0x4e7   :  { %v11462_v58 = vpop.f32.mrb[144].mxu0  ;;  %11993 = vmatmul.mubr.msk.bf16.vlgmr.msra.gmra.mrb[128].mxu1 %vm458_vm1, %v3250_v5  ;;  %v15022_v5 = vld [vmem:[%s17127_s5 + $0x8] sm:$0xff]  }
 0x4e8   :  { %v11463_v13 = vpop.f32.mrb[145].mxu0  ;;  %12001 = vmatpush3.bf16.msra.mxu1 %v14593_v42 }
 0x4e9   :  { %v11464_v2 = vadd.f32 %v11463_v13, %v11462_v58  ;;  %v11465_v46 = vpop.f32.mrb[146].mxu0  ;;  %12010 = vmatprep.subr.bf16.mxu1 %v17150_v62 }
 0x4ea   :  { %v11466_v60 = vpop.f32.mrb[147].mxu0 }
 0x4eb   :  { %v11467_v6 = vadd.f32 %v11466_v60, %v11465_v46 }
 0x4ed   :  { %v3251_v39 = vpack.c.bf16 %v11467_v6, %v11464_v2 }
 0x4ef   :  { %v11468_v0 = vpop.f32.mrb[148].mxu0  ;;  %11996 = vmatprep.mubr.msk.bf16.mxu1 %vm458_vm1, %v3251_v39 }
 0x4f0   :  { %v11469_v44 = vpop.f32.mrb[149].mxu0 }
 0x4f1   :  { %v11470_v23 = vadd.f32 %v11469_v44, %v11468_v0  ;;  %v11471_v32 = vpop.f32.mrb[150].mxu0 }
 0x4f2   :  { %v11472_v18 = vpop.f32.mrb[151].mxu0 }
 0x4f3   :  { %v11473_v49 = vadd.f32 %v11472_v18, %v11471_v32 }
 0x4f5   :  { %v3252_v24 = vpack.c.bf16 %v11473_v49, %v11470_v23 }
 0x4f7   :  { %11997 = vmatmul.mubr.msk.bf16.gmra.mrb[132].mxu1 %vm458_vm1, %v3252_v24  ;;  %v11495_v51 = vpop.f32.mrb[152].mxu0 }
 0x4f8   :  { %v11496_v42 = vpop.f32.mrb[153].mxu0 }
 0x4f9   :  { %v11497_v11 = vadd.f32 %v11496_v42, %v11495_v51  ;;  %v11498_v25 = vpop.f32.mrb[154].mxu0 }
 0x4fa   :  { %v11499_v28 = vpop.f32.mrb[155].mxu0 }
 0x4fb   :  { %v11500_v48 = vadd.f32 %v11499_v28, %v11498_v25 }
 0x4fd   :  { %v3403_v8 = vpack.c.bf16 %v11500_v48, %v11497_v11 }
 0x4ff   :  { %v11501_v54 = vpop.f32.mrb[156].mxu0  ;;  %12002 = vmatprep.mubr.msk.bf16.mxu1 %vm458_vm1, %v3403_v8 }
 0x500   :  { %v11502_v26 = vpop.f32.mrb[157].mxu0 }
 0x501   :  { %v11503_v19 = vadd.f32 %v11502_v26, %v11501_v54  ;;  %v11504_v38 = vpop.f32.mrb[158].mxu0 }
 0x502   :  { %v11505_v12 = vpop.f32.mrb[159].mxu0 }
 0x503   :  { %v11506_v15 = vadd.f32 %v11505_v12, %v11504_v38 }
 0x505   :  { %v3404_v43 = vpack.c.bf16 %v11506_v15, %v11503_v19 }
 0x507   :  { %v11507_v7 = vpop.f32.mrb[160].mxu0  ;;  %12003 = vmatmul.mubr.msk.bf16.vlgmr.msra.gmra.mrb[128].mxu1 %vm458_vm1, %v3404_v43 }
 0x508   :  { %12011 = vmatpush3.bf16.msra.mxu1 %v14779_v20  ;;  %v11508_v35 = vpop.f32.mrb[161].mxu0 }
 0x509   :  { %v11509_v29 = vadd.f32 %v11508_v35, %v11507_v7  ;;  %v11510_v56 = vpop.f32.mrb[162].mxu0  ;;  %12012 = vmatprep.subr.bf16.mxu1 %v17150_v62 }
 0x50a   :  { %v11511_v21 = vpop.f32.mrb[163].mxu0 }
 0x50b   :  { %v11512_v30 = vadd.f32 %v11511_v21, %v11510_v56 }
 0x50c   :  { %12013 = vmatpush3.bf16.msra.mxu1 %v14776_v59 }
 0x50d   :  { %v3405_v34 = vpack.c.bf16 %v11512_v30, %v11509_v29  ;;  %12014 = vmatprep.subr.bf16.mxu1 %v17150_v62 }
 0x50f   :  { %v11513_v36 = vpop.f32.mrb[164].mxu0  ;;  %12006 = vmatprep.mubr.msk.bf16.mxu1 %vm458_vm1, %v3405_v34 }
 0x510   :  { %12015 = vmatpush3.bf16.msra.mxu1 %v14790_v14  ;;  %v11514_v3 = vpop.f32.mrb[165].mxu0 }
 0x511   :  { %v11515_v53 = vadd.f32 %v11514_v3, %v11513_v36  ;;  %v11516_v50 = vpop.f32.mrb[166].mxu0  ;;  %12016 = vmatprep.subr.bf16.mxu1 %v17150_v62 }
 0x512   :  { %v11517_v17 = vpop.f32.mrb[167].mxu0 }
 0x513   :  { %v11518_v47 = vadd.f32 %v11517_v17, %v11516_v50 }
 0x514   :  { %12017 = vmatpush3.bf16.msra.mxu1 %v14788_v16 }
 0x515   :  { %v3406_v37 = vpack.c.bf16 %v11518_v47, %v11515_v53  ;;  %12042 = vmatprep.subr.bf16.mxu1 %v17150_v62 }
 0x517   :  { %12007 = vmatmul.mubr.msk.bf16.gmra.mrb[132].mxu1 %vm458_vm1, %v3406_v37  ;;  %v3624_v55 = vpop.f32.mrb[168].mxu0 }
 0x518   :  { %v12032_v4 = vpop.f32.mrb[169].mxu0  ;;  %12018 = vmatprep.mubr.msk.bf16.mxu1 %vm13775_vm2, %v17150_v62 }
 0x519   :  { %v3627_v63 = vpop.f32.mrb[170].mxu0 }
 0x51a   :  { %v3631_v10 = vpack.c.bf16 %v3627_v63, %v3624_v55  ;;  %v12033_v22 = vpop.f32.mrb[171].mxu0 }
 0x51c   :  { %12039 = vmatmul.mubr.msk.bf16.vlgmr.msra.gmra.mrb[172].mxu0 %vm3649_vm4, %v3631_v10  ;;  %v15062_v10 = vld [vmem:[%s17127_s5 + $0x28] sm:$0xff]  }
 0x51d   :  { %12051 = vmatpush3.bf16.msra.mxu0 %v14779_v20  ;;  %12058 = vmatprep.mubr.msk.bf16.mxu0 %vm13775_vm2, %v17150_v62 }
 0x51e   :  { %12052 = vmatprep.subr.bf16.mxu0 %v17150_v62 }
 0x51f   :  { %12019 = vmatmul.mubr.msk.bf16.vlgmr.msra.gmra.mrb[136].mxu1 %vm3529_vm3, %v14918_v31 }
 0x520   :  { %12046 = vmatprep.mubr.msk.bf16.mxu1 %vm13775_vm2, %v17150_v62  ;;  %12043 = vmatpush3.bf16.msra.mxu1 %v15015_v45 }
 0x521   :  { %12053 = vmatpush3.bf16.msra.mxu0 %v14776_v59  ;;  %12044 = vmatprep.subr.bf16.mxu1 %v17150_v62 }
 0x522   :  { %12054 = vmatprep.subr.bf16.mxu0 %v17150_v62 }
 0x524   :  { %12045 = vmatpush3.bf16.msra.mxu1 %v15022_v5 }
 0x525   :  { %12055 = vmatpush3.bf16.msra.mxu0 %v14790_v14  ;;  %12062 = vmatprep.subr.bf16.mxu1 %v17150_v62 }
 0x526   :  { %12056 = vmatprep.subr.bf16.mxu0 %v17150_v62 }
 0x529   :  { %12057 = vmatpush3.bf16.msra.mxu0 %v14788_v16 }
 0x52a   :  { %12090 = vmatprep.subr.bf16.mxu0 %v17150_v62 }
 0x52c   :  { %12059 = vmatmul.mubr.msk.bf16.vlgmr.msra.gmra.mrb[176].mxu0 %vm3529_vm3, %v14936_v61 }
 0x52d   :  { %12091 = vmatpush3.bf16.msra.mxu0 %v14779_v20  ;;  %12098 = vmatprep.mubr.msk.bf16.mxu0 %vm13775_vm2, %v17150_v62 }
 0x52e   :  { %12092 = vmatprep.subr.bf16.mxu0 %v17150_v62 }
 0x531   :  { %12093 = vmatpush3.bf16.msra.mxu0 %v14776_v59 }
 0x532   :  { %12094 = vmatprep.subr.bf16.mxu0 %v17150_v62 }
 0x535   :  { %12095 = vmatpush3.bf16.msra.mxu0 %v14790_v14 }
 0x536   :  { %12096 = vmatprep.subr.bf16.mxu0 %v17150_v62 }
 0x539   :  { %12097 = vmatpush3.bf16.msra.mxu0 %v14788_v16 }
 0x53a   :  { %12110 = vmatprep.subr.bf16.mxu0 %v17150_v62 }
 0x53c   :  { %12099 = vmatmul.mubr.msk.bf16.vlgmr.msra.gmra.mrb[180].mxu0 %vm3529_vm3, %v14953_v57 }
 0x53d   :  { %12111 = vmatpush3.bf16.msra.mxu0 %v14779_v20  ;;  %12118 = vmatprep.mubr.msk.bf16.mxu0 %vm13775_vm2, %v17150_v62 }
 0x53e   :  { %12112 = vmatprep.subr.bf16.mxu0 %v17150_v62 }
 0x541   :  { %12113 = vmatpush3.bf16.msra.mxu0 %v14776_v59 }
 0x542   :  { %12114 = vmatprep.subr.bf16.mxu0 %v17150_v62 }
 0x545   :  { %12115 = vmatpush3.bf16.msra.mxu0 %v14790_v14 }
 0x546   :  { %12116 = vmatprep.subr.bf16.mxu0 %v17150_v62 }
 0x549   :  { %12117 = vmatpush3.bf16.msra.mxu0 %v14788_v16 }
 0x54a   :  { %12130 = vmatprep.subr.bf16.mxu0 %v17150_v62 }
 0x54c   :  { %12119 = vmatmul.mubr.msk.bf16.vlgmr.msra.gmra.mrb[184].mxu0 %vm3529_vm3, %v14970_v33 }
 0x54d   :  { %12131 = vmatpush3.bf16.msra.mxu0 %v14779_v20  ;;  %12138 = vmatprep.mubr.msk.bf16.mxu0 %vm13775_vm2, %v17150_v62 }
 0x54e   :  { %12132 = vmatprep.subr.bf16.mxu0 %v17150_v62 }
 0x551   :  { %12133 = vmatpush3.bf16.msra.mxu0 %v14776_v59 }
 0x552   :  { %12134 = vmatprep.subr.bf16.mxu0 %v17150_v62 }
 0x555   :  { %12135 = vmatpush3.bf16.msra.mxu0 %v14790_v14 }
 0x556   :  { %12136 = vmatprep.subr.bf16.mxu0 %v17150_v62 }
 0x559   :  { %12137 = vmatpush3.bf16.msra.mxu0 %v14788_v16 }
 0x55a   :  { %12170 = vmatprep.subr.bf16.mxu0 %v17150_v62 }
 0x55c   :  { %12139 = vmatmul.mubr.msk.bf16.vlgmr.msra.gmra.mrb[188].mxu0 %vm3529_vm3, %v14987_v41 }
 0x55d   :  { %12171 = vmatpush3.bf16.msra.mxu0 %v14779_v20  ;;  %12178 = vmatprep.mubr.msk.bf16.mxu0 %vm13775_vm2, %v17150_v62 }
 0x55e   :  { %12172 = vmatprep.subr.bf16.mxu0 %v17150_v62 }
 0x561   :  { %12173 = vmatpush3.bf16.msra.mxu0 %v14776_v59 }
 0x562   :  { %12174 = vmatprep.subr.bf16.mxu0 %v17150_v62 }
 0x565   :  { %12175 = vmatpush3.bf16.msra.mxu0 %v14790_v14 }
 0x566   :  { %12176 = vmatprep.subr.bf16.mxu0 %v17150_v62 }
 0x569   :  { %12177 = vmatpush3.bf16.msra.mxu0 %v14788_v16 }
 0x56a   :  { %12190 = vmatprep.subr.bf16.mxu0 %v17150_v62 }
 0x56c   :  { %12179 = vmatmul.mubr.msk.bf16.vlgmr.msra.gmra.mrb[192].mxu0 %vm3529_vm3, %v15004_v1 }
 0x56d   :  { %12198 = vmatprep.mubr.msk.bf16.mxu0 %vm13775_vm2, %v17150_v62 }
 0x5da   :  { %v12004_v58 = vpop.f32.mrb[128].mxu1 }
 0x5db   :  { %v3494_v13 = vadd.f32 %v12004_v58, %v14765_v9  ;;  %v3453_v2 = vpop.f32.mrb[129].mxu1 }
 0x5dc   :  { %v3492_v46 = vadd.f32 %v14765_v9, %v3453_v2  ;;  %v12005_v60 = vpop.f32.mrb[130].mxu1 }
 0x5dd   :  { %v3502_v6 = vmul.f32 0.2, %v3494_v13  ;;  %v3495_v39 = vadd.f32 %v12005_v60, %v14765_v9  ;;  %v3456_v0 = vpop.f32.mrb[131].mxu1 }
 0x5de   :  { %v3500_v44 = vmul.f32 0.2, %v3492_v46  ;;  %v3493_v23 = vadd.f32 %v14765_v9, %v3456_v0 }
 0x5df   :  { %v3503_v32 = vmul.f32 0.2, %v3495_v39  ;;  %v3510_v49 = vmax.f32 %v3494_v13, %v3502_v6 }
 0x5e0   :  { %v3501_v18 = vmul.f32 0.2, %v3493_v23  ;;  %v3508_v51 = vmax.f32 %v3492_v46, %v3500_v44 }
 0x5e1   :  { %v3511_v24 = vmax.f32 %v3495_v39, %v3503_v32 }
 0x5e2   :  { %v3509_v42 = vmax.f32 %v3493_v23, %v3501_v18 }
 0x5e3   :  { %v15030_v11 = vpack.c.bf16 %v3511_v24, %v3510_v49 }
 0x5e4   :  { %v15032_v25 = vpack.c.bf16 %v3509_v42, %v3508_v51 }
 0x5e6   :  { %12191 = vmatpush3.bf16.msra.mxu0 %v15032_v25 }
 0x5e7   :  { %12192 = vmatprep.subr.bf16.mxu0 %v17150_v62 }
 0x5ea   :  { %v12008_v28 = vpop.f32.mrb[132].mxu1  ;;  %12193 = vmatpush3.bf16.msra.mxu0 %v15030_v11 }
 0x5eb   :  { %v3498_v48 = vadd.f32 %v12008_v28, %v14765_v9  ;;  %v3469_v8 = vpop.f32.mrb[133].mxu1  ;;  %12194 = vmatprep.subr.bf16.mxu0 %v17150_v62 }
 0x5ec   :  { %v3496_v54 = vadd.f32 %v14765_v9, %v3469_v8  ;;  %v12009_v26 = vpop.f32.mrb[134].mxu1 }
 0x5ed   :  { %v3506_v19 = vmul.f32 0.2, %v3498_v48  ;;  %v3499_v38 = vadd.f32 %v12009_v26, %v14765_v9  ;;  %v3472_v12 = vpop.f32.mrb[135].mxu1 }
 0x5ee   :  { %v3504_v15 = vmul.f32 0.2, %v3496_v54  ;;  %v3497_v43 = vadd.f32 %v14765_v9, %v3472_v12  ;;  %v15053_v9 = vld [vmem:[%s17127_s5 + $0x20] sm:$0xff]  }
 0x5ef   :  { %v3507_v7 = vmul.f32 0.2, %v3499_v38  ;;  %v15042_v35 = vpop.f32.mrb[172].mxu0  ;;  %v3514_v21 = vmax.f32 %v3498_v48, %v3506_v19 }
 0x5f0   :  { %v3505_v29 = vmul.f32 0.2, %v3497_v43  ;;  %v12040_v56 = vpop.f32.mrb[173].mxu0  ;;  %v3512_v36 = vmax.f32 %v3496_v54, %v3504_v15 }
 0x5f1   :  { %v3515_v30 = vmax.f32 %v3499_v38, %v3507_v7  ;;  %v15044_v34 = vpop.f32.mrb[174].mxu0  ;;  %v15116_v38 = vld [vmem:[%s17127_s5 + $0x40] sm:$0xff]   ;;  %v15133_v7 = vld [vmem:[%s17127_s5 + $0x50] sm:$0xff]  }
 0x5f2   :  { %v3513_v3 = vmax.f32 %v3497_v43, %v3505_v29  ;;  %v3567_v53 = vpop.f32.mrb[136].mxu1  ;;  %v12041_v50 = vpop.f32.mrb[175].mxu0  ;;  %v15123_v43 = vld [vmem:[%s17127_s5 + $0x48] sm:$0xff]   ;;  %v15140_v29 = vld [vmem:[%s17127_s5 + $0x58] sm:$0xff]   ;;  %v15150_v56 = vld [vmem:[%s17127_s5 + $0x60] sm:$0xff]  }
 0x5f3   :  { %v15046_v17 = vpack.c.bf16 %v3515_v30, %v3514_v21  ;;  %v12020_v47 = vpop.f32.mrb[137].mxu1  ;;  %v15157_v21 = vld [vmem:[%s17127_s5 + $0x68] sm:$0xff]   ;;  %v15176_v30 = vld [vmem:[%s17126_s4 + $0x38] sm:$0xff]  }
 0x5f4   :  { %v15048_v37 = vpack.c.bf16 %v3513_v3, %v3512_v36  ;;  %v3570_v55 = vpop.f32.mrb[138].mxu1 }
 0x5f5   :  { %v3574_v4 = vpack.c.bf16 %v3570_v55, %v3567_v53  ;;  %v12021_v63 = vpop.f32.mrb[139].mxu1 }
 0x5f6   :  { %12195 = vmatpush3.bf16.msra.mxu0 %v15048_v37 }
 0x5f7   :  { %12047 = vmatmul.mubr.msk.bf16.vlgmr.msra.gmra.mrb[140].mxu1 %vm3649_vm4, %v3574_v4  ;;  %12196 = vmatprep.subr.bf16.mxu0 %v17150_v62  ;;  %v15201_v4 = vld [vmem:[%s17127_s5 + $0x80] sm:$0xff]  }
 0x5f8   :  { %12063 = vmatpush3.bf16.msra.mxu1 %v15053_v9  ;;  %12066 = vmatprep.mubr.msk.bf16.mxu1 %vm13775_vm2, %v17150_v62 }
 0x5f9   :  { %12064 = vmatprep.subr.bf16.mxu1 %v17150_v62 }
 0x5fa   :  { %12197 = vmatpush3.bf16.msra.mxu0 %v15046_v17 }
 0x5fb   :  { %12214 = vmatprep.subr.bf16.mxu0 %v17150_v62 }
 0x5fc   :  { %12065 = vmatpush3.bf16.msra.mxu1 %v15062_v10 }
 0x5fd   :  { %12070 = vmatprep.subr.bf16.mxu1 %v17150_v62  ;;  %12199 = vmatmul.mubr.msk.bf16.vlgmr.msra.gmra.mrb[196].mxu0 %vm3529_vm3, %v14918_v31  ;;  %v15109_v31 = vld [vmem:[%s17127_s5 + $0x38] sm:$0xff]  }
 0x5fe   :  { %12215 = vmatpush3.bf16.msra.mxu0 %v14869_v40  ;;  %12218 = vmatprep.mubr.msk.bf16.mxu0 %vm13775_vm2, %v17150_v62  ;;  %v15091_v40 = vld [vmem:[%s17126_s4 + $0x18] sm:$0xff]  }
 0x5ff   :  { %v3795_v22 = vpop.f32.mrb[176].mxu0  ;;  %12216 = vmatprep.subr.bf16.mxu0 %v17150_v62 }
 0x600   :  { %v12060_v58 = vpop.f32.mrb[177].mxu0 }
 0x601   :  { %v3798_v13 = vpop.f32.mrb[178].mxu0  ;;  %v15208_v58 = vld [vmem:[%s17127_s5 + $0x88] sm:$0xff]  }
 0x602   :  { %v3802_v2 = vpack.c.bf16 %v3798_v13, %v3795_v22  ;;  %v12061_v46 = vpop.f32.mrb[179].mxu0  ;;  %12217 = vmatpush3.bf16.msra.mxu0 %v14877_v27  ;;  %v15097_v27 = vld [vmem:[%s17127_s5 + $0x30] sm:$0xff]  }
 0x603   :  { %12222 = vmatprep.subr.bf16.mxu0 %v17150_v62 }
 0x604   :  { %12067 = vmatmul.mubr.msk.bf16.vlgmr.msra.gmra.mrb[140].mxu1 %vm3649_vm4, %v3802_v2 }
 0x605   :  { %12071 = vmatpush3.bf16.msra.mxu1 %v14779_v20  ;;  %12078 = vmatprep.mubr.msk.bf16.mxu1 %vm13775_vm2, %v17150_v62 }
 0x606   :  { %12072 = vmatprep.subr.bf16.mxu1 %v17150_v62 }
 0x609   :  { %12073 = vmatpush3.bf16.msra.mxu1 %v14776_v59 }
 0x60a   :  { %12074 = vmatprep.subr.bf16.mxu1 %v17150_v62 }
 0x60d   :  { %12075 = vmatpush3.bf16.msra.mxu1 %v14790_v14 }
 0x60e   :  { %12076 = vmatprep.subr.bf16.mxu1 %v17150_v62 }
 0x60f   :  { %v4027_v60 = vpop.f32.mrb[180].mxu0 }
 0x610   :  { %v12100_v6 = vpop.f32.mrb[181].mxu0 }
 0x611   :  { %12077 = vmatpush3.bf16.msra.mxu1 %v14788_v16  ;;  %v4030_v39 = vpop.f32.mrb[182].mxu0 }
 0x612   :  { %12082 = vmatprep.subr.bf16.mxu1 %v17150_v62  ;;  %v4034_v0 = vpack.c.bf16 %v4030_v39, %v4027_v60  ;;  %v12101_v44 = vpop.f32.mrb[183].mxu0 }
 0x614   :  { %12079 = vmatmul.mubr.msk.bf16.vlgmr.msra.gmra.mrb[144].mxu1 %vm3529_vm3, %v15091_v40 }
 0x615   :  { %12083 = vmatpush3.bf16.msra.mxu1 %v15097_v27  ;;  %12086 = vmatprep.mubr.msk.bf16.mxu1 %vm13775_vm2, %v17150_v62 }
 0x616   :  { %12084 = vmatprep.subr.bf16.mxu1 %v17150_v62 }
 0x619   :  { %12085 = vmatpush3.bf16.msra.mxu1 %v15109_v31 }
 0x61a   :  { %12102 = vmatprep.subr.bf16.mxu1 %v17150_v62 }
 0x61f   :  { %v4143_v23 = vpop.f32.mrb[184].mxu0 }
 0x620   :  { %v12120_v32 = vpop.f32.mrb[185].mxu0 }
 0x621   :  { %v4146_v18 = vpop.f32.mrb[186].mxu0 }
 0x622   :  { %v4150_v49 = vpack.c.bf16 %v4146_v18, %v4143_v23  ;;  %v12121_v24 = vpop.f32.mrb[187].mxu0 }
 0x62f   :  { %v4259_v51 = vpop.f32.mrb[188].mxu0 }
 0x630   :  { %v12140_v42 = vpop.f32.mrb[189].mxu0 }
 0x631   :  { %v4262_v28 = vpop.f32.mrb[190].mxu0 }
 0x632   :  { %v4266_v48 = vpack.c.bf16 %v4262_v28, %v4259_v51  ;;  %v12141_v8 = vpop.f32.mrb[191].mxu0 }
 0x6e7   :  { %v3911_v54 = vpop.f32.mrb[144].mxu1 }
 0x6e8   :  { %v12080_v26 = vpop.f32.mrb[145].mxu1 }
 0x6e9   :  { %v3914_v19 = vpop.f32.mrb[146].mxu1 }
 0x6ea   :  { %v3918_v12 = vpack.c.bf16 %v3914_v19, %v3911_v54  ;;  %v12081_v15 = vpop.f32.mrb[147].mxu1 }
 0x6ec   :  { %12087 = vmatmul.mubr.msk.bf16.vlgmr.msra.gmra.mrb[140].mxu1 %vm3649_vm4, %v3918_v12 }
 0x6ed   :  { %12103 = vmatpush3.bf16.msra.mxu1 %v15116_v38  ;;  %12106 = vmatprep.mubr.msk.bf16.mxu1 %vm13775_vm2, %v17150_v62 }
 0x6ee   :  { %12104 = vmatprep.subr.bf16.mxu1 %v17150_v62 }
 0x6f1   :  { %12105 = vmatpush3.bf16.msra.mxu1 %v15123_v43 }
 0x6f2   :  { %12122 = vmatprep.subr.bf16.mxu1 %v17150_v62 }
 0x6f8   :  { %12107 = vmatmul.mubr.msk.bf16.vlgmr.msra.gmra.mrb[140].mxu1 %vm3649_vm4, %v4034_v0 }
 0x6f9   :  { %12123 = vmatpush3.bf16.msra.mxu1 %v15133_v7  ;;  %12126 = vmatprep.mubr.msk.bf16.mxu1 %vm13775_vm2, %v17150_v62 }
 0x6fa   :  { %12124 = vmatprep.subr.bf16.mxu1 %v17150_v62 }
 0x6fd   :  { %12125 = vmatpush3.bf16.msra.mxu1 %v15140_v29 }
 0x6fe   :  { %12142 = vmatprep.subr.bf16.mxu1 %v17150_v62 }
 0x704   :  { %12127 = vmatmul.mubr.msk.bf16.vlgmr.msra.gmra.mrb[140].mxu1 %vm3649_vm4, %v4150_v49 }
 0x705   :  { %12143 = vmatpush3.bf16.msra.mxu1 %v15150_v56  ;;  %12146 = vmatprep.mubr.msk.bf16.mxu1 %vm13775_vm2, %v17150_v62 }
 0x706   :  { %12144 = vmatprep.subr.bf16.mxu1 %v17150_v62 }
 0x709   :  { %12145 = vmatpush3.bf16.msra.mxu1 %v15157_v21 }
 0x70a   :  { %12150 = vmatprep.subr.bf16.mxu1 %v17150_v62 }
 0x710   :  { %12147 = vmatmul.mubr.msk.bf16.vlgmr.msra.gmra.mrb[140].mxu1 %vm3649_vm4, %v4266_v48 }
 0x711   :  { %12151 = vmatpush3.bf16.msra.mxu1 %v14779_v20  ;;  %12158 = vmatprep.mubr.msk.bf16.mxu1 %vm13775_vm2, %v17150_v62  ;;  %v15182_v20 = vld [vmem:[%s17127_s5 + $0x70] sm:$0xff]  }
 0x712   :  { %12152 = vmatprep.subr.bf16.mxu1 %v17150_v62 }
 0x715   :  { %12153 = vmatpush3.bf16.msra.mxu1 %v14776_v59  ;;  %v15194_v59 = vld [vmem:[%s17127_s5 + $0x78] sm:$0xff]  }
 0x716   :  { %12154 = vmatprep.subr.bf16.mxu1 %v17150_v62 }
 0x719   :  { %12155 = vmatpush3.bf16.msra.mxu1 %v14790_v14 }
 0x71a   :  { %12156 = vmatprep.subr.bf16.mxu1 %v17150_v62 }
 0x71d   :  { %12157 = vmatpush3.bf16.msra.mxu1 %v14788_v16  ;;  %v4491_v16 = vpop.f32.mrb[192].mxu0 }
 0x71e   :  { %12162 = vmatprep.subr.bf16.mxu1 %v17150_v62  ;;  %v12180_v14 = vpop.f32.mrb[193].mxu0 }
 0x71f   :  { %v4494_v36 = vpop.f32.mrb[194].mxu0 }
 0x720   :  { %12159 = vmatmul.mubr.msk.bf16.vlgmr.msra.gmra.mrb[148].mxu1 %vm3529_vm3, %v15176_v30  ;;  %v4498_v3 = vpack.c.bf16 %v4494_v36, %v4491_v16  ;;  %v12181_v53 = vpop.f32.mrb[195].mxu0 }
 0x721   :  { %12163 = vmatpush3.bf16.msra.mxu1 %v15182_v20  ;;  %12166 = vmatprep.mubr.msk.bf16.mxu1 %vm13775_vm2, %v17150_v62 }
 0x722   :  { %12164 = vmatprep.subr.bf16.mxu1 %v17150_v62 }
 0x725   :  { %12165 = vmatpush3.bf16.msra.mxu1 %v15194_v59 }
 0x726   :  { %12182 = vmatprep.subr.bf16.mxu1 %v17150_v62 }
 0x7f3   :  { %v4375_v50 = vpop.f32.mrb[148].mxu1 }
 0x7f4   :  { %v12160_v47 = vpop.f32.mrb[149].mxu1 }
 0x7f5   :  { %v4378_v55 = vpop.f32.mrb[150].mxu1 }
 0x7f6   :  { %v4382_v63 = vpack.c.bf16 %v4378_v55, %v4375_v50  ;;  %v12161_v22 = vpop.f32.mrb[151].mxu1 }
 0x7f8   :  { %12167 = vmatmul.mubr.msk.bf16.vlgmr.msra.gmra.mrb[140].mxu1 %vm3649_vm4, %v4382_v63 }
 0x7f9   :  { %12183 = vmatpush3.bf16.msra.mxu1 %v15201_v4  ;;  %12186 = vmatprep.mubr.msk.bf16.mxu1 %vm13775_vm2, %v17150_v62 }
 0x7fa   :  { %12184 = vmatprep.subr.bf16.mxu1 %v17150_v62 }
 0x7fd   :  { %12185 = vmatpush3.bf16.msra.mxu1 %v15208_v58 }
 0x7fe   :  { %12202 = vmatprep.subr.bf16.mxu1 %v17150_v62 }
 0x804   :  { %12187 = vmatmul.mubr.msk.bf16.vlgmr.msra.gmra.mrb[140].mxu1 %vm3649_vm4, %v4498_v3 }
 0x805   :  { %12203 = vmatpush3.bf16.msra.mxu1 %v15032_v25  ;;  %12210 = vmatprep.mubr.msk.bf16.mxu1 %vm13775_vm2, %v17150_v62 }
 0x806   :  { %12204 = vmatprep.subr.bf16.mxu1 %v17150_v62 }
 0x809   :  { %12205 = vmatpush3.bf16.msra.mxu1 %v15030_v11 }
 0x80a   :  { %12206 = vmatprep.subr.bf16.mxu1 %v17150_v62 }
 0x80d   :  { %12207 = vmatpush3.bf16.msra.mxu1 %v15048_v37 }
 0x80e   :  { %12208 = vmatprep.subr.bf16.mxu1 %v17150_v62 }
 0x811   :  { %12209 = vmatpush3.bf16.msra.mxu1 %v15046_v17 }
 0x812   :  { %12230 = vmatprep.subr.bf16.mxu1 %v17150_v62 }
 0x814   :  { %12211 = vmatmul.mubr.msk.bf16.vlgmr.msra.gmra.mrb[152].mxu1 %vm3529_vm3, %v14833_v52  ;;  %v4600_v52 = vpop.f32.mrb[196].mxu0 }
 0x815   :  { %12231 = vmatpush3.bf16.msra.mxu1 %v15032_v25  ;;  %12238 = vmatprep.mubr.msk.bf16.mxu1 %vm13775_vm2, %v17150_v62 }
 0x816   :  { %12232 = vmatprep.subr.bf16.mxu1 %v17150_v62 }
 0x819   :  { %12233 = vmatpush3.bf16.msra.mxu1 %v15030_v11 }
 0x81a   :  { %12234 = vmatprep.subr.bf16.mxu1 %v17150_v62 }
 0x81d   :  { %12235 = vmatpush3.bf16.msra.mxu1 %v15048_v37 }
 0x81e   :  { %12236 = vmatprep.subr.bf16.mxu1 %v17150_v62 }
 0x821   :  { %12237 = vmatpush3.bf16.msra.mxu1 %v15046_v17 }
 0x822   :  { %12270 = vmatprep.subr.bf16.mxu1 %v17150_v62 }
 0x824   :  { %12239 = vmatmul.mubr.msk.bf16.vlgmr.msra.gmra.mrb[156].mxu1 %vm3529_vm3, %v14936_v61  ;;  %v12200_v61 = vpop.f32.mrb[197].mxu0 }
 0x825   :  { %12271 = vmatpush3.bf16.msra.mxu1 %v15032_v25  ;;  %12278 = vmatprep.mubr.msk.bf16.mxu1 %vm13775_vm2, %v17150_v62 }
 0x826   :  { %12272 = vmatprep.subr.bf16.mxu1 %v17150_v62 }
 0x829   :  { %12273 = vmatpush3.bf16.msra.mxu1 %v15030_v11 }
 0x82a   :  { %12274 = vmatprep.subr.bf16.mxu1 %v17150_v62 }
 0x82d   :  { %12275 = vmatpush3.bf16.msra.mxu1 %v15048_v37 }
 0x82e   :  { %12276 = vmatprep.subr.bf16.mxu1 %v17150_v62 }
 0x831   :  { %12277 = vmatpush3.bf16.msra.mxu1 %v15046_v17 }
 0x832   :  { %12290 = vmatprep.subr.bf16.mxu1 %v17150_v62 }
 0x834   :  { %12279 = vmatmul.mubr.msk.bf16.vlgmr.msra.gmra.mrb[160].mxu1 %vm3529_vm3, %v14953_v57  ;;  %v4603_v57 = vpop.f32.mrb[198].mxu0 }
 0x835   :  { %12291 = vmatpush3.bf16.msra.mxu1 %v15032_v25  ;;  %12298 = vmatprep.mubr.msk.bf16.mxu1 %vm13775_vm2, %v17150_v62 }
 0x836   :  { %12292 = vmatprep.subr.bf16.mxu1 %v17150_v62 }
 0x839   :  { %12293 = vmatpush3.bf16.msra.mxu1 %v15030_v11 }
 0x83a   :  { %12294 = vmatprep.subr.bf16.mxu1 %v17150_v62 }
 0x83d   :  { %12295 = vmatpush3.bf16.msra.mxu1 %v15048_v37 }
 0x83e   :  { %12296 = vmatprep.subr.bf16.mxu1 %v17150_v62 }
 0x841   :  { %12297 = vmatpush3.bf16.msra.mxu1 %v15046_v17 }
 0x842   :  { %12310 = vmatprep.subr.bf16.mxu1 %v17150_v62 }
 0x844   :  { %12299 = vmatmul.mubr.msk.bf16.vlgmr.msra.gmra.mrb[164].mxu1 %vm3529_vm3, %v14970_v33  ;;  %v4607_v33 = vpack.c.bf16 %v4603_v57, %v4600_v52 }
 0x845   :  { %12311 = vmatpush3.bf16.msra.mxu1 %v15032_v25  ;;  %12318 = vmatprep.mubr.msk.bf16.mxu1 %vm13775_vm2, %v17150_v62 }
 0x846   :  { %12312 = vmatprep.subr.bf16.mxu1 %v17150_v62 }
 0x849   :  { %12313 = vmatpush3.bf16.msra.mxu1 %v15030_v11 }
 0x84a   :  { %12314 = vmatprep.subr.bf16.mxu1 %v17150_v62 }
 0x84d   :  { %12315 = vmatpush3.bf16.msra.mxu1 %v15048_v37 }
 0x84e   :  { %12316 = vmatprep.subr.bf16.mxu1 %v17150_v62 }
 0x851   :  { %12317 = vmatpush3.bf16.msra.mxu1 %v15046_v17 }
 0x852   :  { %12350 = vmatprep.subr.bf16.mxu1 %v17150_v62 }
 0x854   :  { %12319 = vmatmul.mubr.msk.bf16.vlgmr.msra.gmra.mrb[168].mxu1 %vm3529_vm3, %v14987_v41  ;;  %v12201_v41 = vpop.f32.mrb[199].mxu0 }
 0x855   :  { %12351 = vmatpush3.bf16.msra.mxu1 %v15032_v25  ;;  %12358 = vmatprep.mubr.msk.bf16.mxu1 %vm13775_vm2, %v17150_v62 }
 0x856   :  { %12352 = vmatprep.subr.bf16.mxu1 %v17150_v62 }
 0x859   :  { %12353 = vmatpush3.bf16.msra.mxu1 %v15030_v11 }
 0x85a   :  { %12354 = vmatprep.subr.bf16.mxu1 %v17150_v62 }
 0x85d   :  { %12355 = vmatpush3.bf16.msra.mxu1 %v15048_v37 }
 0x85e   :  { %12356 = vmatprep.subr.bf16.mxu1 %v17150_v62 }
 0x861   :  { %12357 = vmatpush3.bf16.msra.mxu1 %v15046_v17 }
 0x862   :  { %12370 = vmatprep.subr.bf16.mxu1 %v17150_v62 }
 0x864   :  { %12359 = vmatmul.mubr.msk.bf16.vlgmr.msra.gmra.mrb[172].mxu1 %vm3529_vm3, %v15004_v1 }
 0x865   :  { %12372 = vmatprep.mubr.msk.bf16.mxu1 %vm13775_vm2, %v17150_v62 }
 0x8d7   :  { %v4553_v13 = vpop.f32.mrb[140].mxu1 }
 0x8d8   :  { %v15291_v2 = vadd.f32 %v4553_v13, %v15042_v35  ;;  %v12188_v46 = vpop.f32.mrb[141].mxu1 }
 0x8d9   :  { %v4556_v60 = vpop.f32.mrb[142].mxu1 }
 0x8da   :  { %v5364_v6 = vmul.f32 %v15291_v2, %v15291_v2  ;;  %v15296_v39 = vadd.f32 %v4556_v60, %v15044_v34  ;;  %v12189_v1 = vpop.f32.mrb[143].mxu1  ;;  %v5354_v0 = vsel %vm3529_vm3, %v15291_v2, 0.0 }
 0x8dc   :  { %v5355_v44 = vsel %vm3529_vm3, %v15296_v39, 0.0  ;;  %v5365_v23 = vmul.f32 %v15296_v39, %v15296_v39  ;;  %v5366_v32 = vsel %vm3529_vm3, %v5364_v6, 0.0 }
 0x8dd   :  { %v15304_v35 = vadd.f32 %v5355_v44, %v5354_v0 }
 0x8de   :  { %v5367_v18 = vsel %vm3529_vm3, %v5365_v23, 0.0 }
 0x8df   :  { %v15308_v49 = vadd.f32 %v5367_v18, %v5366_v32 }
 0x8e7   :  { %v4642_v34 = vpop.f32.mrb[152].mxu1 }
 0x8e8   :  { %v12212_v24 = vpop.f32.mrb[153].mxu1 }
 0x8e9   :  { %v4645_v51 = vpop.f32.mrb[154].mxu1 }
 0x8ea   :  { %v4649_v42 = vpack.c.bf16 %v4645_v51, %v4642_v34  ;;  %v12213_v28 = vpop.f32.mrb[155].mxu1 }
 0x8ec   :  { %12219 = vmatmul.mubr.msk.bf16.vlgmr.msra.gmra.mrb[200].mxu0 %vm3649_vm4, %v4649_v42 }
 0x8ed   :  { %12223 = vmatpush3.bf16.msra.mxu0 %v15015_v45  ;;  %12226 = vmatprep.mubr.msk.bf16.mxu0 %vm13775_vm2, %v17150_v62 }
 0x8ee   :  { %12224 = vmatprep.subr.bf16.mxu0 %v17150_v62 }
 0x8f1   :  { %12225 = vmatpush3.bf16.msra.mxu0 %v15022_v5 }
 0x8f2   :  { %12242 = vmatprep.subr.bf16.mxu0 %v17150_v62 }
 0x8f7   :  { %v4772_v48 = vpop.f32.mrb[156].mxu1 }
 0x8f8   :  { %12227 = vmatmul.mubr.msk.bf16.vlgmr.msra.gmra.mrb[200].mxu0 %vm3649_vm4, %v4607_v33  ;;  %v12240_v8 = vpop.f32.mrb[157].mxu1 }
 0x8f9   :  { %12243 = vmatpush3.bf16.msra.mxu0 %v15053_v9  ;;  %v4775_v54 = vpop.f32.mrb[158].mxu1  ;;  %12246 = vmatprep.mubr.msk.bf16.mxu0 %vm13775_vm2, %v17150_v62 }
 0x8fa   :  { %v4779_v45 = vpack.c.bf16 %v4775_v54, %v4772_v48  ;;  %v12241_v26 = vpop.f32.mrb[159].mxu1  ;;  %12244 = vmatprep.subr.bf16.mxu0 %v17150_v62  ;;  %v15404_v54 = vld [vmem:[%s17131_s9 + $0x20] sm:$0xff]  }
 0x8fd   :  { %12245 = vmatpush3.bf16.msra.mxu0 %v15062_v10 }
 0x8fe   :  { %12250 = vmatprep.subr.bf16.mxu0 %v17150_v62 }
 0x904   :  { %12247 = vmatmul.mubr.msk.bf16.vlgmr.msra.gmra.mrb[200].mxu0 %vm3649_vm4, %v4779_v45 }
 0x905   :  { %12251 = vmatpush3.bf16.msra.mxu0 %v15032_v25  ;;  %12258 = vmatprep.mubr.msk.bf16.mxu0 %vm13775_vm2, %v17150_v62 }
 0x906   :  { %12252 = vmatprep.subr.bf16.mxu0 %v17150_v62 }
 0x907   :  { %v4948_v5 = vpop.f32.mrb[160].mxu1 }
 0x908   :  { %v12280_v9 = vpop.f32.mrb[161].mxu1 }
 0x909   :  { %12253 = vmatpush3.bf16.msra.mxu0 %v15030_v11  ;;  %v4951_v10 = vpop.f32.mrb[162].mxu1  ;;  %v15410_v9 = vld [vmem:[%s17131_s9 + $0x28] sm:$0xff]  }
 0x90a   :  { %12254 = vmatprep.subr.bf16.mxu0 %v17150_v62  ;;  %v4955_v19 = vpack.c.bf16 %v4951_v10, %v4948_v5  ;;  %v12281_v12 = vpop.f32.mrb[163].mxu1 }
 0x90d   :  { %12255 = vmatpush3.bf16.msra.mxu0 %v15048_v37 }
 0x90e   :  { %12256 = vmatprep.subr.bf16.mxu0 %v17150_v62 }
 0x911   :  { %12257 = vmatpush3.bf16.msra.mxu0 %v15046_v17 }
 0x912   :  { %12262 = vmatprep.subr.bf16.mxu0 %v17150_v62 }
 0x914   :  { %12259 = vmatmul.mubr.msk.bf16.vlgmr.msra.gmra.mrb[204].mxu0 %vm3529_vm3, %v15091_v40 }
 0x915   :  { %12263 = vmatpush3.bf16.msra.mxu0 %v15097_v27  ;;  %12266 = vmatprep.mubr.msk.bf16.mxu0 %vm13775_vm2, %v17150_v62 }
 0x916   :  { %12264 = vmatprep.subr.bf16.mxu0 %v17150_v62 }
 0x917   :  { %v5036_v15 = vpop.f32.mrb[164].mxu1 }
 0x918   :  { %v12300_v16 = vpop.f32.mrb[165].mxu1 }
 0x919   :  { %12265 = vmatpush3.bf16.msra.mxu0 %v15109_v31  ;;  %v5039_v14 = vpop.f32.mrb[166].mxu1 }
 0x91a   :  { %12282 = vmatprep.subr.bf16.mxu0 %v17150_v62  ;;  %v5043_v40 = vpack.c.bf16 %v5039_v14, %v5036_v15  ;;  %v12301_v36 = vpop.f32.mrb[167].mxu1 }
 0x927   :  { %v5124_v27 = vpop.f32.mrb[168].mxu1 }
 0x928   :  { %v12320_v3 = vpop.f32.mrb[169].mxu1 }
 0x929   :  { %v5127_v53 = vpop.f32.mrb[170].mxu1 }
 0x92a   :  { %v5131_v50 = vpack.c.bf16 %v5127_v53, %v5124_v27  ;;  %v12321_v47 = vpop.f32.mrb[171].mxu1 }
 0x9e7   :  { %v4860_v55 = vpop.f32.mrb[204].mxu0 }
 0x9e8   :  { %v12260_v63 = vpop.f32.mrb[205].mxu0 }
 0x9e9   :  { %v4863_v31 = vpop.f32.mrb[206].mxu0 }
 0x9ea   :  { %v4867_v22 = vpack.c.bf16 %v4863_v31, %v4860_v55  ;;  %v12261_v52 = vpop.f32.mrb[207].mxu0  ;;  %v5410_v55 = vlaneseq  ;;  %v3516_v31 = vld [vmem:[%s17128_s6] sm:$0x1] }
 0x9ec   :  { %12267 = vmatmul.mubr.msk.bf16.vlgmr.msra.gmra.mrb[200].mxu0 %vm3649_vm4, %v4867_v22  ;;  %v15415_v63 = vshrl.u32 %v5410_v55, 7  ;;  %v15554_v55 = vld [vmem:[%s17131_s9 + $0x48] sm:$0xff]  }
 0x9ed   :  { %12283 = vmatpush3.bf16.msra.mxu0 %v15116_v38  ;;  %12286 = vmatprep.mubr.msk.bf16.mxu0 %vm13775_vm2, %v17150_v62 }
 0x9ee   :  { %12284 = vmatprep.subr.bf16.mxu0 %v17150_v62  ;;  %17233 = vst [vmem:[#allocation22_spill] sm:$0xff] %v15415_v63  ;;  %v15421_v22 = vsub.s32 0, %v15415_v63  ;;  %v16676_v63 = vld [vmem:[%s17135_s13 + $0x310] ss:$8 sps:$4 sm:$0xff]  }
 0x9ef   :  { %17238 = vst [vmem:[#allocation21_spill] sm:$0xff] %v16676_v63 }
 0x9f0   :  { %17234 = vst [vmem:[#allocation17_spill] sm:$0xff] %v15421_v22 }
 0x9f1   :  { %12285 = vmatpush3.bf16.msra.mxu0 %v15123_v43 }
 0x9f2   :  { %12302 = vmatprep.subr.bf16.mxu0 %v17150_v62 }
 0x9f8   :  { %12287 = vmatmul.mubr.msk.bf16.vlgmr.msra.gmra.mrb[200].mxu0 %vm3649_vm4, %v4955_v19 }
 0x9f9   :  { %12303 = vmatpush3.bf16.msra.mxu0 %v15133_v7  ;;  %12306 = vmatprep.mubr.msk.bf16.mxu0 %vm13775_vm2, %v17150_v62 }
 0x9fa   :  { %12304 = vmatprep.subr.bf16.mxu0 %v17150_v62 }
 0x9fd   :  { %12305 = vmatpush3.bf16.msra.mxu0 %v15140_v29 }
 0x9fe   :  { %12322 = vmatprep.subr.bf16.mxu0 %v17150_v62 }
 0xa04   :  { %12307 = vmatmul.mubr.msk.bf16.vlgmr.msra.gmra.mrb[200].mxu0 %vm3649_vm4, %v5043_v40 }
 0xa05   :  { %12323 = vmatpush3.bf16.msra.mxu0 %v15150_v56  ;;  %12326 = vmatprep.mubr.msk.bf16.mxu0 %vm13775_vm2, %v17150_v62 }
 0xa06   :  { %12324 = vmatprep.subr.bf16.mxu0 %v17150_v62 }
 0xa09   :  { %12325 = vmatpush3.bf16.msra.mxu0 %v15157_v21 }
 0xa0a   :  { %12330 = vmatprep.subr.bf16.mxu0 %v17150_v62 }
 0xa10   :  { %12327 = vmatmul.mubr.msk.bf16.vlgmr.msra.gmra.mrb[200].mxu0 %vm3649_vm4, %v5131_v50 }
 0xa11   :  { %12331 = vmatpush3.bf16.msra.mxu0 %v15032_v25  ;;  %12338 = vmatprep.mubr.msk.bf16.mxu0 %vm13775_vm2, %v17150_v62 }
 0xa12   :  { %12332 = vmatprep.subr.bf16.mxu0 %v17150_v62 }
 0xa15   :  { %12333 = vmatpush3.bf16.msra.mxu0 %v15030_v11  ;;  %v5300_v11 = vpop.f32.mrb[172].mxu1 }
 0xa16   :  { %12334 = vmatprep.subr.bf16.mxu0 %v17150_v62  ;;  %v12360_v25 = vpop.f32.mrb[173].mxu1 }
 0xa17   :  { %v3517_v25 = vld [vmem:[%s17129_s7] sm:$0x1] }
 0xa19   :  { %12335 = vmatpush3.bf16.msra.mxu0 %v15048_v37  ;;  %v5303_v37 = vpop.f32.mrb[174].mxu1 }
 0xa1a   :  { %12336 = vmatprep.subr.bf16.mxu0 %v17150_v62  ;;  %v12361_v38 = vpop.f32.mrb[175].mxu1 }
 0xa1d   :  { %12337 = vmatpush3.bf16.msra.mxu0 %v15046_v17  ;;  %v5307_v17 = vpack.c.bf16 %v5303_v37, %v5300_v11 }
 0xa1e   :  { %12342 = vmatprep.subr.bf16.mxu0 %v17150_v62 }
 0xa20   :  { %12339 = vmatmul.mubr.msk.bf16.vlgmr.msra.gmra.mrb[208].mxu0 %vm3529_vm3, %v15176_v30  ;;  %v5357_v30 = vrot.slane %v15304_v35, 4 }
 0xa21   :  { %12343 = vmatpush3.bf16.msra.mxu0 %v15182_v20  ;;  %12346 = vmatprep.mubr.msk.bf16.mxu0 %vm13775_vm2, %v17150_v62  ;;  %v5369_v20 = vrot.slane %v15308_v49, 4 }
 0xa22   :  { %12344 = vmatprep.subr.bf16.mxu0 %v17150_v62 }
 0xa23   :  { %v5370_v33 = vadd.f32 %v5369_v20, %v15308_v49 }
 0xa25   :  { %12345 = vmatpush3.bf16.msra.mxu0 %v15194_v59  ;;  %v5358_v59 = vadd.f32 %v5357_v30, %v15304_v35  ;;  %v5371_v23 = vrot.slane %v5370_v33, 2 }
 0xa26   :  { %12362 = vmatprep.subr.bf16.mxu0 %v17150_v62 }
 0xa27   :  { %v5359_v6 = vrot.slane %v5358_v59, 2  ;;  %v5372_v49 = vadd.f32 %v5371_v23, %v5370_v33  ;;  %v15455_v23 = vld [vmem:[#allocation7 + $0x8] sm:$0x3] }
 0xa29   :  { %v5360_v18 = vadd.f32 %v5359_v6, %v5358_v59  ;;  %v5373_v45 = vrot.slane %v5372_v49, 1 }
 0xa2b   :  { %v5361_v28 = vrot.slane %v5360_v18, 1  ;;  %v5374_v15 = vadd.f32 %v5373_v45, %v5372_v49  ;;  %v13292_v49 = vld [vmem:[%s17131_s9 + $0x38] sm:$0xff]  }
 0xa2d   :  { %v5362_v10 = vadd.f32 %v5361_v28, %v5360_v18  ;;  %v15476_v18 = vld [vmem:[#allocation7 + $0xe] sm:$0x3] }
 0xaf3   :  { %v5212_v43 = vpop.f32.mrb[208].mxu0 }
 0xaf4   :  { %v12340_v7 = vpop.f32.mrb[209].mxu0 }
 0xaf5   :  { %v5215_v29 = vpop.f32.mrb[210].mxu0 }
 0xaf6   :  { %v5219_v56 = vpack.c.bf16 %v5215_v29, %v5212_v43  ;;  %v12341_v21 = vpop.f32.mrb[211].mxu0 }
 0xaf8   :  { %12347 = vmatmul.mubr.msk.bf16.vlgmr.msra.gmra.mrb[200].mxu0 %vm3649_vm4, %v5219_v56 }
 0xaf9   :  { %12363 = vmatpush3.bf16.msra.mxu0 %v15201_v4  ;;  %12366 = vmatprep.mubr.msk.bf16.mxu0 %vm13775_vm2, %v17150_v62 }
 0xafa   :  { %12364 = vmatprep.subr.bf16.mxu0 %v17150_v62 }
 0xafd   :  { %12365 = vmatpush3.bf16.msra.mxu0 %v15208_v58 }
 0xafe   :  { %12382 = vmatprep.subr.bf16.mxu0 %v17150_v62 }
 0xb04   :  { %12367 = vmatmul.mubr.msk.bf16.vlgmr.msra.gmra.mrb[200].mxu0 %vm3649_vm4, %v5307_v17 }
 0xb05   :  { %12390 = vmatprep.mubr.msk.bf16.mxu0 %vm13775_vm2, %v17150_v62  ;;  %12383 = vmatpush3.bf16.msra.mxu0 %v15404_v54 }
 0xb06   :  { %12384 = vmatprep.subr.bf16.mxu0 %v17150_v62 }
 0xb09   :  { %12385 = vmatpush3.bf16.msra.mxu0 %v15410_v9 }
 0xb0a   :  { %12386 = vmatprep.subr.bf16.mxu0 %v17150_v62 }
 0xbd7   :  { %v5345_v4 = vpop.f32.mrb[200].mxu0 }
 0xbd8   :  { %v5386_v61 = vmul.f32 %v5345_v4, %v5345_v4  ;;  %v12368_v57 = vpop.f32.mrb[201].mxu0  ;;  %v5376_v58 = vsel %vm3529_vm3, %v5345_v4, 0.0 }
 0xbd9   :  { %v5348_v41 = vpop.f32.mrb[202].mxu0 }
 0xbda   :  { %v5377_v13 = vsel %vm3529_vm3, %v5348_v41, 0.0  ;;  %v5387_v46 = vmul.f32 %v5348_v41, %v5348_v41  ;;  %v12369_v60 = vpop.f32.mrb[203].mxu0  ;;  %v5388_v0 = vsel %vm3529_vm3, %v5386_v61, 0.0 }
 0xbdb   :  { %v5378_v1 = vadd.f32 %v5377_v13, %v5376_v58 }
 0xbdc   :  { %v5389_v44 = vsel %vm3529_vm3, %v5387_v46, 0.0 }
 0xbdd   :  { %v5379_v35 = vrot.slane %v5378_v1, 4  ;;  %v5390_v32 = vadd.f32 %v5389_v44, %v5388_v0  ;;  %v15448_v44 = vld [vmem:[#allocation7 + $0x6] sm:$0x3] }
 0xbdf   :  { %v5380_v34 = vadd.f32 %v5379_v35, %v5378_v1  ;;  %v5391_v24 = vrot.slane %v5390_v32, 4  ;;  %v15462_v35 = vld [vmem:[#allocation7 + $0xa] sm:$0x3] }
 0xbe1   :  { %v5381_v51 = vrot.slane %v5380_v34, 2  ;;  %v5392_v42 = vadd.f32 %v5391_v24, %v5390_v32  ;;  %v15469_v32 = vld [vmem:[#allocation7 + $0xc] sm:$0x3] }
 0xbe2   :  { %v13291_v24 = vld [vmem:[%s17131_s9 + $0x30] sm:$0xff]  }
 0xbe3   :  { %v5382_v48 = vadd.f32 %v5381_v51, %v5380_v34  ;;  %v5393_v8 = vrot.slane %v5392_v42, 2  ;;  %v15483_v34 = vld [vmem:[#allocation7 + $0x10] sm:$0x3]  ;;  %12387 = vmatpush3.bf16.msra.mxu0 %v13291_v24 }
 0xbe4   :  { %12388 = vmatprep.subr.bf16.mxu0 %v17150_v62 }
 0xbe5   :  { %v5383_v26 = vrot.slane %v5382_v48, 1  ;;  %v5394_v5 = vadd.f32 %v5393_v8, %v5392_v42 }
 0xbe7   :  { %v5384_v19 = vadd.f32 %v5383_v26, %v5382_v48  ;;  %v5395_v12 = vrot.slane %v5394_v5, 1  ;;  %12389 = vmatpush3.bf16.msra.mxu0 %v13292_v49 }
 0xbe8   :  { %12394 = vmatprep.subr.bf16.mxu0 %v17150_v62 }
 0xbe9   :  { %v5385_v16 = vadd.f32 %v5384_v19, %v5362_v10  ;;  %v5396_v14 = vadd.f32 %v5395_v12, %v5394_v5  ;;  %v15523_v10 = vld [vmem:[%s17131_s9 + $0x8] sm:$0xff]   ;;  %v15532_v12 = vld [vmem:[%s17131_s9 + $0x10] sm:$0xff]  }
 0xbeb   :  { %v5397_v40 = vadd.f32 %v5396_v14, %v5374_v15  ;;  %v5399_v36 = vmul.f32 0.03125, %v5385_v16 }
 0xbed   :  { %v5400_v27 = vmul.f32 0.03125, %v5397_v40  ;;  %v5401_v3 = vmul.f32 %v5399_v36, %v5399_v36  ;;  %v15539_v40 = vld [vmem:[%s17131_s9 + $0x18] sm:$0xff]  }
 0xbef   :  { %v5402_v53 = vsub.f32 %v5400_v27, %v5401_v3  ;;  %v15546_v27 = vld [vmem:[%s17131_s9 + $0x40] sm:$0xff]  }
 0xbf1   :  { %v5403_v50 = vmax.f32 %v5402_v53, 0.0 }
 0xbf3   :  { %v5404_v47 = vadd.f32 1e-05, %v5403_v50 }
 0xbf5   :  { %13541 = vrsqrt.f32 %v5404_v47 }
 0xbff   :  { %v13542_v52 = vpop.eup %13541 }
 0xc00   :  { %v5406_v11 = vmul.f32 %v13542_v52, %v3516_v31  ;;  %v15565_v52 = vld [vmem:[%s17131_s9 + $0x50] sm:$0xff]  }
 0xc02   :  { %v5407_v37 = vmul.f32 %v5406_v11, %v5399_v36  ;;  %v5413_v17 = vrot.slane %v5406_v11, %v15421_v22 }
 0xc04   :  { %v5408_v38 = vsub.f32 %v3517_v25, %v5407_v37  ;;  %v5415_v43 = vmul.f32 %v15291_v2, %v5413_v17  ;;  %v5416_v7 = vmul.f32 %v15296_v39, %v5413_v17  ;;  %v5429_v29 = vmul.f32 %v5413_v17, %v5345_v4  ;;  %v5440_v39 = vld [vmem:[#allocation7] sm:$0x3]  ;;  %v5495_v4 = vld [vmem:[#allocation7 + $0x2] sm:$0x3] }
 0xc05   :  { %v5430_v56 = vmul.f32 %v5413_v17, %v5348_v41  ;;  %v15441_v41 = vld [vmem:[#allocation7 + $0x4] sm:$0x3]  ;;  %v15572_v17 = vld [vmem:[%s17131_s9 + $0x58] sm:$0xff]  }
 0xc06   :  { %v5421_v21 = vrot.slane %v5408_v38, %v15421_v22 }
 0xc08   :  { %v5423_v30 = vadd.f32 %v5421_v21, %v5415_v43  ;;  %v5424_v20 = vadd.f32 %v5421_v21, %v5416_v7  ;;  %v5431_v59 = vadd.f32 %v5429_v29, %v5421_v21  ;;  %v5432_v61 = vadd.f32 %v5430_v56, %v5421_v21  ;;  %v15581_v43 = vld [vmem:[%s17131_s9 + $0x60] sm:$0xff]  }
 0xc0a   :  { %v5425_v57 = vmul.f32 0.2, %v5423_v30  ;;  %v5426_v33 = vmul.f32 0.2, %v5424_v20  ;;  %v5433_v58 = vmul.f32 0.2, %v5431_v59 }
 0xc0b   :  { %v5434_v13 = vmul.f32 0.2, %v5432_v61 }
 0xc0c   :  { %v5427_v46 = vmax.f32 %v5423_v30, %v5425_v57  ;;  %v5428_v60 = vmax.f32 %v5424_v20, %v5426_v33  ;;  %v5435_v6 = vmax.f32 %v5431_v59, %v5433_v58  ;;  %v15589_v30 = vld [vmem:[%s17131_s9 + $0x68] sm:$0xff]   ;;  %v15600_v59 = vld [vmem:[%s17131_s9 + $0x70] sm:$0xff]   ;;  %v15607_v58 = vld [vmem:[%s17131_s9 + $0x78] sm:$0xff]  }
 0xc0d   :  { %v5436_v1 = vmax.f32 %v5432_v61, %v5434_v13 }
 0xc0e   :  { %v5439_v0 = vpack.c.bf16 %v5428_v60, %v5427_v46  ;;  %v15616_v46 = vld [vmem:[%s17131_s9 + $0x80] sm:$0xff]  }
 0xc0f   :  { %v15430_v2 = vpack.c.bf16 %v5436_v1, %v5435_v6 }
 0xc10   :  { %12371 = vmatpush3.bf16.msra.mxu1 %v5439_v0 }
 0xc11   :  { %12376 = vmatprep.subr.bf16.mxu1 %v17150_v62 }
 0xc13   :  { %12373 = vmatmul.mubr.msk.bf16.vlgmr.msra.gmra.mrb[176].mxu1 %vm5441_vm5, %v5440_v39 }
 0xc14   :  { %12377 = vmatpush3.bf16.msra.mxu1 %v5439_v0  ;;  %12378 = vmatprep.mubr.msk.bf16.mxu1 %vm13775_vm2, %v17150_v62 }
 0xc15   :  { %12406 = vmatprep.subr.bf16.mxu1 %v17150_v62 }
 0xc1b   :  { %12379 = vmatmul.mubr.msk.bf16.vlgmr.msra.gmra.mrb[180].mxu1 %vm5441_vm5, %v5495_v4 }
 0xc1c   :  { %12407 = vmatpush3.bf16.msra.mxu1 %v5439_v0  ;;  %12408 = vmatprep.mubr.msk.bf16.mxu1 %vm13775_vm2, %v17150_v62 }
 0xc1d   :  { %12424 = vmatprep.subr.bf16.mxu1 %v17150_v62 }
 0xc23   :  { %12409 = vmatmul.mubr.msk.bf16.vlgmr.msra.gmra.mrb[184].mxu1 %vm5441_vm5, %v15441_v41 }
 0xc24   :  { %12425 = vmatpush3.bf16.msra.mxu1 %v5439_v0  ;;  %12426 = vmatprep.mubr.msk.bf16.mxu1 %vm13775_vm2, %v17150_v62 }
 0xc25   :  { %12442 = vmatprep.subr.bf16.mxu1 %v17150_v62 }
 0xc2b   :  { %12427 = vmatmul.mubr.msk.bf16.vlgmr.msra.gmra.mrb[188].mxu1 %vm5441_vm5, %v15448_v44 }
 0xc2c   :  { %12443 = vmatpush3.bf16.msra.mxu1 %v5439_v0  ;;  %12444 = vmatprep.mubr.msk.bf16.mxu1 %vm13775_vm2, %v17150_v62 }
 0xc2d   :  { %12460 = vmatprep.subr.bf16.mxu1 %v17150_v62 }
 0xc33   :  { %12445 = vmatmul.mubr.msk.bf16.vlgmr.msra.gmra.mrb[192].mxu1 %vm5441_vm5, %v15455_v23 }
 0xc34   :  { %12461 = vmatpush3.bf16.msra.mxu1 %v5439_v0  ;;  %12462 = vmatprep.mubr.msk.bf16.mxu1 %vm13775_vm2, %v17150_v62 }
 0xc35   :  { %12478 = vmatprep.subr.bf16.mxu1 %v17150_v62 }
 0xc3b   :  { %12463 = vmatmul.mubr.msk.bf16.vlgmr.msra.gmra.mrb[196].mxu1 %vm5441_vm5, %v15462_v35 }
 0xc3c   :  { %12479 = vmatpush3.bf16.msra.mxu1 %v5439_v0  ;;  %12480 = vmatprep.mubr.msk.bf16.mxu1 %vm13775_vm2, %v17150_v62 }
 0xc3d   :  { %12496 = vmatprep.subr.bf16.mxu1 %v17150_v62 }
 0xc43   :  { %12481 = vmatmul.mubr.msk.bf16.vlgmr.msra.gmra.mrb[200].mxu1 %vm5441_vm5, %v15469_v32 }
 0xc44   :  { %12497 = vmatpush3.bf16.msra.mxu1 %v5439_v0  ;;  %12498 = vmatprep.mubr.msk.bf16.mxu1 %vm13775_vm2, %v17150_v62 }
 0xc45   :  { %12514 = vmatprep.subr.bf16.mxu1 %v17150_v62 }
 0xc4b   :  { %12499 = vmatmul.mubr.msk.bf16.vlgmr.msra.gmra.mrb[204].mxu1 %vm5441_vm5, %v15476_v18 }
 0xc4c   :  { %12515 = vmatpush3.bf16.msra.mxu1 %v5439_v0  ;;  %12516 = vmatprep.mubr.msk.bf16.mxu1 %vm13775_vm2, %v17150_v62 }
 0xc4d   :  { %12532 = vmatprep.subr.bf16.mxu1 %v17150_v62 }
 0xc53   :  { %12517 = vmatmul.mubr.msk.bf16.vlgmr.msra.gmra.mrb[208].mxu1 %vm5441_vm5, %v15483_v34 }
 0xc54   :  { %12533 = vmatpush3.bf16.msra.mxu1 %v15430_v2  ;;  %12534 = vmatprep.mubr.msk.bf16.mxu1 %vm13775_vm2, %v17150_v62 }
 0xc55   :  { %12538 = vmatprep.subr.bf16.mxu1 %v17150_v62 }
 0xc5b   :  { %12535 = vmatmul.mubr.msk.bf16.vlgmr.msra.gmra.mrb[212].mxu1 %vm5441_vm5, %v5440_v39  ;;  %v15624_v39 = vld [vmem:[%s17131_s9 + $0x88] sm:$0xff]  }
 0xc5c   :  { %12539 = vmatpush3.bf16.msra.mxu1 %v15430_v2  ;;  %12540 = vmatprep.mubr.msk.bf16.mxu1 %vm13775_vm2, %v17150_v62 }
 0xc5d   :  { %12544 = vmatprep.subr.bf16.mxu1 %v17150_v62 }
 0xc63   :  { %12541 = vmatmul.mubr.msk.bf16.vlgmr.msra.gmra.mrb[216].mxu1 %vm5441_vm5, %v5495_v4 }
 0xc64   :  { %12545 = vmatpush3.bf16.msra.mxu1 %v15404_v54  ;;  %12552 = vmatprep.mubr.msk.bf16.mxu1 %vm13775_vm2, %v17150_v62  ;;  %v15516_v54 = vld [vmem:[%s17131_s9] sm:$0xff]  }
 0xc65   :  { %12546 = vmatprep.subr.bf16.mxu1 %v17150_v62 }
 0xc68   :  { %12547 = vmatpush3.bf16.msra.mxu1 %v15410_v9 }
 0xc69   :  { %12548 = vmatprep.subr.bf16.mxu1 %v17150_v62 }
 0xc6c   :  { %12549 = vmatpush3.bf16.msra.mxu1 %v13291_v24  ;;  %v15635_v24 = vld [vmem:[%s17131_s9 + $0x90] sm:$0xff]  }
 0xc6d   :  { %12550 = vmatprep.subr.bf16.mxu1 %v17150_v62 }
 0xc70   :  { %12551 = vmatpush3.bf16.msra.mxu1 %v13292_v49 }
 0xc71   :  { %12556 = vmatprep.subr.bf16.mxu1 %v17150_v62 }
 0xce6   :  { %v5479_v51 = vpop.f32.mrb[176].mxu1 }
 0xce7   :  { %v12374_v42 = vpop.f32.mrb[177].mxu1  ;;  %v5485_v3 = vpack.c.bf16 %v5479_v51, %v5479_v51 }
 0xce8   :  { %v5482_v28 = vpop.f32.mrb[178].mxu1 }
 0xce9   :  { %v12375_v48 = vpop.f32.mrb[179].mxu1  ;;  %v15642_v28 = vld [vmem:[%s17131_s9 + $0x98] sm:$0xff]  }
 0xcee   :  { %v5533_v8 = vpop.f32.mrb[180].mxu1 }
 0xcef   :  { %v5539_v45 = vpack.c.bf16 %v5533_v8, %v5533_v8  ;;  %v12380_v26 = vpop.f32.mrb[181].mxu1  ;;  %v15649_v8 = vld [vmem:[%s17131_s9 + $0xa0] sm:$0xff]  }
 0xcf0   :  { %v5536_v5 = vpop.f32.mrb[182].mxu1 }
 0xcf1   :  { %v12381_v9 = vpop.f32.mrb[183].mxu1  ;;  %12391 = vmatmul.mubr.msk.bf16.vlgmr.msra.gmra.mrb[212].mxu0 %vm3529_vm3, %v5539_v45 }
 0xcf2   :  { %12395 = vmatpush3.bf16.msra.mxu0 %v15516_v54  ;;  %12402 = vmatprep.mubr.msk.bf16.mxu0 %vm13775_vm2, %v17150_v62 }
 0xcf3   :  { %12396 = vmatprep.subr.bf16.mxu0 %v17150_v62 }
 0xcf6   :  { %12397 = vmatpush3.bf16.msra.mxu0 %v15523_v10  ;;  %v5722_v19 = vpop.f32.mrb[184].mxu1 }
 0xcf7   :  { %v12410_v15 = vpop.f32.mrb[185].mxu1  ;;  %12398 = vmatprep.subr.bf16.mxu0 %v17150_v62  ;;  %v5728_v7 = vpack.c.bf16 %v5722_v19, %v5722_v19  ;;  %v15659_v19 = vld [vmem:[%s17131_s9 + $0xa8] sm:$0xff]  }
 0xcf8   :  { %v5725_v16 = vpop.f32.mrb[186].mxu1 }
 0xcf9   :  { %v12411_v14 = vpop.f32.mrb[187].mxu1  ;;  %v15668_v16 = vld [vmem:[%s17131_s9 + $0xb0] sm:$0xff]  }
 0xcfa   :  { %12399 = vmatpush3.bf16.msra.mxu0 %v15532_v12 }
 0xcfb   :  { %12400 = vmatprep.subr.bf16.mxu0 %v17150_v62 }
 0xcfe   :  { %12401 = vmatpush3.bf16.msra.mxu0 %v15539_v40  ;;  %v5845_v36 = vpop.f32.mrb[188].mxu1 }
 0xcff   :  { %v12428_v53 = vpop.f32.mrb[189].mxu1  ;;  %12412 = vmatprep.subr.bf16.mxu0 %v17150_v62  ;;  %v5851_v60 = vpack.c.bf16 %v5845_v36, %v5845_v36 }
 0xd00   :  { %v5848_v50 = vpop.f32.mrb[190].mxu1 }
 0xd01   :  { %12403 = vmatmul.mubr.msk.bf16.vlgmr.msra.gmra.mrb[212].mxu0 %vm3529_vm3, %v5485_v3  ;;  %v12429_v47 = vpop.f32.mrb[191].mxu1  ;;  %v15677_v50 = vld [vmem:[%s17131_s9 + $0xb8] sm:$0xff]  }
 0xd02   :  { %12413 = vmatpush3.bf16.msra.mxu0 %v15546_v27  ;;  %12420 = vmatprep.mubr.msk.bf16.mxu0 %vm13775_vm2, %v17150_v62 }
 0xd03   :  { %12414 = vmatprep.subr.bf16.mxu0 %v17150_v62 }
 0xd06   :  { %12415 = vmatpush3.bf16.msra.mxu0 %v15554_v55  ;;  %v15560_v31 = vpop.f32.mrb[192].mxu1 }
 0xd07   :  { %v12446_v11 = vpop.f32.mrb[193].mxu1  ;;  %12416 = vmatprep.subr.bf16.mxu0 %v17150_v62  ;;  %v5974_v45 = vpack.c.bf16 %v15560_v31, %v15560_v31 }
 0xd08   :  { %v5971_v25 = vpop.f32.mrb[194].mxu1  ;;  %v15731_v11 = vld [vmem:[%s17131_s9 + $0xe0] sm:$0xff]  }
 0xd09   :  { %v12447_v37 = vpop.f32.mrb[195].mxu1 }
 0xd0a   :  { %12417 = vmatpush3.bf16.msra.mxu0 %v15565_v52  ;;  %v15743_v37 = vld [vmem:[%s17131_s9 + $0xe8] sm:$0xff]  }
 0xd0b   :  { %12418 = vmatprep.subr.bf16.mxu0 %v17150_v62 }
 0xd0e   :  { %12419 = vmatpush3.bf16.msra.mxu0 %v15572_v17  ;;  %v15576_v38 = vpop.f32.mrb[196].mxu1 }
 0xd0f   :  { %v12464_v29 = vpop.f32.mrb[197].mxu1  ;;  %12430 = vmatprep.subr.bf16.mxu0 %v17150_v62  ;;  %v6097_v47 = vpack.c.bf16 %v15576_v38, %v15576_v38 }
 0xd10   :  { %v6094_v56 = vpop.f32.mrb[198].mxu1 }
 0xd11   :  { %12421 = vmatmul.mubr.msk.bf16.vlgmr.msra.gmra.mrb[212].mxu0 %vm3529_vm3, %v5728_v7  ;;  %v12465_v21 = vpop.f32.mrb[199].mxu1  ;;  %v15802_v7 = vld [vmem:[%s17131_s9 + $0x118] sm:$0xff]  }
 0xd12   :  { %12431 = vmatpush3.bf16.msra.mxu0 %v15581_v43  ;;  %12438 = vmatprep.mubr.msk.bf16.mxu0 %vm13775_vm2, %v17150_v62 }
 0xd13   :  { %12432 = vmatprep.subr.bf16.mxu0 %v17150_v62 }
 0xd16   :  { %12433 = vmatpush3.bf16.msra.mxu0 %v15589_v30  ;;  %v15595_v20 = vpop.f32.mrb[200].mxu1 }
 0xd17   :  { %v12482_v61 = vpop.f32.mrb[201].mxu1  ;;  %12434 = vmatprep.subr.bf16.mxu0 %v17150_v62  ;;  %v6220_v25 = vpack.c.bf16 %v15595_v20, %v15595_v20 }
 0xd18   :  { %v6217_v57 = vpop.f32.mrb[202].mxu1 }
 0xd19   :  { %v12483_v33 = vpop.f32.mrb[203].mxu1 }
 0xd1a   :  { %12435 = vmatpush3.bf16.msra.mxu0 %v15600_v59 }
 0xd1b   :  { %12436 = vmatprep.subr.bf16.mxu0 %v17150_v62 }
 0xd1e   :  { %12437 = vmatpush3.bf16.msra.mxu0 %v15607_v58  ;;  %v15611_v13 = vpop.f32.mrb[204].mxu1 }
 0xd1f   :  { %v12500_v6 = vpop.f32.mrb[205].mxu1  ;;  %12448 = vmatprep.subr.bf16.mxu0 %v17150_v62  ;;  %v6343_v38 = vpack.c.bf16 %v15611_v13, %v15611_v13 }
 0xd20   :  { %v6340_v1 = vpop.f32.mrb[206].mxu1 }
 0xd21   :  { %12439 = vmatmul.mubr.msk.bf16.vlgmr.msra.gmra.mrb[212].mxu0 %vm3529_vm3, %v5851_v60  ;;  %v12501_v0 = vpop.f32.mrb[207].mxu1 }
 0xd22   :  { %12449 = vmatpush3.bf16.msra.mxu0 %v15616_v46  ;;  %12456 = vmatprep.mubr.msk.bf16.mxu0 %vm13775_vm2, %v17150_v62 }
 0xd23   :  { %12450 = vmatprep.subr.bf16.mxu0 %v17150_v62 }
 0xd26   :  { %12451 = vmatpush3.bf16.msra.mxu0 %v15624_v39  ;;  %v15630_v4 = vpop.f32.mrb[208].mxu1 }
 0xd27   :  { %v12518_v49 = vpop.f32.mrb[209].mxu1  ;;  %12452 = vmatprep.subr.bf16.mxu0 %v17150_v62  ;;  %v6466_v29 = vpack.c.bf16 %v15630_v4, %v15630_v4 }
 0xd28   :  { %v6463_v51 = vpop.f32.mrb[210].mxu1 }
 0xd29   :  { %v12519_v42 = vpop.f32.mrb[211].mxu1 }
 0xd2a   :  { %12453 = vmatpush3.bf16.msra.mxu0 %v15635_v24 }
 0xd2b   :  { %12454 = vmatprep.subr.bf16.mxu0 %v17150_v62 }
 0xd2e   :  { %12455 = vmatpush3.bf16.msra.mxu0 %v15642_v28  ;;  %v6579_v48 = vpop.f32.mrb[212].mxu1 }
 0xd2f   :  { %v12536_v26 = vpop.f32.mrb[213].mxu1  ;;  %12466 = vmatprep.subr.bf16.mxu0 %v17150_v62  ;;  %v6585_v31 = vpack.c.bf16 %v6579_v48, %v6579_v48 }
 0xd30   :  { %v6582_v5 = vpop.f32.mrb[214].mxu1 }
 0xd31   :  { %12457 = vmatmul.mubr.msk.bf16.vlgmr.msra.gmra.mrb[212].mxu0 %vm3529_vm3, %v5974_v45  ;;  %v12537_v9 = vpop.f32.mrb[215].mxu1 }
 0xd32   :  { %12467 = vmatpush3.bf16.msra.mxu0 %v15649_v8  ;;  %12474 = vmatprep.mubr.msk.bf16.mxu0 %vm13775_vm2, %v17150_v62 }
 0xd33   :  { %12468 = vmatprep.subr.bf16.mxu0 %v17150_v62 }
 0xd36   :  { %12469 = vmatpush3.bf16.msra.mxu0 %v15659_v19  ;;  %v6620_v15 = vpop.f32.mrb[216].mxu1 }
 0xd37   :  { %v6626_v14 = vpack.c.bf16 %v6620_v15, %v6620_v15  ;;  %v12542_v36 = vpop.f32.mrb[217].mxu1  ;;  %12470 = vmatprep.subr.bf16.mxu0 %v17150_v62 }
 0xd38   :  { %v6623_v3 = vpop.f32.mrb[218].mxu1 }
 0xd39   :  { %v12543_v53 = vpop.f32.mrb[219].mxu1  ;;  %12553 = vmatmul.mubr.msk.bf16.vlgmr.msra.gmra.mrb[220].mxu1 %vm3529_vm3, %v6626_v14 }
 0xd3a   :  { %12471 = vmatpush3.bf16.msra.mxu0 %v15668_v16  ;;  %12557 = vmatpush3.bf16.msra.mxu1 %v15516_v54  ;;  %v15688_v54 = vld [vmem:[%s17131_s9 + $0xc0] sm:$0xff]  }
 0xd3b   :  { %12472 = vmatprep.subr.bf16.mxu0 %v17150_v62  ;;  %12558 = vmatprep.subr.bf16.mxu1 %v17150_v62 }
 0xd3c   :  { %12564 = vmatprep.mubr.msk.bf16.mxu1 %vm13775_vm2, %v17150_v62 }
 0xd3e   :  { %12473 = vmatpush3.bf16.msra.mxu0 %v15677_v50  ;;  %12559 = vmatpush3.bf16.msra.mxu1 %v15523_v10  ;;  %v15700_v10 = vld [vmem:[%s17131_s9 + $0xc8] sm:$0xff]  }
 0xd3f   :  { %12484 = vmatprep.subr.bf16.mxu0 %v17150_v62  ;;  %12560 = vmatprep.subr.bf16.mxu1 %v17150_v62 }
 0xd41   :  { %12475 = vmatmul.mubr.msk.bf16.vlgmr.msra.gmra.mrb[212].mxu0 %vm3529_vm3, %v6097_v47 }
 0xd42   :  { %12485 = vmatpush3.bf16.msra.mxu0 %v15688_v54  ;;  %12561 = vmatpush3.bf16.msra.mxu1 %v15532_v12  ;;  %v15711_v12 = vld [vmem:[%s17131_s9 + $0xd0] sm:$0xff]  }
 0xd43   :  { %12486 = vmatprep.subr.bf16.mxu0 %v17150_v62  ;;  %12562 = vmatprep.subr.bf16.mxu1 %v17150_v62 }
 0xd44   :  { %12492 = vmatprep.mubr.msk.bf16.mxu0 %vm13775_vm2, %v17150_v62 }
 0xd46   :  { %12487 = vmatpush3.bf16.msra.mxu0 %v15700_v10  ;;  %12563 = vmatpush3.bf16.msra.mxu1 %v15539_v40  ;;  %v15721_v40 = vld [vmem:[%s17131_s9 + $0xd8] sm:$0xff]  }
 0xd47   :  { %12488 = vmatprep.subr.bf16.mxu0 %v17150_v62  ;;  %12568 = vmatprep.subr.bf16.mxu1 %v17150_v62 }
 0xd49   :  { %12565 = vmatmul.mubr.msk.bf16.vlgmr.msra.gmra.mrb[220].mxu1 %vm3529_vm3, %v6585_v31 }
 0xd4a   :  { %12489 = vmatpush3.bf16.msra.mxu0 %v15711_v12  ;;  %12569 = vmatpush3.bf16.msra.mxu1 %v15430_v2 }
 0xd4b   :  { %12490 = vmatprep.subr.bf16.mxu0 %v17150_v62  ;;  %12570 = vmatprep.mubr.msk.bf16.mxu1 %vm13775_vm2, %v17150_v62 }
 0xd4c   :  { %12574 = vmatprep.subr.bf16.mxu1 %v17150_v62 }
 0xd4e   :  { %12491 = vmatpush3.bf16.msra.mxu0 %v15721_v40 }
 0xd4f   :  { %12502 = vmatprep.subr.bf16.mxu0 %v17150_v62 }
 0xd51   :  { %12493 = vmatmul.mubr.msk.bf16.vlgmr.msra.gmra.mrb[212].mxu0 %vm3529_vm3, %v6220_v25  ;;  %12571 = vmatmul.mubr.msk.bf16.vlgmr.msra.gmra.mrb[224].mxu1 %vm5441_vm5, %v15441_v41  ;;  %v15756_v41 = vld [vmem:[%s17131_s9 + $0xf0] sm:$0xff]  }
 0xd52   :  { %12503 = vmatpush3.bf16.msra.mxu0 %v15731_v11  ;;  %12510 = vmatprep.mubr.msk.bf16.mxu0 %vm13775_vm2, %v17150_v62 }
 0xd53   :  { %12504 = vmatprep.subr.bf16.mxu0 %v17150_v62  ;;  %12575 = vmatpush3.bf16.msra.mxu1 %v15546_v27  ;;  %v15765_v27 = vld [vmem:[%s17131_s9 + $0xf8] sm:$0xff]  }
 0xd54   :  { %12576 = vmatprep.subr.bf16.mxu1 %v17150_v62  ;;  %12582 = vmatprep.mubr.msk.bf16.mxu1 %vm13775_vm2, %v17150_v62 }
 0xd56   :  { %12505 = vmatpush3.bf16.msra.mxu0 %v15743_v37 }
 0xd57   :  { %12506 = vmatprep.subr.bf16.mxu0 %v17150_v62  ;;  %12577 = vmatpush3.bf16.msra.mxu1 %v15554_v55  ;;  %v15774_v55 = vld [vmem:[%s17131_s9 + $0x100] sm:$0xff]  }
 0xd58   :  { %12578 = vmatprep.subr.bf16.mxu1 %v17150_v62 }
 0xd5a   :  { %12507 = vmatpush3.bf16.msra.mxu0 %v15756_v41 }
 0xd5b   :  { %12508 = vmatprep.subr.bf16.mxu0 %v17150_v62  ;;  %12579 = vmatpush3.bf16.msra.mxu1 %v15565_v52  ;;  %v15786_v52 = vld [vmem:[%s17131_s9 + $0x108] sm:$0xff]  }
 0xd5c   :  { %12580 = vmatprep.subr.bf16.mxu1 %v17150_v62 }
 0xd5e   :  { %12509 = vmatpush3.bf16.msra.mxu0 %v15765_v27 }
 0xd5f   :  { %12520 = vmatprep.subr.bf16.mxu0 %v17150_v62  ;;  %12581 = vmatpush3.bf16.msra.mxu1 %v15572_v17  ;;  %v15795_v17 = vld [vmem:[%s17131_s9 + $0x110] sm:$0xff]  }
 0xd60   :  { %12586 = vmatprep.subr.bf16.mxu1 %v17150_v62 }
 0xd61   :  { %12511 = vmatmul.mubr.msk.bf16.vlgmr.msra.gmra.mrb[212].mxu0 %vm3529_vm3, %v6343_v38 }
 0xd62   :  { %12521 = vmatpush3.bf16.msra.mxu0 %v15774_v55  ;;  %12528 = vmatprep.mubr.msk.bf16.mxu0 %vm13775_vm2, %v17150_v62 }
 0xd63   :  { %12522 = vmatprep.subr.bf16.mxu0 %v17150_v62 }
 0xd66   :  { %12523 = vmatpush3.bf16.msra.mxu0 %v15786_v52 }
 0xd67   :  { %12524 = vmatprep.subr.bf16.mxu0 %v17150_v62 }
 0xd6a   :  { %12525 = vmatpush3.bf16.msra.mxu0 %v15795_v17 }
 0xd6b   :  { %12526 = vmatprep.subr.bf16.mxu0 %v17150_v62 }
 0xd6e   :  { %12527 = vmatpush3.bf16.msra.mxu0 %v15802_v7 }
 0xd6f   :  { %12604 = vmatprep.subr.bf16.mxu0 %v17150_v62 }
 0xd71   :  { %12529 = vmatmul.mubr.msk.bf16.vlgmr.msra.gmra.mrb[212].mxu0 %vm3529_vm3, %v6466_v29 }
 0xd72   :  { %12605 = vmatpush3.bf16.msra.mxu0 %v15430_v2  ;;  %12606 = vmatprep.mubr.msk.bf16.mxu0 %vm13775_vm2, %v17150_v62 }
 0xd73   :  { %12622 = vmatprep.subr.bf16.mxu0 %v17150_v62 }
 0xd79   :  { %12607 = vmatmul.mubr.msk.bf16.vlgmr.msra.gmra.mrb[216].mxu0 %vm5441_vm5, %v15455_v23 }
 0xd7a   :  { %12623 = vmatpush3.bf16.msra.mxu0 %v15430_v2  ;;  %12624 = vmatprep.mubr.msk.bf16.mxu0 %vm13775_vm2, %v17150_v62 }
 0xd7b   :  { %12640 = vmatprep.subr.bf16.mxu0 %v17150_v62 }
 0xd81   :  { %12625 = vmatmul.mubr.msk.bf16.vlgmr.msra.gmra.mrb[220].mxu0 %vm5441_vm5, %v15462_v35 }
 0xd82   :  { %12641 = vmatpush3.bf16.msra.mxu0 %v15430_v2  ;;  %12642 = vmatprep.mubr.msk.bf16.mxu0 %vm13775_vm2, %v17150_v62 }
 0xd83   :  { %12658 = vmatprep.subr.bf16.mxu0 %v17150_v62 }
 0xd89   :  { %12643 = vmatmul.mubr.msk.bf16.vlgmr.msra.gmra.mrb[224].mxu0 %vm5441_vm5, %v15469_v32 }
 0xd8a   :  { %12659 = vmatpush3.bf16.msra.mxu0 %v15430_v2  ;;  %12660 = vmatprep.mubr.msk.bf16.mxu0 %vm13775_vm2, %v17150_v62 }
 0xd8b   :  { %12676 = vmatprep.subr.bf16.mxu0 %v17150_v62 }
 0xd91   :  { %12661 = vmatmul.mubr.msk.bf16.vlgmr.msra.gmra.mrb[228].mxu0 %vm5441_vm5, %v15476_v18 }
 0xd92   :  { %12677 = vmatpush3.bf16.msra.mxu0 %v15430_v2  ;;  %12678 = vmatprep.mubr.msk.bf16.mxu0 %vm13775_vm2, %v17150_v62 }
 0xd93   :  { %12694 = vmatprep.subr.bf16.mxu0 %v17150_v62 }
 0xd99   :  { %12679 = vmatmul.mubr.msk.bf16.vlgmr.msra.gmra.mrb[232].mxu0 %vm5441_vm5, %v15483_v34 }
 0xd9a   :  { %12696 = vmatprep.mubr.msk.bf16.mxu0 %vm13775_vm2, %v17150_v62 }
 0xe24   :  { %v6747_v23 = vpop.f32.mrb[224].mxu1 }
 0xe25   :  { %v6753_v35 = vpack.c.bf16 %v6747_v23, %v6747_v23  ;;  %v12572_v32 = vpop.f32.mrb[225].mxu1 }
 0xe26   :  { %v6750_v56 = vpop.f32.mrb[226].mxu1 }
 0xe27   :  { %v12573_v21 = vpop.f32.mrb[227].mxu1  ;;  %12583 = vmatmul.mubr.msk.bf16.vlgmr.msra.gmra.mrb[220].mxu1 %vm3529_vm3, %v6753_v35 }
 0xe28   :  { %12587 = vmatpush3.bf16.msra.mxu1 %v15430_v2  ;;  %12588 = vmatprep.mubr.msk.bf16.mxu1 %vm13775_vm2, %v17150_v62 }
 0xe29   :  { %12592 = vmatprep.subr.bf16.mxu1 %v17150_v62 }
 0xe2f   :  { %12589 = vmatmul.mubr.msk.bf16.vlgmr.msra.gmra.mrb[228].mxu1 %vm5441_vm5, %v15448_v44 }
 0xe30   :  { %12593 = vmatpush3.bf16.msra.mxu1 %v15581_v43  ;;  %12600 = vmatprep.mubr.msk.bf16.mxu1 %vm13775_vm2, %v17150_v62 }
 0xe31   :  { %12594 = vmatprep.subr.bf16.mxu1 %v17150_v62 }
 0xe34   :  { %12595 = vmatpush3.bf16.msra.mxu1 %v15589_v30 }
 0xe35   :  { %12596 = vmatprep.subr.bf16.mxu1 %v17150_v62 }
 0xe38   :  { %12597 = vmatpush3.bf16.msra.mxu1 %v15600_v59 }
 0xe39   :  { %12598 = vmatprep.subr.bf16.mxu1 %v17150_v62 }
 0xe3c   :  { %12599 = vmatpush3.bf16.msra.mxu1 %v15607_v58 }
 0xe3d   :  { %12610 = vmatprep.subr.bf16.mxu1 %v17150_v62 }
 0xe44   :  { %v15859_v2 = vpop.f32.mrb[212].mxu0 }
 0xe45   :  { %v12530_v44 = vpop.f32.mrb[213].mxu0 }
 0xe46   :  { %v6540_v18 = vpop.f32.mrb[214].mxu0 }
 0xe47   :  { %v12531_v34 = vpop.f32.mrb[215].mxu0 }
 0xe4c   :  { %v6917_v43 = vpop.f32.mrb[216].mxu0 }
 0xe4d   :  { %v12608_v20 = vpop.f32.mrb[217].mxu0  ;;  %v6923_v3 = vpack.c.bf16 %v6917_v43, %v6917_v43 }
 0xe4e   :  { %v6920_v61 = vpop.f32.mrb[218].mxu0 }
 0xe4f   :  { %v12609_v57 = vpop.f32.mrb[219].mxu0 }
 0xe54   :  { %v7002_v30 = vpop.f32.mrb[220].mxu0 }
 0xe55   :  { %v12626_v33 = vpop.f32.mrb[221].mxu0 }
 0xe56   :  { %v7005_v13 = vpop.f32.mrb[222].mxu0 }
 0xe57   :  { %v12627_v60 = vpop.f32.mrb[223].mxu0 }
 0xe5c   :  { %v7087_v59 = vpop.f32.mrb[224].mxu0 }
 0xe5d   :  { %v12644_v6 = vpop.f32.mrb[225].mxu0 }
 0xe5e   :  { %v7090_v1 = vpop.f32.mrb[226].mxu0 }
 0xe5f   :  { %v12645_v0 = vpop.f32.mrb[227].mxu0 }
 0xe64   :  { %v7172_v58 = vpop.f32.mrb[228].mxu0 }
 0xe65   :  { %v12662_v4 = vpop.f32.mrb[229].mxu0 }
 0xe66   :  { %v7175_v49 = vpop.f32.mrb[230].mxu0 }
 0xe67   :  { %v12663_v51 = vpop.f32.mrb[231].mxu0 }
 0xe68   :  { %v5438_v51 = vld [vmem:[%s17133_s11] sm:$0x1] }
 0xe6c   :  { %v15861_v42 = vpop.f32.mrb[232].mxu0 }
 0xe6d   :  { %v12680_v48 = vpop.f32.mrb[233].mxu0 }
 0xe6e   :  { %v7260_v45 = vpop.f32.mrb[234].mxu0 }
 0xe6f   :  { %v12681_v26 = vpop.f32.mrb[235].mxu0 }
 0xf02   :  { %v6832_v5 = vpop.f32.mrb[228].mxu1 }
 0xf03   :  { %v6838_v9 = vpack.c.bf16 %v6832_v5, %v6832_v5  ;;  %v12590_v15 = vpop.f32.mrb[229].mxu1 }
 0xf04   :  { %v6835_v14 = vpop.f32.mrb[230].mxu1 }
 0xf05   :  { %v12591_v36 = vpop.f32.mrb[231].mxu1  ;;  %12601 = vmatmul.mubr.msk.bf16.vlgmr.msra.gmra.mrb[220].mxu1 %vm3529_vm3, %v6838_v9 }
 0xf06   :  { %12611 = vmatpush3.bf16.msra.mxu1 %v15616_v46  ;;  %12618 = vmatprep.mubr.msk.bf16.mxu1 %vm13775_vm2, %v17150_v62  ;;  %v7008_v46 = vpack.c.bf16 %v7002_v30, %v7002_v30 }
 0xf07   :  { %12612 = vmatprep.subr.bf16.mxu1 %v17150_v62 }
 0xf0a   :  { %12613 = vmatpush3.bf16.msra.mxu1 %v15624_v39  ;;  %v7093_v39 = vpack.c.bf16 %v7087_v59, %v7087_v59 }
 0xf0b   :  { %12614 = vmatprep.subr.bf16.mxu1 %v17150_v62 }
 0xf0e   :  { %12615 = vmatpush3.bf16.msra.mxu1 %v15635_v24  ;;  %v7178_v24 = vpack.c.bf16 %v7172_v58, %v7172_v58  ;;  %v5437_v58 = vld [vmem:[%s17132_s10] sm:$0x1] }
 0xf0f   :  { %12616 = vmatprep.subr.bf16.mxu1 %v17150_v62 }
 0xf12   :  { %12617 = vmatpush3.bf16.msra.mxu1 %v15642_v28  ;;  %v7263_v28 = vpack.c.bf16 %v15861_v42, %v15861_v42 }
 0xf13   :  { %12628 = vmatprep.subr.bf16.mxu1 %v17150_v62 }
 0xf15   :  { %12619 = vmatmul.mubr.msk.bf16.vlgmr.msra.gmra.mrb[220].mxu1 %vm3529_vm3, %v6923_v3 }
 0xf16   :  { %12629 = vmatpush3.bf16.msra.mxu1 %v15649_v8  ;;  %12636 = vmatprep.mubr.msk.bf16.mxu1 %vm13775_vm2, %v17150_v62  ;;  %v7316_v8 = vmul.f32 %v15859_v2, %v15859_v2 }
 0xf17   :  { %12630 = vmatprep.subr.bf16.mxu1 %v17150_v62 }
 0xf1a   :  { %12631 = vmatpush3.bf16.msra.mxu1 %v15659_v19  ;;  %v7308_v19 = vsel %vm471_vm0, %v15859_v2, 0.0 }
 0xf1b   :  { %12632 = vmatprep.subr.bf16.mxu1 %v17150_v62  ;;  %v7309_v53 = vrot.slane %v7308_v19, 4 }
 0xf1e   :  { %12633 = vmatpush3.bf16.msra.mxu1 %v15668_v16  ;;  %v7317_v16 = vsel %vm471_vm0, %v7316_v8, 0.0  ;;  %v10416_v8 = vld [vmem:[%s17134_s12 + $0x1] sm:$0x1] }
 0xf1f   :  { %12634 = vmatprep.subr.bf16.mxu1 %v17150_v62 }
 0xf22   :  { %12635 = vmatpush3.bf16.msra.mxu1 %v15677_v50  ;;  %v7318_v50 = vrot.slane %v7317_v16, 4 }
 0xf23   :  { %12646 = vmatprep.subr.bf16.mxu1 %v17150_v62 }
 0xf24   :  { %v7319_v47 = vadd.f32 %v7318_v50, %v7317_v16  ;;  %v13325_v16 = vld [vmem:[%s17135_s13 + $0x80] ss:$8 sps:$4 sm:$0xff]   ;;  %v13328_v50 = vld [vmem:[%s17135_s13 + $0x90] ss:$8 sps:$4 sm:$0xff]  }
 0xf25   :  { %12637 = vmatmul.mubr.msk.bf16.vlgmr.msra.gmra.mrb[220].mxu1 %vm3529_vm3, %v7008_v46 }
 0xf26   :  { %12647 = vmatpush3.bf16.msra.mxu1 %v15688_v54  ;;  %12654 = vmatprep.mubr.msk.bf16.mxu1 %vm13775_vm2, %v17150_v62  ;;  %v7310_v54 = vadd.f32 %v7309_v53, %v7308_v19  ;;  %v7320_v25 = vrot.slane %v7319_v47, 2  ;;  %v15981_v19 = vld [vmem:[%s17134_s12 + $0x3] sm:$0x1]  ;;  %v13330_v53 = vld [vmem:[%s17135_s13 + $0x94] ss:$8 sps:$4 sm:$0xff]  }
 0xf27   :  { %12648 = vmatprep.subr.bf16.mxu1 %v17150_v62 }
 0xf2a   :  { %12649 = vmatpush3.bf16.msra.mxu1 %v15700_v10  ;;  %v7311_v10 = vrot.slane %v7310_v54, 2 }
 0xf2b   :  { %12650 = vmatprep.subr.bf16.mxu1 %v17150_v62 }
 0xf2c   :  { %v7312_v38 = vadd.f32 %v7311_v10, %v7310_v54  ;;  %v13333_v54 = vld [vmem:[%s17135_s13 + $0xa4] ss:$8 sps:$4 sm:$0xff]   ;;  %v13331_v10 = vld [vmem:[%s17135_s13 + $0xa0] ss:$8 sps:$4 sm:$0xff]  }
 0xf2e   :  { %12651 = vmatpush3.bf16.msra.mxu1 %v15711_v12  ;;  %v7313_v35 = vrot.slane %v7312_v38, 1 }
 0xf2f   :  { %12652 = vmatprep.subr.bf16.mxu1 %v17150_v62 }
 0xf30   :  { %v7314_v34 = vadd.f32 %v7313_v35, %v7312_v38  ;;  %v16060_v38 = vld [vmem:[%s17134_s12 + $0x7] sm:$0x1] }
 0xf31   :  { %v13345_v35 = vld [vmem:[%s17135_s13 + $0xe4] ss:$8 sps:$4 sm:$0xff]  }
 0xf32   :  { %12653 = vmatpush3.bf16.msra.mxu1 %v15721_v40 }
 0xf33   :  { %12664 = vmatprep.subr.bf16.mxu1 %v17150_v62 }
 0xf35   :  { %12655 = vmatmul.mubr.msk.bf16.vlgmr.msra.gmra.mrb[220].mxu1 %vm3529_vm3, %v7093_v39 }
 0xf36   :  { %12665 = vmatpush3.bf16.msra.mxu1 %v15731_v11  ;;  %12672 = vmatprep.mubr.msk.bf16.mxu1 %vm13775_vm2, %v17150_v62 }
 0xf37   :  { %12666 = vmatprep.subr.bf16.mxu1 %v17150_v62 }
 0xf3a   :  { %12667 = vmatpush3.bf16.msra.mxu1 %v15743_v37 }
 0xf3b   :  { %12668 = vmatprep.subr.bf16.mxu1 %v17150_v62 }
 0xf3e   :  { %12669 = vmatpush3.bf16.msra.mxu1 %v15756_v41 }
 0xf3f   :  { %12670 = vmatprep.subr.bf16.mxu1 %v17150_v62 }
 0xf42   :  { %12671 = vmatpush3.bf16.msra.mxu1 %v15765_v27 }
 0xf43   :  { %12682 = vmatprep.subr.bf16.mxu1 %v17150_v62 }
 0xf45   :  { %12673 = vmatmul.mubr.msk.bf16.vlgmr.msra.gmra.mrb[220].mxu1 %vm3529_vm3, %v7178_v24  ;;  %v15954_v24 = vld [vmem:[%s17134_s12 + $0x2] sm:$0x1] }
 0xf46   :  { %12683 = vmatpush3.bf16.msra.mxu1 %v15774_v55  ;;  %12690 = vmatprep.mubr.msk.bf16.mxu1 %vm13775_vm2, %v17150_v62 }
 0xf47   :  { %12684 = vmatprep.subr.bf16.mxu1 %v17150_v62 }
 0xf4a   :  { %12685 = vmatpush3.bf16.msra.mxu1 %v15786_v52 }
 0xf4b   :  { %12686 = vmatprep.subr.bf16.mxu1 %v17150_v62 }
 0xf4e   :  { %12687 = vmatpush3.bf16.msra.mxu1 %v15795_v17 }
 0xf4f   :  { %12688 = vmatprep.subr.bf16.mxu1 %v17150_v62 }
 0xf52   :  { %12689 = vmatpush3.bf16.msra.mxu1 %v15802_v7  ;;  %v7321_v7 = vadd.f32 %v7320_v25, %v7319_v47  ;;  %v16005_v47 = vld [vmem:[%s17134_s12 + $0x4] sm:$0x1]  ;;  %v13337_v25 = vld [vmem:[%s17135_s13 + $0xc0] ss:$8 sps:$4 sm:$0xff]  }
 0xf53   :  { %12706 = vmatprep.subr.bf16.mxu1 %v17150_v62 }
 0xf54   :  { %v7322_v21 = vrot.slane %v7321_v7, 1 }
 0xf55   :  { %12691 = vmatmul.mubr.msk.bf16.vlgmr.msra.gmra.mrb[220].mxu1 %vm3529_vm3, %v7263_v28  ;;  %v15961_v28 = vld [vmem:[%s17135_s13 + $0x84] ss:$8 sps:$4 sm:$0xff]  }
 0xf56   :  { %12708 = vmatprep.mubr.msk.bf16.mxu1 %vm13775_vm2, %v17150_v62  ;;  %v7323_v61 = vadd.f32 %v7322_v21, %v7321_v7  ;;  %v16072_v7 = vld [vmem:[%s17134_s12 + $0x8] sm:$0x1]  ;;  %v13351_v21 = vld [vmem:[%s17135_s13 + $0x4] ss:$8 sps:$4 sm:$0xff]  }
0x1028   :  { %v7301_v12 = vpop.f32.mrb[220].mxu1 }
0x1029   :  { %v7325_v31 = vsel %vm471_vm0, %v7301_v12, 0.0  ;;  %v7333_v40 = vmul.f32 %v7301_v12, %v7301_v12  ;;  %v12692_v11 = vpop.f32.mrb[221].mxu1 }
0x102a   :  { %v7326_v37 = vrot.slane %v7325_v31, 4  ;;  %v7304_v41 = vpop.f32.mrb[222].mxu1  ;;  %v16028_v11 = vld [vmem:[%s17134_s12 + $0x5] sm:$0x1] }
0x102b   :  { %v7334_v27 = vsel %vm471_vm0, %v7333_v40, 0.0  ;;  %v12693_v55 = vpop.f32.mrb[223].mxu1  ;;  %v13339_v40 = vld [vmem:[%s17135_s13 + $0xc4] ss:$8 sps:$4 sm:$0xff]   ;;  %v13340_v41 = vld [vmem:[%s17135_s13 + $0xd0] ss:$8 sps:$4 sm:$0xff]  }
0x102c   :  { %v7327_v52 = vadd.f32 %v7326_v37, %v7325_v31  ;;  %v7335_v17 = vrot.slane %v7334_v27, 4  ;;  %v13334_v31 = vld [vmem:[%s17135_s13 + $0xb0] ss:$8 sps:$4 sm:$0xff]   ;;  %v13342_v37 = vld [vmem:[%s17135_s13 + $0xd4] ss:$8 sps:$4 sm:$0xff]  }
0x102e   :  { %v7328_v29 = vrot.slane %v7327_v52, 2  ;;  %v7336_v23 = vadd.f32 %v7335_v17, %v7334_v27  ;;  %v16048_v27 = vld [vmem:[%s17134_s12 + $0x6] sm:$0x1] }
0x1030   :  { %v7329_v32 = vadd.f32 %v7328_v29, %v7327_v52  ;;  %v7337_v56 = vrot.slane %v7336_v23, 2 }
0x1032   :  { %v7330_v44 = vrot.slane %v7329_v32, 1  ;;  %v7338_v18 = vadd.f32 %v7337_v56, %v7336_v23  ;;  %v13343_v23 = vld [vmem:[%s17135_s13 + $0xe0] ss:$8 sps:$4 sm:$0xff]   ;;  %v13346_v56 = vld [vmem:[%s17135_s13 + $0xf0] ss:$8 sps:$4 sm:$0xff]  }
0x1034   :  { %v7331_v43 = vadd.f32 %v7330_v44, %v7329_v32  ;;  %v7339_v20 = vrot.slane %v7338_v18, 1  ;;  %v13348_v32 = vld [vmem:[%s17135_s13 + $0xf4] ss:$8 sps:$4 sm:$0xff]   ;;  %v17152_v44 = vmov 0  }
0x1036   :  { %v7332_v57 = vadd.f32 %v7331_v43, %v7314_v34  ;;  %v7340_v30 = vadd.f32 %v7339_v20, %v7338_v18 }
0x1038   :  { %v7341_v33 = vadd.f32 %v7340_v30, %v7323_v61  ;;  %v7343_v13 = vmul.f32 0.125, %v7332_v57 }
0x103a   :  { %v7344_v60 = vmul.f32 0.125, %v7341_v33  ;;  %v7345_v59 = vmul.f32 %v7343_v13, %v7343_v13 }
0x103c   :  { %v7346_v6 = vsub.f32 %v7344_v60, %v7345_v59  ;;  %v16116_v59 = vld [vmem:[%s17135_s13] ss:$8 sps:$4 sm:$0xff]  }
0x103e   :  { %v7347_v1 = vmax.f32 %v7346_v6, 0.0 }
0x1040   :  { %v7348_v0 = vadd.f32 1e-05, %v7347_v1 }
0x1042   :  { %13543 = vrsqrt.f32 %v7348_v0  ;;  %v16121_v0 = vld [vmem:[%s17135_s13 + $0x14] ss:$8 sps:$4 sm:$0xff]  }
0x104c   :  { %v13544_v4 = vpop.eup %13543 }
0x104d   :  { %v7350_v49 = vmul.f32 %v13544_v4, %v5437_v58 }
0x104f   :  { %v7351_v42 = vmul.f32 %v7350_v49, %v7343_v13  ;;  %v7357_v48 = vrot.slane %v7350_v49, %v15421_v22 }
0x1051   :  { %v7352_v45 = vsub.f32 %v5438_v51, %v7351_v42  ;;  %v7359_v26 = vmul.f32 %v7357_v48, %v15859_v2  ;;  %v7369_v5 = vmul.f32 %v7357_v48, %v7301_v12  ;;  %v15949_v2 = vld [vmem:[%s17134_s12] sm:$0x1]  ;;  %v13336_v12 = vld [vmem:[%s17135_s13 + $0xb4] ss:$8 sps:$4 sm:$0xff]   ;;  %v16127_v48 = vld [vmem:[%s17135_s13 + $0x10] ss:$8 sps:$4 sm:$0xff]  }
0x1053   :  { %v7364_v9 = vrot.slane %v7352_v45, %v15421_v22  ;;  %v16134_v45 = vld [vmem:[%s17135_s13 + $0x24] ss:$8 sps:$4 sm:$0xff]   ;;  %v16670_v22 = vld [vmem:[%s17135_s13 + $0x314] ss:$8 sps:$4 sm:$0xff]  }
0x1054   :  { %17237 = vst [vmem:[#allocation20_spill] sm:$0xff] %v16670_v22 }
0x1055   :  { %v7366_v15 = vadd.f32 %v7364_v9, %v7359_v26  ;;  %v15939_v14 = vadd.f32 %v7369_v5, %v7364_v9  ;;  %v16142_v5 = vld [vmem:[%s17135_s13 + $0x20] ss:$8 sps:$4 sm:$0xff]  }
0x1057   :  { %v7367_v36 = vmul.f32 0.2, %v7366_v15  ;;  %v7371_v55 = vmul.f32 0.2, %v15939_v14 }
0x1059   :  { %v7368_v3 = vmax.f32 %v7366_v15, %v7367_v36  ;;  %v7372_v52 = vmax.f32 %v15939_v14, %v7371_v55  ;;  %v16148_v15 = vld [vmem:[%s17135_s13 + $0x34] ss:$8 sps:$4 sm:$0xff]   ;;  %v16212_v55 = vld [vmem:[%s17135_s13 + $0x104] ss:$8 sps:$4 sm:$0xff]  }
0x105b   :  { %v7375_v46 = vpack.c.bf16 %v7368_v3, %v7368_v3  ;;  %v9049_v17 = vpack.c.bf16 %v7372_v52, %v7372_v52  ;;  %v16154_v3 = vld [vmem:[%s17135_s13 + $0x30] ss:$8 sps:$4 sm:$0xff]  }
0x105d   :  { %v15942_v39 = vsel %vm7381_vm6, %v7375_v46, 0  ;;  %v16075_v29 = vsel %vm7381_vm6, %v9049_v17, 0  ;;  %v16160_v46 = vld [vmem:[%s17135_s13 + $0x44] ss:$8 sps:$4 sm:$0xff]  }
0x105e   :  { %12695 = vmatpush3.bf16.msra.mxu0 %v15942_v39  ;;  %12707 = vmatpush3.bf16.msra.mxu1 %v15942_v39 }
0x105f   :  { %12700 = vmatprep.subr.bf16.mxu0 %v17150_v62  ;;  %12712 = vmatprep.subr.bf16.mxu1 %v17150_v62 }
0x1061   :  { %12697 = vmatmul.mubr.msk.bf16.vlgmr.msra.gmra.mrb[236].mxu0 %vm7377_vm7, %v15949_v2  ;;  %12709 = vmatmul.mubr.msk.bf16.vlgmr.msra.gmra.mrb[232].mxu1 %vm7377_vm7, %v15954_v24 }
0x1062   :  { %12701 = vmatpush3.bf16.msra.mxu0 %v15942_v39  ;;  %12713 = vmatpush3.bf16.msra.mxu1 %v15942_v39 }
0x1063   :  { %12702 = vmatprep.mubr.msk.bf16.mxu0 %vm13775_vm2, %v17150_v62  ;;  %12714 = vmatprep.mubr.msk.bf16.mxu1 %vm13775_vm2, %v17150_v62 }
0x1064   :  { %12718 = vmatprep.subr.bf16.mxu1 %v17150_v62  ;;  %7585 = vmatprep.subr.bf16.mxu0 %v15961_v28 }
0x1069   :  { %12703 = vmatmul.mubr.msk.bf16.vlgmr.msra.gmra.mrb[240].mxu0 %vm7377_vm7, %v10416_v8  ;;  %12715 = vmatmul.mubr.msk.bf16.vlgmr.msra.gmra.mrb[236].mxu1 %vm7377_vm7, %v15981_v19 }
0x106a   :  { %12719 = vmatpush3.bf16.msra.mxu1 %v15942_v39  ;;  %12720 = vmatprep.mubr.msk.bf16.mxu1 %vm13775_vm2, %v17150_v62 }
0x106b   :  { %12724 = vmatprep.subr.bf16.mxu1 %v17150_v62  ;;  %7586 = vmatpush1.bf16.msra.mxu0 %v13325_v16 }
0x106c   :  { %7587 = vmatprep.subr.bf16.mxu0 %v13330_v53  ;;  %7617 = vmatprep.mubr.bf16.mxu0 %v17152_v44 }
0x106f   :  { %7588 = vmatpush1.bf16.msra.mxu0 %v13328_v50 }
0x1070   :  { %7589 = vmatprep.subr.bf16.mxu0 %v13333_v54 }
0x1071   :  { %12721 = vmatmul.mubr.msk.bf16.vlgmr.msra.gmra.mrb[240].mxu1 %vm7377_vm7, %v16005_v47 }
0x1072   :  { %12725 = vmatpush3.bf16.msra.mxu1 %v15942_v39  ;;  %12726 = vmatprep.mubr.msk.bf16.mxu1 %vm13775_vm2, %v17150_v62 }
0x1073   :  { %12730 = vmatprep.subr.bf16.mxu1 %v17150_v62  ;;  %7590 = vmatpush1.bf16.msra.mxu0 %v13331_v10 }
0x1074   :  { %7591 = vmatprep.subr.bf16.mxu0 %v13336_v12 }
0x1077   :  { %7592 = vmatpush1.bf16.msra.mxu0 %v13334_v31 }
0x1078   :  { %7593 = vmatprep.subr.bf16.mxu0 %v13339_v40 }
0x1079   :  { %12727 = vmatmul.mubr.msk.bf16.vlgmr.msra.gmra.mrb[244].mxu1 %vm7377_vm7, %v16028_v11 }
0x107a   :  { %12731 = vmatpush3.bf16.msra.mxu1 %v15942_v39  ;;  %12732 = vmatprep.mubr.msk.bf16.mxu1 %vm13775_vm2, %v17150_v62 }
0x107b   :  { %12736 = vmatprep.subr.bf16.mxu1 %v17150_v62  ;;  %7594 = vmatpush1.bf16.msra.mxu0 %v13337_v25 }
0x107c   :  { %7595 = vmatprep.subr.bf16.mxu0 %v13342_v37 }
0x107f   :  { %7596 = vmatpush1.bf16.msra.mxu0 %v13340_v41 }
0x1080   :  { %7597 = vmatprep.subr.bf16.mxu0 %v13345_v35 }
0x1081   :  { %12733 = vmatmul.mubr.msk.bf16.vlgmr.msra.gmra.mrb[248].mxu1 %vm7377_vm7, %v16048_v27 }
0x1082   :  { %12737 = vmatpush3.bf16.msra.mxu1 %v15942_v39  ;;  %12738 = vmatprep.mubr.msk.bf16.mxu1 %vm13775_vm2, %v17150_v62 }
0x1083   :  { %12742 = vmatprep.subr.bf16.mxu1 %v17150_v62  ;;  %7598 = vmatpush1.bf16.msra.mxu0 %v13343_v23 }
0x1084   :  { %7599 = vmatprep.subr.bf16.mxu0 %v13348_v32 }
0x1087   :  { %7600 = vmatpush1.bf16.msra.mxu0 %v13346_v56 }
0x1088   :  { %7706 = vmatprep.subr.bf16.mxu0 %v13351_v21 }
0x1089   :  { %12739 = vmatmul.mubr.msk.bf16.vlgmr.msra.gmra.mrb[252].mxu1 %vm7377_vm7, %v16060_v38 }
0x108a   :  { %12743 = vmatpush3.bf16.msra.mxu1 %v15942_v39  ;;  %12744 = vmatprep.mubr.msk.bf16.mxu1 %vm13775_vm2, %v17150_v62 }
0x108b   :  { %12748 = vmatprep.subr.bf16.mxu1 %v17150_v62 }
0x1091   :  { %12745 = vmatmul.mubr.msk.bf16.vlgmr.msra.gmra.mrb[0].mxu1 %vm7377_vm7, %v16072_v7 }
0x1092   :  { %12749 = vmatpush3.bf16.msra.mxu1 %v16075_v29  ;;  %12750 = vmatprep.mubr.msk.bf16.mxu1 %vm13775_vm2, %v17150_v62 }
0x1093   :  { %12754 = vmatprep.subr.bf16.mxu1 %v17150_v62 }
0x1099   :  { %12751 = vmatmul.mubr.msk.bf16.vlgmr.msra.gmra.mrb[4].mxu1 %vm7377_vm7, %v15949_v2  ;;  %v16168_v2 = vld [vmem:[%s17135_s13 + $0x40] ss:$8 sps:$4 sm:$0xff]  }
0x109a   :  { %12755 = vmatpush3.bf16.msra.mxu1 %v16075_v29  ;;  %12756 = vmatprep.mubr.msk.bf16.mxu1 %vm13775_vm2, %v17150_v62 }
0x109b   :  { %9135 = vmatprep.subr.bf16.mxu1 %v15961_v28 }
0x10a1   :  { %12757 = vmatmul.mubr.msk.bf16.vlgmr.msra.gmra.mrb[8].mxu1 %vm7377_vm7, %v10416_v8  ;;  %v16174_v8 = vld [vmem:[%s17135_s13 + $0x54] ss:$8 sps:$4 sm:$0xff]  }
0x10a2   :  { %9136 = vmatpush1.bf16.msra.mxu1 %v13325_v16  ;;  %9167 = vmatprep.mubr.bf16.mxu1 %v17152_v44 }
0x10a3   :  { %9137 = vmatprep.subr.bf16.mxu1 %v13330_v53 }
0x10a6   :  { %9138 = vmatpush1.bf16.msra.mxu1 %v13328_v50  ;;  %v16180_v50 = vld [vmem:[%s17135_s13 + $0x50] ss:$8 sps:$4 sm:$0xff]  }
0x10a7   :  { %9139 = vmatprep.subr.bf16.mxu1 %v13333_v54  ;;  %v16186_v54 = vld [vmem:[%s17135_s13 + $0x64] ss:$8 sps:$4 sm:$0xff]  }
0x10aa   :  { %9140 = vmatpush1.bf16.msra.mxu1 %v13331_v10 }
0x10ab   :  { %9141 = vmatprep.subr.bf16.mxu1 %v13336_v12  ;;  %v16194_v12 = vld [vmem:[%s17135_s13 + $0x60] ss:$8 sps:$4 sm:$0xff]  }
0x10ae   :  { %9142 = vmatpush1.bf16.msra.mxu1 %v13334_v31 }
0x10af   :  { %9143 = vmatprep.subr.bf16.mxu1 %v13339_v40  ;;  %v16200_v40 = vld [vmem:[%s17135_s13 + $0x74] ss:$8 sps:$4 sm:$0xff]  }
0x10b2   :  { %9144 = vmatpush1.bf16.msra.mxu1 %v13337_v25 }
0x10b3   :  { %9145 = vmatprep.subr.bf16.mxu1 %v13342_v37 }
0x10b6   :  { %9146 = vmatpush1.bf16.msra.mxu1 %v13340_v41  ;;  %v16206_v41 = vld [vmem:[%s17135_s13 + $0x70] ss:$8 sps:$4 sm:$0xff]  }
0x10b7   :  { %9147 = vmatprep.subr.bf16.mxu1 %v13345_v35 }
0x10ba   :  { %9148 = vmatpush1.bf16.msra.mxu1 %v13343_v23  ;;  %v16222_v23 = vld [vmem:[%s17135_s13 + $0x100] ss:$8 sps:$4 sm:$0xff]  }
0x10bb   :  { %9149 = vmatprep.subr.bf16.mxu1 %v13348_v32  ;;  %v16228_v32 = vld [vmem:[%s17135_s13 + $0x114] ss:$8 sps:$4 sm:$0xff]  }
0x10be   :  { %9150 = vmatpush1.bf16.msra.mxu1 %v13346_v56 }
0x10bf   :  { %9176 = vmatprep.subr.bf16.mxu1 %v13351_v21 }
0x1134   :  { %v16107_v18 = vpop.f32.mrb[232].mxu1  ;;  %v16109_v34 = vpop.f32.mrb[236].mxu0 }
0x1135   :  { %v12710_v43 = vpop.f32.mrb[233].mxu1  ;;  %v12698_v20 = vpop.f32.mrb[237].mxu0  ;;  %v7425_v52 = vpack.c.bf16 %v16109_v34, %v16109_v34  ;;  %v16234_v34 = vld [vmem:[%s17135_s13 + $0x110] ss:$8 sps:$4 sm:$0xff]  }
0x1136   :  { %v7789_v61 = vpop.f32.mrb[234].mxu1  ;;  %v7422_v57 = vpop.f32.mrb[238].mxu0  ;;  %v16241_v43 = vld [vmem:[%s17135_s13 + $0x124] ss:$8 sps:$4 sm:$0xff]  }
0x1137   :  { %v12711_v30 = vpop.f32.mrb[235].mxu1  ;;  %v12699_v33 = vpop.f32.mrb[239].mxu0  ;;  %v16249_v61 = vld [vmem:[%s17135_s13 + $0x120] ss:$8 sps:$4 sm:$0xff]  }
0x1138   :  { %v16255_v30 = vld [vmem:[%s17135_s13 + $0x134] ss:$8 sps:$4 sm:$0xff]  }
0x113c   :  { %v7481_v13 = vpop.f32.mrb[240].mxu0  ;;  %v16111_v60 = vpop.f32.mrb[236].mxu1 }
0x113d   :  { %v7487_v6 = vpack.c.bf16 %v7481_v13, %v7481_v13  ;;  %v12716_v1 = vpop.f32.mrb[237].mxu1  ;;  %v12704_v58 = vpop.f32.mrb[241].mxu0 }
0x113e   :  { %v7975_v4 = vpop.f32.mrb[238].mxu1  ;;  %v7484_v49 = vpop.f32.mrb[242].mxu0  ;;  %v16267_v1 = vld [vmem:[%s17135_s13 + $0x144] ss:$8 sps:$4 sm:$0xff]  }
0x113f   :  { %7618 = vmatmul.mubr.bf16.vlgmr.msra.gmra.mrb[244].mxu0 %v7487_v6  ;;  %v12717_v51 = vpop.f32.mrb[239].mxu1  ;;  %v12705_v42 = vpop.f32.mrb[243].mxu0  ;;  %v16261_v6 = vld [vmem:[%s17135_s13 + $0x130] ss:$8 sps:$4 sm:$0xff]   ;;  %v16275_v4 = vld [vmem:[%s17135_s13 + $0x140] ss:$8 sps:$4 sm:$0xff]  }
0x1140   :  { %7707 = vmatpush1.bf16.msra.mxu0 %v16116_v59  ;;  %7738 = vmatprep.mubr.bf16.mxu0 %v17152_v44  ;;  %v16281_v51 = vld [vmem:[%s17135_s13 + $0x154] ss:$8 sps:$4 sm:$0xff]  }
0x1141   :  { %7708 = vmatprep.subr.bf16.mxu0 %v16121_v0 }
0x1144   :  { %7709 = vmatpush1.bf16.msra.mxu0 %v16127_v48  ;;  %v16137_v26 = vpop.f32.mrb[240].mxu1 }
0x1145   :  { %7710 = vmatprep.subr.bf16.mxu0 %v16134_v45  ;;  %v12722_v9 = vpop.f32.mrb[241].mxu1 }
0x1146   :  { %v8161_v14 = vpop.f32.mrb[242].mxu1 }
0x1147   :  { %v12723_v36 = vpop.f32.mrb[243].mxu1  ;;  %v16287_v14 = vld [vmem:[%s17135_s13 + $0x150] ss:$8 sps:$4 sm:$0xff]  }
0x1148   :  { %7711 = vmatpush1.bf16.msra.mxu0 %v16142_v5  ;;  %v16293_v36 = vld [vmem:[%s17135_s13 + $0x164] ss:$8 sps:$4 sm:$0xff]  }
0x1149   :  { %7712 = vmatprep.subr.bf16.mxu0 %v16148_v15 }
0x114c   :  { %7713 = vmatpush1.bf16.msra.mxu0 %v16154_v3  ;;  %v16163_v39 = vpop.f32.mrb[244].mxu1 }
0x114d   :  { %7714 = vmatprep.subr.bf16.mxu0 %v16160_v46  ;;  %v12728_v28 = vpop.f32.mrb[245].mxu1 }
0x114e   :  { %v8347_v16 = vpop.f32.mrb[246].mxu1 }
0x114f   :  { %v12729_v53 = vpop.f32.mrb[247].mxu1  ;;  %v16299_v16 = vld [vmem:[%s17135_s13 + $0x160] ss:$8 sps:$4 sm:$0xff]  }
0x1150   :  { %7715 = vmatpush1.bf16.msra.mxu0 %v16168_v2 }
0x1151   :  { %7716 = vmatprep.subr.bf16.mxu0 %v16174_v8 }
0x1154   :  { %7717 = vmatpush1.bf16.msra.mxu0 %v16180_v50  ;;  %v16189_v10 = vpop.f32.mrb[248].mxu1 }
0x1155   :  { %7718 = vmatprep.subr.bf16.mxu0 %v16186_v54  ;;  %v12734_v31 = vpop.f32.mrb[249].mxu1 }
0x1156   :  { %v8533_v25 = vpop.f32.mrb[250].mxu1 }
0x1157   :  { %v12735_v37 = vpop.f32.mrb[251].mxu1  ;;  %v16305_v25 = vld [vmem:[%s17135_s13 + $0x174] ss:$8 sps:$4 sm:$0xff]  }
0x1158   :  { %7719 = vmatpush1.bf16.msra.mxu0 %v16194_v12 }
0x1159   :  { %7720 = vmatprep.subr.bf16.mxu0 %v16200_v40 }
0x115c   :  { %7721 = vmatpush1.bf16.msra.mxu0 %v16206_v41  ;;  %v16217_v17 = vpop.f32.mrb[252].mxu1 }
0x115d   :  { %7890 = vmatprep.subr.bf16.mxu0 %v16212_v55  ;;  %v12740_v35 = vpop.f32.mrb[253].mxu1 }
0x115e   :  { %v8719_v56 = vpop.f32.mrb[254].mxu1  ;;  %v16312_v35 = vld [vmem:[%s17135_s13 + $0x170] ss:$8 sps:$4 sm:$0xff]  }
0x115f   :  { %7739 = vmatmul.mubr.bf16.vlgmr.msra.gmra.mrb[244].mxu0 %v7425_v52  ;;  %v12741_v21 = vpop.f32.mrb[255].mxu1  ;;  %v16319_v56 = vld [vmem:[%s17135_s13 + $0x184] ss:$8 sps:$4 sm:$0xff]  }
0x1160   :  { %7891 = vmatpush1.bf16.msra.mxu0 %v16222_v23  ;;  %7922 = vmatprep.mubr.bf16.mxu0 %v17152_v44  ;;  %v7792_v21 = vpack.c.bf16 %v16107_v18, %v16107_v18  ;;  %v16350_v18 = vld [vmem:[%s17135_s13 + $0x1a4] ss:$8 sps:$4 sm:$0xff]  }
0x1161   :  { %7892 = vmatprep.subr.bf16.mxu0 %v16228_v32 }
0x1164   :  { %7893 = vmatpush1.bf16.msra.mxu0 %v16234_v34  ;;  %v16244_v20 = vpop.f32.mrb[0].mxu1 }
0x1165   :  { %7894 = vmatprep.subr.bf16.mxu0 %v16241_v43  ;;  %v12746_v57 = vpop.f32.mrb[1].mxu1 }
0x1166   :  { %v8905_v33 = vpop.f32.mrb[2].mxu1  ;;  %v16438_v57 = vld [vmem:[%s17135_s13 + $0x204] ss:$8 sps:$4 sm:$0xff]  }
0x1167   :  { %v12747_v13 = vpop.f32.mrb[3].mxu1  ;;  %v16445_v33 = vld [vmem:[%s17135_s13 + $0x200] ss:$8 sps:$4 sm:$0xff]  }
0x1168   :  { %7895 = vmatpush1.bf16.msra.mxu0 %v16249_v61  ;;  %v7978_v13 = vpack.c.bf16 %v16111_v60, %v16111_v60  ;;  %v16468_v60 = vld [vmem:[%s17135_s13 + $0x224] ss:$8 sps:$4 sm:$0xff]  }
0x1169   :  { %7896 = vmatprep.subr.bf16.mxu0 %v16255_v30 }
0x116c   :  { %7897 = vmatpush1.bf16.msra.mxu0 %v16261_v6  ;;  %v16270_v58 = vpop.f32.mrb[4].mxu1 }
0x116d   :  { %7898 = vmatprep.subr.bf16.mxu0 %v16267_v1  ;;  %v12752_v49 = vpop.f32.mrb[5].mxu1 }
0x116e   :  { %v9090_v42 = vpop.f32.mrb[6].mxu1  ;;  %v16483_v49 = vld [vmem:[%s17135_s13 + $0x234] ss:$8 sps:$4 sm:$0xff]  }
0x116f   :  { %v12753_v9 = vpop.f32.mrb[7].mxu1  ;;  %v16561_v42 = vld [vmem:[%s17135_s13 + $0x280] ss:$8 sps:$4 sm:$0xff]  }
0x1170   :  { %7899 = vmatpush1.bf16.msra.mxu0 %v16275_v4  ;;  %v8164_v9 = vpack.c.bf16 %v16137_v26, %v16137_v26  ;;  %v16584_v26 = vld [vmem:[%s17135_s13 + $0x2a4] ss:$8 sps:$4 sm:$0xff]  }
0x1171   :  { %7900 = vmatprep.subr.bf16.mxu0 %v16281_v51 }
0x1174   :  { %7901 = vmatpush1.bf16.msra.mxu0 %v16287_v14  ;;  %v9128_v28 = vpop.f32.mrb[8].mxu1 }
0x1175   :  { %v9134_v53 = vpack.c.bf16 %v9128_v28, %v9128_v28  ;;  %7902 = vmatprep.subr.bf16.mxu0 %v16293_v36  ;;  %v12758_v31 = vpop.f32.mrb[9].mxu1  ;;  %v16590_v28 = vld [vmem:[%s17135_s13 + $0x2a0] ss:$8 sps:$4 sm:$0xff]  }
0x1176   :  { %v9131_v37 = vpop.f32.mrb[10].mxu1  ;;  %v16608_v31 = vld [vmem:[%s17135_s13 + $0x2c4] ss:$8 sps:$4 sm:$0xff]  }
0x1177   :  { %9168 = vmatmul.mubr.bf16.vlgmr.msra.gmra.mrb[12].mxu1 %v9134_v53  ;;  %v12759_v52 = vpop.f32.mrb[11].mxu1  ;;  %v16602_v53 = vld [vmem:[%s17135_s13 + $0x2b0] ss:$8 sps:$4 sm:$0xff]   ;;  %v16620_v37 = vld [vmem:[%s17135_s13 + $0x2d4] ss:$8 sps:$4 sm:$0xff]  }
0x1178   :  { %7903 = vmatpush1.bf16.msra.mxu0 %v16299_v16  ;;  %9177 = vmatpush1.bf16.msra.mxu1 %v16116_v59  ;;  %v16327_v59 = vld [vmem:[%s17135_s13 + $0x180] ss:$8 sps:$4 sm:$0xff]   ;;  %v16626_v52 = vld [vmem:[%s17135_s13 + $0x2d0] ss:$8 sps:$4 sm:$0xff]  }
0x1179   :  { %7904 = vmatprep.subr.bf16.mxu0 %v16305_v25  ;;  %9178 = vmatprep.subr.bf16.mxu1 %v16121_v0  ;;  %v16336_v0 = vld [vmem:[%s17135_s13 + $0x194] ss:$8 sps:$4 sm:$0xff]  }
0x117a   :  { %9208 = vmatprep.mubr.bf16.mxu1 %v17152_v44 }
0x117c   :  { %7905 = vmatpush1.bf16.msra.mxu0 %v16312_v35  ;;  %9179 = vmatpush1.bf16.msra.mxu1 %v16127_v48  ;;  %v16343_v48 = vld [vmem:[%s17135_s13 + $0x190] ss:$8 sps:$4 sm:$0xff]  }
0x117d   :  { %8076 = vmatprep.subr.bf16.mxu0 %v16319_v56  ;;  %9180 = vmatprep.subr.bf16.mxu1 %v16134_v45  ;;  %v16358_v45 = vld [vmem:[%s17135_s13 + $0x1a0] ss:$8 sps:$4 sm:$0xff]  }
0x117f   :  { %7923 = vmatmul.mubr.bf16.vlgmr.msra.gmra.mrb[244].mxu0 %v7792_v21  ;;  %v16638_v21 = vld [vmem:[%s17135_s13 + $0x2e0] ss:$8 sps:$4 sm:$0xff]  }
0x1180   :  { %8077 = vmatpush1.bf16.msra.mxu0 %v16327_v59  ;;  %9181 = vmatpush1.bf16.msra.mxu1 %v16142_v5  ;;  %v16365_v5 = vld [vmem:[%s17135_s13 + $0x1b4] ss:$8 sps:$4 sm:$0xff]  }
0x1181   :  { %8078 = vmatprep.subr.bf16.mxu0 %v16336_v0  ;;  %9182 = vmatprep.subr.bf16.mxu1 %v16148_v15  ;;  %v16372_v15 = vld [vmem:[%s17135_s13 + $0x1b0] ss:$8 sps:$4 sm:$0xff]  }
0x1182   :  { %8108 = vmatprep.mubr.bf16.mxu0 %v17152_v44 }
0x1184   :  { %8079 = vmatpush1.bf16.msra.mxu0 %v16343_v48  ;;  %9183 = vmatpush1.bf16.msra.mxu1 %v16154_v3  ;;  %v16379_v3 = vld [vmem:[%s17135_s13 + $0x1c4] ss:$8 sps:$4 sm:$0xff]  }
0x1185   :  { %8080 = vmatprep.subr.bf16.mxu0 %v16350_v18  ;;  %9184 = vmatprep.subr.bf16.mxu1 %v16160_v46  ;;  %v16386_v46 = vld [vmem:[%s17135_s13 + $0x1c0] ss:$8 sps:$4 sm:$0xff]  }
0x1188   :  { %8081 = vmatpush1.bf16.msra.mxu0 %v16358_v45  ;;  %9185 = vmatpush1.bf16.msra.mxu1 %v16168_v2  ;;  %v16393_v2 = vld [vmem:[%s17135_s13 + $0x1d4] ss:$8 sps:$4 sm:$0xff]  }
0x1189   :  { %8082 = vmatprep.subr.bf16.mxu0 %v16365_v5  ;;  %9186 = vmatprep.subr.bf16.mxu1 %v16174_v8  ;;  %v16400_v8 = vld [vmem:[%s17135_s13 + $0x1d0] ss:$8 sps:$4 sm:$0xff]  }
0x118c   :  { %8083 = vmatpush1.bf16.msra.mxu0 %v16372_v15  ;;  %9187 = vmatpush1.bf16.msra.mxu1 %v16180_v50  ;;  %v16407_v50 = vld [vmem:[%s17135_s13 + $0x1e4] ss:$8 sps:$4 sm:$0xff]  }
0x118d   :  { %8084 = vmatprep.subr.bf16.mxu0 %v16379_v3  ;;  %9188 = vmatprep.subr.bf16.mxu1 %v16186_v54  ;;  %v16414_v54 = vld [vmem:[%s17135_s13 + $0x1e0] ss:$8 sps:$4 sm:$0xff]  }
0x1190   :  { %8085 = vmatpush1.bf16.msra.mxu0 %v16386_v46  ;;  %9189 = vmatpush1.bf16.msra.mxu1 %v16194_v12  ;;  %v9093_v12 = vpack.c.bf16 %v16270_v58, %v16270_v58  ;;  %v16453_v58 = vld [vmem:[%s17135_s13 + $0x214] ss:$8 sps:$4 sm:$0xff]  }
0x1191   :  { %8086 = vmatprep.subr.bf16.mxu0 %v16393_v2  ;;  %9190 = vmatprep.subr.bf16.mxu1 %v16200_v40  ;;  %v16423_v40 = vld [vmem:[%s17135_s13 + $0x1f4] ss:$8 sps:$4 sm:$0xff]  }
0x1194   :  { %8087 = vmatpush1.bf16.msra.mxu0 %v16400_v8  ;;  %9191 = vmatpush1.bf16.msra.mxu1 %v16206_v41  ;;  %v16430_v41 = vld [vmem:[%s17135_s13 + $0x1f0] ss:$8 sps:$4 sm:$0xff]  }
0x1195   :  { %8088 = vmatprep.subr.bf16.mxu0 %v16407_v50  ;;  %12760 = vmatprep.subr.bf16.mxu1 %v17150_v62 }
0x1197   :  { %9209 = vmatmul.mubr.bf16.vlgmr.msra.gmra.mrb[12].mxu1 %v9093_v12  ;;  %v16644_v12 = vld [vmem:[%s17135_s13 + $0x2f4] ss:$8 sps:$4 sm:$0xff]  }
0x1198   :  { %8089 = vmatpush1.bf16.msra.mxu0 %v16414_v54  ;;  %12761 = vmatpush3.bf16.msra.mxu1 %v16075_v29 }
0x1199   :  { %8090 = vmatprep.subr.bf16.mxu0 %v16423_v40  ;;  %12762 = vmatprep.mubr.msk.bf16.mxu1 %vm13775_vm2, %v17150_v62 }
0x119a   :  { %9258 = vmatprep.subr.bf16.mxu1 %v16212_v55  ;;  %v16461_v55 = vld [vmem:[%s17135_s13 + $0x210] ss:$8 sps:$4 sm:$0xff]  }
0x119c   :  { %8091 = vmatpush1.bf16.msra.mxu0 %v16430_v41 }
0x119d   :  { %8262 = vmatprep.subr.bf16.mxu0 %v16438_v57 }
0x119f   :  { %8109 = vmatmul.mubr.bf16.vlgmr.msra.gmra.mrb[244].mxu0 %v7978_v13  ;;  %12763 = vmatmul.mubr.msk.bf16.vlgmr.msra.gmra.mrb[16].mxu1 %vm7377_vm7, %v15954_v24  ;;  %v16477_v24 = vld [vmem:[%s17135_s13 + $0x220] ss:$8 sps:$4 sm:$0xff]   ;;  %v16650_v13 = vld [vmem:[%s17135_s13 + $0x2f0] ss:$8 sps:$4 sm:$0xff]  }
0x11a0   :  { %8263 = vmatpush1.bf16.msra.mxu0 %v16445_v33  ;;  %8294 = vmatprep.mubr.bf16.mxu0 %v17152_v44  ;;  %17235 = vst [vmem:[#allocation18_spill] sm:$0xff] %v16650_v13 }
0x11a1   :  { %8264 = vmatprep.subr.bf16.mxu0 %v16453_v58  ;;  %9259 = vmatpush1.bf16.msra.mxu1 %v16222_v23  ;;  %v16491_v23 = vld [vmem:[%s17135_s13 + $0x230] ss:$8 sps:$4 sm:$0xff]  }
0x11a2   :  { %9260 = vmatprep.subr.bf16.mxu1 %v16228_v32  ;;  %9290 = vmatprep.mubr.bf16.mxu1 %v17152_v44  ;;  %v16497_v32 = vld [vmem:[%s17135_s13 + $0x244] ss:$8 sps:$4 sm:$0xff]  }
0x11a4   :  { %8265 = vmatpush1.bf16.msra.mxu0 %v16461_v55 }
0x11a5   :  { %8266 = vmatprep.subr.bf16.mxu0 %v16468_v60  ;;  %9261 = vmatpush1.bf16.msra.mxu1 %v16234_v34  ;;  %v16505_v34 = vld [vmem:[%s17135_s13 + $0x240] ss:$8 sps:$4 sm:$0xff]  }
0x11a6   :  { %9262 = vmatprep.subr.bf16.mxu1 %v16241_v43  ;;  %v16511_v43 = vld [vmem:[%s17135_s13 + $0x254] ss:$8 sps:$4 sm:$0xff]  }
0x11a8   :  { %8267 = vmatpush1.bf16.msra.mxu0 %v16477_v24 }
0x11a9   :  { %8268 = vmatprep.subr.bf16.mxu0 %v16483_v49  ;;  %9263 = vmatpush1.bf16.msra.mxu1 %v16249_v61  ;;  %v16519_v61 = vld [vmem:[%s17135_s13 + $0x250] ss:$8 sps:$4 sm:$0xff]  }
0x11aa   :  { %9264 = vmatprep.subr.bf16.mxu1 %v16255_v30  ;;  %v16525_v30 = vld [vmem:[%s17135_s13 + $0x264] ss:$8 sps:$4 sm:$0xff]  }
0x11ac   :  { %8269 = vmatpush1.bf16.msra.mxu0 %v16491_v23 }
0x11ad   :  { %8270 = vmatprep.subr.bf16.mxu0 %v16497_v32  ;;  %9265 = vmatpush1.bf16.msra.mxu1 %v16261_v6  ;;  %v16533_v6 = vld [vmem:[%s17135_s13 + $0x260] ss:$8 sps:$4 sm:$0xff]  }
0x11ae   :  { %9266 = vmatprep.subr.bf16.mxu1 %v16267_v1  ;;  %v16539_v1 = vld [vmem:[%s17135_s13 + $0x274] ss:$8 sps:$4 sm:$0xff]  }
0x11b0   :  { %8271 = vmatpush1.bf16.msra.mxu0 %v16505_v34 }
0x11b1   :  { %8272 = vmatprep.subr.bf16.mxu0 %v16511_v43  ;;  %9267 = vmatpush1.bf16.msra.mxu1 %v16275_v4  ;;  %v16547_v4 = vld [vmem:[%s17135_s13 + $0x270] ss:$8 sps:$4 sm:$0xff]  }
0x11b2   :  { %9268 = vmatprep.subr.bf16.mxu1 %v16281_v51  ;;  %v16553_v51 = vld [vmem:[%s17135_s13 + $0x284] ss:$8 sps:$4 sm:$0xff]  }
0x11b4   :  { %8273 = vmatpush1.bf16.msra.mxu0 %v16519_v61 }
0x11b5   :  { %8274 = vmatprep.subr.bf16.mxu0 %v16525_v30  ;;  %9269 = vmatpush1.bf16.msra.mxu1 %v16287_v14  ;;  %v16569_v14 = vld [vmem:[%s17135_s13 + $0x294] ss:$8 sps:$4 sm:$0xff]  }
0x11b6   :  { %9270 = vmatprep.subr.bf16.mxu1 %v16293_v36  ;;  %v16577_v36 = vld [vmem:[%s17135_s13 + $0x290] ss:$8 sps:$4 sm:$0xff]  }
0x11b8   :  { %8275 = vmatpush1.bf16.msra.mxu0 %v16533_v6 }
0x11b9   :  { %8276 = vmatprep.subr.bf16.mxu0 %v16539_v1  ;;  %9271 = vmatpush1.bf16.msra.mxu1 %v16299_v16  ;;  %v16596_v16 = vld [vmem:[%s17135_s13 + $0x2b4] ss:$8 sps:$4 sm:$0xff]  }
0x11ba   :  { %9272 = vmatprep.subr.bf16.mxu1 %v16305_v25  ;;  %v16614_v25 = vld [vmem:[%s17135_s13 + $0x2c0] ss:$8 sps:$4 sm:$0xff]  }
0x11bc   :  { %8277 = vmatpush1.bf16.msra.mxu0 %v16547_v4 }
0x11bd   :  { %8448 = vmatprep.subr.bf16.mxu0 %v16553_v51  ;;  %9273 = vmatpush1.bf16.msra.mxu1 %v16312_v35  ;;  %v16632_v35 = vld [vmem:[%s17135_s13 + $0x2e4] ss:$8 sps:$4 sm:$0xff]  }
0x11be   :  { %12766 = vmatprep.subr.bf16.mxu1 %v17150_v62  ;;  %v16662_v62 = vld [vmem:[%s17135_s13 + $0x300] ss:$8 sps:$4 sm:$0xff]  }
0x11bf   :  { %8295 = vmatmul.mubr.bf16.vlgmr.msra.gmra.mrb[244].mxu0 %v8164_v9  ;;  %v16656_v9 = vld [vmem:[%s17135_s13 + $0x304] ss:$8 sps:$4 sm:$0xff]   ;;  %17236 = vst [vmem:[#allocation19_spill] sm:$0xff] %v16662_v62 }
0x11c0   :  { %8449 = vmatpush1.bf16.msra.mxu0 %v16561_v42  ;;  %8480 = vmatprep.mubr.bf16.mxu0 %v17152_v44  ;;  %v8350_v44 = vpack.c.bf16 %v16163_v39, %v16163_v39  ;;  %v16683_v39 = vld [vmem:[%s17135_s13 + $0x324] ss:$8 sps:$4 sm:$0xff]  }
0x11c1   :  { %8450 = vmatprep.subr.bf16.mxu0 %v16569_v14  ;;  %17240 = vst [vmem:[#allocation23_spill] sm:$0xff] %v16683_v39 }
0x11c4   :  { %8451 = vmatpush1.bf16.msra.mxu0 %v16577_v36 }
0x11c5   :  { %8452 = vmatprep.subr.bf16.mxu0 %v16584_v26 }
0x11c8   :  { %8453 = vmatpush1.bf16.msra.mxu0 %v16590_v28 }
0x11c9   :  { %8454 = vmatprep.subr.bf16.mxu0 %v16596_v16 }
0x11cc   :  { %8455 = vmatpush1.bf16.msra.mxu0 %v16602_v53 }
0x11cd   :  { %8456 = vmatprep.subr.bf16.mxu0 %v16608_v31 }
0x11d0   :  { %8457 = vmatpush1.bf16.msra.mxu0 %v16614_v25 }
0x11d1   :  { %8458 = vmatprep.subr.bf16.mxu0 %v16620_v37 }
0x11d4   :  { %8459 = vmatpush1.bf16.msra.mxu0 %v16626_v52 }
0x11d5   :  { %8460 = vmatprep.subr.bf16.mxu0 %v16632_v35 }
0x11d8   :  { %8461 = vmatpush1.bf16.msra.mxu0 %v16638_v21 }
0x11d9   :  { %8462 = vmatprep.subr.bf16.mxu0 %v16644_v12 }
0x11dc   :  { %8463 = vmatpush1.bf16.msra.mxu0 %v16650_v13  ;;  %v17239_v13 = vmov 0  }
0x11dd   :  { %8634 = vmatprep.subr.bf16.mxu0 %v16656_v9 }
0x11df   :  { %8481 = vmatmul.mubr.bf16.vlgmr.msra.gmra.mrb[244].mxu0 %v8350_v44  ;;  %v16689_v44 = vld [vmem:[%s17135_s13 + $0x320] ss:$8 sps:$4 sm:$0xff]  }
0x11e0   :  { %8635 = vmatpush1.bf16.msra.mxu0 %v16662_v62  ;;  %8666 = vmatprep.mubr.bf16.mxu0 %v17239_v13  ;;  %17241 = vst [vmem:[#allocation24_spill] sm:$0xff] %v16689_v44  ;;  %v16695_v62 = vld [vmem:[%s17135_s13 + $0x334] ss:$8 sps:$4 sm:$0xff]  }
0x11e1   :  { %8636 = vmatprep.subr.bf16.mxu0 %v16670_v22  ;;  %17242 = vst [vmem:[#allocation25_spill] sm:$0xff] %v16695_v62  ;;  %v16701_v22 = vld [vmem:[%s17135_s13 + $0x330] ss:$8 sps:$4 sm:$0xff]  }
0x11e2   :  { %17243 = vst [vmem:[#allocation26_spill] sm:$0xff] %v16701_v22 }
0x11e4   :  { %8637 = vmatpush1.bf16.msra.mxu0 %v16676_v63  ;;  %v16707_v63 = vld [vmem:[%s17135_s13 + $0x344] ss:$8 sps:$4 sm:$0xff]  }
0x11e5   :  { %8638 = vmatprep.subr.bf16.mxu0 %v16683_v39  ;;  %17244 = vst [vmem:[#allocation27_spill] sm:$0xff] %v16707_v63  ;;  %v16713_v39 = vld [vmem:[%s17135_s13 + $0x340] ss:$8 sps:$4 sm:$0xff]  }
0x11e6   :  { %17245 = vst [vmem:[#allocation28_spill] sm:$0xff] %v16713_v39 }
0x11e8   :  { %8639 = vmatpush1.bf16.msra.mxu0 %v16689_v44  ;;  %v16719_v44 = vld [vmem:[%s17135_s13 + $0x354] ss:$8 sps:$4 sm:$0xff]  }
0x11e9   :  { %8640 = vmatprep.subr.bf16.mxu0 %v16695_v62  ;;  %17246 = vst [vmem:[#allocation29_spill] sm:$0xff] %v16719_v44  ;;  %v16725_v62 = vld [vmem:[%s17135_s13 + $0x350] ss:$8 sps:$4 sm:$0xff]  }
0x11ea   :  { %17247 = vst [vmem:[#allocation30_spill] sm:$0xff] %v16725_v62 }
0x11ec   :  { %8641 = vmatpush1.bf16.msra.mxu0 %v16701_v22  ;;  %v16731_v22 = vld [vmem:[%s17135_s13 + $0x364] ss:$8 sps:$4 sm:$0xff]  }
0x11ed   :  { %8642 = vmatprep.subr.bf16.mxu0 %v16707_v63  ;;  %17248 = vst [vmem:[#allocation31_spill] sm:$0xff] %v16731_v22  ;;  %v16737_v63 = vld [vmem:[%s17135_s13 + $0x360] ss:$8 sps:$4 sm:$0xff]  }
0x11ee   :  { %17249 = vst [vmem:[#allocation32_spill] sm:$0xff] %v16737_v63 }
0x11f0   :  { %8643 = vmatpush1.bf16.msra.mxu0 %v16713_v39  ;;  %v16743_v39 = vld [vmem:[%s17135_s13 + $0x374] ss:$8 sps:$4 sm:$0xff]  }
0x11f1   :  { %8644 = vmatprep.subr.bf16.mxu0 %v16719_v44  ;;  %17250 = vst [vmem:[#allocation33_spill] sm:$0xff] %v16743_v39  ;;  %v16749_v44 = vld [vmem:[%s17135_s13 + $0x370] ss:$8 sps:$4 sm:$0xff]  }
0x11f2   :  { %17251 = vst [vmem:[#allocation34_spill] sm:$0xff] %v16749_v44 }
0x11f4   :  { %8645 = vmatpush1.bf16.msra.mxu0 %v16725_v62  ;;  %v16755_v62 = vld [vmem:[%s17135_s13 + $0x384] ss:$8 sps:$4 sm:$0xff]  }
0x11f5   :  { %8646 = vmatprep.subr.bf16.mxu0 %v16731_v22  ;;  %v16761_v22 = vld [vmem:[%s17135_s13 + $0x380] ss:$8 sps:$4 sm:$0xff]  }
0x11f6   :  { %17252 = vst [vmem:[#allocation35_spill] sm:$0xff] %v16761_v22 }
0x11f8   :  { %8647 = vmatpush1.bf16.msra.mxu0 %v16737_v63  ;;  %v8536_v63 = vpack.c.bf16 %v16189_v10, %v16189_v10  ;;  %v16782_v10 = vld [vmem:[%s17135_s13 + $0x3a4] ss:$8 sps:$4 sm:$0xff]  }
0x11f9   :  { %8648 = vmatprep.subr.bf16.mxu0 %v16743_v39  ;;  %v16769_v39 = vld [vmem:[%s17135_s13 + $0x394] ss:$8 sps:$4 sm:$0xff]   ;;  %17255 = vst [vmem:[#allocation38_spill] sm:$0xff] %v16782_v10 }
0x11fa   :  { %17253 = vst [vmem:[#allocation36_spill] sm:$0xff] %v16769_v39 }
0x11fc   :  { %8649 = vmatpush1.bf16.msra.mxu0 %v16749_v44  ;;  %v16775_v44 = vld [vmem:[%s17135_s13 + $0x390] ss:$8 sps:$4 sm:$0xff]  }
0x11fd   :  { %8820 = vmatprep.subr.bf16.mxu0 %v16755_v62  ;;  %17254 = vst [vmem:[#allocation37_spill] sm:$0xff] %v16775_v44 }
0x11ff   :  { %8667 = vmatmul.mubr.bf16.vlgmr.msra.gmra.mrb[244].mxu0 %v8536_v63  ;;  %v16788_v63 = vld [vmem:[%s17135_s13 + $0x3a0] ss:$8 sps:$4 sm:$0xff]  }
0x1200   :  { %8821 = vmatpush1.bf16.msra.mxu0 %v16761_v22  ;;  %8852 = vmatprep.mubr.bf16.mxu0 %v17239_v13  ;;  %17256 = vst [vmem:[#allocation39_spill] sm:$0xff] %v16788_v63  ;;  %v16794_v22 = vld [vmem:[%s17135_s13 + $0x3b4] ss:$8 sps:$4 sm:$0xff]  }
0x1201   :  { %8822 = vmatprep.subr.bf16.mxu0 %v16769_v39  ;;  %17257 = vst [vmem:[#allocation40_spill] sm:$0xff] %v16794_v22  ;;  %v16800_v39 = vld [vmem:[%s17135_s13 + $0x3b0] ss:$8 sps:$4 sm:$0xff]  }
0x1202   :  { %17258 = vst [vmem:[#allocation41_spill] sm:$0xff] %v16800_v39 }
0x1204   :  { %8823 = vmatpush1.bf16.msra.mxu0 %v16775_v44  ;;  %v16806_v44 = vld [vmem:[%s17135_s13 + $0x3c4] ss:$8 sps:$4 sm:$0xff]  }
0x1205   :  { %8824 = vmatprep.subr.bf16.mxu0 %v16782_v10  ;;  %17259 = vst [vmem:[#allocation42_spill] sm:$0xff] %v16806_v44  ;;  %v16812_v10 = vld [vmem:[%s17135_s13 + $0x3c0] ss:$8 sps:$4 sm:$0xff]  }
0x1206   :  { %17260 = vst [vmem:[#allocation43_spill] sm:$0xff] %v16812_v10 }
0x1208   :  { %8825 = vmatpush1.bf16.msra.mxu0 %v16788_v63  ;;  %v16818_v63 = vld [vmem:[%s17135_s13 + $0x3d4] ss:$8 sps:$4 sm:$0xff]  }
0x1209   :  { %8826 = vmatprep.subr.bf16.mxu0 %v16794_v22  ;;  %17261 = vst [vmem:[#allocation44_spill] sm:$0xff] %v16818_v63  ;;  %v16824_v22 = vld [vmem:[%s17135_s13 + $0x3d0] ss:$8 sps:$4 sm:$0xff]  }
0x120a   :  { %17262 = vst [vmem:[#allocation45_spill] sm:$0xff] %v16824_v22 }
0x120c   :  { %8827 = vmatpush1.bf16.msra.mxu0 %v16800_v39  ;;  %v16830_v39 = vld [vmem:[%s17135_s13 + $0x3e4] ss:$8 sps:$4 sm:$0xff]  }
0x120d   :  { %8828 = vmatprep.subr.bf16.mxu0 %v16806_v44  ;;  %17263 = vst [vmem:[#allocation46_spill] sm:$0xff] %v16830_v39  ;;  %v16836_v44 = vld [vmem:[%s17135_s13 + $0x3e0] ss:$8 sps:$4 sm:$0xff]  }
0x120e   :  { %17264 = vst [vmem:[#allocation47_spill] sm:$0xff] %v16836_v44 }
0x1210   :  { %8829 = vmatpush1.bf16.msra.mxu0 %v16812_v10  ;;  %v16842_v10 = vld [vmem:[%s17135_s13 + $0x3f4] ss:$8 sps:$4 sm:$0xff]  }
0x1211   :  { %8830 = vmatprep.subr.bf16.mxu0 %v16818_v63  ;;  %17265 = vst [vmem:[#allocation48_spill] sm:$0xff] %v16842_v10  ;;  %v16848_v63 = vld [vmem:[%s17135_s13 + $0x3f0] ss:$8 sps:$4 sm:$0xff]  }
0x1212   :  { %17266 = vst [vmem:[#allocation49_spill] sm:$0xff] %v16848_v63 }
0x1214   :  { %8831 = vmatpush1.bf16.msra.mxu0 %v16824_v22  ;;  %v16854_v22 = vld [vmem:[%s17135_s13 + $0x404] ss:$8 sps:$4 sm:$0xff]  }
0x1215   :  { %8832 = vmatprep.subr.bf16.mxu0 %v16830_v39  ;;  %v16860_v39 = vld [vmem:[%s17135_s13 + $0x400] ss:$8 sps:$4 sm:$0xff]  }
0x1216   :  { %17267 = vst [vmem:[#allocation50_spill] sm:$0xff] %v16860_v39 }
0x1218   :  { %8833 = vmatpush1.bf16.msra.mxu0 %v16836_v44  ;;  %v8722_v44 = vpack.c.bf16 %v16217_v17, %v16217_v17  ;;  %v16881_v17 = vld [vmem:[%s17135_s13 + $0x424] ss:$8 sps:$4 sm:$0xff]  }
0x1219   :  { %8834 = vmatprep.subr.bf16.mxu0 %v16842_v10  ;;  %v16868_v10 = vld [vmem:[%s17135_s13 + $0x414] ss:$8 sps:$4 sm:$0xff]   ;;  %17270 = vst [vmem:[#allocation53_spill] sm:$0xff] %v16881_v17 }
0x121a   :  { %17268 = vst [vmem:[#allocation51_spill] sm:$0xff] %v16868_v10 }
0x121c   :  { %8835 = vmatpush1.bf16.msra.mxu0 %v16848_v63  ;;  %v16874_v63 = vld [vmem:[%s17135_s13 + $0x410] ss:$8 sps:$4 sm:$0xff]  }
0x121d   :  { %9006 = vmatprep.subr.bf16.mxu0 %v16854_v22  ;;  %17269 = vst [vmem:[#allocation52_spill] sm:$0xff] %v16874_v63 }
0x121f   :  { %8853 = vmatmul.mubr.bf16.vlgmr.msra.gmra.mrb[244].mxu0 %v8722_v44  ;;  %v16887_v44 = vld [vmem:[%s17135_s13 + $0x420] ss:$8 sps:$4 sm:$0xff]  }
0x1220   :  { %9007 = vmatpush1.bf16.msra.mxu0 %v16860_v39  ;;  %9038 = vmatprep.mubr.bf16.mxu0 %v17239_v13  ;;  %17271 = vst [vmem:[#allocation54_spill] sm:$0xff] %v16887_v44  ;;  %v16893_v39 = vld [vmem:[%s17135_s13 + $0x434] ss:$8 sps:$4 sm:$0xff]  }
0x1221   :  { %9008 = vmatprep.subr.bf16.mxu0 %v16868_v10  ;;  %17272 = vst [vmem:[#allocation55_spill] sm:$0xff] %v16893_v39  ;;  %v16899_v10 = vld [vmem:[%s17135_s13 + $0x430] ss:$8 sps:$4 sm:$0xff]  }
0x1222   :  { %17273 = vst [vmem:[#allocation56_spill] sm:$0xff] %v16899_v10 }
0x1224   :  { %9009 = vmatpush1.bf16.msra.mxu0 %v16874_v63  ;;  %v16905_v63 = vld [vmem:[%s17135_s13 + $0x444] ss:$8 sps:$4 sm:$0xff]  }
0x1225   :  { %9010 = vmatprep.subr.bf16.mxu0 %v16881_v17  ;;  %17274 = vst [vmem:[#allocation57_spill] sm:$0xff] %v16905_v63  ;;  %v16911_v17 = vld [vmem:[%s17135_s13 + $0x440] ss:$8 sps:$4 sm:$0xff]  }
0x1226   :  { %17275 = vst [vmem:[#allocation58_spill] sm:$0xff] %v16911_v17 }
0x1228   :  { %9011 = vmatpush1.bf16.msra.mxu0 %v16887_v44  ;;  %v16917_v44 = vld [vmem:[%s17135_s13 + $0x454] ss:$8 sps:$4 sm:$0xff]  }
0x1229   :  { %9012 = vmatprep.subr.bf16.mxu0 %v16893_v39  ;;  %17276 = vst [vmem:[#allocation59_spill] sm:$0xff] %v16917_v44  ;;  %v16923_v39 = vld [vmem:[%s17135_s13 + $0x450] ss:$8 sps:$4 sm:$0xff]  }
0x122a   :  { %17277 = vst [vmem:[#allocation60_spill] sm:$0xff] %v16923_v39 }
0x122c   :  { %9013 = vmatpush1.bf16.msra.mxu0 %v16899_v10  ;;  %v16929_v10 = vld [vmem:[%s17135_s13 + $0x464] ss:$8 sps:$4 sm:$0xff]  }
0x122d   :  { %9014 = vmatprep.subr.bf16.mxu0 %v16905_v63  ;;  %17278 = vst [vmem:[#allocation61_spill] sm:$0xff] %v16929_v10  ;;  %v16935_v63 = vld [vmem:[%s17135_s13 + $0x460] ss:$8 sps:$4 sm:$0xff]  }
0x1230   :  { %9015 = vmatpush1.bf16.msra.mxu0 %v16911_v17  ;;  %v16941_v17 = vld [vmem:[%s17135_s13 + $0x474] ss:$8 sps:$4 sm:$0xff]  }
0x1231   :  { %9016 = vmatprep.subr.bf16.mxu0 %v16917_v44  ;;  %v16947_v44 = vld [vmem:[%s17135_s13 + $0x470] ss:$8 sps:$4 sm:$0xff]  }
0x1232   :  { %17279 = vst [vmem:[#allocation62_spill] sm:$0xff] %v16947_v44 }
0x1234   :  { %9017 = vmatpush1.bf16.msra.mxu0 %v16923_v39  ;;  %v8908_v39 = vpack.c.bf16 %v16244_v20, %v16244_v20 }
0x1235   :  { %9018 = vmatprep.subr.bf16.mxu0 %v16929_v10  ;;  %v17280_v10 = vmov 0.0  }
0x1238   :  { %9019 = vmatpush1.bf16.msra.mxu0 %v16935_v63 }
0x1239   :  { %9020 = vmatprep.subr.bf16.mxu0 %v16941_v17 }
0x123c   :  { %9021 = vmatpush1.bf16.msra.mxu0 %v16947_v44 }
0x123d   :  { %12778 = vmatprep.subr.bf16.mxu0 %v17280_v10 }
0x123f   :  { %9039 = vmatmul.mubr.bf16.vlgmr.msra.gmra.mrb[244].mxu0 %v8908_v39 }
0x1240   :  { %12779 = vmatpush3.bf16.msra.mxu0 %v16075_v29  ;;  %12780 = vmatprep.mubr.msk.bf16.mxu0 %vm13775_vm2, %v17280_v10 }
0x1241   :  { %12784 = vmatprep.subr.bf16.mxu0 %v17280_v10 }
0x1247   :  { %12781 = vmatmul.mubr.msk.bf16.vlgmr.msra.gmra.mrb[248].mxu0 %vm7377_vm7, %v16028_v11 }
0x1248   :  { %12785 = vmatpush3.bf16.msra.mxu0 %v16075_v29  ;;  %12786 = vmatprep.mubr.msk.bf16.mxu0 %vm13775_vm2, %v17280_v10 }
0x1249   :  { %12790 = vmatprep.subr.bf16.mxu0 %v17280_v10 }
0x124f   :  { %12787 = vmatmul.mubr.msk.bf16.vlgmr.msra.gmra.mrb[252].mxu0 %vm7377_vm7, %v16048_v27 }
0x1250   :  { %12791 = vmatpush3.bf16.msra.mxu0 %v16075_v29  ;;  %12792 = vmatprep.mubr.msk.bf16.mxu0 %vm13775_vm2, %v17280_v10 }
0x1251   :  { %12796 = vmatprep.subr.bf16.mxu0 %v17280_v10 }
0x1257   :  { %12793 = vmatmul.mubr.msk.bf16.vlgmr.msra.gmra.mrb[0].mxu0 %vm7377_vm7, %v16060_v38 }
0x1258   :  { %12797 = vmatpush3.bf16.msra.mxu0 %v16075_v29  ;;  %12798 = vmatprep.mubr.msk.bf16.mxu0 %vm13775_vm2, %v17280_v10 }
0x125f   :  { %12799 = vmatmul.mubr.msk.bf16.vlgmr.msra.gmra.mrb[4].mxu0 %vm7377_vm7, %v16072_v7 }
0x1272   :  { %v9251_v11 = vpop.f32.mrb[16].mxu1 }
0x1273   :  { %v9257_v27 = vpack.c.bf16 %v9251_v11, %v9251_v11  ;;  %v12764_v20 = vpop.f32.mrb[17].mxu1  ;;  %v17304_v11 = vld [vmem:[#allocation42_spill] sm:$0xff] }
0x1274   :  { %v9254_v39 = vpop.f32.mrb[18].mxu1  ;;  %v17307_v20 = vld [vmem:[#allocation45_spill] sm:$0xff] }
0x1275   :  { %9291 = vmatmul.mubr.bf16.vlgmr.msra.gmra.mrb[12].mxu1 %v9257_v27  ;;  %v12765_v44 = vpop.f32.mrb[19].mxu1  ;;  %v17306_v27 = vld [vmem:[#allocation44_spill] sm:$0xff]  ;;  %v17308_v39 = vld [vmem:[#allocation46_spill] sm:$0xff] }
0x1276   :  { %12767 = vmatpush3.bf16.msra.mxu1 %v16075_v29  ;;  %12768 = vmatprep.mubr.msk.bf16.mxu1 %vm13775_vm2, %v17280_v10  ;;  %v17303_v44 = vld [vmem:[#allocation41_spill] sm:$0xff] }
0x1277   :  { %9342 = vmatprep.subr.bf16.mxu1 %v16319_v56 }
0x127d   :  { %12769 = vmatmul.mubr.msk.bf16.vlgmr.msra.gmra.mrb[20].mxu1 %vm7377_vm7, %v15981_v19 }
0x127e   :  { %9343 = vmatpush1.bf16.msra.mxu1 %v16327_v59  ;;  %9374 = vmatprep.mubr.bf16.mxu1 %v17239_v13 }
0x127f   :  { %9344 = vmatprep.subr.bf16.mxu1 %v16336_v0 }
0x1282   :  { %9345 = vmatpush1.bf16.msra.mxu1 %v16343_v48 }
0x1283   :  { %9346 = vmatprep.subr.bf16.mxu1 %v16350_v18 }
0x1286   :  { %9347 = vmatpush1.bf16.msra.mxu1 %v16358_v45 }
0x1287   :  { %9348 = vmatprep.subr.bf16.mxu1 %v16365_v5 }
0x128a   :  { %9349 = vmatpush1.bf16.msra.mxu1 %v16372_v15 }
0x128b   :  { %9350 = vmatprep.subr.bf16.mxu1 %v16379_v3 }
0x128e   :  { %9351 = vmatpush1.bf16.msra.mxu1 %v16386_v46 }
0x128f   :  { %9352 = vmatprep.subr.bf16.mxu1 %v16393_v2 }
0x1292   :  { %9353 = vmatpush1.bf16.msra.mxu1 %v16400_v8 }
0x1293   :  { %9354 = vmatprep.subr.bf16.mxu1 %v16407_v50 }
0x1296   :  { %9355 = vmatpush1.bf16.msra.mxu1 %v16414_v54 }
0x1297   :  { %9356 = vmatprep.subr.bf16.mxu1 %v16423_v40 }
0x129a   :  { %9357 = vmatpush1.bf16.msra.mxu1 %v16430_v41 }
0x129b   :  { %12772 = vmatprep.subr.bf16.mxu1 %v17280_v10 }
0x1312   :  { %v17000_v19 = vpop.f32.mrb[244].mxu0 }
0x1313   :  { %v17002_v38 = vpop.f32.mrb[245].mxu0 }
0x1314   :  { %v9044_v7 = vpop.f32.mrb[246].mxu0 }
0x1315   :  { %v9045_v56 = vpop.f32.mrb[247].mxu0  ;;  %v17309_v7 = vld [vmem:[#allocation47_spill] sm:$0xff] }
0x1316   :  { %v17310_v56 = vld [vmem:[#allocation48_spill] sm:$0xff] }
0x1350   :  { %v9335_v59 = vpop.f32.mrb[20].mxu1 }
0x1351   :  { %v9341_v0 = vpack.c.bf16 %v9335_v59, %v9335_v59  ;;  %v12770_v48 = vpop.f32.mrb[21].mxu1 }
0x1352   :  { %v9338_v18 = vpop.f32.mrb[22].mxu1  ;;  %v17312_v48 = vld [vmem:[#allocation50_spill] sm:$0xff] }
0x1353   :  { %9375 = vmatmul.mubr.bf16.vlgmr.msra.gmra.mrb[12].mxu1 %v9341_v0  ;;  %v12771_v45 = vpop.f32.mrb[23].mxu1  ;;  %v17311_v0 = vld [vmem:[#allocation49_spill] sm:$0xff]  ;;  %v17313_v18 = vld [vmem:[#allocation51_spill] sm:$0xff] }
0x1354   :  { %12773 = vmatpush3.bf16.msra.mxu1 %v16075_v29  ;;  %12774 = vmatprep.mubr.msk.bf16.mxu1 %vm13775_vm2, %v17280_v10  ;;  %v17302_v10 = vld [vmem:[#allocation40_spill] sm:$0xff] }
0x1355   :  { %9426 = vmatprep.subr.bf16.mxu1 %v16438_v57  ;;  %v17314_v45 = vld [vmem:[#allocation52_spill] sm:$0xff] }
0x135b   :  { %12775 = vmatmul.mubr.msk.bf16.vlgmr.msra.gmra.mrb[24].mxu1 %vm7377_vm7, %v16005_v47  ;;  %v9503_v47 = vpop.f32.mrb[248].mxu0 }
0x135c   :  { %9427 = vmatpush1.bf16.msra.mxu1 %v16445_v33  ;;  %9458 = vmatprep.mubr.bf16.mxu1 %v17239_v13  ;;  %v12782_v29 = vpop.f32.mrb[249].mxu0 }
0x135d   :  { %9428 = vmatprep.subr.bf16.mxu1 %v16453_v58  ;;  %v9506_v5 = vpop.f32.mrb[250].mxu0  ;;  %v17316_v29 = vld [vmem:[#allocation54_spill] sm:$0xff] }
0x135e   :  { %v12783_v15 = vpop.f32.mrb[251].mxu0  ;;  %v17317_v5 = vld [vmem:[#allocation55_spill] sm:$0xff] }
0x135f   :  { %v9587_v3 = vpop.f32.mrb[252].mxu0  ;;  %v17318_v15 = vld [vmem:[#allocation56_spill] sm:$0xff] }
0x1360   :  { %9429 = vmatpush1.bf16.msra.mxu1 %v16461_v55  ;;  %v12788_v46 = vpop.f32.mrb[253].mxu0 }
0x1361   :  { %9430 = vmatprep.subr.bf16.mxu1 %v16468_v60  ;;  %v9590_v2 = vpop.f32.mrb[254].mxu0  ;;  %v17321_v46 = vld [vmem:[#allocation59_spill] sm:$0xff] }
0x1362   :  { %v12789_v8 = vpop.f32.mrb[255].mxu0  ;;  %v17322_v2 = vld [vmem:[#allocation60_spill] sm:$0xff] }
0x1363   :  { %v17027_v50 = vpop.f32.mrb[0].mxu0 }
0x1364   :  { %9431 = vmatpush1.bf16.msra.mxu1 %v16477_v24  ;;  %v12794_v54 = vpop.f32.mrb[1].mxu0  ;;  %v9677_v59 = vpack.c.bf16 %v17027_v50, %v17027_v50  ;;  %v17324_v50 = vld [vmem:[#allocation62_spill] sm:$0xff] }
0x1365   :  { %9432 = vmatprep.subr.bf16.mxu1 %v16483_v49  ;;  %v9674_v40 = vpop.f32.mrb[2].mxu0 }
0x1366   :  { %v12795_v41 = vpop.f32.mrb[3].mxu0  ;;  %v9809_v40 = vmul.f32 %v17000_v19, %v17000_v19 }
0x1367   :  { %v17029_v57 = vpop.f32.mrb[4].mxu0 }
0x1368   :  { %9433 = vmatpush1.bf16.msra.mxu1 %v16491_v23  ;;  %v12800_v33 = vpop.f32.mrb[5].mxu0  ;;  %v9761_v8 = vpack.c.bf16 %v17029_v57, %v17029_v57 }
0x1369   :  { %9434 = vmatprep.subr.bf16.mxu1 %v16497_v32  ;;  %v9758_v58 = vpop.f32.mrb[6].mxu0 }
0x136a   :  { %v12801_v60 = vpop.f32.mrb[7].mxu0 }
0x136c   :  { %9435 = vmatpush1.bf16.msra.mxu1 %v16505_v34  ;;  %v9509_v34 = vpack.c.bf16 %v9503_v47, %v9503_v47  ;;  %v17315_v47 = vld [vmem:[#allocation53_spill] sm:$0xff] }
0x136d   :  { %9436 = vmatprep.subr.bf16.mxu1 %v16511_v43  ;;  %v17281_v43 = vld [vmem:[#allocation18_spill] sm:$0xff] }
0x1370   :  { %9437 = vmatpush1.bf16.msra.mxu1 %v16519_v61  ;;  %v17282_v61 = vld [vmem:[#allocation19_spill] sm:$0xff] }
0x1371   :  { %9438 = vmatprep.subr.bf16.mxu1 %v16525_v30  ;;  %v17283_v30 = vld [vmem:[#allocation20_spill] sm:$0xff] }
0x1374   :  { %9439 = vmatpush1.bf16.msra.mxu1 %v16533_v6  ;;  %v17284_v6 = vld [vmem:[#allocation21_spill] sm:$0xff] }
0x1375   :  { %9440 = vmatprep.subr.bf16.mxu1 %v16539_v1  ;;  %v17285_v1 = vld [vmem:[#allocation23_spill] sm:$0xff] }
0x1378   :  { %9441 = vmatpush1.bf16.msra.mxu1 %v16547_v4  ;;  %v17286_v4 = vld [vmem:[#allocation24_spill] sm:$0xff] }
0x1379   :  { %9510 = vmatprep.subr.bf16.mxu1 %v16553_v51  ;;  %v17287_v51 = vld [vmem:[#allocation25_spill] sm:$0xff] }
0x142e   :  { %v9419_v55 = vpop.f32.mrb[24].mxu1 }
0x142f   :  { %v9425_v24 = vpack.c.bf16 %v9419_v55, %v9419_v55  ;;  %v12776_v49 = vpop.f32.mrb[25].mxu1  ;;  %v9810_v55 = vmul.f32 %v17002_v38, %v17002_v38 }
0x1430   :  { %v9422_v23 = vpop.f32.mrb[26].mxu1 }
0x1431   :  { %9459 = vmatmul.mubr.bf16.vlgmr.msra.gmra.mrb[12].mxu1 %v9425_v24  ;;  %v12777_v32 = vpop.f32.mrb[27].mxu1 }
0x1432   :  { %9511 = vmatpush1.bf16.msra.mxu1 %v16561_v42  ;;  %9542 = vmatprep.mubr.bf16.mxu1 %v17239_v13  ;;  %v17288_v42 = vld [vmem:[#allocation26_spill] sm:$0xff] }
0x1433   :  { %9512 = vmatprep.subr.bf16.mxu1 %v16569_v14  ;;  %v17289_v14 = vld [vmem:[#allocation27_spill] sm:$0xff] }
0x1436   :  { %9513 = vmatpush1.bf16.msra.mxu1 %v16577_v36  ;;  %v17290_v36 = vld [vmem:[#allocation28_spill] sm:$0xff] }
0x1437   :  { %9514 = vmatprep.subr.bf16.mxu1 %v16584_v26  ;;  %v17291_v26 = vld [vmem:[#allocation29_spill] sm:$0xff] }
0x143a   :  { %9515 = vmatpush1.bf16.msra.mxu1 %v16590_v28  ;;  %v17292_v28 = vld [vmem:[#allocation30_spill] sm:$0xff] }
0x143b   :  { %9516 = vmatprep.subr.bf16.mxu1 %v16596_v16  ;;  %v17293_v16 = vld [vmem:[#allocation31_spill] sm:$0xff] }
0x143e   :  { %9517 = vmatpush1.bf16.msra.mxu1 %v16602_v53  ;;  %v17294_v53 = vld [vmem:[#allocation32_spill] sm:$0xff] }
0x143f   :  { %9518 = vmatprep.subr.bf16.mxu1 %v16608_v31  ;;  %v17295_v31 = vld [vmem:[#allocation33_spill] sm:$0xff] }
0x1442   :  { %9519 = vmatpush1.bf16.msra.mxu1 %v16614_v25  ;;  %v9593_v25 = vpack.c.bf16 %v9587_v3, %v9587_v3  ;;  %v17319_v3 = vld [vmem:[#allocation57_spill] sm:$0xff] }
0x1443   :  { %9520 = vmatprep.subr.bf16.mxu1 %v16620_v37  ;;  %v17296_v37 = vld [vmem:[#allocation34_spill] sm:$0xff] }
0x1446   :  { %9521 = vmatpush1.bf16.msra.mxu1 %v16626_v52  ;;  %v17297_v52 = vld [vmem:[#allocation35_spill] sm:$0xff] }
0x1447   :  { %9522 = vmatprep.subr.bf16.mxu1 %v16632_v35  ;;  %v17298_v35 = vld [vmem:[#allocation36_spill] sm:$0xff] }
0x144a   :  { %9523 = vmatpush1.bf16.msra.mxu1 %v16638_v21  ;;  %v17299_v21 = vld [vmem:[#allocation37_spill] sm:$0xff] }
0x144b   :  { %9524 = vmatprep.subr.bf16.mxu1 %v16644_v12  ;;  %v17300_v12 = vld [vmem:[#allocation38_spill] sm:$0xff] }
0x144e   :  { %9525 = vmatpush1.bf16.msra.mxu1 %v17281_v43 }
0x144f   :  { %9594 = vmatprep.subr.bf16.mxu1 %v16656_v9  ;;  %v17301_v9 = vld [vmem:[#allocation39_spill] sm:$0xff] }
0x1451   :  { %9543 = vmatmul.mubr.bf16.vlgmr.msra.gmra.mrb[12].mxu1 %v9509_v34 }
0x1452   :  { %9595 = vmatpush1.bf16.msra.mxu1 %v17282_v61  ;;  %9626 = vmatprep.mubr.bf16.mxu1 %v17239_v13 }
0x1453   :  { %9596 = vmatprep.subr.bf16.mxu1 %v17283_v30 }
0x1456   :  { %9597 = vmatpush1.bf16.msra.mxu1 %v17284_v6 }
0x1457   :  { %9598 = vmatprep.subr.bf16.mxu1 %v17285_v1 }
0x145a   :  { %9599 = vmatpush1.bf16.msra.mxu1 %v17286_v4 }
0x145b   :  { %9600 = vmatprep.subr.bf16.mxu1 %v17287_v51 }
0x145e   :  { %9601 = vmatpush1.bf16.msra.mxu1 %v17288_v42 }
0x145f   :  { %9602 = vmatprep.subr.bf16.mxu1 %v17289_v14 }
0x1462   :  { %9603 = vmatpush1.bf16.msra.mxu1 %v17290_v36  ;;  %v13777_v36 = vmov 1966171168  }
0x1463   :  { %9604 = vmatprep.subr.bf16.mxu1 %v17291_v26  ;;  %v9844_v26 = vunpack.c.l.s4 %v13777_v36 }
0x1466   :  { %9605 = vmatpush1.bf16.msra.mxu1 %v17292_v28  ;;  %v9845_v28 = vunpack.c.0.s8 %v9844_v26 }
0x1467   :  { %9606 = vmatprep.subr.bf16.mxu1 %v17293_v16 }
0x146a   :  { %9607 = vmatpush1.bf16.msra.mxu1 %v17294_v53  ;;  %v17325_v53 = vld [vmem:[#allocation22_spill] sm:$0xff] }
0x146b   :  { %9608 = vmatprep.subr.bf16.mxu1 %v17295_v31  ;;  %v9848_v31 = vsub.s32 %v9845_v28, %v17325_v53  ;;  %vm9941_vm9 = vcmp.eq.s32.totalorder %v17325_v53, 0  ;;  %vm9956_vm10 = vcmp.eq.s32.totalorder %v17325_v53, 1 }
0x146e   :  { %9609 = vmatpush1.bf16.msra.mxu1 %v17296_v37 }
0x146f   :  { %9678 = vmatprep.subr.bf16.mxu1 %v16755_v62  ;;  %v17305_v62 = vld [vmem:[#allocation43_spill] sm:$0xff] }
0x1471   :  { %9627 = vmatmul.mubr.bf16.vlgmr.msra.gmra.mrb[12].mxu1 %v9593_v25 }
0x1472   :  { %9679 = vmatpush1.bf16.msra.mxu1 %v17297_v52  ;;  %9710 = vmatprep.mubr.bf16.mxu1 %v17239_v13 }
0x1473   :  { %9680 = vmatprep.subr.bf16.mxu1 %v17298_v35  ;;  %v7373_v35 = vld [vmem:[#allocation8] sm:$0x3] }
0x1476   :  { %9681 = vmatpush1.bf16.msra.mxu1 %v17299_v21 }
0x1477   :  { %9682 = vmatprep.subr.bf16.mxu1 %v17300_v12  ;;  %v9866_v12 = vsub.s32 1, %v17325_v53 }
0x147a   :  { %9683 = vmatpush1.bf16.msra.mxu1 %v17301_v9 }
0x147b   :  { %9684 = vmatprep.subr.bf16.mxu1 %v17302_v10  ;;  %v17326_v10 = vld [vmem:[#allocation17_spill] sm:$0xff] }
0x147e   :  { %9685 = vmatpush1.bf16.msra.mxu1 %v17303_v44 }
0x147f   :  { %9686 = vmatprep.subr.bf16.mxu1 %v17304_v11 }
0x1482   :  { %9687 = vmatpush1.bf16.msra.mxu1 %v17305_v62 }
0x1483   :  { %9688 = vmatprep.subr.bf16.mxu1 %v17306_v27 }
0x1486   :  { %9689 = vmatpush1.bf16.msra.mxu1 %v17307_v20 }
0x1487   :  { %9690 = vmatprep.subr.bf16.mxu1 %v17308_v39 }
0x148a   :  { %9691 = vmatpush1.bf16.msra.mxu1 %v17309_v7 }
0x148b   :  { %9692 = vmatprep.subr.bf16.mxu1 %v17310_v56 }
0x148e   :  { %9693 = vmatpush1.bf16.msra.mxu1 %v17311_v0 }
0x148f   :  { %9762 = vmatprep.subr.bf16.mxu1 %v16854_v22  ;;  %v17320_v22 = vld [vmem:[#allocation58_spill] sm:$0xff] }
0x1491   :  { %9711 = vmatmul.mubr.bf16.vlgmr.msra.gmra.mrb[12].mxu1 %v9677_v59 }
0x1492   :  { %9763 = vmatpush1.bf16.msra.mxu1 %v17312_v48  ;;  %9794 = vmatprep.mubr.bf16.mxu1 %v17239_v13  ;;  %v17323_v13 = vld [vmem:[#allocation61_spill] sm:$0xff]  ;;  %v7374_v48 = vld [vmem:[#allocation10] sm:$0x3] }
0x1493   :  { %9764 = vmatprep.subr.bf16.mxu1 %v17313_v18 }
0x1496   :  { %9765 = vmatpush1.bf16.msra.mxu1 %v17314_v45 }
0x1497   :  { %9766 = vmatprep.subr.bf16.mxu1 %v17315_v47 }
0x149a   :  { %9767 = vmatpush1.bf16.msra.mxu1 %v17316_v29 }
0x149b   :  { %9768 = vmatprep.subr.bf16.mxu1 %v17317_v5  ;;  %v9918_v5 = vld [vmem:[#allocation11] sm:$0x3] }
0x149e   :  { %9769 = vmatpush1.bf16.msra.mxu1 %v17318_v15 }
0x149f   :  { %9770 = vmatprep.subr.bf16.mxu1 %v17319_v3 }
0x14a2   :  { %9771 = vmatpush1.bf16.msra.mxu1 %v17320_v22 }
0x14a3   :  { %9772 = vmatprep.subr.bf16.mxu1 %v17321_v46 }
0x14a6   :  { %9773 = vmatpush1.bf16.msra.mxu1 %v17322_v2  ;;  %v9925_v2 = vrot.slane %v9918_v5, %v17326_v10 }
0x14a7   :  { %9774 = vmatprep.subr.bf16.mxu1 %v17323_v13 }
0x14aa   :  { %9775 = vmatpush1.bf16.msra.mxu1 %v16935_v63 }
0x14ab   :  { %9776 = vmatprep.subr.bf16.mxu1 %v16941_v17 }
0x14ae   :  { %9777 = vmatpush1.bf16.msra.mxu1 %v17324_v50 }
0x14b1   :  { %9795 = vmatmul.mubr.bf16.vlgmr.msra.gmra.mrb[12].mxu1 %v9761_v8 }
0x1584   :  { %v9796_v54 = vpop.f32.mrb[12].mxu1 }
0x1585   :  { %v9817_v41 = vadd.f32 %v9796_v54, %v17000_v19  ;;  %v9819_v33 = vmul.f32 %v9796_v54, %v9796_v54  ;;  %v9798_v58 = vpop.f32.mrb[13].mxu1 }
0x1586   :  { %v9818_v63 = vadd.f32 %v9798_v58, %v17002_v38  ;;  %v9820_v17 = vmul.f32 %v9798_v58, %v9798_v58  ;;  %v9800_v60 = vpop.f32.mrb[14].mxu1 }
0x1587   :  { %v9823_v24 = vadd.f32 %v9819_v33, %v9809_v40  ;;  %v9826_v57 = vmul.f32 0.5, %v9817_v41  ;;  %v9801_v49 = vpop.f32.mrb[15].mxu1 }
0x1588   :  { %v9824_v23 = vadd.f32 %v9820_v17, %v9810_v55  ;;  %v9827_v32 = vmul.f32 0.5, %v9818_v63 }
0x1589   :  { %v9828_v34 = vmul.f32 0.5, %v9823_v24  ;;  %v9830_v43 = vmul.f32 %v9826_v57, %v9826_v57 }
0x158a   :  { %v9829_v61 = vmul.f32 0.5, %v9824_v23  ;;  %v9831_v30 = vmul.f32 %v9827_v32, %v9827_v32 }
0x158b   :  { %v9832_v6 = vsub.f32 %v9828_v34, %v9830_v43 }
0x158c   :  { %v9833_v1 = vsub.f32 %v9829_v61, %v9831_v30 }
0x158d   :  { %v9834_v4 = vmax.f32 %v9832_v6, 0.0 }
0x158e   :  { %v9835_v51 = vmax.f32 %v9833_v1, 0.0  ;;  %v10713_v1 = vld [vmem:[#allocation2] ss:$0 sm:$0xff] }
0x158f   :  { %v9836_v42 = vadd.f32 1e-05, %v9834_v4 }
0x1590   :  { %v9837_v14 = vadd.f32 1e-05, %v9835_v51 }
0x1591   :  { %13545 = vrsqrt.f32 %v9836_v42 }
0x1592   :  { %13547 = vrsqrt.f32 %v9837_v14 }
0x159b   :  { %v13546_v16 = vpop.eup %13545 }
0x159c   :  { %v13548_v25 = vpop.eup %13547 }
0x159d   :  { %v9842_v37 = vcombine.low %v13546_v16, %v13548_v25 }
0x159f   :  { %v9849_v52 = vrot.slane %v9842_v37, %v9848_v31 }
0x15a1   :  { %v9856_v21 = vrot.slane %v9849_v52, %v9848_v31 }
0x15a3   :  { %v9858_v9 = vmul.f32 %v9856_v21, %v7373_v35 }
0x15a5   :  { %v9863_v44 = vrot.slane %v9858_v9, %v17326_v10  ;;  %v9867_v11 = vrot.slane %v9858_v9, %v9866_v12 }
0x15a7   :  { %v9870_v62 = vmul.f32 %v9863_v44, %v9826_v57  ;;  %v9871_v27 = vmul.f32 %v9867_v11, %v9827_v32  ;;  %v9911_v20 = vmul.f32 %v9867_v11, %v9798_v58  ;;  %v9891_v39 = vmul.f32 %v9863_v44, %v17000_v19 }
0x15a8   :  { %v9892_v7 = vmul.f32 %v9867_v11, %v17002_v38  ;;  %v9910_v56 = vmul.f32 %v9863_v44, %v9796_v54  ;;  %v9929_v38 = vrot.slane %v9918_v5, %v9866_v12 }
0x15a9   :  { %v9874_v59 = vcombine.low %v9870_v62, %v9871_v27 }
0x15ab   :  { %v9881_v0 = vrot.slane %v9874_v59, %v9848_v31 }
0x15ad   :  { %v9888_v18 = vrot.slane %v9881_v0, %v9848_v31 }
0x15af   :  { %v9890_v45 = vsub.f32 %v7374_v48, %v9888_v18 }
0x15b1   :  { %v9901_v47 = vrot.slane %v9890_v45, %v9866_v12  ;;  %v9897_v29 = vrot.slane %v9890_v45, %v17326_v10 }
0x15b3   :  { %v9913_v15 = vadd.f32 %v9911_v20, %v9901_v47  ;;  %v9904_v3 = vadd.f32 %v9897_v29, %v9891_v39  ;;  %v9905_v22 = vadd.f32 %v9901_v47, %v9892_v7  ;;  %v9912_v46 = vadd.f32 %v9910_v56, %v9897_v29 }
0x15b5   :  { %v9915_v13 = vmul.f32 0.2, %v9913_v15  ;;  %v9906_v19 = vmul.f32 0.2, %v9904_v3  ;;  %v9907_v8 = vmul.f32 0.2, %v9905_v22 }
0x15b6   :  { %v9914_v50 = vmul.f32 0.2, %v9912_v46 }
0x15b7   :  { %v9908_v54 = vmax.f32 %v9904_v3, %v9906_v19  ;;  %v9909_v40 = vmax.f32 %v9905_v22, %v9907_v8  ;;  %v9917_v41 = vmax.f32 %v9913_v15, %v9915_v13 }
0x15b8   :  { %v9916_v33 = vmax.f32 %v9912_v46, %v9914_v50 }
0x15b9   :  { %v9932_v58 = vmul.f32 %v9925_v2, %v9908_v54  ;;  %v9933_v55 = vmul.f32 %v9929_v38, %v9909_v40  ;;  %v9949_v63 = vmul.f32 %v9929_v38, %v9917_v41 }
0x15ba   :  { %v9948_v17 = vmul.f32 %v9925_v2, %v9916_v33 }
0x15bb   :  { %v9935_v60 = vsel %vm9934_vm8, %v9932_v58, 0.0  ;;  %v9936_v24 = vsel %vm9934_vm8, %v9933_v55, 0.0  ;;  %v9951_v57 = vsel %vm9934_vm8, %v9949_v63, 0.0 }
0x15bc   :  { %v9937_v49 = vadd.f32 %v9936_v24, %v9935_v60  ;;  %v9950_v23 = vsel %vm9934_vm8, %v9948_v17, 0.0 }
0x15bd   :  { %v9952_v32 = vadd.f32 %v9951_v57, %v9950_v23 }
0x15be   :  { %9938 = vadd.xlane.f32.xlu0 %v9937_v49 }
0x15c2   :  { %9953 = vadd.xlane.f32.xlu0 %v9952_v32 }
0x164b   :  { %v9939_v34 = vpop.xlane.xlu0 %9938 }
0x164c   :  { %v9945_v43 = vrot.slane %v9939_v34, %v17326_v10 }
0x164e   :  { %v9946_v6 = vsel %vm9941_vm9, %v9945_v43, 0.0 }
0x164f   :  { %v9954_v61 = vpop.xlane.xlu0 %9953 }
0x1650   :  { %v9960_v30 = vrot.slane %v9954_v61, %v17326_v10 }
0x1652   :  { %v9961_v4 = vsel %vm9956_vm10, %v9960_v30, 0.0 }
0x1653   :  { %v9962_v51 = vadd.f32 %v9961_v4, %v9946_v6 }
0x1655   :  { %v9970_v42 = vadd.f32 %v10713_v1, %v9962_v51 }
0x1657   :  { %v9971_v14 = vand.u32 2147483647, %v9970_v42  ;;  %vm9978_vm12 = vcmp.ge.f32.partialorder %v9970_v42, 0.0 }
0x1659   :  { %v9972_v36 = vsub.f32 0.0, %v9971_v14 }
0x165b   :  { %v9973_v26 = vmul.f32 1.442695, %v9972_v36 }
0x165d   :  { %13549 = vpow2.f32 %v9973_v26 }
0x1667   :  { %v13550_v28 = vpop.eup %13549 }
0x1668   :  { %v9975_v16 = vadd.f32 1.0, %v13550_v28 }
0x166a   :  { %13551 = vrcp.f32 %v9975_v16 }
0x1674   :  { %v13552_v31 = vpop.eup %13551 }
0x1675   :  { %v9979_v25 = vsub.f32 1.0, %v13552_v31 }
0x1677   :  { %v9980_v53 = vsel %vm9978_vm12, %v13552_v31, %v9979_v25 }
0x1678   :  { %9982 = vst.msk [vmem:[%s17327_s28] sm:$0x3] %vm9981_vm11, %v9980_v53 }
0x1679   :  { %9987 = vsyncpa [#allocation4], 1 }
0x167a   :  { %9988 = vsyncpa [#allocation6], 1 }
0x167b   :  { %9989 = vsyncpa [#allocation9], 1 }
0x167c   :  { %9990 = vsyncpa [#allocation12], 1 }

</bundles_post_ra>
